<compile_context>
chip_gen: v7x
topology: tpu7x:2x2x1
jax: 0.10.0
libtpu: 0.0.40
codegen_flags: <defaults>
</compile_context>

<pallas_src>
import functools

import jax
import jax.numpy as jnp
from jax.experimental import pallas as pl
from jax.experimental.pallas import tpu as pltpu


_CONV_M_TARGET = 2048              # target rows (TH*Wo) of the per-tile matmul
_CHUNK_TARGET = 2048               # target rows per grid step, IN normalize pass
_VMEM_LIMIT = 48 * 1024 * 1024     # leaves headroom even on v7x (64 MiB / TC)


def _largest_divisor_leq(n, limit):
    best = 1
    for d in range(1, n + 1):
        if d > limit:
            break
        if n % d == 0:
            best = d
    return best


def _pick_chunk(hw, target):
    """Largest divisor of hw that is <= target and a multiple of 8 (or hw)."""
    if hw <= target:
        return hw
    best = None
    d = 8
    while d <= target:
        if hw % d == 0:
            best = d
        d += 8
    return best if best is not None else hw


# ----------------------------------------------------------------------------
# Direct convolution kernel (stride 1, taps looped in-kernel, halo via a
# second block view of the same padded input).  Optionally emits per-image
# sum / sum-of-squares of the f32 output for a following InstanceNorm.
# ----------------------------------------------------------------------------
def _conv_kernel(xa_ref, xb_ref, w_ref, b_ref, *rest, kh, kw, relu, emit_stats):
    if emit_stats:
        o_ref, sum_ref, sq_ref, sum_acc, sq_acc = rest
    else:
        (o_ref,) = rest

    th, wo, cout = o_ref.shape[1], o_ref.shape[2], o_ref.shape[3]
    cin = xa_ref.shape[3]

    xa = xa_ref[...]                                    # (1, TH, Wp, Cin) bf16
    if kh > 1:
        halo = xb_ref[:, 0:kh - 1, :, :]                # (1, KH-1, Wp, Cin)
        full = jnp.concatenate([xa, halo], axis=1)      # (1, TH+KH-1, Wp, Cin)
    else:
        full = xa

    acc = jnp.zeros((th * wo, cout), jnp.float32)
    for i in range(kh):
        for j in range(kw):
            win = full[0, i:i + th, j:j + wo, :]        # (TH, Wo, Cin)
            acc = acc + jnp.dot(win.reshape(th * wo, cin),
                                w_ref[i * kw + j],
                                preferred_element_type=jnp.float32)

    y = acc + b_ref[...]                                # (TH*Wo, Cout) f32
    if relu:
        y = jnp.maximum(y, 0.0)
    o_ref[...] = y.reshape(1, th, wo, cout).astype(o_ref.dtype)

    if emit_stats:
        @pl.when(pl.program_id(1) == 0)
        def _init():
            sum_acc[...] = jnp.zeros_like(sum_acc)
            sq_acc[...] = jnp.zeros_like(sq_acc)

        sum_acc[...] += jnp.sum(y, axis=0).reshape(1, 1, cout)
        sq_acc[...] += jnp.sum(y * y, axis=0).reshape(1, 1, cout)

        @pl.when(pl.program_id(1) == pl.num_programs(1) - 1)
        def _fin():
            sum_ref[...] = sum_acc[...]
            sq_ref[...] = sq_acc[...]


def conv2d(x, w, b, *, pad, relu, emit_stats=False, out_dtype=jnp.bfloat16):
    """Stride-1 conv.  x:(N,H,W,Cin), w:(KH,KW,Cin,Cout), b:(Cout,)."""
    N, H, W, Cin = x.shape
    KH, KW, wcin, Cout = w.shape
    assert wcin == Cin
    Ho = H + 2 * pad - KH + 1
    Wo = W + 2 * pad - KW + 1
    Wp = W + 2 * pad

    TH = _largest_divisor_leq(Ho, max(1, _CONV_M_TARGET // max(Wo, 1)))
    if TH < KH - 1:
        TH = Ho
    assert TH >= KH - 1, "output height too small for this conv kernel"
    nb = Ho // TH
    G = 8 if TH % 8 == 0 else TH          # rows fetched for the bottom halo
    thg = TH // G

    # Rows laid out: conv top pad + image + conv bottom pad + extension so the
    # (i+1) halo block always exists.  Only zero rows are added.
    Hp = (nb + 1) * TH
    assert Hp >= Ho + KH - 1
    xp = jnp.pad(x.astype(jnp.bfloat16),
                 ((0, 0), (pad, Hp - H - pad), (pad, pad), (0, 0)))
    wmat = w.astype(jnp.bfloat16).reshape(KH * KW, Cin, Cout)
    bvec = b.astype(jnp.float32).reshape(1, Cout)

    in_specs = [
        pl.BlockSpec((1, TH, Wp, Cin), lambda n, i: (n, i, 0, 0)),
        pl.BlockSpec((1, G, Wp, Cin), lambda n, i: (n, (i + 1) * thg, 0, 0)),
        pl.BlockSpec((KH * KW, Cin, Cout), lambda n, i: (0, 0, 0)),
        pl.BlockSpec((1, Cout), lambda n, i: (0, 0)),
    ]
    out_shape = [jax.ShapeDtypeStruct((N, Ho, Wo, Cout), out_dtype)]
    out_specs = [pl.BlockSpec((1, TH, Wo, Cout), lambda n, i: (n, i, 0, 0))]
    scratch = []
    if emit_stats:
        out_shape += [jax.ShapeDtypeStruct((N, 1, Cout), jnp.float32)] * 2
        out_specs += [pl.BlockSpec((1, 1, Cout), lambda n, i: (n, 0, 0))] * 2
        scratch = [pltpu.VMEM((1, 1, Cout), jnp.float32)] * 2
        sems = ("parallel", "arbitrary")   # stats accumulate along the row axis
    else:
        sems = ("parallel", "parallel")

    outs = pl.pallas_call(
        functools.partial(_conv_kernel, kh=KH, kw=KW, relu=relu,
                          emit_stats=emit_stats),
        out_shape=tuple(out_shape) if emit_stats else out_shape[0],
        grid_spec=pltpu.PrefetchScalarGridSpec(
            num_scalar_prefetch=0,
            grid=(N, nb),
            in_specs=in_specs,
            out_specs=tuple(out_specs) if emit_stats else out_specs[0],
            scratch_shapes=scratch,
        ),
        compiler_params=pltpu.CompilerParams(
            dimension_semantics=sems,
            vmem_limit_bytes=_VMEM_LIMIT,
        ),
    )(xp, xp, wmat, bvec)

    if emit_stats:
        y, s, q = outs
        return y, (s.reshape(N, Cout), q.reshape(N, Cout))
    return outs


def conv2d_stride2(x, w, b, *, relu):
    """4x4 stride-2 pad-1 conv as a 2x2 stride-1 VALID conv on a
    space-to-depth (factor 2) view of the padded input."""
    N, H, W, C = x.shape
    KH, KW, wcin, Cout = w.shape
    assert (KH, KW) == (4, 4) and wcin == C
    assert H % 2 == 0 and W % 2 == 0
    xp = jnp.pad(x, ((0, 0), (1, 1), (1, 1), (0, 0)))
    Hs, Ws = H + 2, W + 2
    z = xp.reshape(N, Hs // 2, 2, Ws // 2, 2, C)
    z = z.transpose(0, 1, 3, 2, 4, 5).reshape(N, Hs // 2, Ws // 2, 4 * C)
    w2 = w.reshape(2, 2, 2, 2, C, Cout).transpose(0, 2, 1, 3, 4, 5)
    w2 = w2.reshape(2, 2, 4 * C, Cout)
    return conv2d(z, w2, b, pad=0, relu=relu)


# ----------------------------------------------------------------------------
# InstanceNorm normalize kernel (lane-dense view, optional ReLU / residual add
# / stats emission for a following InstanceNorm).
# ----------------------------------------------------------------------------
def _in_norm_kernel(x_ref, mean_ref, rstd_ref, g_ref, b_ref, *rest,
                    relu, has_res, emit_stats):
    pos = 0
    res_ref = None
    if has_res:
        res_ref = rest[pos]
        pos += 1
    o_ref = rest[pos]
    pos += 1
    if emit_stats:
        sum_ref, sq_ref, sum_acc, sq_acc = rest[pos:pos + 4]

    x = x_ref[...].astype(jnp.float32)                         # (1, chunk, Cv)
    y = (x - mean_ref[...]) * (rstd_ref[...] * g_ref[...]) + b_ref[...]
    if relu:
        y = jnp.maximum(y, 0.0)
    if has_res:
        y = y + res_ref[...].astype(jnp.float32)
    o_ref[...] = y.astype(o_ref.dtype)

    if emit_stats:
        @pl.when(pl.program_id(1) == 0)
        def _init():
            sum_acc[...] = jnp.zeros_like(sum_acc)
            sq_acc[...] = jnp.zeros_like(sq_acc)

        sum_acc[...] += jnp.sum(y, axis=1, keepdims=True)
        sq_acc[...] += jnp.sum(y * y, axis=1, keepdims=True)

        @pl.when(pl.program_id(1) == pl.num_programs(1) - 1)
        def _fin():
            sum_ref[...] = sum_acc[...]
            sq_ref[...] = sq_acc[...]


def instance_norm_apply(x, mean, rstd, gamma, beta, *, relu=False,
                        residual=None, emit_stats=False, out_dtype=None):
    """x:(N,H,W,C); mean/rstd:(N,C); gamma/beta:(C,)."""
    N, H, W, C = x.shape
    HW = H * W
    # Lane-dense packing: view (HW, C) as (HW/r, r*C) so the minor dim is 128.
    r = 1
    if C < 128 and 128 % C == 0:
        r = 128 // C
        while r > 1 and HW % r != 0:
            r //= 2
    Cv, HWv = C * r, HW // r

    xv = x.reshape(N, HWv, Cv)
    mean_v = jnp.tile(mean.reshape(N, 1, C).astype(jnp.float32), (1, 1, r))
    rstd_v = jnp.tile(rstd.reshape(N, 1, C).astype(jnp.float32), (1, 1, r))
    g_v = jnp.tile(gamma.reshape(1, 1, C).astype(jnp.float32), (1, 1, r))
    b_v = jnp.tile(beta.reshape(1, 1, C).astype(jnp.float32), (1, 1, r))

    chunk = _pick_chunk(HWv, _CHUNK_TARGET)
    nc = HWv // chunk

    in_specs = [
        pl.BlockSpec((1, chunk, Cv), lambda n, k: (n, k, 0)),
        pl.BlockSpec((1, 1, Cv), lambda n, k: (n, 0, 0)),
        pl.BlockSpec((1, 1, Cv), lambda n, k: (n, 0, 0)),
        pl.BlockSpec((1, 1, Cv), lambda n, k: (0, 0, 0)),
        pl.BlockSpec((1, 1, Cv), lambda n, k: (0, 0, 0)),
    ]
    args = [xv, mean_v, rstd_v, g_v, b_v]
    if residual is not None:
        in_specs.append(pl.BlockSpec((1, chunk, Cv), lambda n, k: (n, k, 0)))
        args.append(residual.reshape(N, HWv, Cv))

    odt = out_dtype if out_dtype is not None else x.dtype
    out_shape = [jax.ShapeDtypeStruct((N, HWv, Cv), odt)]
    out_specs = [pl.BlockSpec((1, chunk, Cv), lambda n, k: (n, k, 0))]
    scratch = []
    if emit_stats:
        out_shape += [jax.ShapeDtypeStruct((N, 1, Cv), jnp.float32)] * 2
        out_specs += [pl.BlockSpec((1, 1, Cv), lambda n, k: (n, 0, 0))] * 2
        scratch = [pltpu.VMEM((1, 1, Cv), jnp.float32)] * 2
        sems = ("parallel", "arbitrary")
    else:
        sems = ("parallel", "parallel")

    outs = pl.pallas_call(
        functools.partial(_in_norm_kernel, relu=relu,
                          has_res=residual is not None, emit_stats=emit_stats),
        out_shape=tuple(out_shape) if emit_stats else out_shape[0],
        grid_spec=pltpu.PrefetchScalarGridSpec(
            num_scalar_prefetch=0,
            grid=(N, nc),
            in_specs=in_specs,
            out_specs=tuple(out_specs) if emit_stats else out_specs[0],
            scratch_shapes=scratch,
        ),
        compiler_params=pltpu.CompilerParams(
            dimension_semantics=sems,
            vmem_limit_bytes=_VMEM_LIMIT,
        ),
    )(*args)

    if emit_stats:
        y, s, q = outs
        s = s.reshape(N, r, C).sum(axis=1)
        q = q.reshape(N, r, C).sum(axis=1)
        return y.reshape(N, H, W, C), (s, q)
    return outs.reshape(N, H, W, C)


def _finish_stats(s, q, count, eps=1e-5):
    """Per-(image, channel) mean / rstd from sum and sum-of-squares."""
    inv = 1.0 / count
    mean = s * inv
    var = jnp.maximum(q * inv - mean * mean, 0.0)   # guard against cancellation
    rstd = jax.lax.rsqrt(var + eps)
    return mean, rstd


# ----------------------------------------------------------------------------
# Residual block (assumed StarGAN-style): x + IN(conv3x3(ReLU(IN(conv3x3(x)))))
# Conv IN-stats are fused into the conv epilogue; the add-kernel can emit the
# stats of its own output for a following InstanceNorm.
# ----------------------------------------------------------------------------
def residual_block(x, p, emit_out_stats=False):
    N, H, W, C = x.shape
    hw = float(H * W)
    h, (s1, q1) = conv2d(x, p["w1"], p["zb1"], pad=1, relu=False,
                         emit_stats=True)
    m1, r1 = _finish_stats(s1, q1, hw)
    h = instance_norm_apply(h, m1, r1, p["g1"], p["b1"], relu=True)
    h, (s2, q2) = conv2d(h, p["w2"], p["zb2"], pad=1, relu=False,
                         emit_stats=True)
    m2, r2 = _finish_stats(s2, q2, hw)
    return instance_norm_apply(h, m2, r2, p["g2"], p["b2"], residual=x,
                               emit_stats=emit_out_stats)


# ----------------------------------------------------------------------------
# Content_Encoder forward
# ----------------------------------------------------------------------------
def content_encoder_forward(seg, params, n_class):
    # seg: (N, 1, H, W) int labels in [-1, n_class-1]
    labels = seg[:, 0, :, :] + 1                                  # (N,H,W)
    # 1x1 conv on the one-hot segmap == row gather of the weight matrix + bias.
    table = params["emb_w"].reshape(n_class + 1, 64)
    x = jnp.take(table, labels, axis=0) + params["emb_b"]         # (N,H,W,64)
    x = x.astype(jnp.bfloat16)

    x = conv2d(x, params["c1_w"], params["c1_b"], pad=1, relu=True)   # 64->128
    x = conv2d_stride2(x, params["c2_w"], params["c2_b"], relu=True)  # H/2
    x = residual_block(x, params["rb1"])
    x = residual_block(x, params["rb2"])
    x = conv2d(x, params["c3_w"], params["c3_b"], pad=1, relu=True)   # 128->64
    x = conv2d(x, params["c4_w"], params["c4_b"], pad=1, relu=True)   # 64->64
    x = residual_block(x, params["rb3"])
    x, (s, q) = residual_block(x, params["rb4"], emit_out_stats=True)

    # final InstanceNorm2d(64, affine=False) -> f32 output, stats came from the
    # rb4 add-kernel epilogue (no extra stats pass over the activation).
    N, H2, W2, C = x.shape
    m, r = _finish_stats(s, q, float(H2 * W2))
    x = instance_norm_apply(x, m, r, jnp.ones((C,), jnp.float32),
                            jnp.zeros((C,), jnp.float32),
                            out_dtype=jnp.float32)
    return x  # (N, H/2, W/2, 64) in NHWC


# ----------------------------------------------------------------------------
# Deterministic parameter initialization
# ----------------------------------------------------------------------------
def init_params(key, n_class):
    ks = iter(jax.random.split(key, 32))

    def w(shape, scale=0.05):
        return scale * jax.random.normal(next(ks), shape, dtype=jnp.float32)

    def rb(c):
        return {
            "w1": w((3, 3, c, c)), "zb1": jnp.zeros((c,), jnp.float32),
            "g1": jnp.ones((c,), jnp.float32), "b1": jnp.zeros((c,), jnp.float32),
            "w2": w((3, 3, c, c)), "zb2": jnp.zeros((c,), jnp.float32),
            "g2": jnp.ones((c,), jnp.float32), "b2": jnp.zeros((c,), jnp.float32),
        }

    return {
        "emb_w": w((1, 1, n_class + 1, 64)), "emb_b": jnp.zeros((64,), jnp.float32),
        "c1_w": w((3, 3, 64, 128)), "c1_b": jnp.zeros((128,), jnp.float32),
        "c2_w": w((4, 4, 128, 128)), "c2_b": jnp.zeros((128,), jnp.float32),
        "rb1": rb(128), "rb2": rb(128),
        "c3_w": w((3, 3, 128, 64)), "c3_b": jnp.zeros((64,), jnp.float32),
        "c4_w": w((3, 3, 64, 64)), "c4_b": jnp.zeros((64,), jnp.float32),
        "rb3": rb(64), "rb4": rb(64),
    }


if __name__ == "__main__":
    n_class = 4
    key = jax.random.PRNGKey(0)
    k_seg, k_par = jax.random.split(key)

    # seg: (N=2, 1, H=16, W=16), labels in [-1, n_class-1]
    seg = jax.random.randint(k_seg, (2, 1, 16, 16), minval=-1, maxval=n_class,
                             dtype=jnp.int32)
    params = init_params(k_par, n_class)

    fwd = jax.jit(functools.partial(content_encoder_forward, n_class=n_class))
    out = fwd(seg, params)
    jax.block_until_ready(out)

    assert out.shape == (2, 8, 8, 64), out.shape   # NHWC (PyTorch: (2, 64, 8, 8))
    print("KERNEL_OK")
</pallas_src>

<mosaic_0001>
module attributes {stable_mosaic.version = 11 : i64} {
  func.func @_conv_kernel(%arg0: i32, %arg1: i32, %arg2: memref<1x16x18x64xbf16, #tpu.memory_space<vmem>>, %arg3: memref<1x8x18x64xbf16, #tpu.memory_space<vmem>>, %arg4: memref<9x64x128xbf16, #tpu.memory_space<vmem>>, %arg5: memref<1x128xf32, #tpu.memory_space<vmem>>, %arg6: memref<1x16x16x128xbf16, #tpu.memory_space<vmem>>) attributes {dimension_semantics = [#tpu.dimension_semantics<parallel>, #tpu.dimension_semantics<parallel>], iteration_bounds = array<i64: 2, 1>, scalar_prefetch = 0 : i64, scratch_operands = 0 : i64, tpu.core_type = #tpu.core_type<tc>, window_params = [{transform_indices = @transform_0, window_bounds = array<i64: 1, 16, 18, 64>}, {transform_indices = @transform_1, window_bounds = array<i64: 1, 8, 18, 64>}, {pipeline_mode = #tpu.pipeline_mode<synchronous>, transform_indices = @transform_2, window_bounds = array<i64: 9, 64, 128>}, {pipeline_mode = #tpu.pipeline_mode<synchronous>, transform_indices = @transform_3, window_bounds = array<i64: 1, 128>}, {transform_indices = @transform_4, window_bounds = array<i64: 1, 16, 16, 128>}]} {
    %c0 = arith.constant 0 : index
    %c0_0 = arith.constant 0 : index
    %c0_1 = arith.constant 0 : index
    %c0_2 = arith.constant 0 : index
    %0 = vector.load %arg2[%c0, %c0_0, %c0_1, %c0_2] : memref<1x16x18x64xbf16, #tpu.memory_space<vmem>>, vector<1x16x18x64xbf16>
    %c0_3 = arith.constant 0 : index
    %c0_4 = arith.constant 0 : index
    %c0_5 = arith.constant 0 : index
    %c0_6 = arith.constant 0 : index
    %1 = vector.load %arg3[%c0_3, %c0_4, %c0_5, %c0_6] : memref<1x8x18x64xbf16, #tpu.memory_space<vmem>>, vector<1x2x18x64xbf16>
    %2 = tpu.concatenate %0, %1 in 1 : vector<1x16x18x64xbf16>, vector<1x2x18x64xbf16> -> vector<1x18x18x64xbf16>
    %cst = arith.constant 0.000000e+00 : f32
    %3 = vector.broadcast %cst : f32 to vector<256x128xf32>
    %4 = vector.extract_strided_slice %2 {offsets = [0, 0, 0, 0], sizes = [1, 16, 16, 64], strides = [1, 1, 1, 1]} : vector<1x18x18x64xbf16> to vector<1x16x16x64xbf16>
    %5 = vector.shape_cast %4 : vector<1x16x16x64xbf16> to vector<16x16x64xbf16>
    %6 = vector.shape_cast %5 : vector<16x16x64xbf16> to vector<256x64xbf16>
    %c0_7 = arith.constant 0 : index
    %c0_8 = arith.constant 0 : index
    %c0_9 = arith.constant 0 : index
    %7 = vector.load %arg4[%c0_7, %c0_8, %c0_9] : memref<9x64x128xbf16, #tpu.memory_space<vmem>>, vector<1x64x128xbf16>
    %8 = vector.shape_cast %7 : vector<1x64x128xbf16> to vector<64x128xbf16>
    %cst_10 = arith.constant dense<0.000000e+00> : vector<256x128xf32>
    %9 = tpu.matmul %6, %8, %cst_10 {dimension_numbers = #tpu.dot_dimension_numbers<[1], [0], [0], [1], [0, 0, 1, 1], [], []>} : vector<256x64xbf16>, vector<64x128xbf16>, vector<256x128xf32> -> vector<256x128xf32>
    %10 = arith.addf %3, %9 : vector<256x128xf32>
    %11 = vector.extract_strided_slice %2 {offsets = [0, 0, 1, 0], sizes = [1, 16, 16, 64], strides = [1, 1, 1, 1]} : vector<1x18x18x64xbf16> to vector<1x16x16x64xbf16>
    %12 = vector.shape_cast %11 : vector<1x16x16x64xbf16> to vector<16x16x64xbf16>
    %13 = vector.shape_cast %12 : vector<16x16x64xbf16> to vector<256x64xbf16>
    %c1 = arith.constant 1 : index
    %c0_11 = arith.constant 0 : index
    %c0_12 = arith.constant 0 : index
    %14 = vector.load %arg4[%c1, %c0_11, %c0_12] : memref<9x64x128xbf16, #tpu.memory_space<vmem>>, vector<1x64x128xbf16>
    %15 = vector.shape_cast %14 : vector<1x64x128xbf16> to vector<64x128xbf16>
    %cst_13 = arith.constant dense<0.000000e+00> : vector<256x128xf32>
    %16 = tpu.matmul %13, %15, %cst_13 {dimension_numbers = #tpu.dot_dimension_numbers<[1], [0], [0], [1], [0, 0, 1, 1], [], []>} : vector<256x64xbf16>, vector<64x128xbf16>, vector<256x128xf32> -> vector<256x128xf32>
    %17 = arith.addf %10, %16 : vector<256x128xf32>
    %18 = vector.extract_strided_slice %2 {offsets = [0, 0, 2, 0], sizes = [1, 16, 16, 64], strides = [1, 1, 1, 1]} : vector<1x18x18x64xbf16> to vector<1x16x16x64xbf16>
    %19 = vector.shape_cast %18 : vector<1x16x16x64xbf16> to vector<16x16x64xbf16>
    %20 = vector.shape_cast %19 : vector<16x16x64xbf16> to vector<256x64xbf16>
    %c2 = arith.constant 2 : index
    %c0_14 = arith.constant 0 : index
    %c0_15 = arith.constant 0 : index
    %21 = vector.load %arg4[%c2, %c0_14, %c0_15] : memref<9x64x128xbf16, #tpu.memory_space<vmem>>, vector<1x64x128xbf16>
    %22 = vector.shape_cast %21 : vector<1x64x128xbf16> to vector<64x128xbf16>
    %cst_16 = arith.constant dense<0.000000e+00> : vector<256x128xf32>
    %23 = tpu.matmul %20, %22, %cst_16 {dimension_numbers = #tpu.dot_dimension_numbers<[1], [0], [0], [1], [0, 0, 1, 1], [], []>} : vector<256x64xbf16>, vector<64x128xbf16>, vector<256x128xf32> -> vector<256x128xf32>
    %24 = arith.addf %17, %23 : vector<256x128xf32>
    %25 = vector.extract_strided_slice %2 {offsets = [0, 1, 0, 0], sizes = [1, 16, 16, 64], strides = [1, 1, 1, 1]} : vector<1x18x18x64xbf16> to vector<1x16x16x64xbf16>
    %26 = vector.shape_cast %25 : vector<1x16x16x64xbf16> to vector<16x16x64xbf16>
    %27 = vector.shape_cast %26 : vector<16x16x64xbf16> to vector<256x64xbf16>
    %c3 = arith.constant 3 : index
    %c0_17 = arith.constant 0 : index
    %c0_18 = arith.constant 0 : index
    %28 = vector.load %arg4[%c3, %c0_17, %c0_18] : memref<9x64x128xbf16, #tpu.memory_space<vmem>>, vector<1x64x128xbf16>
    %29 = vector.shape_cast %28 : vector<1x64x128xbf16> to vector<64x128xbf16>
    %cst_19 = arith.constant dense<0.000000e+00> : vector<256x128xf32>
    %30 = tpu.matmul %27, %29, %cst_19 {dimension_numbers = #tpu.dot_dimension_numbers<[1], [0], [0], [1], [0, 0, 1, 1], [], []>} : vector<256x64xbf16>, vector<64x128xbf16>, vector<256x128xf32> -> vector<256x128xf32>
    %31 = arith.addf %24, %30 : vector<256x128xf32>
    %32 = vector.extract_strided_slice %2 {offsets = [0, 1, 1, 0], sizes = [1, 16, 16, 64], strides = [1, 1, 1, 1]} : vector<1x18x18x64xbf16> to vector<1x16x16x64xbf16>
    %33 = vector.shape_cast %32 : vector<1x16x16x64xbf16> to vector<16x16x64xbf16>
    %34 = vector.shape_cast %33 : vector<16x16x64xbf16> to vector<256x64xbf16>
    %c4 = arith.constant 4 : index
    %c0_20 = arith.constant 0 : index
    %c0_21 = arith.constant 0 : index
    %35 = vector.load %arg4[%c4, %c0_20, %c0_21] : memref<9x64x128xbf16, #tpu.memory_space<vmem>>, vector<1x64x128xbf16>
    %36 = vector.shape_cast %35 : vector<1x64x128xbf16> to vector<64x128xbf16>
    %cst_22 = arith.constant dense<0.000000e+00> : vector<256x128xf32>
    %37 = tpu.matmul %34, %36, %cst_22 {dimension_numbers = #tpu.dot_dimension_numbers<[1], [0], [0], [1], [0, 0, 1, 1], [], []>} : vector<256x64xbf16>, vector<64x128xbf16>, vector<256x128xf32> -> vector<256x128xf32>
    %38 = arith.addf %31, %37 : vector<256x128xf32>
    %39 = vector.extract_strided_slice %2 {offsets = [0, 1, 2, 0], sizes = [1, 16, 16, 64], strides = [1, 1, 1, 1]} : vector<1x18x18x64xbf16> to vector<1x16x16x64xbf16>
    %40 = vector.shape_cast %39 : vector<1x16x16x64xbf16> to vector<16x16x64xbf16>
    %41 = vector.shape_cast %40 : vector<16x16x64xbf16> to vector<256x64xbf16>
    %c5 = arith.constant 5 : index
    %c0_23 = arith.constant 0 : index
    %c0_24 = arith.constant 0 : index
    %42 = vector.load %arg4[%c5, %c0_23, %c0_24] : memref<9x64x128xbf16, #tpu.memory_space<vmem>>, vector<1x64x128xbf16>
    %43 = vector.shape_cast %42 : vector<1x64x128xbf16> to vector<64x128xbf16>
    %cst_25 = arith.constant dense<0.000000e+00> : vector<256x128xf32>
    %44 = tpu.matmul %41, %43, %cst_25 {dimension_numbers = #tpu.dot_dimension_numbers<[1], [0], [0], [1], [0, 0, 1, 1], [], []>} : vector<256x64xbf16>, vector<64x128xbf16>, vector<256x128xf32> -> vector<256x128xf32>
    %45 = arith.addf %38, %44 : vector<256x128xf32>
    %46 = vector.extract_strided_slice %2 {offsets = [0, 2, 0, 0], sizes = [1, 16, 16, 64], strides = [1, 1, 1, 1]} : vector<1x18x18x64xbf16> to vector<1x16x16x64xbf16>
    %47 = vector.shape_cast %46 : vector<1x16x16x64xbf16> to vector<16x16x64xbf16>
    %48 = vector.shape_cast %47 : vector<16x16x64xbf16> to vector<256x64xbf16>
    %c6 = arith.constant 6 : index
    %c0_26 = arith.constant 0 : index
    %c0_27 = arith.constant 0 : index
    %49 = vector.load %arg4[%c6, %c0_26, %c0_27] : memref<9x64x128xbf16, #tpu.memory_space<vmem>>, vector<1x64x128xbf16>
    %50 = vector.shape_cast %49 : vector<1x64x128xbf16> to vector<64x128xbf16>
    %cst_28 = arith.constant dense<0.000000e+00> : vector<256x128xf32>
    %51 = tpu.matmul %48, %50, %cst_28 {dimension_numbers = #tpu.dot_dimension_numbers<[1], [0], [0], [1], [0, 0, 1, 1], [], []>} : vector<256x64xbf16>, vector<64x128xbf16>, vector<256x128xf32> -> vector<256x128xf32>
    %52 = arith.addf %45, %51 : vector<256x128xf32>
    %53 = vector.extract_strided_slice %2 {offsets = [0, 2, 1, 0], sizes = [1, 16, 16, 64], strides = [1, 1, 1, 1]} : vector<1x18x18x64xbf16> to vector<1x16x16x64xbf16>
    %54 = vector.shape_cast %53 : vector<1x16x16x64xbf16> to vector<16x16x64xbf16>
    %55 = vector.shape_cast %54 : vector<16x16x64xbf16> to vector<256x64xbf16>
    %c7 = arith.constant 7 : index
    %c0_29 = arith.constant 0 : index
    %c0_30 = arith.constant 0 : index
    %56 = vector.load %arg4[%c7, %c0_29, %c0_30] : memref<9x64x128xbf16, #tpu.memory_space<vmem>>, vector<1x64x128xbf16>
    %57 = vector.shape_cast %56 : vector<1x64x128xbf16> to vector<64x128xbf16>
    %cst_31 = arith.constant dense<0.000000e+00> : vector<256x128xf32>
    %58 = tpu.matmul %55, %57, %cst_31 {dimension_numbers = #tpu.dot_dimension_numbers<[1], [0], [0], [1], [0, 0, 1, 1], [], []>} : vector<256x64xbf16>, vector<64x128xbf16>, vector<256x128xf32> -> vector<256x128xf32>
    %59 = arith.addf %52, %58 : vector<256x128xf32>
    %60 = vector.extract_strided_slice %2 {offsets = [0, 2, 2, 0], sizes = [1, 16, 16, 64], strides = [1, 1, 1, 1]} : vector<1x18x18x64xbf16> to vector<1x16x16x64xbf16>
    %61 = vector.shape_cast %60 : vector<1x16x16x64xbf16> to vector<16x16x64xbf16>
    %62 = vector.shape_cast %61 : vector<16x16x64xbf16> to vector<256x64xbf16>
    %c8 = arith.constant 8 : index
    %c0_32 = arith.constant 0 : index
    %c0_33 = arith.constant 0 : index
    %63 = vector.load %arg4[%c8, %c0_32, %c0_33] : memref<9x64x128xbf16, #tpu.memory_space<vmem>>, vector<1x64x128xbf16>
    %64 = vector.shape_cast %63 : vector<1x64x128xbf16> to vector<64x128xbf16>
    %cst_34 = arith.constant dense<0.000000e+00> : vector<256x128xf32>
    %65 = tpu.matmul %62, %64, %cst_34 {dimension_numbers = #tpu.dot_dimension_numbers<[1], [0], [0], [1], [0, 0, 1, 1], [], []>} : vector<256x64xbf16>, vector<64x128xbf16>, vector<256x128xf32> -> vector<256x128xf32>
    %66 = arith.addf %59, %65 : vector<256x128xf32>
    %c0_35 = arith.constant 0 : index
    %c0_36 = arith.constant 0 : index
    %67 = vector.load %arg5[%c0_35, %c0_36] : memref<1x128xf32, #tpu.memory_space<vmem>>, vector<1x128xf32>
    %68 = vector.broadcast %67 : vector<1x128xf32> to vector<256x128xf32>
    %69 = arith.addf %66, %68 : vector<256x128xf32>
    %cst_37 = arith.constant 0.000000e+00 : f32
    %70 = vector.broadcast %cst_37 : f32 to vector<256x128xf32>
    %71 = arith.maximumf %69, %70 : vector<256x128xf32>
    %72 = vector.shape_cast %71 : vector<256x128xf32> to vector<1x16x16x128xf32>
    %73 = arith.truncf %72 : vector<1x16x16x128xf32> to vector<1x16x16x128xbf16>
    %c0_38 = arith.constant 0 : index
    %c0_39 = arith.constant 0 : index
    %c0_40 = arith.constant 0 : index
    %c0_41 = arith.constant 0 : index
    %74 = vector.load %arg6[%c0_38, %c0_39, %c0_40, %c0_41] : memref<1x16x16x128xbf16, #tpu.memory_space<vmem>>, vector<1x16x16x128xbf16>
    tpu.vector_store %arg6[%c0_38, %c0_39, %c0_40, %c0_41], %73 {strides = array<i32>} : memref<1x16x16x128xbf16, #tpu.memory_space<vmem>>, vector<1x16x16x128xbf16>,
    return
  }
  func.func @transform_0(%arg0: i32, %arg1: i32) -> (i32, i32, i32, i32) {
    %c0_i32 = arith.constant 0 : i32
    %c0_i32_0 = arith.constant 0 : i32
    %c0_i32_1 = arith.constant 0 : i32
    return %arg0, %arg1, %c0_i32, %c0_i32_0 : i32, i32, i32, i32
  }
  func.func @transform_1(%arg0: i32, %arg1: i32) -> (i32, i32, i32, i32) {
    %c1_i32 = arith.constant 1 : i32
    %0 = arith.addi %arg1, %c1_i32 : i32
    %c2_i32 = arith.constant 2 : i32
    %1 = arith.muli %0, %c2_i32 : i32
    %c0_i32 = arith.constant 0 : i32
    %c0_i32_0 = arith.constant 0 : i32
    %c0_i32_1 = arith.constant 0 : i32
    return %arg0, %1, %c0_i32, %c0_i32_0 : i32, i32, i32, i32
  }
  func.func @transform_2(%arg0: i32, %arg1: i32) -> (i32, i32, i32) {
    %c0_i32 = arith.constant 0 : i32
    %c0_i32_0 = arith.constant 0 : i32
    %c0_i32_1 = arith.constant 0 : i32
    %c0_i32_2 = arith.constant 0 : i32
    return %c0_i32, %c0_i32_0, %c0_i32_1 : i32, i32, i32
  }
  func.func @transform_3(%arg0: i32, %arg1: i32) -> (i32, i32) {
    %c0_i32 = arith.constant 0 : i32
    %c0_i32_0 = arith.constant 0 : i32
    %c0_i32_1 = arith.constant 0 : i32
    return %c0_i32, %c0_i32_0 : i32, i32
  }
  func.func @transform_4(%arg0: i32, %arg1: i32) -> (i32, i32, i32, i32) {
    %c0_i32 = arith.constant 0 : i32
    %c0_i32_0 = arith.constant 0 : i32
    %c0_i32_1 = arith.constant 0 : i32
    return %arg0, %arg1, %c0_i32, %c0_i32_0 : i32, i32, i32, i32
  }
}

module attributes {stable_mosaic.version = 11 : i64} {
  func.func @_conv_kernel(%arg0: i32, %arg1: i32, %arg2: memref<1x8x9x512xbf16, #tpu.memory_space<vmem>>, %arg3: memref<1x8x9x512xbf16, #tpu.memory_space<vmem>>, %arg4: memref<4x512x128xbf16, #tpu.memory_space<vmem>>, %arg5: memref<1x128xf32, #tpu.memory_space<vmem>>, %arg6: memref<1x8x8x128xbf16, #tpu.memory_space<vmem>>) attributes {dimension_semantics = [#tpu.dimension_semantics<parallel>, #tpu.dimension_semantics<parallel>], iteration_bounds = array<i64: 2, 1>, scalar_prefetch = 0 : i64, scratch_operands = 0 : i64, tpu.core_type = #tpu.core_type<tc>, window_params = [{transform_indices = @transform_0, window_bounds = array<i64: 1, 8, 9, 512>}, {transform_indices = @transform_1, window_bounds = array<i64: 1, 8, 9, 512>}, {pipeline_mode = #tpu.pipeline_mode<synchronous>, transform_indices = @transform_2, window_bounds = array<i64: 4, 512, 128>}, {pipeline_mode = #tpu.pipeline_mode<synchronous>, transform_indices = @transform_3, window_bounds = array<i64: 1, 128>}, {transform_indices = @transform_4, window_bounds = array<i64: 1, 8, 8, 128>}]} {
    %c0 = arith.constant 0 : index
    %c0_0 = arith.constant 0 : index
    %c0_1 = arith.constant 0 : index
    %c0_2 = arith.constant 0 : index
    %0 = vector.load %arg2[%c0, %c0_0, %c0_1, %c0_2] : memref<1x8x9x512xbf16, #tpu.memory_space<vmem>>, vector<1x8x9x512xbf16>
    %c0_3 = arith.constant 0 : index
    %c0_4 = arith.constant 0 : index
    %c0_5 = arith.constant 0 : index
    %c0_6 = arith.constant 0 : index
    %1 = vector.load %arg3[%c0_3, %c0_4, %c0_5, %c0_6] : memref<1x8x9x512xbf16, #tpu.memory_space<vmem>>, vector<1x1x9x512xbf16>
    %2 = tpu.concatenate %0, %1 in 1 : vector<1x8x9x512xbf16>, vector<1x1x9x512xbf16> -> vector<1x9x9x512xbf16>
    %cst = arith.constant 0.000000e+00 : f32
    %3 = vector.broadcast %cst : f32 to vector<64x128xf32>
    %4 = vector.extract_strided_slice %2 {offsets = [0, 0, 0, 0], sizes = [1, 8, 8, 512], strides = [1, 1, 1, 1]} : vector<1x9x9x512xbf16> to vector<1x8x8x512xbf16>
    %5 = vector.shape_cast %4 : vector<1x8x8x512xbf16> to vector<8x8x512xbf16>
    %6 = vector.shape_cast %5 : vector<8x8x512xbf16> to vector<64x512xbf16>
    %c0_7 = arith.constant 0 : index
    %c0_8 = arith.constant 0 : index
    %c0_9 = arith.constant 0 : index
    %7 = vector.load %arg4[%c0_7, %c0_8, %c0_9] : memref<4x512x128xbf16, #tpu.memory_space<vmem>>, vector<1x512x128xbf16>
    %8 = vector.shape_cast %7 : vector<1x512x128xbf16> to vector<512x128xbf16>
    %cst_10 = arith.constant dense<0.000000e+00> : vector<64x128xf32>
    %9 = tpu.matmul %6, %8, %cst_10 {dimension_numbers = #tpu.dot_dimension_numbers<[1], [0], [0], [1], [0, 0, 1, 1], [], []>} : vector<64x512xbf16>, vector<512x128xbf16>, vector<64x128xf32> -> vector<64x128xf32>
    %10 = arith.addf %3, %9 : vector<64x128xf32>
    %11 = vector.extract_strided_slice %2 {offsets = [0, 0, 1, 0], sizes = [1, 8, 8, 512], strides = [1, 1, 1, 1]} : vector<1x9x9x512xbf16> to vector<1x8x8x512xbf16>
    %12 = vector.shape_cast %11 : vector<1x8x8x512xbf16> to vector<8x8x512xbf16>
    %13 = vector.shape_cast %12 : vector<8x8x512xbf16> to vector<64x512xbf16>
    %c1 = arith.constant 1 : index
    %c0_11 = arith.constant 0 : index
    %c0_12 = arith.constant 0 : index
    %14 = vector.load %arg4[%c1, %c0_11, %c0_12] : memref<4x512x128xbf16, #tpu.memory_space<vmem>>, vector<1x512x128xbf16>
    %15 = vector.shape_cast %14 : vector<1x512x128xbf16> to vector<512x128xbf16>
    %cst_13 = arith.constant dense<0.000000e+00> : vector<64x128xf32>
    %16 = tpu.matmul %13, %15, %cst_13 {dimension_numbers = #tpu.dot_dimension_numbers<[1], [0], [0], [1], [0, 0, 1, 1], [], []>} : vector<64x512xbf16>, vector<512x128xbf16>, vector<64x128xf32> -> vector<64x128xf32>
    %17 = arith.addf %10, %16 : vector<64x128xf32>
    %18 = vector.extract_strided_slice %2 {offsets = [0, 1, 0, 0], sizes = [1, 8, 8, 512], strides = [1, 1, 1, 1]} : vector<1x9x9x512xbf16> to vector<1x8x8x512xbf16>
    %19 = vector.shape_cast %18 : vector<1x8x8x512xbf16> to vector<8x8x512xbf16>
    %20 = vector.shape_cast %19 : vector<8x8x512xbf16> to vector<64x512xbf16>
    %c2 = arith.constant 2 : index
    %c0_14 = arith.constant 0 : index
    %c0_15 = arith.constant 0 : index
    %21 = vector.load %arg4[%c2, %c0_14, %c0_15] : memref<4x512x128xbf16, #tpu.memory_space<vmem>>, vector<1x512x128xbf16>
    %22 = vector.shape_cast %21 : vector<1x512x128xbf16> to vector<512x128xbf16>
    %cst_16 = arith.constant dense<0.000000e+00> : vector<64x128xf32>
    %23 = tpu.matmul %20, %22, %cst_16 {dimension_numbers = #tpu.dot_dimension_numbers<[1], [0], [0], [1], [0, 0, 1, 1], [], []>} : vector<64x512xbf16>, vector<512x128xbf16>, vector<64x128xf32> -> vector<64x128xf32>
    %24 = arith.addf %17, %23 : vector<64x128xf32>
    %25 = vector.extract_strided_slice %2 {offsets = [0, 1, 1, 0], sizes = [1, 8, 8, 512], strides = [1, 1, 1, 1]} : vector<1x9x9x512xbf16> to vector<1x8x8x512xbf16>
    %26 = vector.shape_cast %25 : vector<1x8x8x512xbf16> to vector<8x8x512xbf16>
    %27 = vector.shape_cast %26 : vector<8x8x512xbf16> to vector<64x512xbf16>
    %c3 = arith.constant 3 : index
    %c0_17 = arith.constant 0 : index
    %c0_18 = arith.constant 0 : index
    %28 = vector.load %arg4[%c3, %c0_17, %c0_18] : memref<4x512x128xbf16, #tpu.memory_space<vmem>>, vector<1x512x128xbf16>
    %29 = vector.shape_cast %28 : vector<1x512x128xbf16> to vector<512x128xbf16>
    %cst_19 = arith.constant dense<0.000000e+00> : vector<64x128xf32>
    %30 = tpu.matmul %27, %29, %cst_19 {dimension_numbers = #tpu.dot_dimension_numbers<[1], [0], [0], [1], [0, 0, 1, 1], [], []>} : vector<64x512xbf16>, vector<512x128xbf16>, vector<64x128xf32> -> vector<64x128xf32>
    %31 = arith.addf %24, %30 : vector<64x128xf32>
    %c0_20 = arith.constant 0 : index
    %c0_21 = arith.constant 0 : index
    %32 = vector.load %arg5[%c0_20, %c0_21] : memref<1x128xf32, #tpu.memory_space<vmem>>, vector<1x128xf32>
    %33 = vector.broadcast %32 : vector<1x128xf32> to vector<64x128xf32>
    %34 = arith.addf %31, %33 : vector<64x128xf32>
    %cst_22 = arith.constant 0.000000e+00 : f32
    %35 = vector.broadcast %cst_22 : f32 to vector<64x128xf32>
    %36 = arith.maximumf %34, %35 : vector<64x128xf32>
    %37 = vector.shape_cast %36 : vector<64x128xf32> to vector<1x8x8x128xf32>
    %38 = arith.truncf %37 : vector<1x8x8x128xf32> to vector<1x8x8x128xbf16>
    %c0_23 = arith.constant 0 : index
    %c0_24 = arith.constant 0 : index
    %c0_25 = arith.constant 0 : index
    %c0_26 = arith.constant 0 : index
    %39 = vector.load %arg6[%c0_23, %c0_24, %c0_25, %c0_26] : memref<1x8x8x128xbf16, #tpu.memory_space<vmem>>, vector<1x8x8x128xbf16>
    tpu.vector_store %arg6[%c0_23, %c0_24, %c0_25, %c0_26], %38 {strides = array<i32>} : memref<1x8x8x128xbf16, #tpu.memory_space<vmem>>, vector<1x8x8x128xbf16>,
    return
  }
  func.func @transform_0(%arg0: i32, %arg1: i32) -> (i32, i32, i32, i32) {
    %c0_i32 = arith.constant 0 : i32
    %c0_i32_0 = arith.constant 0 : i32
    %c0_i32_1 = arith.constant 0 : i32
    return %arg0, %arg1, %c0_i32, %c0_i32_0 : i32, i32, i32, i32
  }
  func.func @transform_1(%arg0: i32, %arg1: i32) -> (i32, i32, i32, i32) {
    %c1_i32 = arith.constant 1 : i32
    %0 = arith.addi %arg1, %c1_i32 : i32
    %c1_i32_0 = arith.constant 1 : i32
    %1 = arith.muli %0, %c1_i32_0 : i32
    %c0_i32 = arith.constant 0 : i32
    %c0_i32_1 = arith.constant 0 : i32
    %c0_i32_2 = arith.constant 0 : i32
    return %arg0, %1, %c0_i32, %c0_i32_1 : i32, i32, i32, i32
  }
  func.func @transform_2(%arg0: i32, %arg1: i32) -> (i32, i32, i32) {
    %c0_i32 = arith.constant 0 : i32
    %c0_i32_0 = arith.constant 0 : i32
    %c0_i32_1 = arith.constant 0 : i32
    %c0_i32_2 = arith.constant 0 : i32
    return %c0_i32, %c0_i32_0, %c0_i32_1 : i32, i32, i32
  }
  func.func @transform_3(%arg0: i32, %arg1: i32) -> (i32, i32) {
    %c0_i32 = arith.constant 0 : i32
    %c0_i32_0 = arith.constant 0 : i32
    %c0_i32_1 = arith.constant 0 : i32
    return %c0_i32, %c0_i32_0 : i32, i32
  }
  func.func @transform_4(%arg0: i32, %arg1: i32) -> (i32, i32, i32, i32) {
    %c0_i32 = arith.constant 0 : i32
    %c0_i32_0 = arith.constant 0 : i32
    %c0_i32_1 = arith.constant 0 : i32
    return %arg0, %arg1, %c0_i32, %c0_i32_0 : i32, i32, i32, i32
  }
}

module attributes {stable_mosaic.version = 11 : i64} {
  func.func @_in_norm_kernel(%arg0: i32, %arg1: i32, %arg2: memref<1x64x128xbf16, #tpu.memory_space<vmem>>, %arg3: memref<1x1x128xf32, #tpu.memory_space<vmem>>, %arg4: memref<1x1x128xf32, #tpu.memory_space<vmem>>, %arg5: memref<1x1x128xf32, #tpu.memory_space<vmem>>, %arg6: memref<1x1x128xf32, #tpu.memory_space<vmem>>, %arg7: memref<1x64x128xbf16, #tpu.memory_space<vmem>>) attributes {dimension_semantics = [#tpu.dimension_semantics<parallel>, #tpu.dimension_semantics<parallel>], iteration_bounds = array<i64: 2, 1>, scalar_prefetch = 0 : i64, scratch_operands = 0 : i64, tpu.core_type = #tpu.core_type<tc>, window_params = [{transform_indices = @transform_0, window_bounds = array<i64: 1, 64, 128>}, {transform_indices = @transform_1, window_bounds = array<i64: 1, 1, 128>}, {transform_indices = @transform_2, window_bounds = array<i64: 1, 1, 128>}, {pipeline_mode = #tpu.pipeline_mode<synchronous>, transform_indices = @transform_3, window_bounds = array<i64: 1, 1, 128>}, {pipeline_mode = #tpu.pipeline_mode<synchronous>, transform_indices = @transform_4, window_bounds = array<i64: 1, 1, 128>}, {transform_indices = @transform_5, window_bounds = array<i64: 1, 64, 128>}]} {
    %c0 = arith.constant 0 : index
    %c0_0 = arith.constant 0 : index
    %c0_1 = arith.constant 0 : index
    %0 = vector.load %arg2[%c0, %c0_0, %c0_1] : memref<1x64x128xbf16, #tpu.memory_space<vmem>>, vector<1x64x128xbf16>
    %1 = arith.extf %0 : vector<1x64x128xbf16> to vector<1x64x128xf32>
    %c0_2 = arith.constant 0 : index
    %c0_3 = arith.constant 0 : index
    %c0_4 = arith.constant 0 : index
    %2 = vector.load %arg3[%c0_2, %c0_3, %c0_4] : memref<1x1x128xf32, #tpu.memory_space<vmem>>, vector<1x1x128xf32>
    %3 = vector.broadcast %2 : vector<1x1x128xf32> to vector<1x64x128xf32>
    %4 = arith.subf %1, %3 : vector<1x64x128xf32>
    %c0_5 = arith.constant 0 : index
    %c0_6 = arith.constant 0 : index
    %c0_7 = arith.constant 0 : index
    %5 = vector.load %arg4[%c0_5, %c0_6, %c0_7] : memref<1x1x128xf32, #tpu.memory_space<vmem>>, vector<1x1x128xf32>
    %c0_8 = arith.constant 0 : index
    %c0_9 = arith.constant 0 : index
    %c0_10 = arith.constant 0 : index
    %6 = vector.load %arg5[%c0_8, %c0_9, %c0_10] : memref<1x1x128xf32, #tpu.memory_space<vmem>>, vector<1x1x128xf32>
    %7 = arith.mulf %5, %6 : vector<1x1x128xf32>
    %8 = vector.broadcast %7 : vector<1x1x128xf32> to vector<1x64x128xf32>
    %9 = arith.mulf %4, %8 : vector<1x64x128xf32>
    %c0_11 = arith.constant 0 : index
    %c0_12 = arith.constant 0 : index
    %c0_13 = arith.constant 0 : index
    %10 = vector.load %arg6[%c0_11, %c0_12, %c0_13] : memref<1x1x128xf32, #tpu.memory_space<vmem>>, vector<1x1x128xf32>
    %11 = vector.broadcast %10 : vector<1x1x128xf32> to vector<1x64x128xf32>
    %12 = arith.addf %9, %11 : vector<1x64x128xf32>
    %cst = arith.constant 0.000000e+00 : f32
    %13 = vector.broadcast %cst : f32 to vector<1x64x128xf32>
    %14 = arith.maximumf %12, %13 : vector<1x64x128xf32>
    %15 = arith.truncf %14 : vector<1x64x128xf32> to vector<1x64x128xbf16>
    %c0_14 = arith.constant 0 : index
    %c0_15 = arith.constant 0 : index
    %c0_16 = arith.constant 0 : index
    %16 = vector.load %arg7[%c0_14, %c0_15, %c0_16] : memref<1x64x128xbf16, #tpu.memory_space<vmem>>, vector<1x64x128xbf16>
    tpu.vector_store %arg7[%c0_14, %c0_15, %c0_16], %15 {strides = array<i32>} : memref<1x64x128xbf16, #tpu.memory_space<vmem>>, vector<1x64x128xbf16>,
    return
  }
  func.func @transform_0(%arg0: i32, %arg1: i32) -> (i32, i32, i32) {
    %c0_i32 = arith.constant 0 : i32
    %c0_i32_0 = arith.constant 0 : i32
    return %arg0, %arg1, %c0_i32 : i32, i32, i32
  }
  func.func @transform_1(%arg0: i32, %arg1: i32) -> (i32, i32, i32) {
    %c0_i32 = arith.constant 0 : i32
    %c0_i32_0 = arith.constant 0 : i32
    %c0_i32_1 = arith.constant 0 : i32
    return %arg0, %c0_i32, %c0_i32_0 : i32, i32, i32
  }
  func.func @transform_2(%arg0: i32, %arg1: i32) -> (i32, i32, i32) {
    %c0_i32 = arith.constant 0 : i32
    %c0_i32_0 = arith.constant 0 : i32
    %c0_i32_1 = arith.constant 0 : i32
    return %arg0, %c0_i32, %c0_i32_0 : i32, i32, i32
  }
  func.func @transform_3(%arg0: i32, %arg1: i32) -> (i32, i32, i32) {
    %c0_i32 = arith.constant 0 : i32
    %c0_i32_0 = arith.constant 0 : i32
    %c0_i32_1 = arith.constant 0 : i32
    %c0_i32_2 = arith.constant 0 : i32
    return %c0_i32, %c0_i32_0, %c0_i32_1 : i32, i32, i32
  }
  func.func @transform_4(%arg0: i32, %arg1: i32) -> (i32, i32, i32) {
    %c0_i32 = arith.constant 0 : i32
    %c0_i32_0 = arith.constant 0 : i32
    %c0_i32_1 = arith.constant 0 : i32
    %c0_i32_2 = arith.constant 0 : i32
    return %c0_i32, %c0_i32_0, %c0_i32_1 : i32, i32, i32
  }
  func.func @transform_5(%arg0: i32, %arg1: i32) -> (i32, i32, i32) {
    %c0_i32 = arith.constant 0 : i32
    %c0_i32_0 = arith.constant 0 : i32
    return %arg0, %arg1, %c0_i32 : i32, i32, i32
  }
}

module attributes {stable_mosaic.version = 11 : i64} {
  func.func @_conv_kernel(%arg0: i32, %arg1: i32, %arg2: memref<1x8x10x128xbf16, #tpu.memory_space<vmem>>, %arg3: memref<1x8x10x128xbf16, #tpu.memory_space<vmem>>, %arg4: memref<9x128x128xbf16, #tpu.memory_space<vmem>>, %arg5: memref<1x128xf32, #tpu.memory_space<vmem>>, %arg6: memref<1x8x8x128xbf16, #tpu.memory_space<vmem>>, %arg7: memref<1x1x128xf32, #tpu.memory_space<vmem>>, %arg8: memref<1x1x128xf32, #tpu.memory_space<vmem>>, %arg9: memref<1x1x128xf32, #tpu.memory_space<vmem>>, %arg10: memref<1x1x128xf32, #tpu.memory_space<vmem>>) attributes {dimension_semantics = [#tpu.dimension_semantics<parallel>, #tpu.dimension_semantics<arbitrary>], iteration_bounds = array<i64: 2, 1>, scalar_prefetch = 0 : i64, scratch_operands = 2 : i64, tpu.core_type = #tpu.core_type<tc>, window_params = [{transform_indices = @transform_0, window_bounds = array<i64: 1, 8, 10, 128>}, {transform_indices = @transform_1, window_bounds = array<i64: 1, 8, 10, 128>}, {pipeline_mode = #tpu.pipeline_mode<synchronous>, transform_indices = @transform_2, window_bounds = array<i64: 9, 128, 128>}, {pipeline_mode = #tpu.pipeline_mode<synchronous>, transform_indices = @transform_3, window_bounds = array<i64: 1, 128>}, {transform_indices = @transform_4, window_bounds = array<i64: 1, 8, 8, 128>}, {transform_indices = @transform_5, window_bounds = array<i64: 1, 1, 128>}, {transform_indices = @transform_6, window_bounds = array<i64: 1, 1, 128>}]} {
    %c0 = arith.constant 0 : index
    %c0_0 = arith.constant 0 : index
    %c0_1 = arith.constant 0 : index
    %c0_2 = arith.constant 0 : index
    %0 = vector.load %arg2[%c0, %c0_0, %c0_1, %c0_2] : memref<1x8x10x128xbf16, #tpu.memory_space<vmem>>, vector<1x8x10x128xbf16>
    %c0_3 = arith.constant 0 : index
    %c0_4 = arith.constant 0 : index
    %c0_5 = arith.constant 0 : index
    %c0_6 = arith.constant 0 : index
    %1 = vector.load %arg3[%c0_3, %c0_4, %c0_5, %c0_6] : memref<1x8x10x128xbf16, #tpu.memory_space<vmem>>, vector<1x2x10x128xbf16>
    %2 = tpu.concatenate %0, %1 in 1 : vector<1x8x10x128xbf16>, vector<1x2x10x128xbf16> -> vector<1x10x10x128xbf16>
    %cst = arith.constant 0.000000e+00 : f32
    %3 = vector.broadcast %cst : f32 to vector<64x128xf32>
    %4 = vector.extract_strided_slice %2 {offsets = [0, 0, 0, 0], sizes = [1, 8, 8, 128], strides = [1, 1, 1, 1]} : vector<1x10x10x128xbf16> to vector<1x8x8x128xbf16>
    %5 = vector.shape_cast %4 : vector<1x8x8x128xbf16> to vector<8x8x128xbf16>
    %6 = vector.shape_cast %5 : vector<8x8x128xbf16> to vector<64x128xbf16>
    %c0_7 = arith.constant 0 : index
    %c0_8 = arith.constant 0 : index
    %c0_9 = arith.constant 0 : index
    %7 = vector.load %arg4[%c0_7, %c0_8, %c0_9] : memref<9x128x128xbf16, #tpu.memory_space<vmem>>, vector<1x128x128xbf16>
    %8 = vector.shape_cast %7 : vector<1x128x128xbf16> to vector<128x128xbf16>
    %cst_10 = arith.constant dense<0.000000e+00> : vector<64x128xf32>
    %9 = tpu.matmul %6, %8, %cst_10 {dimension_numbers = #tpu.dot_dimension_numbers<[1], [0], [0], [1], [0, 0, 1, 1], [], []>} : vector<64x128xbf16>, vector<128x128xbf16>, vector<64x128xf32> -> vector<64x128xf32>
    %10 = arith.addf %3, %9 : vector<64x128xf32>
    %11 = vector.extract_strided_slice %2 {offsets = [0, 0, 1, 0], sizes = [1, 8, 8, 128], strides = [1, 1, 1, 1]} : vector<1x10x10x128xbf16> to vector<1x8x8x128xbf16>
    %12 = vector.shape_cast %11 : vector<1x8x8x128xbf16> to vector<8x8x128xbf16>
    %13 = vector.shape_cast %12 : vector<8x8x128xbf16> to vector<64x128xbf16>
    %c1 = arith.constant 1 : index
    %c0_11 = arith.constant 0 : index
    %c0_12 = arith.constant 0 : index
    %14 = vector.load %arg4[%c1, %c0_11, %c0_12] : memref<9x128x128xbf16, #tpu.memory_space<vmem>>, vector<1x128x128xbf16>
    %15 = vector.shape_cast %14 : vector<1x128x128xbf16> to vector<128x128xbf16>
    %cst_13 = arith.constant dense<0.000000e+00> : vector<64x128xf32>
    %16 = tpu.matmul %13, %15, %cst_13 {dimension_numbers = #tpu.dot_dimension_numbers<[1], [0], [0], [1], [0, 0, 1, 1], [], []>} : vector<64x128xbf16>, vector<128x128xbf16>, vector<64x128xf32> -> vector<64x128xf32>
    %17 = arith.addf %10, %16 : vector<64x128xf32>
    %18 = vector.extract_strided_slice %2 {offsets = [0, 0, 2, 0], sizes = [1, 8, 8, 128], strides = [1, 1, 1, 1]} : vector<1x10x10x128xbf16> to vector<1x8x8x128xbf16>
    %19 = vector.shape_cast %18 : vector<1x8x8x128xbf16> to vector<8x8x128xbf16>
    %20 = vector.shape_cast %19 : vector<8x8x128xbf16> to vector<64x128xbf16>
    %c2 = arith.constant 2 : index
    %c0_14 = arith.constant 0 : index
    %c0_15 = arith.constant 0 : index
    %21 = vector.load %arg4[%c2, %c0_14, %c0_15] : memref<9x128x128xbf16, #tpu.memory_space<vmem>>, vector<1x128x128xbf16>
    %22 = vector.shape_cast %21 : vector<1x128x128xbf16> to vector<128x128xbf16>
    %cst_16 = arith.constant dense<0.000000e+00> : vector<64x128xf32>
    %23 = tpu.matmul %20, %22, %cst_16 {dimension_numbers = #tpu.dot_dimension_numbers<[1], [0], [0], [1], [0, 0, 1, 1], [], []>} : vector<64x128xbf16>, vector<128x128xbf16>, vector<64x128xf32> -> vector<64x128xf32>
    %24 = arith.addf %17, %23 : vector<64x128xf32>
    %25 = vector.extract_strided_slice %2 {offsets = [0, 1, 0, 0], sizes = [1, 8, 8, 128], strides = [1, 1, 1, 1]} : vector<1x10x10x128xbf16> to vector<1x8x8x128xbf16>
    %26 = vector.shape_cast %25 : vector<1x8x8x128xbf16> to vector<8x8x128xbf16>
    %27 = vector.shape_cast %26 : vector<8x8x128xbf16> to vector<64x128xbf16>
    %c3 = arith.constant 3 : index
    %c0_17 = arith.constant 0 : index
    %c0_18 = arith.constant 0 : index
    %28 = vector.load %arg4[%c3, %c0_17, %c0_18] : memref<9x128x128xbf16, #tpu.memory_space<vmem>>, vector<1x128x128xbf16>
    %29 = vector.shape_cast %28 : vector<1x128x128xbf16> to vector<128x128xbf16>
    %cst_19 = arith.constant dense<0.000000e+00> : vector<64x128xf32>
    %30 = tpu.matmul %27, %29, %cst_19 {dimension_numbers = #tpu.dot_dimension_numbers<[1], [0], [0], [1], [0, 0, 1, 1], [], []>} : vector<64x128xbf16>, vector<128x128xbf16>, vector<64x128xf32> -> vector<64x128xf32>
    %31 = arith.addf %24, %30 : vector<64x128xf32>
    %32 = vector.extract_strided_slice %2 {offsets = [0, 1, 1, 0], sizes = [1, 8, 8, 128], strides = [1, 1, 1, 1]} : vector<1x10x10x128xbf16> to vector<1x8x8x128xbf16>
    %33 = vector.shape_cast %32 : vector<1x8x8x128xbf16> to vector<8x8x128xbf16>
    %34 = vector.shape_cast %33 : vector<8x8x128xbf16> to vector<64x128xbf16>
    %c4 = arith.constant 4 : index
    %c0_20 = arith.constant 0 : index
    %c0_21 = arith.constant 0 : index
    %35 = vector.load %arg4[%c4, %c0_20, %c0_21] : memref<9x128x128xbf16, #tpu.memory_space<vmem>>, vector<1x128x128xbf16>
    %36 = vector.shape_cast %35 : vector<1x128x128xbf16> to vector<128x128xbf16>
    %cst_22 = arith.constant dense<0.000000e+00> : vector<64x128xf32>
    %37 = tpu.matmul %34, %36, %cst_22 {dimension_numbers = #tpu.dot_dimension_numbers<[1], [0], [0], [1], [0, 0, 1, 1], [], []>} : vector<64x128xbf16>, vector<128x128xbf16>, vector<64x128xf32> -> vector<64x128xf32>
    %38 = arith.addf %31, %37 : vector<64x128xf32>
    %39 = vector.extract_strided_slice %2 {offsets = [0, 1, 2, 0], sizes = [1, 8, 8, 128], strides = [1, 1, 1, 1]} : vector<1x10x10x128xbf16> to vector<1x8x8x128xbf16>
    %40 = vector.shape_cast %39 : vector<1x8x8x128xbf16> to vector<8x8x128xbf16>
    %41 = vector.shape_cast %40 : vector<8x8x128xbf16> to vector<64x128xbf16>
    %c5 = arith.constant 5 : index
    %c0_23 = arith.constant 0 : index
    %c0_24 = arith.constant 0 : index
    %42 = vector.load %arg4[%c5, %c0_23, %c0_24] : memref<9x128x128xbf16, #tpu.memory_space<vmem>>, vector<1x128x128xbf16>
    %43 = vector.shape_cast %42 : vector<1x128x128xbf16> to vector<128x128xbf16>
    %cst_25 = arith.constant dense<0.000000e+00> : vector<64x128xf32>
    %44 = tpu.matmul %41, %43, %cst_25 {dimension_numbers = #tpu.dot_dimension_numbers<[1], [0], [0], [1], [0, 0, 1, 1], [], []>} : vector<64x128xbf16>, vector<128x128xbf16>, vector<64x128xf32> -> vector<64x128xf32>
    %45 = arith.addf %38, %44 : vector<64x128xf32>
    %46 = vector.extract_strided_slice %2 {offsets = [0, 2, 0, 0], sizes = [1, 8, 8, 128], strides = [1, 1, 1, 1]} : vector<1x10x10x128xbf16> to vector<1x8x8x128xbf16>
    %47 = vector.shape_cast %46 : vector<1x8x8x128xbf16> to vector<8x8x128xbf16>
    %48 = vector.shape_cast %47 : vector<8x8x128xbf16> to vector<64x128xbf16>
    %c6 = arith.constant 6 : index
    %c0_26 = arith.constant 0 : index
    %c0_27 = arith.constant 0 : index
    %49 = vector.load %arg4[%c6, %c0_26, %c0_27] : memref<9x128x128xbf16, #tpu.memory_space<vmem>>, vector<1x128x128xbf16>
    %50 = vector.shape_cast %49 : vector<1x128x128xbf16> to vector<128x128xbf16>
    %cst_28 = arith.constant dense<0.000000e+00> : vector<64x128xf32>
    %51 = tpu.matmul %48, %50, %cst_28 {dimension_numbers = #tpu.dot_dimension_numbers<[1], [0], [0], [1], [0, 0, 1, 1], [], []>} : vector<64x128xbf16>, vector<128x128xbf16>, vector<64x128xf32> -> vector<64x128xf32>
    %52 = arith.addf %45, %51 : vector<64x128xf32>
    %53 = vector.extract_strided_slice %2 {offsets = [0, 2, 1, 0], sizes = [1, 8, 8, 128], strides = [1, 1, 1, 1]} : vector<1x10x10x128xbf16> to vector<1x8x8x128xbf16>
    %54 = vector.shape_cast %53 : vector<1x8x8x128xbf16> to vector<8x8x128xbf16>
    %55 = vector.shape_cast %54 : vector<8x8x128xbf16> to vector<64x128xbf16>
    %c7 = arith.constant 7 : index
    %c0_29 = arith.constant 0 : index
    %c0_30 = arith.constant 0 : index
    %56 = vector.load %arg4[%c7, %c0_29, %c0_30] : memref<9x128x128xbf16, #tpu.memory_space<vmem>>, vector<1x128x128xbf16>
    %57 = vector.shape_cast %56 : vector<1x128x128xbf16> to vector<128x128xbf16>
    %cst_31 = arith.constant dense<0.000000e+00> : vector<64x128xf32>
    %58 = tpu.matmul %55, %57, %cst_31 {dimension_numbers = #tpu.dot_dimension_numbers<[1], [0], [0], [1], [0, 0, 1, 1], [], []>} : vector<64x128xbf16>, vector<128x128xbf16>, vector<64x128xf32> -> vector<64x128xf32>
    %59 = arith.addf %52, %58 : vector<64x128xf32>
    %60 = vector.extract_strided_slice %2 {offsets = [0, 2, 2, 0], sizes = [1, 8, 8, 128], strides = [1, 1, 1, 1]} : vector<1x10x10x128xbf16> to vector<1x8x8x128xbf16>
    %61 = vector.shape_cast %60 : vector<1x8x8x128xbf16> to vector<8x8x128xbf16>
    %62 = vector.shape_cast %61 : vector<8x8x128xbf16> to vector<64x128xbf16>
    %c8 = arith.constant 8 : index
    %c0_32 = arith.constant 0 : index
    %c0_33 = arith.constant 0 : index
    %63 = vector.load %arg4[%c8, %c0_32, %c0_33] : memref<9x128x128xbf16, #tpu.memory_space<vmem>>, vector<1x128x128xbf16>
    %64 = vector.shape_cast %63 : vector<1x128x128xbf16> to vector<128x128xbf16>
    %cst_34 = arith.constant dense<0.000000e+00> : vector<64x128xf32>
    %65 = tpu.matmul %62, %64, %cst_34 {dimension_numbers = #tpu.dot_dimension_numbers<[1], [0], [0], [1], [0, 0, 1, 1], [], []>} : vector<64x128xbf16>, vector<128x128xbf16>, vector<64x128xf32> -> vector<64x128xf32>
    %66 = arith.addf %59, %65 : vector<64x128xf32>
    %c0_35 = arith.constant 0 : index
    %c0_36 = arith.constant 0 : index
    %67 = vector.load %arg5[%c0_35, %c0_36] : memref<1x128xf32, #tpu.memory_space<vmem>>, vector<1x128xf32>
    %68 = vector.broadcast %67 : vector<1x128xf32> to vector<64x128xf32>
    %69 = arith.addf %66, %68 : vector<64x128xf32>
    %70 = vector.shape_cast %69 : vector<64x128xf32> to vector<1x8x8x128xf32>
    %71 = arith.truncf %70 : vector<1x8x8x128xf32> to vector<1x8x8x128xbf16>
    %c0_37 = arith.constant 0 : index
    %c0_38 = arith.constant 0 : index
    %c0_39 = arith.constant 0 : index
    %c0_40 = arith.constant 0 : index
    %72 = vector.load %arg6[%c0_37, %c0_38, %c0_39, %c0_40] : memref<1x8x8x128xbf16, #tpu.memory_space<vmem>>, vector<1x8x8x128xbf16>
    tpu.vector_store %arg6[%c0_37, %c0_38, %c0_39, %c0_40], %71 {strides = array<i32>} : memref<1x8x8x128xbf16, #tpu.memory_space<vmem>>, vector<1x8x8x128xbf16>,
    %c0_i32 = arith.constant 0 : i32
    %73 = arith.cmpi eq, %arg1, %c0_i32 : i32
    %74 = arith.extui %73 : i1 to i32
    %c0_i32_41 = arith.constant 0 : i32
    %75 = arith.cmpi ne, %74, %c0_i32_41 : i32
    scf.if %75 {
      %cst_58 = arith.constant 0.000000e+00 : f32
      %90 = vector.broadcast %cst_58 : f32 to vector<1x1x128xf32>
      %c0_59 = arith.constant 0 : index
      %c0_60 = arith.constant 0 : index
      %c0_61 = arith.constant 0 : index
      %91 = vector.load %arg9[%c0_59, %c0_60, %c0_61] : memref<1x1x128xf32, #tpu.memory_space<vmem>>, vector<1x1x128xf32>
      tpu.vector_store %arg9[%c0_59, %c0_60, %c0_61], %90 {strides = array<i32>} : memref<1x1x128xf32, #tpu.memory_space<vmem>>, vector<1x1x128xf32>,
      %cst_62 = arith.constant 0.000000e+00 : f32
      %92 = vector.broadcast %cst_62 : f32 to vector<1x1x128xf32>
      %c0_63 = arith.constant 0 : index
      %c0_64 = arith.constant 0 : index
      %c0_65 = arith.constant 0 : index
      %93 = vector.load %arg10[%c0_63, %c0_64, %c0_65] : memref<1x1x128xf32, #tpu.memory_space<vmem>>, vector<1x1x128xf32>
      tpu.vector_store %arg10[%c0_63, %c0_64, %c0_65], %92 {strides = array<i32>} : memref<1x1x128xf32, #tpu.memory_space<vmem>>, vector<1x1x128xf32>,
    } else {
    }
    %c0_42 = arith.constant 0 : index
    %c0_43 = arith.constant 0 : index
    %c0_44 = arith.constant 0 : index
    %76 = vector.load %arg9[%c0_42, %c0_43, %c0_44] : memref<1x1x128xf32, #tpu.memory_space<vmem>>, vector<1x1x128xf32>
    %cst_45 = arith.constant dense<0.000000e+00> : vector<128xf32>
    %77 = vector.multi_reduction <add>, %69, %cst_45 [0] : vector<64x128xf32> to vector<128xf32>
    %78 = vector.shape_cast %77 : vector<128xf32> to vector<1x1x128xf32>
    %79 = arith.addf %76, %78 : vector<1x1x128xf32>
    %c0_46 = arith.constant 0 : index
    %c0_47 = arith.constant 0 : index
    %c0_48 = arith.constant 0 : index
    %80 = vector.load %arg9[%c0_46, %c0_47, %c0_48] : memref<1x1x128xf32, #tpu.memory_space<vmem>>, vector<1x1x128xf32>
    tpu.vector_store %arg9[%c0_46, %c0_47, %c0_48], %79 {strides = array<i32>} : memref<1x1x128xf32, #tpu.memory_space<vmem>>, vector<1x1x128xf32>,
    %c0_49 = arith.constant 0 : index
    %c0_50 = arith.constant 0 : index
    %c0_51 = arith.constant 0 : index
    %81 = vector.load %arg10[%c0_49, %c0_50, %c0_51] : memref<1x1x128xf32, #tpu.memory_space<vmem>>, vector<1x1x128xf32>
    %82 = arith.mulf %69, %69 : vector<64x128xf32>
    %cst_52 = arith.constant dense<0.000000e+00> : vector<128xf32>
    %83 = vector.multi_reduction <add>, %82, %cst_52 [0] : vector<64x128xf32> to vector<128xf32>
    %84 = vector.shape_cast %83 : vector<128xf32> to vector<1x1x128xf32>
    %85 = arith.addf %81, %84 : vector<1x1x128xf32>
    %c0_53 = arith.constant 0 : index
    %c0_54 = arith.constant 0 : index
    %c0_55 = arith.constant 0 : index
    %86 = vector.load %arg10[%c0_53, %c0_54, %c0_55] : memref<1x1x128xf32, #tpu.memory_space<vmem>>, vector<1x1x128xf32>
    tpu.vector_store %arg10[%c0_53, %c0_54, %c0_55], %85 {strides = array<i32>} : memref<1x1x128xf32, #tpu.memory_space<vmem>>, vector<1x1x128xf32>,
    %c0_i32_56 = arith.constant 0 : i32
    %87 = arith.cmpi eq, %arg1, %c0_i32_56 : i32
    %88 = arith.extui %87 : i1 to i32
    %c0_i32_57 = arith.constant 0 : i32
    %89 = arith.cmpi ne, %88, %c0_i32_57 : i32
    scf.if %89 {
      %c0_58 = arith.constant 0 : index
      %c0_59 = arith.constant 0 : index
      %c0_60 = arith.constant 0 : index
      %90 = vector.load %arg9[%c0_58, %c0_59, %c0_60] : memref<1x1x128xf32, #tpu.memory_space<vmem>>, vector<1x1x128xf32>
      %c0_61 = arith.constant 0 : index
      %c0_62 = arith.constant 0 : index
      %c0_63 = arith.constant 0 : index
      %91 = vector.load %arg7[%c0_61, %c0_62, %c0_63] : memref<1x1x128xf32, #tpu.memory_space<vmem>>, vector<1x1x128xf32>
      tpu.vector_store %arg7[%c0_61, %c0_62, %c0_63], %90 {strides = array<i32>} : memref<1x1x128xf32, #tpu.memory_space<vmem>>, vector<1x1x128xf32>,
      %c0_64 = arith.constant 0 : index
      %c0_65 = arith.constant 0 : index
      %c0_66 = arith.constant 0 : index
      %92 = vector.load %arg10[%c0_64, %c0_65, %c0_66] : memref<1x1x128xf32, #tpu.memory_space<vmem>>, vector<1x1x128xf32>
      %c0_67 = arith.constant 0 : index
      %c0_68 = arith.constant 0 : index
      %c0_69 = arith.constant 0 : index
      %93 = vector.load %arg8[%c0_67, %c0_68, %c0_69] : memref<1x1x128xf32, #tpu.memory_space<vmem>>, vector<1x1x128xf32>
      tpu.vector_store %arg8[%c0_67, %c0_68, %c0_69], %92 {strides = array<i32>} : memref<1x1x128xf32, #tpu.memory_space<vmem>>, vector<1x1x128xf32>,
    } else {
    }
    return
  }
  func.func @transform_0(%arg0: i32, %arg1: i32) -> (i32, i32, i32, i32) {
    %c0_i32 = arith.constant 0 : i32
    %c0_i32_0 = arith.constant 0 : i32
    %c0_i32_1 = arith.constant 0 : i32
    return %arg0, %arg1, %c0_i32, %c0_i32_0 : i32, i32, i32, i32
  }
  func.func @transform_1(%arg0: i32, %arg1: i32) -> (i32, i32, i32, i32) {
    %c1_i32 = arith.constant 1 : i32
    %0 = arith.addi %arg1, %c1_i32 : i32
    %c1_i32_0 = arith.constant 1 : i32
    %1 = arith.muli %0, %c1_i32_0 : i32
    %c0_i32 = arith.constant 0 : i32
    %c0_i32_1 = arith.constant 0 : i32
    %c0_i32_2 = arith.constant 0 : i32
    return %arg0, %1, %c0_i32, %c0_i32_1 : i32, i32, i32, i32
  }
  func.func @transform_2(%arg0: i32, %arg1: i32) -> (i32, i32, i32) {
    %c0_i32 = arith.constant 0 : i32
    %c0_i32_0 = arith.constant 0 : i32
    %c0_i32_1 = arith.constant 0 : i32
    %c0_i32_2 = arith.constant 0 : i32
    return %c0_i32, %c0_i32_0, %c0_i32_1 : i32, i32, i32
  }
  func.func @transform_3(%arg0: i32, %arg1: i32) -> (i32, i32) {
    %c0_i32 = arith.constant 0 : i32
    %c0_i32_0 = arith.constant 0 : i32
    %c0_i32_1 = arith.constant 0 : i32
    return %c0_i32, %c0_i32_0 : i32, i32
  }
  func.func @transform_4(%arg0: i32, %arg1: i32) -> (i32, i32, i32, i32) {
    %c0_i32 = arith.constant 0 : i32
    %c0_i32_0 = arith.constant 0 : i32
    %c0_i32_1 = arith.constant 0 : i32
    return %arg0, %arg1, %c0_i32, %c0_i32_0 : i32, i32, i32, i32
  }
  func.func @transform_5(%arg0: i32, %arg1: i32) -> (i32, i32, i32) {
    %c0_i32 = arith.constant 0 : i32
    %c0_i32_0 = arith.constant 0 : i32
    %c0_i32_1 = arith.constant 0 : i32
    return %arg0, %c0_i32, %c0_i32_0 : i32, i32, i32
  }
  func.func @transform_6(%arg0: i32, %arg1: i32) -> (i32, i32, i32) {
    %c0_i32 = arith.constant 0 : i32
    %c0_i32_0 = arith.constant 0 : i32
    %c0_i32_1 = arith.constant 0 : i32
    return %arg0, %c0_i32, %c0_i32_0 : i32, i32, i32
  }
}

module attributes {stable_mosaic.version = 11 : i64} {
  func.func @_in_norm_kernel(%arg0: i32, %arg1: i32, %arg2: memref<1x64x128xbf16, #tpu.memory_space<vmem>>, %arg3: memref<1x1x128xf32, #tpu.memory_space<vmem>>, %arg4: memref<1x1x128xf32, #tpu.memory_space<vmem>>, %arg5: memref<1x1x128xf32, #tpu.memory_space<vmem>>, %arg6: memref<1x1x128xf32, #tpu.memory_space<vmem>>, %arg7: memref<1x64x128xbf16, #tpu.memory_space<vmem>>, %arg8: memref<1x64x128xbf16, #tpu.memory_space<vmem>>) attributes {dimension_semantics = [#tpu.dimension_semantics<parallel>, #tpu.dimension_semantics<parallel>], iteration_bounds = array<i64: 2, 1>, scalar_prefetch = 0 : i64, scratch_operands = 0 : i64, tpu.core_type = #tpu.core_type<tc>, window_params = [{transform_indices = @transform_0, window_bounds = array<i64: 1, 64, 128>}, {transform_indices = @transform_1, window_bounds = array<i64: 1, 1, 128>}, {transform_indices = @transform_2, window_bounds = array<i64: 1, 1, 128>}, {pipeline_mode = #tpu.pipeline_mode<synchronous>, transform_indices = @transform_3, window_bounds = array<i64: 1, 1, 128>}, {pipeline_mode = #tpu.pipeline_mode<synchronous>, transform_indices = @transform_4, window_bounds = array<i64: 1, 1, 128>}, {transform_indices = @transform_5, window_bounds = array<i64: 1, 64, 128>}, {transform_indices = @transform_6, window_bounds = array<i64: 1, 64, 128>}]} {
    %c0 = arith.constant 0 : index
    %c0_0 = arith.constant 0 : index
    %c0_1 = arith.constant 0 : index
    %0 = vector.load %arg2[%c0, %c0_0, %c0_1] : memref<1x64x128xbf16, #tpu.memory_space<vmem>>, vector<1x64x128xbf16>
    %1 = arith.extf %0 : vector<1x64x128xbf16> to vector<1x64x128xf32>
    %c0_2 = arith.constant 0 : index
    %c0_3 = arith.constant 0 : index
    %c0_4 = arith.constant 0 : index
    %2 = vector.load %arg3[%c0_2, %c0_3, %c0_4] : memref<1x1x128xf32, #tpu.memory_space<vmem>>, vector<1x1x128xf32>
    %3 = vector.broadcast %2 : vector<1x1x128xf32> to vector<1x64x128xf32>
    %4 = arith.subf %1, %3 : vector<1x64x128xf32>
    %c0_5 = arith.constant 0 : index
    %c0_6 = arith.constant 0 : index
    %c0_7 = arith.constant 0 : index
    %5 = vector.load %arg4[%c0_5, %c0_6, %c0_7] : memref<1x1x128xf32, #tpu.memory_space<vmem>>, vector<1x1x128xf32>
    %c0_8 = arith.constant 0 : index
    %c0_9 = arith.constant 0 : index
    %c0_10 = arith.constant 0 : index
    %6 = vector.load %arg5[%c0_8, %c0_9, %c0_10] : memref<1x1x128xf32, #tpu.memory_space<vmem>>, vector<1x1x128xf32>
    %7 = arith.mulf %5, %6 : vector<1x1x128xf32>
    %8 = vector.broadcast %7 : vector<1x1x128xf32> to vector<1x64x128xf32>
    %9 = arith.mulf %4, %8 : vector<1x64x128xf32>
    %c0_11 = arith.constant 0 : index
    %c0_12 = arith.constant 0 : index
    %c0_13 = arith.constant 0 : index
    %10 = vector.load %arg6[%c0_11, %c0_12, %c0_13] : memref<1x1x128xf32, #tpu.memory_space<vmem>>, vector<1x1x128xf32>
    %11 = vector.broadcast %10 : vector<1x1x128xf32> to vector<1x64x128xf32>
    %12 = arith.addf %9, %11 : vector<1x64x128xf32>
    %c0_14 = arith.constant 0 : index
    %c0_15 = arith.constant 0 : index
    %c0_16 = arith.constant 0 : index
    %13 = vector.load %arg7[%c0_14, %c0_15, %c0_16] : memref<1x64x128xbf16, #tpu.memory_space<vmem>>, vector<1x64x128xbf16>
    %14 = arith.extf %13 : vector<1x64x128xbf16> to vector<1x64x128xf32>
    %15 = arith.addf %12, %14 : vector<1x64x128xf32>
    %16 = arith.truncf %15 : vector<1x64x128xf32> to vector<1x64x128xbf16>
    %c0_17 = arith.constant 0 : index
    %c0_18 = arith.constant 0 : index
    %c0_19 = arith.constant 0 : index
    %17 = vector.load %arg8[%c0_17, %c0_18, %c0_19] : memref<1x64x128xbf16, #tpu.memory_space<vmem>>, vector<1x64x128xbf16>
    tpu.vector_store %arg8[%c0_17, %c0_18, %c0_19], %16 {strides = array<i32>} : memref<1x64x128xbf16, #tpu.memory_space<vmem>>, vector<1x64x128xbf16>,
    return
  }
  func.func @transform_0(%arg0: i32, %arg1: i32) -> (i32, i32, i32) {
    %c0_i32 = arith.constant 0 : i32
    %c0_i32_0 = arith.constant 0 : i32
    return %arg0, %arg1, %c0_i32 : i32, i32, i32
  }
  func.func @transform_1(%arg0: i32, %arg1: i32) -> (i32, i32, i32) {
    %c0_i32 = arith.constant 0 : i32
    %c0_i32_0 = arith.constant 0 : i32
    %c0_i32_1 = arith.constant 0 : i32
    return %arg0, %c0_i32, %c0_i32_0 : i32, i32, i32
  }
  func.func @transform_2(%arg0: i32, %arg1: i32) -> (i32, i32, i32) {
    %c0_i32 = arith.constant 0 : i32
    %c0_i32_0 = arith.constant 0 : i32
    %c0_i32_1 = arith.constant 0 : i32
    return %arg0, %c0_i32, %c0_i32_0 : i32, i32, i32
  }
  func.func @transform_3(%arg0: i32, %arg1: i32) -> (i32, i32, i32) {
    %c0_i32 = arith.constant 0 : i32
    %c0_i32_0 = arith.constant 0 : i32
    %c0_i32_1 = arith.constant 0 : i32
    %c0_i32_2 = arith.constant 0 : i32
    return %c0_i32, %c0_i32_0, %c0_i32_1 : i32, i32, i32
  }
  func.func @transform_4(%arg0: i32, %arg1: i32) -> (i32, i32, i32) {
    %c0_i32 = arith.constant 0 : i32
    %c0_i32_0 = arith.constant 0 : i32
    %c0_i32_1 = arith.constant 0 : i32
    %c0_i32_2 = arith.constant 0 : i32
    return %c0_i32, %c0_i32_0, %c0_i32_1 : i32, i32, i32
  }
  func.func @transform_5(%arg0: i32, %arg1: i32) -> (i32, i32, i32) {
    %c0_i32 = arith.constant 0 : i32
    %c0_i32_0 = arith.constant 0 : i32
    return %arg0, %arg1, %c0_i32 : i32, i32, i32
  }
  func.func @transform_6(%arg0: i32, %arg1: i32) -> (i32, i32, i32) {
    %c0_i32 = arith.constant 0 : i32
    %c0_i32_0 = arith.constant 0 : i32
    return %arg0, %arg1, %c0_i32 : i32, i32, i32
  }
}

module attributes {stable_mosaic.version = 11 : i64} {
  func.func @_conv_kernel(%arg0: i32, %arg1: i32, %arg2: memref<1x8x10x128xbf16, #tpu.memory_space<vmem>>, %arg3: memref<1x8x10x128xbf16, #tpu.memory_space<vmem>>, %arg4: memref<9x128x64xbf16, #tpu.memory_space<vmem>>, %arg5: memref<1x64xf32, #tpu.memory_space<vmem>>, %arg6: memref<1x8x8x64xbf16, #tpu.memory_space<vmem>>) attributes {dimension_semantics = [#tpu.dimension_semantics<parallel>, #tpu.dimension_semantics<parallel>], iteration_bounds = array<i64: 2, 1>, scalar_prefetch = 0 : i64, scratch_operands = 0 : i64, tpu.core_type = #tpu.core_type<tc>, window_params = [{transform_indices = @transform_0, window_bounds = array<i64: 1, 8, 10, 128>}, {transform_indices = @transform_1, window_bounds = array<i64: 1, 8, 10, 128>}, {pipeline_mode = #tpu.pipeline_mode<synchronous>, transform_indices = @transform_2, window_bounds = array<i64: 9, 128, 64>}, {pipeline_mode = #tpu.pipeline_mode<synchronous>, transform_indices = @transform_3, window_bounds = array<i64: 1, 64>}, {transform_indices = @transform_4, window_bounds = array<i64: 1, 8, 8, 64>}]} {
    %c0 = arith.constant 0 : index
    %c0_0 = arith.constant 0 : index
    %c0_1 = arith.constant 0 : index
    %c0_2 = arith.constant 0 : index
    %0 = vector.load %arg2[%c0, %c0_0, %c0_1, %c0_2] : memref<1x8x10x128xbf16, #tpu.memory_space<vmem>>, vector<1x8x10x128xbf16>
    %c0_3 = arith.constant 0 : index
    %c0_4 = arith.constant 0 : index
    %c0_5 = arith.constant 0 : index
    %c0_6 = arith.constant 0 : index
    %1 = vector.load %arg3[%c0_3, %c0_4, %c0_5, %c0_6] : memref<1x8x10x128xbf16, #tpu.memory_space<vmem>>, vector<1x2x10x128xbf16>
    %2 = tpu.concatenate %0, %1 in 1 : vector<1x8x10x128xbf16>, vector<1x2x10x128xbf16> -> vector<1x10x10x128xbf16>
    %cst = arith.constant 0.000000e+00 : f32
    %3 = vector.broadcast %cst : f32 to vector<64x64xf32>
    %4 = vector.extract_strided_slice %2 {offsets = [0, 0, 0, 0], sizes = [1, 8, 8, 128], strides = [1, 1, 1, 1]} : vector<1x10x10x128xbf16> to vector<1x8x8x128xbf16>
    %5 = vector.shape_cast %4 : vector<1x8x8x128xbf16> to vector<8x8x128xbf16>
    %6 = vector.shape_cast %5 : vector<8x8x128xbf16> to vector<64x128xbf16>
    %c0_7 = arith.constant 0 : index
    %c0_8 = arith.constant 0 : index
    %c0_9 = arith.constant 0 : index
    %7 = vector.load %arg4[%c0_7, %c0_8, %c0_9] : memref<9x128x64xbf16, #tpu.memory_space<vmem>>, vector<1x128x64xbf16>
    %8 = vector.shape_cast %7 : vector<1x128x64xbf16> to vector<128x64xbf16>
    %cst_10 = arith.constant dense<0.000000e+00> : vector<64x64xf32>
    %9 = tpu.matmul %6, %8, %cst_10 {dimension_numbers = #tpu.dot_dimension_numbers<[1], [0], [0], [1], [0, 0, 1, 1], [], []>} : vector<64x128xbf16>, vector<128x64xbf16>, vector<64x64xf32> -> vector<64x64xf32>
    %10 = arith.addf %3, %9 : vector<64x64xf32>
    %11 = vector.extract_strided_slice %2 {offsets = [0, 0, 1, 0], sizes = [1, 8, 8, 128], strides = [1, 1, 1, 1]} : vector<1x10x10x128xbf16> to vector<1x8x8x128xbf16>
    %12 = vector.shape_cast %11 : vector<1x8x8x128xbf16> to vector<8x8x128xbf16>
    %13 = vector.shape_cast %12 : vector<8x8x128xbf16> to vector<64x128xbf16>
    %c1 = arith.constant 1 : index
    %c0_11 = arith.constant 0 : index
    %c0_12 = arith.constant 0 : index
    %14 = vector.load %arg4[%c1, %c0_11, %c0_12] : memref<9x128x64xbf16, #tpu.memory_space<vmem>>, vector<1x128x64xbf16>
    %15 = vector.shape_cast %14 : vector<1x128x64xbf16> to vector<128x64xbf16>
    %cst_13 = arith.constant dense<0.000000e+00> : vector<64x64xf32>
    %16 = tpu.matmul %13, %15, %cst_13 {dimension_numbers = #tpu.dot_dimension_numbers<[1], [0], [0], [1], [0, 0, 1, 1], [], []>} : vector<64x128xbf16>, vector<128x64xbf16>, vector<64x64xf32> -> vector<64x64xf32>
    %17 = arith.addf %10, %16 : vector<64x64xf32>
    %18 = vector.extract_strided_slice %2 {offsets = [0, 0, 2, 0], sizes = [1, 8, 8, 128], strides = [1, 1, 1, 1]} : vector<1x10x10x128xbf16> to vector<1x8x8x128xbf16>
    %19 = vector.shape_cast %18 : vector<1x8x8x128xbf16> to vector<8x8x128xbf16>
    %20 = vector.shape_cast %19 : vector<8x8x128xbf16> to vector<64x128xbf16>
    %c2 = arith.constant 2 : index
    %c0_14 = arith.constant 0 : index
    %c0_15 = arith.constant 0 : index
    %21 = vector.load %arg4[%c2, %c0_14, %c0_15] : memref<9x128x64xbf16, #tpu.memory_space<vmem>>, vector<1x128x64xbf16>
    %22 = vector.shape_cast %21 : vector<1x128x64xbf16> to vector<128x64xbf16>
    %cst_16 = arith.constant dense<0.000000e+00> : vector<64x64xf32>
    %23 = tpu.matmul %20, %22, %cst_16 {dimension_numbers = #tpu.dot_dimension_numbers<[1], [0], [0], [1], [0, 0, 1, 1], [], []>} : vector<64x128xbf16>, vector<128x64xbf16>, vector<64x64xf32> -> vector<64x64xf32>
    %24 = arith.addf %17, %23 : vector<64x64xf32>
    %25 = vector.extract_strided_slice %2 {offsets = [0, 1, 0, 0], sizes = [1, 8, 8, 128], strides = [1, 1, 1, 1]} : vector<1x10x10x128xbf16> to vector<1x8x8x128xbf16>
    %26 = vector.shape_cast %25 : vector<1x8x8x128xbf16> to vector<8x8x128xbf16>
    %27 = vector.shape_cast %26 : vector<8x8x128xbf16> to vector<64x128xbf16>
    %c3 = arith.constant 3 : index
    %c0_17 = arith.constant 0 : index
    %c0_18 = arith.constant 0 : index
    %28 = vector.load %arg4[%c3, %c0_17, %c0_18] : memref<9x128x64xbf16, #tpu.memory_space<vmem>>, vector<1x128x64xbf16>
    %29 = vector.shape_cast %28 : vector<1x128x64xbf16> to vector<128x64xbf16>
    %cst_19 = arith.constant dense<0.000000e+00> : vector<64x64xf32>
    %30 = tpu.matmul %27, %29, %cst_19 {dimension_numbers = #tpu.dot_dimension_numbers<[1], [0], [0], [1], [0, 0, 1, 1], [], []>} : vector<64x128xbf16>, vector<128x64xbf16>, vector<64x64xf32> -> vector<64x64xf32>
    %31 = arith.addf %24, %30 : vector<64x64xf32>
    %32 = vector.extract_strided_slice %2 {offsets = [0, 1, 1, 0], sizes = [1, 8, 8, 128], strides = [1, 1, 1, 1]} : vector<1x10x10x128xbf16> to vector<1x8x8x128xbf16>
    %33 = vector.shape_cast %32 : vector<1x8x8x128xbf16> to vector<8x8x128xbf16>
    %34 = vector.shape_cast %33 : vector<8x8x128xbf16> to vector<64x128xbf16>
    %c4 = arith.constant 4 : index
    %c0_20 = arith.constant 0 : index
    %c0_21 = arith.constant 0 : index
    %35 = vector.load %arg4[%c4, %c0_20, %c0_21] : memref<9x128x64xbf16, #tpu.memory_space<vmem>>, vector<1x128x64xbf16>
    %36 = vector.shape_cast %35 : vector<1x128x64xbf16> to vector<128x64xbf16>
    %cst_22 = arith.constant dense<0.000000e+00> : vector<64x64xf32>
    %37 = tpu.matmul %34, %36, %cst_22 {dimension_numbers = #tpu.dot_dimension_numbers<[1], [0], [0], [1], [0, 0, 1, 1], [], []>} : vector<64x128xbf16>, vector<128x64xbf16>, vector<64x64xf32> -> vector<64x64xf32>
    %38 = arith.addf %31, %37 : vector<64x64xf32>
    %39 = vector.extract_strided_slice %2 {offsets = [0, 1, 2, 0], sizes = [1, 8, 8, 128], strides = [1, 1, 1, 1]} : vector<1x10x10x128xbf16> to vector<1x8x8x128xbf16>
    %40 = vector.shape_cast %39 : vector<1x8x8x128xbf16> to vector<8x8x128xbf16>
    %41 = vector.shape_cast %40 : vector<8x8x128xbf16> to vector<64x128xbf16>
    %c5 = arith.constant 5 : index
    %c0_23 = arith.constant 0 : index
    %c0_24 = arith.constant 0 : index
    %42 = vector.load %arg4[%c5, %c0_23, %c0_24] : memref<9x128x64xbf16, #tpu.memory_space<vmem>>, vector<1x128x64xbf16>
    %43 = vector.shape_cast %42 : vector<1x128x64xbf16> to vector<128x64xbf16>
    %cst_25 = arith.constant dense<0.000000e+00> : vector<64x64xf32>
    %44 = tpu.matmul %41, %43, %cst_25 {dimension_numbers = #tpu.dot_dimension_numbers<[1], [0], [0], [1], [0, 0, 1, 1], [], []>} : vector<64x128xbf16>, vector<128x64xbf16>, vector<64x64xf32> -> vector<64x64xf32>
    %45 = arith.addf %38, %44 : vector<64x64xf32>
    %46 = vector.extract_strided_slice %2 {offsets = [0, 2, 0, 0], sizes = [1, 8, 8, 128], strides = [1, 1, 1, 1]} : vector<1x10x10x128xbf16> to vector<1x8x8x128xbf16>
    %47 = vector.shape_cast %46 : vector<1x8x8x128xbf16> to vector<8x8x128xbf16>
    %48 = vector.shape_cast %47 : vector<8x8x128xbf16> to vector<64x128xbf16>
    %c6 = arith.constant 6 : index
    %c0_26 = arith.constant 0 : index
    %c0_27 = arith.constant 0 : index
    %49 = vector.load %arg4[%c6, %c0_26, %c0_27] : memref<9x128x64xbf16, #tpu.memory_space<vmem>>, vector<1x128x64xbf16>
    %50 = vector.shape_cast %49 : vector<1x128x64xbf16> to vector<128x64xbf16>
    %cst_28 = arith.constant dense<0.000000e+00> : vector<64x64xf32>
    %51 = tpu.matmul %48, %50, %cst_28 {dimension_numbers = #tpu.dot_dimension_numbers<[1], [0], [0], [1], [0, 0, 1, 1], [], []>} : vector<64x128xbf16>, vector<128x64xbf16>, vector<64x64xf32> -> vector<64x64xf32>
    %52 = arith.addf %45, %51 : vector<64x64xf32>
    %53 = vector.extract_strided_slice %2 {offsets = [0, 2, 1, 0], sizes = [1, 8, 8, 128], strides = [1, 1, 1, 1]} : vector<1x10x10x128xbf16> to vector<1x8x8x128xbf16>
    %54 = vector.shape_cast %53 : vector<1x8x8x128xbf16> to vector<8x8x128xbf16>
    %55 = vector.shape_cast %54 : vector<8x8x128xbf16> to vector<64x128xbf16>
    %c7 = arith.constant 7 : index
    %c0_29 = arith.constant 0 : index
    %c0_30 = arith.constant 0 : index
    %56 = vector.load %arg4[%c7, %c0_29, %c0_30] : memref<9x128x64xbf16, #tpu.memory_space<vmem>>, vector<1x128x64xbf16>
    %57 = vector.shape_cast %56 : vector<1x128x64xbf16> to vector<128x64xbf16>
    %cst_31 = arith.constant dense<0.000000e+00> : vector<64x64xf32>
    %58 = tpu.matmul %55, %57, %cst_31 {dimension_numbers = #tpu.dot_dimension_numbers<[1], [0], [0], [1], [0, 0, 1, 1], [], []>} : vector<64x128xbf16>, vector<128x64xbf16>, vector<64x64xf32> -> vector<64x64xf32>
    %59 = arith.addf %52, %58 : vector<64x64xf32>
    %60 = vector.extract_strided_slice %2 {offsets = [0, 2, 2, 0], sizes = [1, 8, 8, 128], strides = [1, 1, 1, 1]} : vector<1x10x10x128xbf16> to vector<1x8x8x128xbf16>
    %61 = vector.shape_cast %60 : vector<1x8x8x128xbf16> to vector<8x8x128xbf16>
    %62 = vector.shape_cast %61 : vector<8x8x128xbf16> to vector<64x128xbf16>
    %c8 = arith.constant 8 : index
    %c0_32 = arith.constant 0 : index
    %c0_33 = arith.constant 0 : index
    %63 = vector.load %arg4[%c8, %c0_32, %c0_33] : memref<9x128x64xbf16, #tpu.memory_space<vmem>>, vector<1x128x64xbf16>
    %64 = vector.shape_cast %63 : vector<1x128x64xbf16> to vector<128x64xbf16>
    %cst_34 = arith.constant dense<0.000000e+00> : vector<64x64xf32>
    %65 = tpu.matmul %62, %64, %cst_34 {dimension_numbers = #tpu.dot_dimension_numbers<[1], [0], [0], [1], [0, 0, 1, 1], [], []>} : vector<64x128xbf16>, vector<128x64xbf16>, vector<64x64xf32> -> vector<64x64xf32>
    %66 = arith.addf %59, %65 : vector<64x64xf32>
    %c0_35 = arith.constant 0 : index
    %c0_36 = arith.constant 0 : index
    %67 = vector.load %arg5[%c0_35, %c0_36] : memref<1x64xf32, #tpu.memory_space<vmem>>, vector<1x64xf32>
    %68 = vector.broadcast %67 : vector<1x64xf32> to vector<64x64xf32>
    %69 = arith.addf %66, %68 : vector<64x64xf32>
    %cst_37 = arith.constant 0.000000e+00 : f32
    %70 = vector.broadcast %cst_37 : f32 to vector<64x64xf32>
    %71 = arith.maximumf %69, %70 : vector<64x64xf32>
    %72 = vector.shape_cast %71 : vector<64x64xf32> to vector<1x8x8x64xf32>
    %73 = arith.truncf %72 : vector<1x8x8x64xf32> to vector<1x8x8x64xbf16>
    %c0_38 = arith.constant 0 : index
    %c0_39 = arith.constant 0 : index
    %c0_40 = arith.constant 0 : index
    %c0_41 = arith.constant 0 : index
    %74 = vector.load %arg6[%c0_38, %c0_39, %c0_40, %c0_41] : memref<1x8x8x64xbf16, #tpu.memory_space<vmem>>, vector<1x8x8x64xbf16>
    tpu.vector_store %arg6[%c0_38, %c0_39, %c0_40, %c0_41], %73 {strides = array<i32>} : memref<1x8x8x64xbf16, #tpu.memory_space<vmem>>, vector<1x8x8x64xbf16>,
    return
  }
  func.func @transform_0(%arg0: i32, %arg1: i32) -> (i32, i32, i32, i32) {
    %c0_i32 = arith.constant 0 : i32
    %c0_i32_0 = arith.constant 0 : i32
    %c0_i32_1 = arith.constant 0 : i32
    return %arg0, %arg1, %c0_i32, %c0_i32_0 : i32, i32, i32, i32
  }
  func.func @transform_1(%arg0: i32, %arg1: i32) -> (i32, i32, i32, i32) {
    %c1_i32 = arith.constant 1 : i32
    %0 = arith.addi %arg1, %c1_i32 : i32
    %c1_i32_0 = arith.constant 1 : i32
    %1 = arith.muli %0, %c1_i32_0 : i32
    %c0_i32 = arith.constant 0 : i32
    %c0_i32_1 = arith.constant 0 : i32
    %c0_i32_2 = arith.constant 0 : i32
    return %arg0, %1, %c0_i32, %c0_i32_1 : i32, i32, i32, i32
  }
  func.func @transform_2(%arg0: i32, %arg1: i32) -> (i32, i32, i32) {
    %c0_i32 = arith.constant 0 : i32
    %c0_i32_0 = arith.constant 0 : i32
    %c0_i32_1 = arith.constant 0 : i32
    %c0_i32_2 = arith.constant 0 : i32
    return %c0_i32, %c0_i32_0, %c0_i32_1 : i32, i32, i32
  }
  func.func @transform_3(%arg0: i32, %arg1: i32) -> (i32, i32) {
    %c0_i32 = arith.constant 0 : i32
    %c0_i32_0 = arith.constant 0 : i32
    %c0_i32_1 = arith.constant 0 : i32
    return %c0_i32, %c0_i32_0 : i32, i32
  }
  func.func @transform_4(%arg0: i32, %arg1: i32) -> (i32, i32, i32, i32) {
    %c0_i32 = arith.constant 0 : i32
    %c0_i32_0 = arith.constant 0 : i32
    %c0_i32_1 = arith.constant 0 : i32
    return %arg0, %arg1, %c0_i32, %c0_i32_0 : i32, i32, i32, i32
  }
}

module attributes {stable_mosaic.version = 11 : i64} {
  func.func @_conv_kernel(%arg0: i32, %arg1: i32, %arg2: memref<1x8x10x64xbf16, #tpu.memory_space<vmem>>, %arg3: memref<1x8x10x64xbf16, #tpu.memory_space<vmem>>, %arg4: memref<9x64x64xbf16, #tpu.memory_space<vmem>>, %arg5: memref<1x64xf32, #tpu.memory_space<vmem>>, %arg6: memref<1x8x8x64xbf16, #tpu.memory_space<vmem>>) attributes {dimension_semantics = [#tpu.dimension_semantics<parallel>, #tpu.dimension_semantics<parallel>], iteration_bounds = array<i64: 2, 1>, scalar_prefetch = 0 : i64, scratch_operands = 0 : i64, tpu.core_type = #tpu.core_type<tc>, window_params = [{transform_indices = @transform_0, window_bounds = array<i64: 1, 8, 10, 64>}, {transform_indices = @transform_1, window_bounds = array<i64: 1, 8, 10, 64>}, {pipeline_mode = #tpu.pipeline_mode<synchronous>, transform_indices = @transform_2, window_bounds = array<i64: 9, 64, 64>}, {pipeline_mode = #tpu.pipeline_mode<synchronous>, transform_indices = @transform_3, window_bounds = array<i64: 1, 64>}, {transform_indices = @transform_4, window_bounds = array<i64: 1, 8, 8, 64>}]} {
    %c0 = arith.constant 0 : index
    %c0_0 = arith.constant 0 : index
    %c0_1 = arith.constant 0 : index
    %c0_2 = arith.constant 0 : index
    %0 = vector.load %arg2[%c0, %c0_0, %c0_1, %c0_2] : memref<1x8x10x64xbf16, #tpu.memory_space<vmem>>, vector<1x8x10x64xbf16>
    %c0_3 = arith.constant 0 : index
    %c0_4 = arith.constant 0 : index
    %c0_5 = arith.constant 0 : index
    %c0_6 = arith.constant 0 : index
    %1 = vector.load %arg3[%c0_3, %c0_4, %c0_5, %c0_6] : memref<1x8x10x64xbf16, #tpu.memory_space<vmem>>, vector<1x2x10x64xbf16>
    %2 = tpu.concatenate %0, %1 in 1 : vector<1x8x10x64xbf16>, vector<1x2x10x64xbf16> -> vector<1x10x10x64xbf16>
    %cst = arith.constant 0.000000e+00 : f32
    %3 = vector.broadcast %cst : f32 to vector<64x64xf32>
    %4 = vector.extract_strided_slice %2 {offsets = [0, 0, 0, 0], sizes = [1, 8, 8, 64], strides = [1, 1, 1, 1]} : vector<1x10x10x64xbf16> to vector<1x8x8x64xbf16>
    %5 = vector.shape_cast %4 : vector<1x8x8x64xbf16> to vector<8x8x64xbf16>
    %6 = vector.shape_cast %5 : vector<8x8x64xbf16> to vector<64x64xbf16>
    %c0_7 = arith.constant 0 : index
    %c0_8 = arith.constant 0 : index
    %c0_9 = arith.constant 0 : index
    %7 = vector.load %arg4[%c0_7, %c0_8, %c0_9] : memref<9x64x64xbf16, #tpu.memory_space<vmem>>, vector<1x64x64xbf16>
    %8 = vector.shape_cast %7 : vector<1x64x64xbf16> to vector<64x64xbf16>
    %cst_10 = arith.constant dense<0.000000e+00> : vector<64x64xf32>
    %9 = tpu.matmul %6, %8, %cst_10 {dimension_numbers = #tpu.dot_dimension_numbers<[1], [0], [0], [1], [0, 0, 1, 1], [], []>} : vector<64x64xbf16>, vector<64x64xbf16>, vector<64x64xf32> -> vector<64x64xf32>
    %10 = arith.addf %3, %9 : vector<64x64xf32>
    %11 = vector.extract_strided_slice %2 {offsets = [0, 0, 1, 0], sizes = [1, 8, 8, 64], strides = [1, 1, 1, 1]} : vector<1x10x10x64xbf16> to vector<1x8x8x64xbf16>
    %12 = vector.shape_cast %11 : vector<1x8x8x64xbf16> to vector<8x8x64xbf16>
    %13 = vector.shape_cast %12 : vector<8x8x64xbf16> to vector<64x64xbf16>
    %c1 = arith.constant 1 : index
    %c0_11 = arith.constant 0 : index
    %c0_12 = arith.constant 0 : index
    %14 = vector.load %arg4[%c1, %c0_11, %c0_12] : memref<9x64x64xbf16, #tpu.memory_space<vmem>>, vector<1x64x64xbf16>
    %15 = vector.shape_cast %14 : vector<1x64x64xbf16> to vector<64x64xbf16>
    %cst_13 = arith.constant dense<0.000000e+00> : vector<64x64xf32>
    %16 = tpu.matmul %13, %15, %cst_13 {dimension_numbers = #tpu.dot_dimension_numbers<[1], [0], [0], [1], [0, 0, 1, 1], [], []>} : vector<64x64xbf16>, vector<64x64xbf16>, vector<64x64xf32> -> vector<64x64xf32>
    %17 = arith.addf %10, %16 : vector<64x64xf32>
    %18 = vector.extract_strided_slice %2 {offsets = [0, 0, 2, 0], sizes = [1, 8, 8, 64], strides = [1, 1, 1, 1]} : vector<1x10x10x64xbf16> to vector<1x8x8x64xbf16>
    %19 = vector.shape_cast %18 : vector<1x8x8x64xbf16> to vector<8x8x64xbf16>
    %20 = vector.shape_cast %19 : vector<8x8x64xbf16> to vector<64x64xbf16>
    %c2 = arith.constant 2 : index
    %c0_14 = arith.constant 0 : index
    %c0_15 = arith.constant 0 : index
    %21 = vector.load %arg4[%c2, %c0_14, %c0_15] : memref<9x64x64xbf16, #tpu.memory_space<vmem>>, vector<1x64x64xbf16>
    %22 = vector.shape_cast %21 : vector<1x64x64xbf16> to vector<64x64xbf16>
    %cst_16 = arith.constant dense<0.000000e+00> : vector<64x64xf32>
    %23 = tpu.matmul %20, %22, %cst_16 {dimension_numbers = #tpu.dot_dimension_numbers<[1], [0], [0], [1], [0, 0, 1, 1], [], []>} : vector<64x64xbf16>, vector<64x64xbf16>, vector<64x64xf32> -> vector<64x64xf32>
    %24 = arith.addf %17, %23 : vector<64x64xf32>
    %25 = vector.extract_strided_slice %2 {offsets = [0, 1, 0, 0], sizes = [1, 8, 8, 64], strides = [1, 1, 1, 1]} : vector<1x10x10x64xbf16> to vector<1x8x8x64xbf16>
    %26 = vector.shape_cast %25 : vector<1x8x8x64xbf16> to vector<8x8x64xbf16>
    %27 = vector.shape_cast %26 : vector<8x8x64xbf16> to vector<64x64xbf16>
    %c3 = arith.constant 3 : index
    %c0_17 = arith.constant 0 : index
    %c0_18 = arith.constant 0 : index
    %28 = vector.load %arg4[%c3, %c0_17, %c0_18] : memref<9x64x64xbf16, #tpu.memory_space<vmem>>, vector<1x64x64xbf16>
    %29 = vector.shape_cast %28 : vector<1x64x64xbf16> to vector<64x64xbf16>
    %cst_19 = arith.constant dense<0.000000e+00> : vector<64x64xf32>
    %30 = tpu.matmul %27, %29, %cst_19 {dimension_numbers = #tpu.dot_dimension_numbers<[1], [0], [0], [1], [0, 0, 1, 1], [], []>} : vector<64x64xbf16>, vector<64x64xbf16>, vector<64x64xf32> -> vector<64x64xf32>
    %31 = arith.addf %24, %30 : vector<64x64xf32>
    %32 = vector.extract_strided_slice %2 {offsets = [0, 1, 1, 0], sizes = [1, 8, 8, 64], strides = [1, 1, 1, 1]} : vector<1x10x10x64xbf16> to vector<1x8x8x64xbf16>
    %33 = vector.shape_cast %32 : vector<1x8x8x64xbf16> to vector<8x8x64xbf16>
    %34 = vector.shape_cast %33 : vector<8x8x64xbf16> to vector<64x64xbf16>
    %c4 = arith.constant 4 : index
    %c0_20 = arith.constant 0 : index
    %c0_21 = arith.constant 0 : index
    %35 = vector.load %arg4[%c4, %c0_20, %c0_21] : memref<9x64x64xbf16, #tpu.memory_space<vmem>>, vector<1x64x64xbf16>
    %36 = vector.shape_cast %35 : vector<1x64x64xbf16> to vector<64x64xbf16>
    %cst_22 = arith.constant dense<0.000000e+00> : vector<64x64xf32>
    %37 = tpu.matmul %34, %36, %cst_22 {dimension_numbers = #tpu.dot_dimension_numbers<[1], [0], [0], [1], [0, 0, 1, 1], [], []>} : vector<64x64xbf16>, vector<64x64xbf16>, vector<64x64xf32> -> vector<64x64xf32>
    %38 = arith.addf %31, %37 : vector<64x64xf32>
    %39 = vector.extract_strided_slice %2 {offsets = [0, 1, 2, 0], sizes = [1, 8, 8, 64], strides = [1, 1, 1, 1]} : vector<1x10x10x64xbf16> to vector<1x8x8x64xbf16>
    %40 = vector.shape_cast %39 : vector<1x8x8x64xbf16> to vector<8x8x64xbf16>
    %41 = vector.shape_cast %40 : vector<8x8x64xbf16> to vector<64x64xbf16>
    %c5 = arith.constant 5 : index
    %c0_23 = arith.constant 0 : index
    %c0_24 = arith.constant 0 : index
    %42 = vector.load %arg4[%c5, %c0_23, %c0_24] : memref<9x64x64xbf16, #tpu.memory_space<vmem>>, vector<1x64x64xbf16>
    %43 = vector.shape_cast %42 : vector<1x64x64xbf16> to vector<64x64xbf16>
    %cst_25 = arith.constant dense<0.000000e+00> : vector<64x64xf32>
    %44 = tpu.matmul %41, %43, %cst_25 {dimension_numbers = #tpu.dot_dimension_numbers<[1], [0], [0], [1], [0, 0, 1, 1], [], []>} : vector<64x64xbf16>, vector<64x64xbf16>, vector<64x64xf32> -> vector<64x64xf32>
    %45 = arith.addf %38, %44 : vector<64x64xf32>
    %46 = vector.extract_strided_slice %2 {offsets = [0, 2, 0, 0], sizes = [1, 8, 8, 64], strides = [1, 1, 1, 1]} : vector<1x10x10x64xbf16> to vector<1x8x8x64xbf16>
    %47 = vector.shape_cast %46 : vector<1x8x8x64xbf16> to vector<8x8x64xbf16>
    %48 = vector.shape_cast %47 : vector<8x8x64xbf16> to vector<64x64xbf16>
    %c6 = arith.constant 6 : index
    %c0_26 = arith.constant 0 : index
    %c0_27 = arith.constant 0 : index
    %49 = vector.load %arg4[%c6, %c0_26, %c0_27] : memref<9x64x64xbf16, #tpu.memory_space<vmem>>, vector<1x64x64xbf16>
    %50 = vector.shape_cast %49 : vector<1x64x64xbf16> to vector<64x64xbf16>
    %cst_28 = arith.constant dense<0.000000e+00> : vector<64x64xf32>
    %51 = tpu.matmul %48, %50, %cst_28 {dimension_numbers = #tpu.dot_dimension_numbers<[1], [0], [0], [1], [0, 0, 1, 1], [], []>} : vector<64x64xbf16>, vector<64x64xbf16>, vector<64x64xf32> -> vector<64x64xf32>
    %52 = arith.addf %45, %51 : vector<64x64xf32>
    %53 = vector.extract_strided_slice %2 {offsets = [0, 2, 1, 0], sizes = [1, 8, 8, 64], strides = [1, 1, 1, 1]} : vector<1x10x10x64xbf16> to vector<1x8x8x64xbf16>
    %54 = vector.shape_cast %53 : vector<1x8x8x64xbf16> to vector<8x8x64xbf16>
    %55 = vector.shape_cast %54 : vector<8x8x64xbf16> to vector<64x64xbf16>
    %c7 = arith.constant 7 : index
    %c0_29 = arith.constant 0 : index
    %c0_30 = arith.constant 0 : index
    %56 = vector.load %arg4[%c7, %c0_29, %c0_30] : memref<9x64x64xbf16, #tpu.memory_space<vmem>>, vector<1x64x64xbf16>
    %57 = vector.shape_cast %56 : vector<1x64x64xbf16> to vector<64x64xbf16>
    %cst_31 = arith.constant dense<0.000000e+00> : vector<64x64xf32>
    %58 = tpu.matmul %55, %57, %cst_31 {dimension_numbers = #tpu.dot_dimension_numbers<[1], [0], [0], [1], [0, 0, 1, 1], [], []>} : vector<64x64xbf16>, vector<64x64xbf16>, vector<64x64xf32> -> vector<64x64xf32>
    %59 = arith.addf %52, %58 : vector<64x64xf32>
    %60 = vector.extract_strided_slice %2 {offsets = [0, 2, 2, 0], sizes = [1, 8, 8, 64], strides = [1, 1, 1, 1]} : vector<1x10x10x64xbf16> to vector<1x8x8x64xbf16>
    %61 = vector.shape_cast %60 : vector<1x8x8x64xbf16> to vector<8x8x64xbf16>
    %62 = vector.shape_cast %61 : vector<8x8x64xbf16> to vector<64x64xbf16>
    %c8 = arith.constant 8 : index
    %c0_32 = arith.constant 0 : index
    %c0_33 = arith.constant 0 : index
    %63 = vector.load %arg4[%c8, %c0_32, %c0_33] : memref<9x64x64xbf16, #tpu.memory_space<vmem>>, vector<1x64x64xbf16>
    %64 = vector.shape_cast %63 : vector<1x64x64xbf16> to vector<64x64xbf16>
    %cst_34 = arith.constant dense<0.000000e+00> : vector<64x64xf32>
    %65 = tpu.matmul %62, %64, %cst_34 {dimension_numbers = #tpu.dot_dimension_numbers<[1], [0], [0], [1], [0, 0, 1, 1], [], []>} : vector<64x64xbf16>, vector<64x64xbf16>, vector<64x64xf32> -> vector<64x64xf32>
    %66 = arith.addf %59, %65 : vector<64x64xf32>
    %c0_35 = arith.constant 0 : index
    %c0_36 = arith.constant 0 : index
    %67 = vector.load %arg5[%c0_35, %c0_36] : memref<1x64xf32, #tpu.memory_space<vmem>>, vector<1x64xf32>
    %68 = vector.broadcast %67 : vector<1x64xf32> to vector<64x64xf32>
    %69 = arith.addf %66, %68 : vector<64x64xf32>
    %cst_37 = arith.constant 0.000000e+00 : f32
    %70 = vector.broadcast %cst_37 : f32 to vector<64x64xf32>
    %71 = arith.maximumf %69, %70 : vector<64x64xf32>
    %72 = vector.shape_cast %71 : vector<64x64xf32> to vector<1x8x8x64xf32>
    %73 = arith.truncf %72 : vector<1x8x8x64xf32> to vector<1x8x8x64xbf16>
    %c0_38 = arith.constant 0 : index
    %c0_39 = arith.constant 0 : index
    %c0_40 = arith.constant 0 : index
    %c0_41 = arith.constant 0 : index
    %74 = vector.load %arg6[%c0_38, %c0_39, %c0_40, %c0_41] : memref<1x8x8x64xbf16, #tpu.memory_space<vmem>>, vector<1x8x8x64xbf16>
    tpu.vector_store %arg6[%c0_38, %c0_39, %c0_40, %c0_41], %73 {strides = array<i32>} : memref<1x8x8x64xbf16, #tpu.memory_space<vmem>>, vector<1x8x8x64xbf16>,
    return
  }
  func.func @transform_0(%arg0: i32, %arg1: i32) -> (i32, i32, i32, i32) {
    %c0_i32 = arith.constant 0 : i32
    %c0_i32_0 = arith.constant 0 : i32
    %c0_i32_1 = arith.constant 0 : i32
    return %arg0, %arg1, %c0_i32, %c0_i32_0 : i32, i32, i32, i32
  }
  func.func @transform_1(%arg0: i32, %arg1: i32) -> (i32, i32, i32, i32) {
    %c1_i32 = arith.constant 1 : i32
    %0 = arith.addi %arg1, %c1_i32 : i32
    %c1_i32_0 = arith.constant 1 : i32
    %1 = arith.muli %0, %c1_i32_0 : i32
    %c0_i32 = arith.constant 0 : i32
    %c0_i32_1 = arith.constant 0 : i32
    %c0_i32_2 = arith.constant 0 : i32
    return %arg0, %1, %c0_i32, %c0_i32_1 : i32, i32, i32, i32
  }
  func.func @transform_2(%arg0: i32, %arg1: i32) -> (i32, i32, i32) {
    %c0_i32 = arith.constant 0 : i32
    %c0_i32_0 = arith.constant 0 : i32
    %c0_i32_1 = arith.constant 0 : i32
    %c0_i32_2 = arith.constant 0 : i32
    return %c0_i32, %c0_i32_0, %c0_i32_1 : i32, i32, i32
  }
  func.func @transform_3(%arg0: i32, %arg1: i32) -> (i32, i32) {
    %c0_i32 = arith.constant 0 : i32
    %c0_i32_0 = arith.constant 0 : i32
    %c0_i32_1 = arith.constant 0 : i32
    return %c0_i32, %c0_i32_0 : i32, i32
  }
  func.func @transform_4(%arg0: i32, %arg1: i32) -> (i32, i32, i32, i32) {
    %c0_i32 = arith.constant 0 : i32
    %c0_i32_0 = arith.constant 0 : i32
    %c0_i32_1 = arith.constant 0 : i32
    return %arg0, %arg1, %c0_i32, %c0_i32_0 : i32, i32, i32, i32
  }
}

module attributes {stable_mosaic.version = 11 : i64} {
  func.func @_conv_kernel(%arg0: i32, %arg1: i32, %arg2: memref<1x8x10x64xbf16, #tpu.memory_space<vmem>>, %arg3: memref<1x8x10x64xbf16, #tpu.memory_space<vmem>>, %arg4: memref<9x64x64xbf16, #tpu.memory_space<vmem>>, %arg5: memref<1x64xf32, #tpu.memory_space<vmem>>, %arg6: memref<1x8x8x64xbf16, #tpu.memory_space<vmem>>, %arg7: memref<1x1x64xf32, #tpu.memory_space<vmem>>, %arg8: memref<1x1x64xf32, #tpu.memory_space<vmem>>, %arg9: memref<1x1x64xf32, #tpu.memory_space<vmem>>, %arg10: memref<1x1x64xf32, #tpu.memory_space<vmem>>) attributes {dimension_semantics = [#tpu.dimension_semantics<parallel>, #tpu.dimension_semantics<arbitrary>], iteration_bounds = array<i64: 2, 1>, scalar_prefetch = 0 : i64, scratch_operands = 2 : i64, tpu.core_type = #tpu.core_type<tc>, window_params = [{transform_indices = @transform_0, window_bounds = array<i64: 1, 8, 10, 64>}, {transform_indices = @transform_1, window_bounds = array<i64: 1, 8, 10, 64>}, {pipeline_mode = #tpu.pipeline_mode<synchronous>, transform_indices = @transform_2, window_bounds = array<i64: 9, 64, 64>}, {pipeline_mode = #tpu.pipeline_mode<synchronous>, transform_indices = @transform_3, window_bounds = array<i64: 1, 64>}, {transform_indices = @transform_4, window_bounds = array<i64: 1, 8, 8, 64>}, {transform_indices = @transform_5, window_bounds = array<i64: 1, 1, 64>}, {transform_indices = @transform_6, window_bounds = array<i64: 1, 1, 64>}]} {
    %c0 = arith.constant 0 : index
    %c0_0 = arith.constant 0 : index
    %c0_1 = arith.constant 0 : index
    %c0_2 = arith.constant 0 : index
    %0 = vector.load %arg2[%c0, %c0_0, %c0_1, %c0_2] : memref<1x8x10x64xbf16, #tpu.memory_space<vmem>>, vector<1x8x10x64xbf16>
    %c0_3 = arith.constant 0 : index
    %c0_4 = arith.constant 0 : index
    %c0_5 = arith.constant 0 : index
    %c0_6 = arith.constant 0 : index
    %1 = vector.load %arg3[%c0_3, %c0_4, %c0_5, %c0_6] : memref<1x8x10x64xbf16, #tpu.memory_space<vmem>>, vector<1x2x10x64xbf16>
    %2 = tpu.concatenate %0, %1 in 1 : vector<1x8x10x64xbf16>, vector<1x2x10x64xbf16> -> vector<1x10x10x64xbf16>
    %cst = arith.constant 0.000000e+00 : f32
    %3 = vector.broadcast %cst : f32 to vector<64x64xf32>
    %4 = vector.extract_strided_slice %2 {offsets = [0, 0, 0, 0], sizes = [1, 8, 8, 64], strides = [1, 1, 1, 1]} : vector<1x10x10x64xbf16> to vector<1x8x8x64xbf16>
    %5 = vector.shape_cast %4 : vector<1x8x8x64xbf16> to vector<8x8x64xbf16>
    %6 = vector.shape_cast %5 : vector<8x8x64xbf16> to vector<64x64xbf16>
    %c0_7 = arith.constant 0 : index
    %c0_8 = arith.constant 0 : index
    %c0_9 = arith.constant 0 : index
    %7 = vector.load %arg4[%c0_7, %c0_8, %c0_9] : memref<9x64x64xbf16, #tpu.memory_space<vmem>>, vector<1x64x64xbf16>
    %8 = vector.shape_cast %7 : vector<1x64x64xbf16> to vector<64x64xbf16>
    %cst_10 = arith.constant dense<0.000000e+00> : vector<64x64xf32>
    %9 = tpu.matmul %6, %8, %cst_10 {dimension_numbers = #tpu.dot_dimension_numbers<[1], [0], [0], [1], [0, 0, 1, 1], [], []>} : vector<64x64xbf16>, vector<64x64xbf16>, vector<64x64xf32> -> vector<64x64xf32>
    %10 = arith.addf %3, %9 : vector<64x64xf32>
    %11 = vector.extract_strided_slice %2 {offsets = [0, 0, 1, 0], sizes = [1, 8, 8, 64], strides = [1, 1, 1, 1]} : vector<1x10x10x64xbf16> to vector<1x8x8x64xbf16>
    %12 = vector.shape_cast %11 : vector<1x8x8x64xbf16> to vector<8x8x64xbf16>
    %13 = vector.shape_cast %12 : vector<8x8x64xbf16> to vector<64x64xbf16>
    %c1 = arith.constant 1 : index
    %c0_11 = arith.constant 0 : index
    %c0_12 = arith.constant 0 : index
    %14 = vector.load %arg4[%c1, %c0_11, %c0_12] : memref<9x64x64xbf16, #tpu.memory_space<vmem>>, vector<1x64x64xbf16>
    %15 = vector.shape_cast %14 : vector<1x64x64xbf16> to vector<64x64xbf16>
    %cst_13 = arith.constant dense<0.000000e+00> : vector<64x64xf32>
    %16 = tpu.matmul %13, %15, %cst_13 {dimension_numbers = #tpu.dot_dimension_numbers<[1], [0], [0], [1], [0, 0, 1, 1], [], []>} : vector<64x64xbf16>, vector<64x64xbf16>, vector<64x64xf32> -> vector<64x64xf32>
    %17 = arith.addf %10, %16 : vector<64x64xf32>
    %18 = vector.extract_strided_slice %2 {offsets = [0, 0, 2, 0], sizes = [1, 8, 8, 64], strides = [1, 1, 1, 1]} : vector<1x10x10x64xbf16> to vector<1x8x8x64xbf16>
    %19 = vector.shape_cast %18 : vector<1x8x8x64xbf16> to vector<8x8x64xbf16>
    %20 = vector.shape_cast %19 : vector<8x8x64xbf16> to vector<64x64xbf16>
    %c2 = arith.constant 2 : index
    %c0_14 = arith.constant 0 : index
    %c0_15 = arith.constant 0 : index
    %21 = vector.load %arg4[%c2, %c0_14, %c0_15] : memref<9x64x64xbf16, #tpu.memory_space<vmem>>, vector<1x64x64xbf16>
    %22 = vector.shape_cast %21 : vector<1x64x64xbf16> to vector<64x64xbf16>
    %cst_16 = arith.constant dense<0.000000e+00> : vector<64x64xf32>
    %23 = tpu.matmul %20, %22, %cst_16 {dimension_numbers = #tpu.dot_dimension_numbers<[1], [0], [0], [1], [0, 0, 1, 1], [], []>} : vector<64x64xbf16>, vector<64x64xbf16>, vector<64x64xf32> -> vector<64x64xf32>
    %24 = arith.addf %17, %23 : vector<64x64xf32>
    %25 = vector.extract_strided_slice %2 {offsets = [0, 1, 0, 0], sizes = [1, 8, 8, 64], strides = [1, 1, 1, 1]} : vector<1x10x10x64xbf16> to vector<1x8x8x64xbf16>
    %26 = vector.shape_cast %25 : vector<1x8x8x64xbf16> to vector<8x8x64xbf16>
    %27 = vector.shape_cast %26 : vector<8x8x64xbf16> to vector<64x64xbf16>
    %c3 = arith.constant 3 : index
    %c0_17 = arith.constant 0 : index
    %c0_18 = arith.constant 0 : index
    %28 = vector.load %arg4[%c3, %c0_17, %c0_18] : memref<9x64x64xbf16, #tpu.memory_space<vmem>>, vector<1x64x64xbf16>
    %29 = vector.shape_cast %28 : vector<1x64x64xbf16> to vector<64x64xbf16>
    %cst_19 = arith.constant dense<0.000000e+00> : vector<64x64xf32>
    %30 = tpu.matmul %27, %29, %cst_19 {dimension_numbers = #tpu.dot_dimension_numbers<[1], [0], [0], [1], [0, 0, 1, 1], [], []>} : vector<64x64xbf16>, vector<64x64xbf16>, vector<64x64xf32> -> vector<64x64xf32>
    %31 = arith.addf %24, %30 : vector<64x64xf32>
    %32 = vector.extract_strided_slice %2 {offsets = [0, 1, 1, 0], sizes = [1, 8, 8, 64], strides = [1, 1, 1, 1]} : vector<1x10x10x64xbf16> to vector<1x8x8x64xbf16>
    %33 = vector.shape_cast %32 : vector<1x8x8x64xbf16> to vector<8x8x64xbf16>
    %34 = vector.shape_cast %33 : vector<8x8x64xbf16> to vector<64x64xbf16>
    %c4 = arith.constant 4 : index
    %c0_20 = arith.constant 0 : index
    %c0_21 = arith.constant 0 : index
    %35 = vector.load %arg4[%c4, %c0_20, %c0_21] : memref<9x64x64xbf16, #tpu.memory_space<vmem>>, vector<1x64x64xbf16>
    %36 = vector.shape_cast %35 : vector<1x64x64xbf16> to vector<64x64xbf16>
    %cst_22 = arith.constant dense<0.000000e+00> : vector<64x64xf32>
    %37 = tpu.matmul %34, %36, %cst_22 {dimension_numbers = #tpu.dot_dimension_numbers<[1], [0], [0], [1], [0, 0, 1, 1], [], []>} : vector<64x64xbf16>, vector<64x64xbf16>, vector<64x64xf32> -> vector<64x64xf32>
    %38 = arith.addf %31, %37 : vector<64x64xf32>
    %39 = vector.extract_strided_slice %2 {offsets = [0, 1, 2, 0], sizes = [1, 8, 8, 64], strides = [1, 1, 1, 1]} : vector<1x10x10x64xbf16> to vector<1x8x8x64xbf16>
    %40 = vector.shape_cast %39 : vector<1x8x8x64xbf16> to vector<8x8x64xbf16>
    %41 = vector.shape_cast %40 : vector<8x8x64xbf16> to vector<64x64xbf16>
    %c5 = arith.constant 5 : index
    %c0_23 = arith.constant 0 : index
    %c0_24 = arith.constant 0 : index
    %42 = vector.load %arg4[%c5, %c0_23, %c0_24] : memref<9x64x64xbf16, #tpu.memory_space<vmem>>, vector<1x64x64xbf16>
    %43 = vector.shape_cast %42 : vector<1x64x64xbf16> to vector<64x64xbf16>
    %cst_25 = arith.constant dense<0.000000e+00> : vector<64x64xf32>
    %44 = tpu.matmul %41, %43, %cst_25 {dimension_numbers = #tpu.dot_dimension_numbers<[1], [0], [0], [1], [0, 0, 1, 1], [], []>} : vector<64x64xbf16>, vector<64x64xbf16>, vector<64x64xf32> -> vector<64x64xf32>
    %45 = arith.addf %38, %44 : vector<64x64xf32>
    %46 = vector.extract_strided_slice %2 {offsets = [0, 2, 0, 0], sizes = [1, 8, 8, 64], strides = [1, 1, 1, 1]} : vector<1x10x10x64xbf16> to vector<1x8x8x64xbf16>
    %47 = vector.shape_cast %46 : vector<1x8x8x64xbf16> to vector<8x8x64xbf16>
    %48 = vector.shape_cast %47 : vector<8x8x64xbf16> to vector<64x64xbf16>
    %c6 = arith.constant 6 : index
    %c0_26 = arith.constant 0 : index
    %c0_27 = arith.constant 0 : index
    %49 = vector.load %arg4[%c6, %c0_26, %c0_27] : memref<9x64x64xbf16, #tpu.memory_space<vmem>>, vector<1x64x64xbf16>
    %50 = vector.shape_cast %49 : vector<1x64x64xbf16> to vector<64x64xbf16>
    %cst_28 = arith.constant dense<0.000000e+00> : vector<64x64xf32>
    %51 = tpu.matmul %48, %50, %cst_28 {dimension_numbers = #tpu.dot_dimension_numbers<[1], [0], [0], [1], [0, 0, 1, 1], [], []>} : vector<64x64xbf16>, vector<64x64xbf16>, vector<64x64xf32> -> vector<64x64xf32>
    %52 = arith.addf %45, %51 : vector<64x64xf32>
    %53 = vector.extract_strided_slice %2 {offsets = [0, 2, 1, 0], sizes = [1, 8, 8, 64], strides = [1, 1, 1, 1]} : vector<1x10x10x64xbf16> to vector<1x8x8x64xbf16>
    %54 = vector.shape_cast %53 : vector<1x8x8x64xbf16> to vector<8x8x64xbf16>
    %55 = vector.shape_cast %54 : vector<8x8x64xbf16> to vector<64x64xbf16>
    %c7 = arith.constant 7 : index
    %c0_29 = arith.constant 0 : index
    %c0_30 = arith.constant 0 : index
    %56 = vector.load %arg4[%c7, %c0_29, %c0_30] : memref<9x64x64xbf16, #tpu.memory_space<vmem>>, vector<1x64x64xbf16>
    %57 = vector.shape_cast %56 : vector<1x64x64xbf16> to vector<64x64xbf16>
    %cst_31 = arith.constant dense<0.000000e+00> : vector<64x64xf32>
    %58 = tpu.matmul %55, %57, %cst_31 {dimension_numbers = #tpu.dot_dimension_numbers<[1], [0], [0], [1], [0, 0, 1, 1], [], []>} : vector<64x64xbf16>, vector<64x64xbf16>, vector<64x64xf32> -> vector<64x64xf32>
    %59 = arith.addf %52, %58 : vector<64x64xf32>
    %60 = vector.extract_strided_slice %2 {offsets = [0, 2, 2, 0], sizes = [1, 8, 8, 64], strides = [1, 1, 1, 1]} : vector<1x10x10x64xbf16> to vector<1x8x8x64xbf16>
    %61 = vector.shape_cast %60 : vector<1x8x8x64xbf16> to vector<8x8x64xbf16>
    %62 = vector.shape_cast %61 : vector<8x8x64xbf16> to vector<64x64xbf16>
    %c8 = arith.constant 8 : index
    %c0_32 = arith.constant 0 : index
    %c0_33 = arith.constant 0 : index
    %63 = vector.load %arg4[%c8, %c0_32, %c0_33] : memref<9x64x64xbf16, #tpu.memory_space<vmem>>, vector<1x64x64xbf16>
    %64 = vector.shape_cast %63 : vector<1x64x64xbf16> to vector<64x64xbf16>
    %cst_34 = arith.constant dense<0.000000e+00> : vector<64x64xf32>
    %65 = tpu.matmul %62, %64, %cst_34 {dimension_numbers = #tpu.dot_dimension_numbers<[1], [0], [0], [1], [0, 0, 1, 1], [], []>} : vector<64x64xbf16>, vector<64x64xbf16>, vector<64x64xf32> -> vector<64x64xf32>
    %66 = arith.addf %59, %65 : vector<64x64xf32>
    %c0_35 = arith.constant 0 : index
    %c0_36 = arith.constant 0 : index
    %67 = vector.load %arg5[%c0_35, %c0_36] : memref<1x64xf32, #tpu.memory_space<vmem>>, vector<1x64xf32>
    %68 = vector.broadcast %67 : vector<1x64xf32> to vector<64x64xf32>
    %69 = arith.addf %66, %68 : vector<64x64xf32>
    %70 = vector.shape_cast %69 : vector<64x64xf32> to vector<1x8x8x64xf32>
    %71 = arith.truncf %70 : vector<1x8x8x64xf32> to vector<1x8x8x64xbf16>
    %c0_37 = arith.constant 0 : index
    %c0_38 = arith.constant 0 : index
    %c0_39 = arith.constant 0 : index
    %c0_40 = arith.constant 0 : index
    %72 = vector.load %arg6[%c0_37, %c0_38, %c0_39, %c0_40] : memref<1x8x8x64xbf16, #tpu.memory_space<vmem>>, vector<1x8x8x64xbf16>
    tpu.vector_store %arg6[%c0_37, %c0_38, %c0_39, %c0_40], %71 {strides = array<i32>} : memref<1x8x8x64xbf16, #tpu.memory_space<vmem>>, vector<1x8x8x64xbf16>,
    %c0_i32 = arith.constant 0 : i32
    %73 = arith.cmpi eq, %arg1, %c0_i32 : i32
    %74 = arith.extui %73 : i1 to i32
    %c0_i32_41 = arith.constant 0 : i32
    %75 = arith.cmpi ne, %74, %c0_i32_41 : i32
    scf.if %75 {
      %cst_58 = arith.constant 0.000000e+00 : f32
      %90 = vector.broadcast %cst_58 : f32 to vector<1x1x64xf32>
      %c0_59 = arith.constant 0 : index
      %c0_60 = arith.constant 0 : index
      %c0_61 = arith.constant 0 : index
      %91 = vector.load %arg9[%c0_59, %c0_60, %c0_61] : memref<1x1x64xf32, #tpu.memory_space<vmem>>, vector<1x1x64xf32>
      tpu.vector_store %arg9[%c0_59, %c0_60, %c0_61], %90 {strides = array<i32>} : memref<1x1x64xf32, #tpu.memory_space<vmem>>, vector<1x1x64xf32>,
      %cst_62 = arith.constant 0.000000e+00 : f32
      %92 = vector.broadcast %cst_62 : f32 to vector<1x1x64xf32>
      %c0_63 = arith.constant 0 : index
      %c0_64 = arith.constant 0 : index
      %c0_65 = arith.constant 0 : index
      %93 = vector.load %arg10[%c0_63, %c0_64, %c0_65] : memref<1x1x64xf32, #tpu.memory_space<vmem>>, vector<1x1x64xf32>
      tpu.vector_store %arg10[%c0_63, %c0_64, %c0_65], %92 {strides = array<i32>} : memref<1x1x64xf32, #tpu.memory_space<vmem>>, vector<1x1x64xf32>,
    } else {
    }
    %c0_42 = arith.constant 0 : index
    %c0_43 = arith.constant 0 : index
    %c0_44 = arith.constant 0 : index
    %76 = vector.load %arg9[%c0_42, %c0_43, %c0_44] : memref<1x1x64xf32, #tpu.memory_space<vmem>>, vector<1x1x64xf32>
    %cst_45 = arith.constant dense<0.000000e+00> : vector<64xf32>
    %77 = vector.multi_reduction <add>, %69, %cst_45 [0] : vector<64x64xf32> to vector<64xf32>
    %78 = vector.shape_cast %77 : vector<64xf32> to vector<1x1x64xf32>
    %79 = arith.addf %76, %78 : vector<1x1x64xf32>
    %c0_46 = arith.constant 0 : index
    %c0_47 = arith.constant 0 : index
    %c0_48 = arith.constant 0 : index
    %80 = vector.load %arg9[%c0_46, %c0_47, %c0_48] : memref<1x1x64xf32, #tpu.memory_space<vmem>>, vector<1x1x64xf32>
    tpu.vector_store %arg9[%c0_46, %c0_47, %c0_48], %79 {strides = array<i32>} : memref<1x1x64xf32, #tpu.memory_space<vmem>>, vector<1x1x64xf32>,
    %c0_49 = arith.constant 0 : index
    %c0_50 = arith.constant 0 : index
    %c0_51 = arith.constant 0 : index
    %81 = vector.load %arg10[%c0_49, %c0_50, %c0_51] : memref<1x1x64xf32, #tpu.memory_space<vmem>>, vector<1x1x64xf32>
    %82 = arith.mulf %69, %69 : vector<64x64xf32>
    %cst_52 = arith.constant dense<0.000000e+00> : vector<64xf32>
    %83 = vector.multi_reduction <add>, %82, %cst_52 [0] : vector<64x64xf32> to vector<64xf32>
    %84 = vector.shape_cast %83 : vector<64xf32> to vector<1x1x64xf32>
    %85 = arith.addf %81, %84 : vector<1x1x64xf32>
    %c0_53 = arith.constant 0 : index
    %c0_54 = arith.constant 0 : index
    %c0_55 = arith.constant 0 : index
    %86 = vector.load %arg10[%c0_53, %c0_54, %c0_55] : memref<1x1x64xf32, #tpu.memory_space<vmem>>, vector<1x1x64xf32>
    tpu.vector_store %arg10[%c0_53, %c0_54, %c0_55], %85 {strides = array<i32>} : memref<1x1x64xf32, #tpu.memory_space<vmem>>, vector<1x1x64xf32>,
    %c0_i32_56 = arith.constant 0 : i32
    %87 = arith.cmpi eq, %arg1, %c0_i32_56 : i32
    %88 = arith.extui %87 : i1 to i32
    %c0_i32_57 = arith.constant 0 : i32
    %89 = arith.cmpi ne, %88, %c0_i32_57 : i32
    scf.if %89 {
      %c0_58 = arith.constant 0 : index
      %c0_59 = arith.constant 0 : index
      %c0_60 = arith.constant 0 : index
      %90 = vector.load %arg9[%c0_58, %c0_59, %c0_60] : memref<1x1x64xf32, #tpu.memory_space<vmem>>, vector<1x1x64xf32>
      %c0_61 = arith.constant 0 : index
      %c0_62 = arith.constant 0 : index
      %c0_63 = arith.constant 0 : index
      %91 = vector.load %arg7[%c0_61, %c0_62, %c0_63] : memref<1x1x64xf32, #tpu.memory_space<vmem>>, vector<1x1x64xf32>
      tpu.vector_store %arg7[%c0_61, %c0_62, %c0_63], %90 {strides = array<i32>} : memref<1x1x64xf32, #tpu.memory_space<vmem>>, vector<1x1x64xf32>,
      %c0_64 = arith.constant 0 : index
      %c0_65 = arith.constant 0 : index
      %c0_66 = arith.constant 0 : index
      %92 = vector.load %arg10[%c0_64, %c0_65, %c0_66] : memref<1x1x64xf32, #tpu.memory_space<vmem>>, vector<1x1x64xf32>
      %c0_67 = arith.constant 0 : index
      %c0_68 = arith.constant 0 : index
      %c0_69 = arith.constant 0 : index
      %93 = vector.load %arg8[%c0_67, %c0_68, %c0_69] : memref<1x1x64xf32, #tpu.memory_space<vmem>>, vector<1x1x64xf32>
      tpu.vector_store %arg8[%c0_67, %c0_68, %c0_69], %92 {strides = array<i32>} : memref<1x1x64xf32, #tpu.memory_space<vmem>>, vector<1x1x64xf32>,
    } else {
    }
    return
  }
  func.func @transform_0(%arg0: i32, %arg1: i32) -> (i32, i32, i32, i32) {
    %c0_i32 = arith.constant 0 : i32
    %c0_i32_0 = arith.constant 0 : i32
    %c0_i32_1 = arith.constant 0 : i32
    return %arg0, %arg1, %c0_i32, %c0_i32_0 : i32, i32, i32, i32
  }
  func.func @transform_1(%arg0: i32, %arg1: i32) -> (i32, i32, i32, i32) {
    %c1_i32 = arith.constant 1 : i32
    %0 = arith.addi %arg1, %c1_i32 : i32
    %c1_i32_0 = arith.constant 1 : i32
    %1 = arith.muli %0, %c1_i32_0 : i32
    %c0_i32 = arith.constant 0 : i32
    %c0_i32_1 = arith.constant 0 : i32
    %c0_i32_2 = arith.constant 0 : i32
    return %arg0, %1, %c0_i32, %c0_i32_1 : i32, i32, i32, i32
  }
  func.func @transform_2(%arg0: i32, %arg1: i32) -> (i32, i32, i32) {
    %c0_i32 = arith.constant 0 : i32
    %c0_i32_0 = arith.constant 0 : i32
    %c0_i32_1 = arith.constant 0 : i32
    %c0_i32_2 = arith.constant 0 : i32
    return %c0_i32, %c0_i32_0, %c0_i32_1 : i32, i32, i32
  }
  func.func @transform_3(%arg0: i32, %arg1: i32) -> (i32, i32) {
    %c0_i32 = arith.constant 0 : i32
    %c0_i32_0 = arith.constant 0 : i32
    %c0_i32_1 = arith.constant 0 : i32
    return %c0_i32, %c0_i32_0 : i32, i32
  }
  func.func @transform_4(%arg0: i32, %arg1: i32) -> (i32, i32, i32, i32) {
    %c0_i32 = arith.constant 0 : i32
    %c0_i32_0 = arith.constant 0 : i32
    %c0_i32_1 = arith.constant 0 : i32
    return %arg0, %arg1, %c0_i32, %c0_i32_0 : i32, i32, i32, i32
  }
  func.func @transform_5(%arg0: i32, %arg1: i32) -> (i32, i32, i32) {
    %c0_i32 = arith.constant 0 : i32
    %c0_i32_0 = arith.constant 0 : i32
    %c0_i32_1 = arith.constant 0 : i32
    return %arg0, %c0_i32, %c0_i32_0 : i32, i32, i32
  }
  func.func @transform_6(%arg0: i32, %arg1: i32) -> (i32, i32, i32) {
    %c0_i32 = arith.constant 0 : i32
    %c0_i32_0 = arith.constant 0 : i32
    %c0_i32_1 = arith.constant 0 : i32
    return %arg0, %c0_i32, %c0_i32_0 : i32, i32, i32
  }
}

module attributes {stable_mosaic.version = 11 : i64} {
  func.func @_in_norm_kernel(%arg0: i32, %arg1: i32, %arg2: memref<1x32x128xbf16, #tpu.memory_space<vmem>>, %arg3: memref<1x1x128xf32, #tpu.memory_space<vmem>>, %arg4: memref<1x1x128xf32, #tpu.memory_space<vmem>>, %arg5: memref<1x1x128xf32, #tpu.memory_space<vmem>>, %arg6: memref<1x1x128xf32, #tpu.memory_space<vmem>>, %arg7: memref<1x32x128xbf16, #tpu.memory_space<vmem>>) attributes {dimension_semantics = [#tpu.dimension_semantics<parallel>, #tpu.dimension_semantics<parallel>], iteration_bounds = array<i64: 2, 1>, scalar_prefetch = 0 : i64, scratch_operands = 0 : i64, tpu.core_type = #tpu.core_type<tc>, window_params = [{transform_indices = @transform_0, window_bounds = array<i64: 1, 32, 128>}, {transform_indices = @transform_1, window_bounds = array<i64: 1, 1, 128>}, {transform_indices = @transform_2, window_bounds = array<i64: 1, 1, 128>}, {pipeline_mode = #tpu.pipeline_mode<synchronous>, transform_indices = @transform_3, window_bounds = array<i64: 1, 1, 128>}, {pipeline_mode = #tpu.pipeline_mode<synchronous>, transform_indices = @transform_4, window_bounds = array<i64: 1, 1, 128>}, {transform_indices = @transform_5, window_bounds = array<i64: 1, 32, 128>}]} {
    %c0 = arith.constant 0 : index
    %c0_0 = arith.constant 0 : index
    %c0_1 = arith.constant 0 : index
    %0 = vector.load %arg2[%c0, %c0_0, %c0_1] : memref<1x32x128xbf16, #tpu.memory_space<vmem>>, vector<1x32x128xbf16>
    %1 = arith.extf %0 : vector<1x32x128xbf16> to vector<1x32x128xf32>
    %c0_2 = arith.constant 0 : index
    %c0_3 = arith.constant 0 : index
    %c0_4 = arith.constant 0 : index
    %2 = vector.load %arg3[%c0_2, %c0_3, %c0_4] : memref<1x1x128xf32, #tpu.memory_space<vmem>>, vector<1x1x128xf32>
    %3 = vector.broadcast %2 : vector<1x1x128xf32> to vector<1x32x128xf32>
    %4 = arith.subf %1, %3 : vector<1x32x128xf32>
    %c0_5 = arith.constant 0 : index
    %c0_6 = arith.constant 0 : index
    %c0_7 = arith.constant 0 : index
    %5 = vector.load %arg4[%c0_5, %c0_6, %c0_7] : memref<1x1x128xf32, #tpu.memory_space<vmem>>, vector<1x1x128xf32>
    %c0_8 = arith.constant 0 : index
    %c0_9 = arith.constant 0 : index
    %c0_10 = arith.constant 0 : index
    %6 = vector.load %arg5[%c0_8, %c0_9, %c0_10] : memref<1x1x128xf32, #tpu.memory_space<vmem>>, vector<1x1x128xf32>
    %7 = arith.mulf %5, %6 : vector<1x1x128xf32>
    %8 = vector.broadcast %7 : vector<1x1x128xf32> to vector<1x32x128xf32>
    %9 = arith.mulf %4, %8 : vector<1x32x128xf32>
    %c0_11 = arith.constant 0 : index
    %c0_12 = arith.constant 0 : index
    %c0_13 = arith.constant 0 : index
    %10 = vector.load %arg6[%c0_11, %c0_12, %c0_13] : memref<1x1x128xf32, #tpu.memory_space<vmem>>, vector<1x1x128xf32>
    %11 = vector.broadcast %10 : vector<1x1x128xf32> to vector<1x32x128xf32>
    %12 = arith.addf %9, %11 : vector<1x32x128xf32>
    %cst = arith.constant 0.000000e+00 : f32
    %13 = vector.broadcast %cst : f32 to vector<1x32x128xf32>
    %14 = arith.maximumf %12, %13 : vector<1x32x128xf32>
    %15 = arith.truncf %14 : vector<1x32x128xf32> to vector<1x32x128xbf16>
    %c0_14 = arith.constant 0 : index
    %c0_15 = arith.constant 0 : index
    %c0_16 = arith.constant 0 : index
    %16 = vector.load %arg7[%c0_14, %c0_15, %c0_16] : memref<1x32x128xbf16, #tpu.memory_space<vmem>>, vector<1x32x128xbf16>
    tpu.vector_store %arg7[%c0_14, %c0_15, %c0_16], %15 {strides = array<i32>} : memref<1x32x128xbf16, #tpu.memory_space<vmem>>, vector<1x32x128xbf16>,
    return
  }
  func.func @transform_0(%arg0: i32, %arg1: i32) -> (i32, i32, i32) {
    %c0_i32 = arith.constant 0 : i32
    %c0_i32_0 = arith.constant 0 : i32
    return %arg0, %arg1, %c0_i32 : i32, i32, i32
  }
  func.func @transform_1(%arg0: i32, %arg1: i32) -> (i32, i32, i32) {
    %c0_i32 = arith.constant 0 : i32
    %c0_i32_0 = arith.constant 0 : i32
    %c0_i32_1 = arith.constant 0 : i32
    return %arg0, %c0_i32, %c0_i32_0 : i32, i32, i32
  }
  func.func @transform_2(%arg0: i32, %arg1: i32) -> (i32, i32, i32) {
    %c0_i32 = arith.constant 0 : i32
    %c0_i32_0 = arith.constant 0 : i32
    %c0_i32_1 = arith.constant 0 : i32
    return %arg0, %c0_i32, %c0_i32_0 : i32, i32, i32
  }
  func.func @transform_3(%arg0: i32, %arg1: i32) -> (i32, i32, i32) {
    %c0_i32 = arith.constant 0 : i32
    %c0_i32_0 = arith.constant 0 : i32
    %c0_i32_1 = arith.constant 0 : i32
    %c0_i32_2 = arith.constant 0 : i32
    return %c0_i32, %c0_i32_0, %c0_i32_1 : i32, i32, i32
  }
  func.func @transform_4(%arg0: i32, %arg1: i32) -> (i32, i32, i32) {
    %c0_i32 = arith.constant 0 : i32
    %c0_i32_0 = arith.constant 0 : i32
    %c0_i32_1 = arith.constant 0 : i32
    %c0_i32_2 = arith.constant 0 : i32
    return %c0_i32, %c0_i32_0, %c0_i32_1 : i32, i32, i32
  }
  func.func @transform_5(%arg0: i32, %arg1: i32) -> (i32, i32, i32) {
    %c0_i32 = arith.constant 0 : i32
    %c0_i32_0 = arith.constant 0 : i32
    return %arg0, %arg1, %c0_i32 : i32, i32, i32
  }
}

module attributes {stable_mosaic.version = 11 : i64} {
  func.func @_in_norm_kernel(%arg0: i32, %arg1: i32, %arg2: memref<1x32x128xbf16, #tpu.memory_space<vmem>>, %arg3: memref<1x1x128xf32, #tpu.memory_space<vmem>>, %arg4: memref<1x1x128xf32, #tpu.memory_space<vmem>>, %arg5: memref<1x1x128xf32, #tpu.memory_space<vmem>>, %arg6: memref<1x1x128xf32, #tpu.memory_space<vmem>>, %arg7: memref<1x32x128xbf16, #tpu.memory_space<vmem>>, %arg8: memref<1x32x128xbf16, #tpu.memory_space<vmem>>) attributes {dimension_semantics = [#tpu.dimension_semantics<parallel>, #tpu.dimension_semantics<parallel>], iteration_bounds = array<i64: 2, 1>, scalar_prefetch = 0 : i64, scratch_operands = 0 : i64, tpu.core_type = #tpu.core_type<tc>, window_params = [{transform_indices = @transform_0, window_bounds = array<i64: 1, 32, 128>}, {transform_indices = @transform_1, window_bounds = array<i64: 1, 1, 128>}, {transform_indices = @transform_2, window_bounds = array<i64: 1, 1, 128>}, {pipeline_mode = #tpu.pipeline_mode<synchronous>, transform_indices = @transform_3, window_bounds = array<i64: 1, 1, 128>}, {pipeline_mode = #tpu.pipeline_mode<synchronous>, transform_indices = @transform_4, window_bounds = array<i64: 1, 1, 128>}, {transform_indices = @transform_5, window_bounds = array<i64: 1, 32, 128>}, {transform_indices = @transform_6, window_bounds = array<i64: 1, 32, 128>}]} {
    %c0 = arith.constant 0 : index
    %c0_0 = arith.constant 0 : index
    %c0_1 = arith.constant 0 : index
    %0 = vector.load %arg2[%c0, %c0_0, %c0_1] : memref<1x32x128xbf16, #tpu.memory_space<vmem>>, vector<1x32x128xbf16>
    %1 = arith.extf %0 : vector<1x32x128xbf16> to vector<1x32x128xf32>
    %c0_2 = arith.constant 0 : index
    %c0_3 = arith.constant 0 : index
    %c0_4 = arith.constant 0 : index
    %2 = vector.load %arg3[%c0_2, %c0_3, %c0_4] : memref<1x1x128xf32, #tpu.memory_space<vmem>>, vector<1x1x128xf32>
    %3 = vector.broadcast %2 : vector<1x1x128xf32> to vector<1x32x128xf32>
    %4 = arith.subf %1, %3 : vector<1x32x128xf32>
    %c0_5 = arith.constant 0 : index
    %c0_6 = arith.constant 0 : index
    %c0_7 = arith.constant 0 : index
    %5 = vector.load %arg4[%c0_5, %c0_6, %c0_7] : memref<1x1x128xf32, #tpu.memory_space<vmem>>, vector<1x1x128xf32>
    %c0_8 = arith.constant 0 : index
    %c0_9 = arith.constant 0 : index
    %c0_10 = arith.constant 0 : index
    %6 = vector.load %arg5[%c0_8, %c0_9, %c0_10] : memref<1x1x128xf32, #tpu.memory_space<vmem>>, vector<1x1x128xf32>
    %7 = arith.mulf %5, %6 : vector<1x1x128xf32>
    %8 = vector.broadcast %7 : vector<1x1x128xf32> to vector<1x32x128xf32>
    %9 = arith.mulf %4, %8 : vector<1x32x128xf32>
    %c0_11 = arith.constant 0 : index
    %c0_12 = arith.constant 0 : index
    %c0_13 = arith.constant 0 : index
    %10 = vector.load %arg6[%c0_11, %c0_12, %c0_13] : memref<1x1x128xf32, #tpu.memory_space<vmem>>, vector<1x1x128xf32>
    %11 = vector.broadcast %10 : vector<1x1x128xf32> to vector<1x32x128xf32>
    %12 = arith.addf %9, %11 : vector<1x32x128xf32>
    %c0_14 = arith.constant 0 : index
    %c0_15 = arith.constant 0 : index
    %c0_16 = arith.constant 0 : index
    %13 = vector.load %arg7[%c0_14, %c0_15, %c0_16] : memref<1x32x128xbf16, #tpu.memory_space<vmem>>, vector<1x32x128xbf16>
    %14 = arith.extf %13 : vector<1x32x128xbf16> to vector<1x32x128xf32>
    %15 = arith.addf %12, %14 : vector<1x32x128xf32>
    %16 = arith.truncf %15 : vector<1x32x128xf32> to vector<1x32x128xbf16>
    %c0_17 = arith.constant 0 : index
    %c0_18 = arith.constant 0 : index
    %c0_19 = arith.constant 0 : index
    %17 = vector.load %arg8[%c0_17, %c0_18, %c0_19] : memref<1x32x128xbf16, #tpu.memory_space<vmem>>, vector<1x32x128xbf16>
    tpu.vector_store %arg8[%c0_17, %c0_18, %c0_19], %16 {strides = array<i32>} : memref<1x32x128xbf16, #tpu.memory_space<vmem>>, vector<1x32x128xbf16>,
    return
  }
  func.func @transform_0(%arg0: i32, %arg1: i32) -> (i32, i32, i32) {
    %c0_i32 = arith.constant 0 : i32
    %c0_i32_0 = arith.constant 0 : i32
    return %arg0, %arg1, %c0_i32 : i32, i32, i32
  }
  func.func @transform_1(%arg0: i32, %arg1: i32) -> (i32, i32, i32) {
    %c0_i32 = arith.constant 0 : i32
    %c0_i32_0 = arith.constant 0 : i32
    %c0_i32_1 = arith.constant 0 : i32
    return %arg0, %c0_i32, %c0_i32_0 : i32, i32, i32
  }
  func.func @transform_2(%arg0: i32, %arg1: i32) -> (i32, i32, i32) {
    %c0_i32 = arith.constant 0 : i32
    %c0_i32_0 = arith.constant 0 : i32
    %c0_i32_1 = arith.constant 0 : i32
    return %arg0, %c0_i32, %c0_i32_0 : i32, i32, i32
  }
  func.func @transform_3(%arg0: i32, %arg1: i32) -> (i32, i32, i32) {
    %c0_i32 = arith.constant 0 : i32
    %c0_i32_0 = arith.constant 0 : i32
    %c0_i32_1 = arith.constant 0 : i32
    %c0_i32_2 = arith.constant 0 : i32
    return %c0_i32, %c0_i32_0, %c0_i32_1 : i32, i32, i32
  }
  func.func @transform_4(%arg0: i32, %arg1: i32) -> (i32, i32, i32) {
    %c0_i32 = arith.constant 0 : i32
    %c0_i32_0 = arith.constant 0 : i32
    %c0_i32_1 = arith.constant 0 : i32
    %c0_i32_2 = arith.constant 0 : i32
    return %c0_i32, %c0_i32_0, %c0_i32_1 : i32, i32, i32
  }
  func.func @transform_5(%arg0: i32, %arg1: i32) -> (i32, i32, i32) {
    %c0_i32 = arith.constant 0 : i32
    %c0_i32_0 = arith.constant 0 : i32
    return %arg0, %arg1, %c0_i32 : i32, i32, i32
  }
  func.func @transform_6(%arg0: i32, %arg1: i32) -> (i32, i32, i32) {
    %c0_i32 = arith.constant 0 : i32
    %c0_i32_0 = arith.constant 0 : i32
    return %arg0, %arg1, %c0_i32 : i32, i32, i32
  }
}

module attributes {stable_mosaic.version = 11 : i64} {
  func.func @_in_norm_kernel(%arg0: i32, %arg1: i32, %arg2: memref<1x32x128xbf16, #tpu.memory_space<vmem>>, %arg3: memref<1x1x128xf32, #tpu.memory_space<vmem>>, %arg4: memref<1x1x128xf32, #tpu.memory_space<vmem>>, %arg5: memref<1x1x128xf32, #tpu.memory_space<vmem>>, %arg6: memref<1x1x128xf32, #tpu.memory_space<vmem>>, %arg7: memref<1x32x128xbf16, #tpu.memory_space<vmem>>, %arg8: memref<1x32x128xbf16, #tpu.memory_space<vmem>>, %arg9: memref<1x1x128xf32, #tpu.memory_space<vmem>>, %arg10: memref<1x1x128xf32, #tpu.memory_space<vmem>>, %arg11: memref<1x1x128xf32, #tpu.memory_space<vmem>>, %arg12: memref<1x1x128xf32, #tpu.memory_space<vmem>>) attributes {dimension_semantics = [#tpu.dimension_semantics<parallel>, #tpu.dimension_semantics<arbitrary>], iteration_bounds = array<i64: 2, 1>, scalar_prefetch = 0 : i64, scratch_operands = 2 : i64, tpu.core_type = #tpu.core_type<tc>, window_params = [{transform_indices = @transform_0, window_bounds = array<i64: 1, 32, 128>}, {transform_indices = @transform_1, window_bounds = array<i64: 1, 1, 128>}, {transform_indices = @transform_2, window_bounds = array<i64: 1, 1, 128>}, {pipeline_mode = #tpu.pipeline_mode<synchronous>, transform_indices = @transform_3, window_bounds = array<i64: 1, 1, 128>}, {pipeline_mode = #tpu.pipeline_mode<synchronous>, transform_indices = @transform_4, window_bounds = array<i64: 1, 1, 128>}, {transform_indices = @transform_5, window_bounds = array<i64: 1, 32, 128>}, {transform_indices = @transform_6, window_bounds = array<i64: 1, 32, 128>}, {transform_indices = @transform_7, window_bounds = array<i64: 1, 1, 128>}, {transform_indices = @transform_8, window_bounds = array<i64: 1, 1, 128>}]} {
    %c0 = arith.constant 0 : index
    %c0_0 = arith.constant 0 : index
    %c0_1 = arith.constant 0 : index
    %0 = vector.load %arg2[%c0, %c0_0, %c0_1] : memref<1x32x128xbf16, #tpu.memory_space<vmem>>, vector<1x32x128xbf16>
    %1 = arith.extf %0 : vector<1x32x128xbf16> to vector<1x32x128xf32>
    %c0_2 = arith.constant 0 : index
    %c0_3 = arith.constant 0 : index
    %c0_4 = arith.constant 0 : index
    %2 = vector.load %arg3[%c0_2, %c0_3, %c0_4] : memref<1x1x128xf32, #tpu.memory_space<vmem>>, vector<1x1x128xf32>
    %3 = vector.broadcast %2 : vector<1x1x128xf32> to vector<1x32x128xf32>
    %4 = arith.subf %1, %3 : vector<1x32x128xf32>
    %c0_5 = arith.constant 0 : index
    %c0_6 = arith.constant 0 : index
    %c0_7 = arith.constant 0 : index
    %5 = vector.load %arg4[%c0_5, %c0_6, %c0_7] : memref<1x1x128xf32, #tpu.memory_space<vmem>>, vector<1x1x128xf32>
    %c0_8 = arith.constant 0 : index
    %c0_9 = arith.constant 0 : index
    %c0_10 = arith.constant 0 : index
    %6 = vector.load %arg5[%c0_8, %c0_9, %c0_10] : memref<1x1x128xf32, #tpu.memory_space<vmem>>, vector<1x1x128xf32>
    %7 = arith.mulf %5, %6 : vector<1x1x128xf32>
    %8 = vector.broadcast %7 : vector<1x1x128xf32> to vector<1x32x128xf32>
    %9 = arith.mulf %4, %8 : vector<1x32x128xf32>
    %c0_11 = arith.constant 0 : index
    %c0_12 = arith.constant 0 : index
    %c0_13 = arith.constant 0 : index
    %10 = vector.load %arg6[%c0_11, %c0_12, %c0_13] : memref<1x1x128xf32, #tpu.memory_space<vmem>>, vector<1x1x128xf32>
    %11 = vector.broadcast %10 : vector<1x1x128xf32> to vector<1x32x128xf32>
    %12 = arith.addf %9, %11 : vector<1x32x128xf32>
    %c0_14 = arith.constant 0 : index
    %c0_15 = arith.constant 0 : index
    %c0_16 = arith.constant 0 : index
    %13 = vector.load %arg7[%c0_14, %c0_15, %c0_16] : memref<1x32x128xbf16, #tpu.memory_space<vmem>>, vector<1x32x128xbf16>
    %14 = arith.extf %13 : vector<1x32x128xbf16> to vector<1x32x128xf32>
    %15 = arith.addf %12, %14 : vector<1x32x128xf32>
    %16 = arith.truncf %15 : vector<1x32x128xf32> to vector<1x32x128xbf16>
    %c0_17 = arith.constant 0 : index
    %c0_18 = arith.constant 0 : index
    %c0_19 = arith.constant 0 : index
    %17 = vector.load %arg8[%c0_17, %c0_18, %c0_19] : memref<1x32x128xbf16, #tpu.memory_space<vmem>>, vector<1x32x128xbf16>
    tpu.vector_store %arg8[%c0_17, %c0_18, %c0_19], %16 {strides = array<i32>} : memref<1x32x128xbf16, #tpu.memory_space<vmem>>, vector<1x32x128xbf16>,
    %c0_i32 = arith.constant 0 : i32
    %18 = arith.cmpi eq, %arg1, %c0_i32 : i32
    %19 = arith.extui %18 : i1 to i32
    %c0_i32_20 = arith.constant 0 : i32
    %20 = arith.cmpi ne, %19, %c0_i32_20 : i32
    scf.if %20 {
      %cst_36 = arith.constant 0.000000e+00 : f32
      %35 = vector.broadcast %cst_36 : f32 to vector<1x1x128xf32>
      %c0_37 = arith.constant 0 : index
      %c0_38 = arith.constant 0 : index
      %c0_39 = arith.constant 0 : index
      %36 = vector.load %arg11[%c0_37, %c0_38, %c0_39] : memref<1x1x128xf32, #tpu.memory_space<vmem>>, vector<1x1x128xf32>
      tpu.vector_store %arg11[%c0_37, %c0_38, %c0_39], %35 {strides = array<i32>} : memref<1x1x128xf32, #tpu.memory_space<vmem>>, vector<1x1x128xf32>,
      %cst_40 = arith.constant 0.000000e+00 : f32
      %37 = vector.broadcast %cst_40 : f32 to vector<1x1x128xf32>
      %c0_41 = arith.constant 0 : index
      %c0_42 = arith.constant 0 : index
      %c0_43 = arith.constant 0 : index
      %38 = vector.load %arg12[%c0_41, %c0_42, %c0_43] : memref<1x1x128xf32, #tpu.memory_space<vmem>>, vector<1x1x128xf32>
      tpu.vector_store %arg12[%c0_41, %c0_42, %c0_43], %37 {strides = array<i32>} : memref<1x1x128xf32, #tpu.memory_space<vmem>>, vector<1x1x128xf32>,
    } else {
    }
    %c0_21 = arith.constant 0 : index
    %c0_22 = arith.constant 0 : index
    %c0_23 = arith.constant 0 : index
    %21 = vector.load %arg11[%c0_21, %c0_22, %c0_23] : memref<1x1x128xf32, #tpu.memory_space<vmem>>, vector<1x1x128xf32>
    %cst = arith.constant dense<0.000000e+00> : vector<1x128xf32>
    %22 = vector.multi_reduction <add>, %15, %cst [1] : vector<1x32x128xf32> to vector<1x128xf32>
    %23 = vector.shape_cast %22 : vector<1x128xf32> to vector<1x1x128xf32>
    %24 = arith.addf %21, %23 : vector<1x1x128xf32>
    %c0_24 = arith.constant 0 : index
    %c0_25 = arith.constant 0 : index
    %c0_26 = arith.constant 0 : index
    %25 = vector.load %arg11[%c0_24, %c0_25, %c0_26] : memref<1x1x128xf32, #tpu.memory_space<vmem>>, vector<1x1x128xf32>
    tpu.vector_store %arg11[%c0_24, %c0_25, %c0_26], %24 {strides = array<i32>} : memref<1x1x128xf32, #tpu.memory_space<vmem>>, vector<1x1x128xf32>,
    %c0_27 = arith.constant 0 : index
    %c0_28 = arith.constant 0 : index
    %c0_29 = arith.constant 0 : index
    %26 = vector.load %arg12[%c0_27, %c0_28, %c0_29] : memref<1x1x128xf32, #tpu.memory_space<vmem>>, vector<1x1x128xf32>
    %27 = arith.mulf %15, %15 : vector<1x32x128xf32>
    %cst_30 = arith.constant dense<0.000000e+00> : vector<1x128xf32>
    %28 = vector.multi_reduction <add>, %27, %cst_30 [1] : vector<1x32x128xf32> to vector<1x128xf32>
    %29 = vector.shape_cast %28 : vector<1x128xf32> to vector<1x1x128xf32>
    %30 = arith.addf %26, %29 : vector<1x1x128xf32>
    %c0_31 = arith.constant 0 : index
    %c0_32 = arith.constant 0 : index
    %c0_33 = arith.constant 0 : index
    %31 = vector.load %arg12[%c0_31, %c0_32, %c0_33] : memref<1x1x128xf32, #tpu.memory_space<vmem>>, vector<1x1x128xf32>
    tpu.vector_store %arg12[%c0_31, %c0_32, %c0_33], %30 {strides = array<i32>} : memref<1x1x128xf32, #tpu.memory_space<vmem>>, vector<1x1x128xf32>,
    %c0_i32_34 = arith.constant 0 : i32
    %32 = arith.cmpi eq, %arg1, %c0_i32_34 : i32
    %33 = arith.extui %32 : i1 to i32
    %c0_i32_35 = arith.constant 0 : i32
    %34 = arith.cmpi ne, %33, %c0_i32_35 : i32
    scf.if %34 {
      %c0_36 = arith.constant 0 : index
      %c0_37 = arith.constant 0 : index
      %c0_38 = arith.constant 0 : index
      %35 = vector.load %arg11[%c0_36, %c0_37, %c0_38] : memref<1x1x128xf32, #tpu.memory_space<vmem>>, vector<1x1x128xf32>
      %c0_39 = arith.constant 0 : index
      %c0_40 = arith.constant 0 : index
      %c0_41 = arith.constant 0 : index
      %36 = vector.load %arg9[%c0_39, %c0_40, %c0_41] : memref<1x1x128xf32, #tpu.memory_space<vmem>>, vector<1x1x128xf32>
      tpu.vector_store %arg9[%c0_39, %c0_40, %c0_41], %35 {strides = array<i32>} : memref<1x1x128xf32, #tpu.memory_space<vmem>>, vector<1x1x128xf32>,
      %c0_42 = arith.constant 0 : index
      %c0_43 = arith.constant 0 : index
      %c0_44 = arith.constant 0 : index
      %37 = vector.load %arg12[%c0_42, %c0_43, %c0_44] : memref<1x1x128xf32, #tpu.memory_space<vmem>>, vector<1x1x128xf32>
      %c0_45 = arith.constant 0 : index
      %c0_46 = arith.constant 0 : index
      %c0_47 = arith.constant 0 : index
      %38 = vector.load %arg10[%c0_45, %c0_46, %c0_47] : memref<1x1x128xf32, #tpu.memory_space<vmem>>, vector<1x1x128xf32>
      tpu.vector_store %arg10[%c0_45, %c0_46, %c0_47], %37 {strides = array<i32>} : memref<1x1x128xf32, #tpu.memory_space<vmem>>, vector<1x1x128xf32>,
    } else {
    }
    return
  }
  func.func @transform_0(%arg0: i32, %arg1: i32) -> (i32, i32, i32) {
    %c0_i32 = arith.constant 0 : i32
    %c0_i32_0 = arith.constant 0 : i32
    return %arg0, %arg1, %c0_i32 : i32, i32, i32
  }
  func.func @transform_1(%arg0: i32, %arg1: i32) -> (i32, i32, i32) {
    %c0_i32 = arith.constant 0 : i32
    %c0_i32_0 = arith.constant 0 : i32
    %c0_i32_1 = arith.constant 0 : i32
    return %arg0, %c0_i32, %c0_i32_0 : i32, i32, i32
  }
  func.func @transform_2(%arg0: i32, %arg1: i32) -> (i32, i32, i32) {
    %c0_i32 = arith.constant 0 : i32
    %c0_i32_0 = arith.constant 0 : i32
    %c0_i32_1 = arith.constant 0 : i32
    return %arg0, %c0_i32, %c0_i32_0 : i32, i32, i32
  }
  func.func @transform_3(%arg0: i32, %arg1: i32) -> (i32, i32, i32) {
    %c0_i32 = arith.constant 0 : i32
    %c0_i32_0 = arith.constant 0 : i32
    %c0_i32_1 = arith.constant 0 : i32
    %c0_i32_2 = arith.constant 0 : i32
    return %c0_i32, %c0_i32_0, %c0_i32_1 : i32, i32, i32
  }
  func.func @transform_4(%arg0: i32, %arg1: i32) -> (i32, i32, i32) {
    %c0_i32 = arith.constant 0 : i32
    %c0_i32_0 = arith.constant 0 : i32
    %c0_i32_1 = arith.constant 0 : i32
    %c0_i32_2 = arith.constant 0 : i32
    return %c0_i32, %c0_i32_0, %c0_i32_1 : i32, i32, i32
  }
  func.func @transform_5(%arg0: i32, %arg1: i32) -> (i32, i32, i32) {
    %c0_i32 = arith.constant 0 : i32
    %c0_i32_0 = arith.constant 0 : i32
    return %arg0, %arg1, %c0_i32 : i32, i32, i32
  }
  func.func @transform_6(%arg0: i32, %arg1: i32) -> (i32, i32, i32) {
    %c0_i32 = arith.constant 0 : i32
    %c0_i32_0 = arith.constant 0 : i32
    return %arg0, %arg1, %c0_i32 : i32, i32, i32
  }
  func.func @transform_7(%arg0: i32, %arg1: i32) -> (i32, i32, i32) {
    %c0_i32 = arith.constant 0 : i32
    %c0_i32_0 = arith.constant 0 : i32
    %c0_i32_1 = arith.constant 0 : i32
    return %arg0, %c0_i32, %c0_i32_0 : i32, i32, i32
  }
  func.func @transform_8(%arg0: i32, %arg1: i32) -> (i32, i32, i32) {
    %c0_i32 = arith.constant 0 : i32
    %c0_i32_0 = arith.constant 0 : i32
    %c0_i32_1 = arith.constant 0 : i32
    return %arg0, %c0_i32, %c0_i32_0 : i32, i32, i32
  }
}

module attributes {stable_mosaic.version = 11 : i64} {
  func.func @_in_norm_kernel(%arg0: i32, %arg1: i32, %arg2: memref<1x32x128xbf16, #tpu.memory_space<vmem>>, %arg3: memref<1x1x128xf32, #tpu.memory_space<vmem>>, %arg4: memref<1x1x128xf32, #tpu.memory_space<vmem>>, %arg5: memref<1x1x128xf32, #tpu.memory_space<vmem>>, %arg6: memref<1x1x128xf32, #tpu.memory_space<vmem>>, %arg7: memref<1x32x128xf32, #tpu.memory_space<vmem>>) attributes {dimension_semantics = [#tpu.dimension_semantics<parallel>, #tpu.dimension_semantics<parallel>], iteration_bounds = array<i64: 2, 1>, scalar_prefetch = 0 : i64, scratch_operands = 0 : i64, tpu.core_type = #tpu.core_type<tc>, window_params = [{transform_indices = @transform_0, window_bounds = array<i64: 1, 32, 128>}, {transform_indices = @transform_1, window_bounds = array<i64: 1, 1, 128>}, {transform_indices = @transform_2, window_bounds = array<i64: 1, 1, 128>}, {pipeline_mode = #tpu.pipeline_mode<synchronous>, transform_indices = @transform_3, window_bounds = array<i64: 1, 1, 128>}, {pipeline_mode = #tpu.pipeline_mode<synchronous>, transform_indices = @transform_4, window_bounds = array<i64: 1, 1, 128>}, {transform_indices = @transform_5, window_bounds = array<i64: 1, 32, 128>}]} {
    %c0 = arith.constant 0 : index
    %c0_0 = arith.constant 0 : index
    %c0_1 = arith.constant 0 : index
    %0 = vector.load %arg2[%c0, %c0_0, %c0_1] : memref<1x32x128xbf16, #tpu.memory_space<vmem>>, vector<1x32x128xbf16>
    %1 = arith.extf %0 : vector<1x32x128xbf16> to vector<1x32x128xf32>
    %c0_2 = arith.constant 0 : index
    %c0_3 = arith.constant 0 : index
    %c0_4 = arith.constant 0 : index
    %2 = vector.load %arg3[%c0_2, %c0_3, %c0_4] : memref<1x1x128xf32, #tpu.memory_space<vmem>>, vector<1x1x128xf32>
    %3 = vector.broadcast %2 : vector<1x1x128xf32> to vector<1x32x128xf32>
    %4 = arith.subf %1, %3 : vector<1x32x128xf32>
    %c0_5 = arith.constant 0 : index
    %c0_6 = arith.constant 0 : index
    %c0_7 = arith.constant 0 : index
    %5 = vector.load %arg4[%c0_5, %c0_6, %c0_7] : memref<1x1x128xf32, #tpu.memory_space<vmem>>, vector<1x1x128xf32>
    %c0_8 = arith.constant 0 : index
    %c0_9 = arith.constant 0 : index
    %c0_10 = arith.constant 0 : index
    %6 = vector.load %arg5[%c0_8, %c0_9, %c0_10] : memref<1x1x128xf32, #tpu.memory_space<vmem>>, vector<1x1x128xf32>
    %7 = arith.mulf %5, %6 : vector<1x1x128xf32>
    %8 = vector.broadcast %7 : vector<1x1x128xf32> to vector<1x32x128xf32>
    %9 = arith.mulf %4, %8 : vector<1x32x128xf32>
    %c0_11 = arith.constant 0 : index
    %c0_12 = arith.constant 0 : index
    %c0_13 = arith.constant 0 : index
    %10 = vector.load %arg6[%c0_11, %c0_12, %c0_13] : memref<1x1x128xf32, #tpu.memory_space<vmem>>, vector<1x1x128xf32>
    %11 = vector.broadcast %10 : vector<1x1x128xf32> to vector<1x32x128xf32>
    %12 = arith.addf %9, %11 : vector<1x32x128xf32>
    %c0_14 = arith.constant 0 : index
    %c0_15 = arith.constant 0 : index
    %c0_16 = arith.constant 0 : index
    %13 = vector.load %arg7[%c0_14, %c0_15, %c0_16] : memref<1x32x128xf32, #tpu.memory_space<vmem>>, vector<1x32x128xf32>
    tpu.vector_store %arg7[%c0_14, %c0_15, %c0_16], %12 {strides = array<i32>} : memref<1x32x128xf32, #tpu.memory_space<vmem>>, vector<1x32x128xf32>,
    return
  }
  func.func @transform_0(%arg0: i32, %arg1: i32) -> (i32, i32, i32) {
    %c0_i32 = arith.constant 0 : i32
    %c0_i32_0 = arith.constant 0 : i32
    return %arg0, %arg1, %c0_i32 : i32, i32, i32
  }
  func.func @transform_1(%arg0: i32, %arg1: i32) -> (i32, i32, i32) {
    %c0_i32 = arith.constant 0 : i32
    %c0_i32_0 = arith.constant 0 : i32
    %c0_i32_1 = arith.constant 0 : i32
    return %arg0, %c0_i32, %c0_i32_0 : i32, i32, i32
  }
  func.func @transform_2(%arg0: i32, %arg1: i32) -> (i32, i32, i32) {
    %c0_i32 = arith.constant 0 : i32
    %c0_i32_0 = arith.constant 0 : i32
    %c0_i32_1 = arith.constant 0 : i32
    return %arg0, %c0_i32, %c0_i32_0 : i32, i32, i32
  }
  func.func @transform_3(%arg0: i32, %arg1: i32) -> (i32, i32, i32) {
    %c0_i32 = arith.constant 0 : i32
    %c0_i32_0 = arith.constant 0 : i32
    %c0_i32_1 = arith.constant 0 : i32
    %c0_i32_2 = arith.constant 0 : i32
    return %c0_i32, %c0_i32_0, %c0_i32_1 : i32, i32, i32
  }
  func.func @transform_4(%arg0: i32, %arg1: i32) -> (i32, i32, i32) {
    %c0_i32 = arith.constant 0 : i32
    %c0_i32_0 = arith.constant 0 : i32
    %c0_i32_1 = arith.constant 0 : i32
    %c0_i32_2 = arith.constant 0 : i32
    return %c0_i32, %c0_i32_0, %c0_i32_1 : i32, i32, i32
  }
  func.func @transform_5(%arg0: i32, %arg1: i32) -> (i32, i32, i32) {
    %c0_i32 = arith.constant 0 : i32
    %c0_i32_0 = arith.constant 0 : i32
    return %arg0, %arg1, %c0_i32 : i32, i32, i32
  }
}

</mosaic_0001>

<bundles_post_ra>
// kernel: content_encoder_forward.21
= control target key start
LH: loop header
LB: loop body
LE: loop exit
PB: predicated region body
PF: predicated region fallthrough
CT: control target
= control target key end

     0   :  { %s5041_s15 = smov 0   ;;  %s5043_s16 = smov 0   ;;  %s6173_s0 = inlined_call_operand.vmem [shape: bf16[2,32,18,64], index: 0, kind: input, shape index: {}, may-alias: {0,1}]   ;;  %s6174_s1 = inlined_call_operand.vmem [shape: bf16[2,32,18,64], index: 1, kind: input, shape index: {}, may-alias: {0,1}]   ;;  %s6175_s2 = inlined_call_operand.vmem [shape: bf16[9,64,128], index: 2, kind: input, shape index: {}]   ;;  %s6176_s3 = inlined_call_operand.vmem [shape: f32[1,128], index: 3, kind: input, shape index: {}]   ;;  %s6177_s4 = inlined_call_operand.vmem [shape: bf16[2,16,16,128], index: 4, kind: output, shape index: {}]  }
   0x1   :  { %s5045_s17 = smov 0  }
   0x2 LB: > { %s26_s18 = sadd.s32 1, %s5010_s16  ;;  %p3614_p0 = scmp.ge.s32.totalorder %s5014_s17, 1  ;;  %s5014_s17 = sphi %s5045_s17, %s14_s17   ;;  %s5010_s16 = sphi %s5043_s16, %s6253_s16   ;;  %s5006_s15 = sphi %s5041_s15, %s6252_s15  }
   0x3   : > { %p28_p1 = scmp.ge.s32.totalorder %s26_s18, 2  ;;  %p210_p2 = scmp.lt.s32.totalorder %s5014_s17, 3 }
   0x5   : > { %s6255_s18 = smov (%p28_p1, %s26_s18), 0  ;;  %p211_p3 = pnand %p3614_p0, %p210_p2 }
   0x7   : > { %214 = sbr.rel (%p211_p3) target bundleno = 556 (0x22c), region = 36 }
   0xe   : > { %v4931_v0 = vld [vmem:[%s6175_s2 + $0x20] sm:$0xff]   ;;  %p259_p4 = scmp.lt.s32.totalorder %s5006_s15, 1  ;;  %v4933_v2 = vld [vmem:[%s6175_s2 + $0x28] sm:$0xff]   ;;  %v4935_v4 = vld [vmem:[%s6175_s2 + $0x30] sm:$0xff]   ;;  %vm358_vm0 = vsmask.f32 3328 }
   0xf   : > { %v4932_v1 = vld [vmem:[%s6175_s2 + $0x80] sm:$0xff]   ;;  %4280 = vmatprep.subr.bf16.mxu1 %v4931_v0  ;;  %v4934_v3 = vld [vmem:[%s6175_s2 + $0x88] sm:$0xff]   ;;  %v4936_v5 = vld [vmem:[%s6175_s2 + $0x90] sm:$0xff]   ;;  %vm359_vm1 = vsmask.f32 7440  ;;  %vm826_vm2 = vcmask 523264  }
  0x10   : > { %s6257_s15 = smov (!%p259_p4, %s5006_s15), 1  ;;  %4440 = vmatprep.subr.bf16.mxu0 %v4932_v1  ;;  %4281 = vmatpush3.bf16.msra.mxu1 %v4931_v0  ;;  %v4937_v6 = vld [vmem:[%s6175_s2 + $0x38] sm:$0xff]   ;;  %v5107_v18 = vld [vmem:[%s6175_s2] sm:$0xff]   ;;  %vm5127_vm3 = vmor %vm358_vm0, %vm359_vm1  ;;  %vm1365_vm4 = vcmask 1042432   ;;  %vm1366_vm5 = vcmask 1046532  }
  0x11   : > { %4441 = vmatpush3.bf16.msra.mxu0 %v4932_v1  ;;  %4282 = vmatprep.subr.bf16.mxu1 %v4933_v2  ;;  %s4904_s29 = smul.u32 384, %s6257_s15  ;;  %v4938_v7 = vld [vmem:[%s6175_s2 + $0x98] sm:$0xff]   ;;  %v5115_v23 = vld [vmem:[%s6175_s2 + $0xa0] sm:$0xff]   ;;  %vm5334_vm6 = vmor %vm1365_vm4, %vm1366_vm5 }
  0x12   : > { %4442 = vmatprep.subr.bf16.mxu0 %v4934_v3 }
  0x13   : > { %s5088_s10 = scalar_lea.vmem %s6173_s0, %s4904_s29  ;;  %s3971_s27 = sadd.s32 192, %s4904_s29 }
  0x14   : > { %4283 = vmatpush3.bf16.msra.mxu1 %v4933_v2  ;;  %v5094_v8 = vld [vmem:[%s5088_s10] sm:$0xf]  ;;  %v5097_v9 = vld [vmem:[%s5088_s10 + $0x4] sm:$0xf]  ;;  %v298_v10 = vld [vmem:[%s5088_s10 + $0x8] sm:$0x1]  ;;  %s5711_s6 = scalar_lea.vmem %s6174_s1, %s3971_s27 }
  0x15   : > { %4443 = vmatpush3.bf16.msra.mxu0 %v4934_v3  ;;  %4284 = vmatprep.subr.bf16.mxu1 %v4935_v4  ;;  %v362_v11 = vshrl.u32 %v5094_v8, 16  ;;  %v365_v12 = vshll.u32 %v5094_v8, 16  ;;  %v371_v13 = vshll.u32 %v5097_v9, 16  ;;  %v375_v14 = vshrl.u32 %v5097_v9, 16  ;;  %v5110_v22 = vld [vmem:[%s5088_s10 + $0xc] sm:$0xf] }
  0x16   : > { %4444 = vmatprep.subr.bf16.mxu0 %v4936_v5  ;;  %v381_v15 = vshll.u32 %v298_v10, 16  ;;  %v5118_v25 = vld [vmem:[%s5088_s10 + $0x10] sm:$0xf]  ;;  %v5121_v26 = vld [vmem:[%s5088_s10 + $0x14] sm:$0x1]  ;;  %v386_v27 = vshrl.u32 %v5110_v22, 16 }
  0x17   : > { %v364_v16 = vrot.slane %v362_v11, 4  ;;  %v367_v17 = vrot.slane %v365_v12, 5  ;;  %v373_v19 = vrot.slane %v371_v13, 5  ;;  %v377_v20 = vrot.slane %v375_v14, 4  ;;  %v5140_v42 = vld [vmem:[%s5088_s10 + $0x18] sm:$0xf] }
  0x18   : > { %4285 = vmatpush3.bf16.msra.mxu1 %v4935_v4  ;;  %v383_v21 = vrot.slane %v381_v15, 5  ;;  %v389_v28 = vshll.u32 %v5110_v22, 16  ;;  %v395_v31 = vshll.u32 %v5118_v25, 16  ;;  %v399_v32 = vshrl.u32 %v5118_v25, 16  ;;  %v5147_v46 = vld [vmem:[%s5088_s10 + $0x1c] sm:$0xf] }
  0x19   : > { %4445 = vmatpush3.bf16.msra.mxu0 %v4936_v5  ;;  %4286 = vmatprep.subr.bf16.mxu1 %v4937_v6  ;;  %v368_v24 = vor.u32 %v367_v17, %v364_v16  ;;  %v378_v30 = vor.u32 %v377_v20, %v373_v19  ;;  %v405_v33 = vshll.u32 %v5121_v26, 16  ;;  %v388_v35 = vrot.slane %v386_v27, 4  ;;  %v5150_v47 = vld [vmem:[%s5088_s10 + $0x20] sm:$0x1]  ;;  %v5158_v53 = vld [vmem:[%s5088_s10 + $0x24] sm:$0xf] }
  0x1a   : > { %4446 = vmatprep.subr.bf16.mxu0 %v4938_v7  ;;  %v391_v36 = vrot.slane %v389_v28, 5  ;;  %v5136_v37 = vcombine.low %v5110_v22, %v5118_v25  ;;  %v397_v39 = vrot.slane %v395_v31, 5  ;;  %v401_v40 = vrot.slane %v399_v32, 4  ;;  %v5161_v54 = vld [vmem:[%s5088_s10 + $0x28] sm:$0xf] }
  0x1b   : > { %v369_v34 = vrot.slane %v368_v24, 4  ;;  %v379_v38 = vrot.slane %v378_v30, 4  ;;  %v407_v41 = vrot.slane %v405_v33, 5  ;;  %v1380_v45 = vrot.slane %v5121_v26, 5  ;;  %v5165_v59 = vld [vmem:[%s5088_s10 + $0x2c] sm:$0x1] }
  0x1c   : > { %4287 = vmatpush3.bf16.msra.mxu1 %v4937_v6  ;;  %v392_v44 = vor.u32 %v391_v36, %v388_v35  ;;  %v410_v48 = vshrl.u32 %v5140_v42, 16  ;;  %v402_v50 = vor.u32 %v401_v40, %v397_v39  ;;  %v413_v51 = vshll.u32 %v5140_v42, 16  ;;  %v5177_v10 = vld [vmem:[%s5088_s10 + $0x30] sm:$0xf]  ;;  %v4943_v11 = vld [vmem:[%s6175_s2 + $0x8] sm:$0xff]  }
  0x1d   : > { %4447 = vmatpush3.bf16.msra.mxu0 %v4938_v7  ;;  %4320 = vmatprep.subr.bf16.mxu1 %v5107_v18  ;;  %v374_v43 = vsel %vm5127_vm3, %v369_v34, %v373_v19  ;;  %v384_v49 = vsel %vm5127_vm3, %v379_v38, %v383_v21  ;;  %v419_v52 = vshll.u32 %v5147_v46, 16  ;;  %v423_v58 = vshrl.u32 %v5147_v46, 16  ;;  %v5185_v16 = vld [vmem:[%s5088_s10 + $0x34] sm:$0xf]  ;;  %v5192_v30 = vld [vmem:[%s5088_s10 + $0x38] sm:$0x1] }
  0x1e   : > { %4480 = vmatprep.subr.bf16.mxu0 %v5115_v23  ;;  %v3627_v55 = vcombine.low %v374_v43, %v384_v49  ;;  %v393_v56 = vrot.slane %v392_v44, 4  ;;  %v412_v57 = vrot.slane %v410_v48, 4  ;;  %v403_v60 = vrot.slane %v402_v50, 4  ;;  %v5200_v36 = vld [vmem:[%s5088_s10 + $0x3c] sm:$0xf]  ;;  %v4942_v40 = vld [vmem:[%s6175_s2 + $0xa8] sm:$0xff]  }
  0x1f   : > { %v415_v61 = vrot.slane %v413_v51, 5  ;;  %v421_v62 = vrot.slane %v419_v52, 5  ;;  %v429_v63 = vshll.u32 %v5150_v47, 16  ;;  %v425_v1 = vrot.slane %v423_v58, 4  ;;  %v4946_v43 = vld [vmem:[%s6175_s2 + $0x10] sm:$0xff]  }
  0x20   : > { %4288 = vmatprep.mubr.msk.bf16.mxu1 %vm826_vm2, %v3627_v55  ;;  %v398_v0 = vsel %vm5127_vm3, %v393_v56, %v397_v39  ;;  %v1384_v2 = vrot.slane %v5147_v46, 5  ;;  %v1387_v3 = vrot.slane %v5150_v47, 5  ;;  %v408_v4 = vsel %vm5127_vm3, %v403_v60, %v407_v41  ;;  %v5215_v51 = vld [vmem:[%s5088_s10 + $0x40] sm:$0xf] }
  0x21   : > { %v416_v5 = vor.u32 %v415_v61, %v412_v57  ;;  %v431_v6 = vrot.slane %v429_v63, 5  ;;  %v434_v7 = vshrl.u32 %v5158_v53, 16  ;;  %v3628_v12 = vcombine.low %v398_v0, %v408_v4 }
  0x22   : > { %v426_v13 = vor.u32 %v425_v1, %v421_v62  ;;  %v437_v14 = vshll.u32 %v5158_v53, 16  ;;  %v443_v15 = vshll.u32 %v5161_v54, 16  ;;  %v447_v20 = vshrl.u32 %v5161_v54, 16 }
  0x23   : > { %v417_v17 = vrot.slane %v416_v5, 4  ;;  %v436_v19 = vrot.slane %v434_v7, 4  ;;  %v453_v21 = vshll.u32 %v5165_v59, 16  ;;  %4448 = vmatprep.mubr.msk.bf16.mxu0 %vm826_vm2, %v3628_v12  ;;  %4289 = vmatmul.mubr.msk.bf16.vlgmr.msra.gmra.mrb[0].mxu1 %vm826_vm2, %v3628_v12  ;;  %v458_v31 = vshrl.u32 %v5177_v10, 16 }
  0x24   : > { %v427_v24 = vrot.slane %v426_v13, 4  ;;  %v439_v27 = vrot.slane %v437_v14, 5  ;;  %v445_v28 = vrot.slane %v443_v15, 5  ;;  %4321 = vmatpush3.bf16.msra.mxu1 %v5107_v18  ;;  %v449_v33 = vrot.slane %v447_v20, 4  ;;  %v5240_v15 = vld [vmem:[%s5088_s10 + $0x4c] sm:$0xf] }
  0x25   : > { %v422_v32 = vsel %vm5127_vm3, %v417_v17, %v421_v62  ;;  %v455_v34 = vrot.slane %v453_v21, 5  ;;  %v461_v35 = vshll.u32 %v5177_v10, 16  ;;  %v460_v41 = vrot.slane %v458_v31, 4  ;;  %4322 = vmatprep.subr.bf16.mxu1 %v4943_v11  ;;  %v5224_v62 = vld [vmem:[%s5088_s10 + $0x44] sm:$0x1]  ;;  %v4948_v21 = vld [vmem:[%s6175_s2 + $0x18] sm:$0xff]  }
  0x26   : > { %v432_v38 = vsel %vm5127_vm3, %v427_v24, %v431_v6  ;;  %v440_v39 = vor.u32 %v439_v27, %v436_v19  ;;  %v467_v18 = vshll.u32 %v5185_v16, 16  ;;  %v450_v48 = vor.u32 %v449_v33, %v445_v28  ;;  %v5232_v6 = vld [vmem:[%s5088_s10 + $0x48] sm:$0xf]  ;;  %v5252_v31 = vld [vmem:[%s5088_s10 + $0x50] sm:$0x1] }
  0x27   : > { %v5211_v44 = vcombine.low %v422_v32, %v432_v38  ;;  %v463_v49 = vrot.slane %v461_v35, 5  ;;  %v471_v50 = vshrl.u32 %v5185_v16, 16  ;;  %v477_v56 = vshll.u32 %v5192_v30, 16 }
  0x28   : > { %v441_v52 = vrot.slane %v440_v39, 4  ;;  %v469_v55 = vrot.slane %v467_v18, 5  ;;  %v482_v57 = vshrl.u32 %v5200_v36, 16  ;;  %v451_v58 = vrot.slane %v450_v48, 4  ;;  %4323 = vmatpush3.bf16.msra.mxu1 %v4943_v11  ;;  %v5262_v39 = vld [vmem:[%s5088_s10 + $0x54] sm:$0xf] }
  0x29   : > { %6210 = vst [vmem:[#allocation2_spill] sm:$0xff] %v5211_v44  ;;  %4449 = vmatmul.mubr.msk.bf16.vlgmr.msra.gmra.mrb[0].mxu0 %vm826_vm2, %v5211_v44  ;;  %4292 = vmatprep.mubr.msk.bf16.mxu1 %vm826_vm2, %v5211_v44  ;;  %v464_v60 = vor.u32 %v463_v49, %v460_v41  ;;  %v473_v61 = vrot.slane %v471_v50, 4  ;;  %v485_v63 = vshll.u32 %v5200_v36, 16  ;;  %v479_v1 = vrot.slane %v477_v56, 5  ;;  %6212 = vst [vmem:[#allocation4_spill] sm:$0xff] %v5262_v39  ;;  %v4945_v41 = vld [vmem:[%s6175_s2 + $0xb8] sm:$0xff]  }
  0x2a   : > { %4481 = vmatpush3.bf16.msra.mxu0 %v5115_v23  ;;  %v446_v0 = vsel %vm5127_vm3, %v441_v52, %v445_v28  ;;  %v484_v4 = vrot.slane %v482_v57, 4  ;;  %v491_v5 = vshll.u32 %v5215_v51, 16  ;;  %v456_v7 = vsel %vm5127_vm3, %v451_v58, %v455_v34  ;;  %v4944_v23 = vld [vmem:[%s6175_s2 + $0xb0] sm:$0xff]   ;;  %4324 = vmatprep.subr.bf16.mxu1 %v4946_v43  ;;  %v5271_v52 = vld [vmem:[%s5088_s10 + $0x58] sm:$0xf] }
  0x2b   : > { %4482 = vmatprep.subr.bf16.mxu0 %v4942_v40  ;;  %v465_v12 = vrot.slane %v464_v60, 4  ;;  %v474_v13 = vor.u32 %v473_v61, %v469_v55  ;;  %v487_v14 = vrot.slane %v485_v63, 5  ;;  %v5242_v17 = vcombine.low %v446_v0, %v456_v7  ;;  %v5281_v61 = vld [vmem:[%s5088_s10 + $0x5c] sm:$0x1] }
  0x2c   : > { %v493_v11 = vrot.slane %v491_v5, 5  ;;  %v495_v19 = vshrl.u32 %v5215_v51, 16  ;;  %v501_v20 = vshll.u32 %v5224_v62, 16  ;;  %v506_v32 = vshrl.u32 %v5232_v6, 16  ;;  %4325 = vmatpush3.bf16.msra.mxu1 %v4946_v43 }
  0x2d   : > { %6211 = vst [vmem:[#allocation3_spill] sm:$0xff] %v5242_v17  ;;  %v470_v24 = vsel %vm5127_vm3, %v465_v12, %v469_v55  ;;  %v475_v27 = vrot.slane %v474_v13, 4  ;;  %v488_v28 = vor.u32 %v487_v14, %v484_v4  ;;  %4452 = vmatprep.mubr.msk.bf16.mxu0 %vm826_vm2, %v5242_v17  ;;  %4293 = vmatmul.mubr.msk.bf16.gmra.mrb[4].mxu1 %vm826_vm2, %v5242_v17  ;;  %v509_v35 = vshll.u32 %v5232_v6, 16  ;;  %v5276_v55 = vld [vmem:[%s6175_s2 + $0x40] sm:$0xff]  }
  0x2e   : > { %v497_v33 = vrot.slane %v495_v19, 4  ;;  %v503_v34 = vrot.slane %v501_v20, 5  ;;  %v515_v38 = vshll.u32 %v5240_v15, 16  ;;  %4483 = vmatpush3.bf16.msra.mxu0 %v4942_v40  ;;  %v508_v49 = vrot.slane %v506_v32, 4  ;;  %4326 = vmatprep.subr.bf16.mxu1 %v4948_v21  ;;  %v5295_v19 = vld [vmem:[%s5088_s10 + $0x60] sm:$0xf] }
  0x2f   : > { %v480_v18 = vsel %vm5127_vm3, %v475_v27, %v479_v1  ;;  %v489_v48 = vrot.slane %v488_v28, 4  ;;  %v519_v50 = vshrl.u32 %v5240_v15, 16  ;;  %4484 = vmatprep.subr.bf16.mxu0 %v4944_v23  ;;  %v511_v58 = vrot.slane %v509_v35, 5  ;;  %v5300_v32 = vld [vmem:[%s5088_s10 + $0x64] sm:$0xf] }
  0x30   : > { %v5278_v56 = vcombine.low %v470_v24, %v480_v18  ;;  %v498_v57 = vor.u32 %v497_v33, %v493_v11  ;;  %v517_v60 = vrot.slane %v515_v38, 5  ;;  %v525_v43 = vshll.u32 %v5252_v31, 16  ;;  %4327 = vmatpush3.bf16.msra.mxu1 %v4948_v21  ;;  %v5309_v21 = vld [vmem:[%s6175_s2 + $0xc0] sm:$0xff]  }
  0x31   : > { %v494_v40 = vsel %vm5127_vm3, %v489_v48, %v493_v11  ;;  %v521_v63 = vrot.slane %v519_v50, 4  ;;  %v530_v0 = vshrl.u32 %v5262_v39, 16  ;;  %v512_v4 = vor.u32 %v511_v58, %v508_v49  ;;  %4360 = vmatprep.subr.bf16.mxu1 %v5276_v55  ;;  %v5314_v48 = vld [vmem:[%s5088_s10 + $0x68] sm:$0x1] }
  0x32   : > { %6213 = vst [vmem:[#allocation5_spill] sm:$0xff] %v5278_v56  ;;  %4453 = vmatmul.mubr.msk.bf16.gmra.mrb[4].mxu0 %vm826_vm2, %v5278_v56  ;;  %4296 = vmatprep.mubr.msk.bf16.mxu1 %vm826_vm2, %v5278_v56  ;;  %v499_v1 = vrot.slane %v498_v57, 4  ;;  %v533_v5 = vshll.u32 %v5262_v39, 16  ;;  %v539_v7 = vshll.u32 %v5271_v52, 16  ;;  %v527_v13 = vrot.slane %v525_v43, 5 }
  0x33   : > { %v522_v12 = vor.u32 %v521_v63, %v517_v60  ;;  %4485 = vmatpush3.bf16.msra.mxu0 %v4944_v23  ;;  %v532_v14 = vrot.slane %v530_v0, 4  ;;  %v543_v11 = vshrl.u32 %v5271_v52, 16  ;;  %v513_v24 = vrot.slane %v512_v4, 4  ;;  %v5328_v4 = vld [vmem:[%s5088_s10 + $0x6c] sm:$0xf] }
  0x34   : > { %v504_v20 = vsel %vm5127_vm3, %v499_v1, %v503_v34  ;;  %v535_v27 = vrot.slane %v533_v5, 5  ;;  %v541_v28 = vrot.slane %v539_v7, 5  ;;  %4486 = vmatprep.subr.bf16.mxu0 %v4945_v41  ;;  %v549_v38 = vshll.u32 %v5281_v61, 16 }
  0x35   : > { %v5303_v33 = vcombine.low %v494_v40, %v504_v20  ;;  %v523_v23 = vrot.slane %v522_v12, 4  ;;  %v545_v35 = vrot.slane %v543_v11, 4  ;;  %v518_v34 = vsel %vm5127_vm3, %v513_v24, %v517_v60 }
  0x36   : > { %v536_v18 = vor.u32 %v535_v27, %v532_v14  ;;  %v554_v49 = vshrl.u32 %v5295_v19, 16  ;;  %v557_v50 = vshll.u32 %v5295_v19, 16  ;;  %v551_v40 = vrot.slane %v549_v38, 5  ;;  %v5348_v27 = vld [vmem:[%s5088_s10 + $0x70] sm:$0xf] }
  0x37   : > { %6214 = vst [vmem:[#allocation6_spill] sm:$0xff] %v5303_v33  ;;  %4456 = vmatprep.mubr.msk.bf16.mxu0 %vm826_vm2, %v5303_v33  ;;  %4297 = vmatmul.mubr.msk.bf16.gmra.mrb[8].mxu1 %vm826_vm2, %v5303_v33  ;;  %v528_v57 = vsel %vm5127_vm3, %v523_v23, %v527_v13  ;;  %v546_v58 = vor.u32 %v545_v35, %v541_v28  ;;  %v563_v60 = vshll.u32 %v5300_v32, 16  ;;  %v567_v12 = vshrl.u32 %v5300_v32, 16 }
  0x38   : > { %v5325_v63 = vcombine.low %v518_v34, %v528_v57  ;;  %v537_v43 = vrot.slane %v536_v18, 4  ;;  %v556_v0 = vrot.slane %v554_v49, 4  ;;  %v559_v1 = vrot.slane %v557_v50, 5  ;;  %4487 = vmatpush3.bf16.msra.mxu0 %v4945_v41  ;;  %v5353_v34 = vld [vmem:[%s5088_s10 + $0x74] sm:$0x1] }
  0x39   : > { %v547_v5 = vrot.slane %v546_v58, 4  ;;  %v565_v7 = vrot.slane %v563_v60, 5  ;;  %v573_v13 = vshll.u32 %v5314_v48, 16  ;;  %4520 = vmatprep.subr.bf16.mxu0 %v5309_v21  ;;  %v3700_v20 = vrot.slane %v5110_v22, 9 }
  0x3a   : > { %6215 = vst [vmem:[#allocation7_spill] sm:$0xff] %v5325_v63  ;;  %4457 = vmatmul.mubr.msk.bf16.gmra.mrb[8].mxu0 %vm826_vm2, %v5325_v63  ;;  %4300 = vmatprep.mubr.msk.bf16.mxu1 %vm826_vm2, %v5325_v63  ;;  %v542_v41 = vsel %vm5127_vm3, %v537_v43, %v541_v28  ;;  %v560_v11 = vor.u32 %v559_v1, %v556_v0  ;;  %v1377_v24 = vrot.slane %v5118_v25, 5  ;;  %v569_v35 = vrot.slane %v567_v12, 4 }
  0x3b   : > { %v552_v23 = vsel %vm5127_vm3, %v547_v5, %v551_v40  ;;  %v575_v38 = vrot.slane %v573_v13, 5  ;;  %v578_v18 = vshrl.u32 %v5328_v4, 16  ;;  %v581_v58 = vshll.u32 %v5328_v4, 16  ;;  %v5373_v5 = vld [vmem:[%s5088_s10 + $0x78] sm:$0xf] }
  0x3c   : > { %v5356_v49 = vcombine.low %v542_v41, %v552_v23  ;;  %v561_v28 = vrot.slane %v560_v11, 4  ;;  %v1378_v22 = vsel %vm5334_vm6, %v3700_v20, %v1377_v24  ;;  %v1379_v50 = vrot.slane %v1377_v24, 4 }
  0x3d   : > { %v570_v25 = vor.u32 %v569_v35, %v565_v7  ;;  %v580_v57 = vrot.slane %v578_v18, 4  ;;  %v587_v40 = vshll.u32 %v5348_v27, 16  ;;  %v591_v0 = vshrl.u32 %v5348_v27, 16  ;;  %v5385_v35 = vld [vmem:[%s5088_s10 + $0x7c] sm:$0xf] }
  0x3e   : > { %6218 = vst [vmem:[#allocation8_spill] sm:$0xff] %v5356_v49  ;;  %4460 = vmatprep.mubr.msk.bf16.mxu0 %vm826_vm2, %v5356_v49  ;;  %v566_v60 = vsel %vm5127_vm3, %v561_v28, %v565_v7  ;;  %v1381_v43 = vsel %vm5334_vm6, %v1379_v50, %v1380_v45  ;;  %v597_v1 = vshll.u32 %v5353_v34, 16  ;;  %v583_v7 = vrot.slane %v581_v58, 5  ;;  %v5388_v18 = vld [vmem:[%s5088_s10 + $0x80] sm:$0x1] }
  0x3f   : > { %4301 = vmatmul.mubr.msk.bf16.gmra.mrb[12].mxu1 %vm826_vm2, %v5356_v49  ;;  %v571_v12 = vrot.slane %v570_v25, 4  ;;  %v5377_v13 = vcombine.low %v1378_v22, %v1381_v43  ;;  %v589_v41 = vrot.slane %v587_v40, 5  ;;  %v593_v26 = vrot.slane %v591_v0, 4 }
  0x40   : > { %v599_v11 = vrot.slane %v597_v1, 5  ;;  %v3701_v20 = vrot.slane %v5140_v42, 9  ;;  %v1386_v45 = vrot.slane %v1384_v2, 4  ;;  %v584_v23 = vor.u32 %v583_v7, %v580_v57  ;;  %v5405_v1 = vld [vmem:[%s5088_s10 + $0x84] sm:$0xf] }
  0x41   : > { %6219 = vst [vmem:[#allocation9_spill] sm:$0xff] %v5377_v13  ;;  %v576_v24 = vsel %vm5127_vm3, %v571_v12, %v575_v38  ;;  %v602_v28 = vshrl.u32 %v5373_v5, 16  ;;  %v605_v22 = vshll.u32 %v5373_v5, 16  ;;  %v594_v25 = vor.u32 %v593_v26, %v589_v41  ;;  %v5415_v12 = vld [vmem:[%s5088_s10 + $0x88] sm:$0xf] }
  0x42   : > { %v5392_v50 = vcombine.low %v566_v60, %v576_v24  ;;  %v1385_v58 = vsel %vm5334_vm6, %v3701_v20, %v1384_v2  ;;  %v1388_v38 = vsel %vm5334_vm6, %v1386_v45, %v1387_v3  ;;  %v585_v57 = vrot.slane %v584_v23, 4  ;;  %v5418_v7 = vld [vmem:[%s5088_s10 + $0x8c] sm:$0x1] }
  0x43   : > { %v5402_v40 = vcombine.low %v1385_v58, %v1388_v38  ;;  %v604_v43 = vrot.slane %v602_v28, 4  ;;  %v607_v0 = vrot.slane %v605_v22, 5  ;;  %v595_v60 = vrot.slane %v594_v25, 4 }
  0x44   : > { %6220 = vst [vmem:[#allocation10_spill] sm:$0xff] %v5392_v50  ;;  %4461 = vmatmul.mubr.msk.bf16.gmra.mrb[12].mxu0 %vm826_vm2, %v5392_v50  ;;  %4304 = vmatprep.mubr.msk.bf16.mxu1 %vm826_vm2, %v5392_v50  ;;  %v611_v2 = vshll.u32 %v5385_v35, 16  ;;  %v615_v47 = vshrl.u32 %v5385_v35, 16  ;;  %v621_v3 = vshll.u32 %v5388_v18, 16  ;;  %v590_v26 = vsel %vm5127_vm3, %v585_v57, %v589_v41 }
  0x45   : > { %6221 = vst [vmem:[#allocation11_spill] sm:$0xff] %v5402_v40  ;;  %4488 = vmatprep.mubr.msk.bf16.mxu0 %vm826_vm2, %v5377_v13  ;;  %v608_v20 = vor.u32 %v607_v0, %v604_v43  ;;  %v3702_v45 = vrot.slane %v5158_v53, 9  ;;  %v1391_v24 = vrot.slane %v5161_v54, 5  ;;  %v600_v23 = vsel %vm5127_vm3, %v595_v60, %v599_v11 }
  0x46   : > { %v613_v28 = vrot.slane %v611_v2, 5  ;;  %v617_v22 = vrot.slane %v615_v47, 4  ;;  %v623_v25 = vrot.slane %v621_v3, 5  ;;  %v5428_v58 = vcombine.low %v590_v26, %v600_v23 }
  0x47   : > { %v609_v38 = vrot.slane %v608_v20, 4  ;;  %v1392_v50 = vsel %vm5334_vm6, %v3702_v45, %v1391_v24  ;;  %v1393_v49 = vrot.slane %v1391_v24, 4  ;;  %v1394_v57 = vrot.slane %v5165_v59, 5  ;;  %v5445_v45 = vld [vmem:[%s5088_s10 + $0x90] sm:$0xf]  ;;  %v4949_v24 = vld [vmem:[%s6175_s2 + $0xc8] sm:$0xff]  }
  0x48   : > { %6222 = vst [vmem:[#allocation12_spill] sm:$0xff] %v5428_v58  ;;  %v618_v41 = vor.u32 %v617_v22, %v613_v28  ;;  %v626_v43 = vshrl.u32 %v5405_v1, 16  ;;  %v629_v0 = vshll.u32 %v5405_v1, 16  ;;  %4305 = vmatmul.mubr.msk.bf16.gmra.mrb[16].mxu1 %vm826_vm2, %v5428_v58  ;;  %v635_v60 = vshll.u32 %v5415_v12, 16  ;;  %v5453_v58 = vld [vmem:[%s5088_s10 + $0x94] sm:$0xf] }
  0x49   : > { %v614_v11 = vsel %vm5127_vm3, %v609_v38, %v613_v28  ;;  %v639_v2 = vshrl.u32 %v5415_v12, 16  ;;  %v645_v47 = vshll.u32 %v5418_v7, 16  ;;  %v1395_v59 = vsel %vm5334_vm6, %v1393_v49, %v1394_v57 }
  0x4a   : > { %v619_v3 = vrot.slane %v618_v41, 4  ;;  %v628_v26 = vrot.slane %v626_v43, 4  ;;  %v631_v20 = vrot.slane %v629_v0, 5  ;;  %v5450_v23 = vcombine.low %v1392_v50, %v1395_v59  ;;  %v5462_v0 = vld [vmem:[%s5088_s10 + $0x98] sm:$0x1] }
  0x4b   : > { %v637_v28 = vrot.slane %v635_v60, 5  ;;  %v641_v22 = vrot.slane %v639_v2, 4  ;;  %v647_v38 = vrot.slane %v645_v47, 5  ;;  %v3703_v57 = vrot.slane %v5177_v10, 9 }
  0x4c   : > { %6223 = vst [vmem:[#allocation13_spill] sm:$0xff] %v5450_v23  ;;  %4489 = vmatmul.mubr.msk.bf16.vlgmr.msra.gmra.mrb[0].mxu0 %vm826_vm2, %v5402_v40  ;;  %v624_v49 = vsel %vm5127_vm3, %v619_v3, %v623_v25  ;;  %v632_v41 = vor.u32 %v631_v20, %v628_v26  ;;  %v1398_v43 = vrot.slane %v5185_v16, 5  ;;  %v1401_v2 = vrot.slane %v5192_v30, 5  ;;  %v5572_v40 = vld [vmem:[%s5088_s10 + $0xbc] sm:$0x1] }
  0x4d   : > { %4521 = vmatpush3.bf16.msra.mxu0 %v5309_v21  ;;  %v5465_v50 = vcombine.low %v614_v11, %v624_v49  ;;  %4492 = vmatprep.mubr.msk.bf16.mxu0 %vm826_vm2, %v5450_v23  ;;  %v642_v60 = vor.u32 %v641_v22, %v637_v28  ;;  %v650_v25 = vshrl.u32 %v5445_v45, 16  ;;  %v653_v26 = vshll.u32 %v5445_v45, 16  ;;  %v5475_v21 = vld [vmem:[%s5088_s10 + $0x9c] sm:$0xf]  ;;  %v4952_v11 = vld [vmem:[%s6175_s2 + $0xd0] sm:$0xff]  }
  0x4e   : > { %v633_v47 = vrot.slane %v632_v41, 4  ;;  %v1399_v3 = vsel %vm5334_vm6, %v3703_v57, %v1398_v43  ;;  %v1400_v59 = vrot.slane %v1398_v43, 4  ;;  %4522 = vmatprep.subr.bf16.mxu0 %v4949_v24  ;;  %v659_v22 = vshll.u32 %v5453_v58, 16  ;;  %v5485_v41 = vld [vmem:[%s5088_s10 + $0xa0] sm:$0xf] }
  0x4f   : > { %6224 = vst [vmem:[#allocation14_spill] sm:$0xff] %v5465_v50  ;;  %4308 = vmatprep.mubr.msk.bf16.mxu1 %vm826_vm2, %v5465_v50  ;;  %v643_v30 = vrot.slane %v642_v60, 4  ;;  %v652_v20 = vrot.slane %v650_v25, 4  ;;  %v663_v49 = vshrl.u32 %v5453_v58, 16  ;;  %v655_v63 = vrot.slane %v653_v26, 5  ;;  %v4957_v60 = vld [vmem:[%s6175_s2 + $0xd8] sm:$0xff]  }
  0x50   : > { %v638_v57 = vsel %vm5127_vm3, %v633_v47, %v637_v28  ;;  %v1402_v43 = vsel %vm5334_vm6, %v1400_v59, %v1401_v2  ;;  %v669_v33 = vshll.u32 %v5462_v0, 16  ;;  %v661_v56 = vrot.slane %v659_v22, 5  ;;  %v5503_v59 = vld [vmem:[%s5088_s10 + $0xa4] sm:$0x1] }
  0x51   : > { %v648_v25 = vsel %vm5127_vm3, %v643_v30, %v647_v38  ;;  %v5497_v50 = vcombine.low %v1399_v3, %v1402_v43  ;;  %v665_v17 = vrot.slane %v663_v49, 4  ;;  %4523 = vmatpush3.bf16.msra.mxu0 %v4949_v24  ;;  %v656_v28 = vor.u32 %v655_v63, %v652_v20 }
  0x52   : > { %v5499_v44 = vcombine.low %v638_v57, %v648_v25  ;;  %v671_v2 = vrot.slane %v669_v33, 5  ;;  %v3704_v47 = vrot.slane %v5200_v36, 9  ;;  %4524 = vmatprep.subr.bf16.mxu0 %v4952_v11  ;;  %v1405_v23 = vrot.slane %v5215_v51, 5 }
  0x53   : > { %6225 = vst [vmem:[#allocation15_spill] sm:$0xff] %v5497_v50  ;;  %v666_v26 = vor.u32 %v665_v17, %v661_v56  ;;  %v1408_v38 = vrot.slane %v5224_v62, 5  ;;  %v674_v3 = vshrl.u32 %v5475_v21, 16  ;;  %v657_v63 = vrot.slane %v656_v28, 4  ;;  %v5516_v17 = vld [vmem:[%s5088_s10 + $0xa8] sm:$0xf] }
  0x54   : > { %6226 = vst [vmem:[#allocation16_spill] sm:$0xff] %v5499_v44  ;;  %4309 = vmatmul.mubr.msk.bf16.gmra.mrb[20].mxu1 %vm826_vm2, %v5499_v44  ;;  %4493 = vmatmul.mubr.msk.bf16.gmra.mrb[4].mxu0 %vm826_vm2, %v5497_v50  ;;  %v677_v33 = vshll.u32 %v5475_v21, 16  ;;  %v683_v24 = vshll.u32 %v5485_v41, 16  ;;  %v687_v30 = vshrl.u32 %v5485_v41, 16  ;;  %v1406_v62 = vsel %vm5334_vm6, %v3704_v47, %v1405_v23  ;;  %v5525_v44 = vld [vmem:[%s6175_s2 + $0xe0] sm:$0xff]  }
  0x55   : > { %v667_v20 = vrot.slane %v666_v26, 4  ;;  %v1407_v22 = vrot.slane %v1405_v23, 4  ;;  %v676_v49 = vrot.slane %v674_v3, 4  ;;  %4525 = vmatpush3.bf16.msra.mxu0 %v4952_v11  ;;  %v662_v57 = vsel %vm5127_vm3, %v657_v63, %v661_v56  ;;  %6227 = vst [vmem:[#allocation17_spill] sm:$0xff] %v5525_v44  ;;  %v5534_v56 = vld [vmem:[%s5088_s10 + $0xac] sm:$0xf] }
  0x56   : > { %v679_v43 = vrot.slane %v677_v33, 5  ;;  %v685_v25 = vrot.slane %v683_v24, 5  ;;  %v689_v28 = vrot.slane %v687_v30, 4  ;;  %4526 = vmatprep.subr.bf16.mxu0 %v4957_v60  ;;  %v693_v11 = vshll.u32 %v5503_v59, 16  ;;  %v5541_v30 = vld [vmem:[%s5088_s10 + $0xb0] sm:$0x1] }
  0x57   : > { %v672_v26 = vsel %vm5127_vm3, %v667_v20, %v671_v2  ;;  %v1409_v23 = vsel %vm5334_vm6, %v1407_v22, %v1408_v38  ;;  %v3705_v47 = vrot.slane %v5232_v6, 9  ;;  %v1412_v2 = vrot.slane %v5240_v15, 5 }
  0x58   : > { %v5536_v3 = vcombine.low %v662_v57, %v672_v26  ;;  %v5538_v63 = vcombine.low %v1406_v62, %v1409_v23  ;;  %v680_v33 = vor.u32 %v679_v43, %v676_v49  ;;  %v690_v24 = vor.u32 %v689_v28, %v685_v25  ;;  %v5553_v43 = vld [vmem:[%s5088_s10 + $0xb4] sm:$0xf] }
  0x59   : > { %v695_v50 = vrot.slane %v693_v11, 5  ;;  %v1415_v38 = vrot.slane %v5252_v31, 5  ;;  %v698_v20 = vshrl.u32 %v5516_v17, 16  ;;  %4527 = vmatpush3.bf16.msra.mxu0 %v4957_v60  ;;  %v701_v49 = vshll.u32 %v5516_v17, 16 }
  0x5a   : > { %6228 = vst [vmem:[#allocation18_spill] sm:$0xff] %v5536_v3  ;;  %6229 = vst [vmem:[#allocation19_spill] sm:$0xff] %v5538_v63  ;;  %4312 = vmatprep.mubr.msk.bf16.mxu1 %vm826_vm2, %v5536_v3  ;;  %4496 = vmatprep.mubr.msk.bf16.mxu0 %vm826_vm2, %v5538_v63  ;;  %v681_v62 = vrot.slane %v680_v33, 4  ;;  %v691_v22 = vrot.slane %v690_v24, 4  ;;  %v707_v57 = vshll.u32 %v5534_v56, 16  ;;  %v1413_v31 = vsel %vm5334_vm6, %v3705_v47, %v1412_v2 }
  0x5b   : > { %v1414_v60 = vrot.slane %v1412_v2, 4  ;;  %v700_v28 = vrot.slane %v698_v20, 4  ;;  %v711_v26 = vshrl.u32 %v5534_v56, 16  ;;  %4560 = vmatprep.subr.bf16.mxu0 %v5525_v44  ;;  %v703_v33 = vrot.slane %v701_v49, 5  ;;  %v5564_v3 = vld [vmem:[%s5088_s10 + $0xb8] sm:$0xf] }
  0x5c   : > { %v686_v23 = vsel %vm5127_vm3, %v681_v62, %v685_v25  ;;  %v696_v11 = vsel %vm5127_vm3, %v691_v22, %v695_v50  ;;  %v709_v24 = vrot.slane %v707_v57, 5  ;;  %v717_v20 = vshll.u32 %v5541_v30, 16 }
  0x5d   : > { %v5566_v63 = vcombine.low %v686_v23, %v696_v11  ;;  %v1416_v47 = vsel %vm5334_vm6, %v1414_v60, %v1415_v38  ;;  %v713_v2 = vrot.slane %v711_v26, 4  ;;  %v704_v25 = vor.u32 %v703_v33, %v700_v28 }
  0x5e   : > { %v5574_v13 = vcombine.low %v1413_v31, %v1416_v47  ;;  %v3706_v62 = vrot.slane %v5262_v39, 9  ;;  %v1419_v50 = vrot.slane %v5271_v52, 5  ;;  %v719_v49 = vrot.slane %v717_v20, 5 }
  0x5f   : > { %6230 = vst [vmem:[#allocation20_spill] sm:$0xff] %v5566_v63  ;;  %4313 = vmatmul.mubr.msk.bf16.gmra.mrb[24].mxu1 %vm826_vm2, %v5566_v63  ;;  %v714_v22 = vor.u32 %v713_v2, %v709_v24  ;;  %v1422_v57 = vrot.slane %v5281_v61, 5  ;;  %v722_v38 = vshrl.u32 %v5553_v43, 16  ;;  %v705_v60 = vrot.slane %v704_v25, 4 }
  0x60   : > { %6231 = vst [vmem:[#allocation21_spill] sm:$0xff] %v5574_v13  ;;  %4497 = vmatmul.mubr.msk.bf16.gmra.mrb[8].mxu0 %vm826_vm2, %v5574_v13  ;;  %v1420_v31 = vsel %vm5334_vm6, %v3706_v62, %v1419_v50  ;;  %v1421_v28 = vrot.slane %v1419_v50, 4  ;;  %v725_v26 = vshll.u32 %v5553_v43, 16  ;;  %v731_v33 = vshll.u32 %v5564_v3, 16 }
  0x61   : > { %v715_v23 = vrot.slane %v714_v22, 4  ;;  %v724_v11 = vrot.slane %v722_v38, 4  ;;  %v735_v47 = vshrl.u32 %v5564_v3, 16  ;;  %v710_v61 = vsel %vm5127_vm3, %v705_v60, %v709_v24 }
  0x62   : > { %v1423_v2 = vsel %vm5334_vm6, %v1421_v28, %v1422_v57  ;;  %v727_v20 = vrot.slane %v725_v26, 5  ;;  %v741_v25 = vshll.u32 %v5572_v40, 16  ;;  %v733_v22 = vrot.slane %v731_v33, 5 }
  0x63   : > { %v720_v62 = vsel %vm5127_vm3, %v715_v23, %v719_v49  ;;  %v5596_v50 = vcombine.low %v1420_v31, %v1423_v2  ;;  %v737_v38 = vrot.slane %v735_v47, 4  ;;  %v3707_v39 = vrot.slane %v5295_v19, 9 }
  0x64   : > { %v5598_v63 = vcombine.low %v710_v61, %v720_v62  ;;  %v728_v13 = vor.u32 %v727_v20, %v724_v11  ;;  %v743_v44 = vrot.slane %v741_v25, 5  ;;  %v1426_v57 = vrot.slane %v5300_v32, 5 }
  0x65   : > { %4500 = vmatprep.mubr.msk.bf16.mxu0 %vm826_vm2, %v5596_v50  ;;  %v738_v24 = vor.u32 %v737_v38, %v733_v22  ;;  %v1429_v60 = vrot.slane %v5314_v48, 5  ;;  %v3708_v49 = vrot.slane %v5328_v4, 9  ;;  %v3663_v28 = vcombine.low %v5094_v8, %v5097_v9 }
  0x66   : > { %4316 = vmatprep.mubr.msk.bf16.mxu1 %vm826_vm2, %v5598_v63  ;;  %v729_v31 = vrot.slane %v728_v13, 4  ;;  %v1433_v26 = vrot.slane %v5348_v27, 5  ;;  %v1436_v23 = vrot.slane %v5353_v34, 5  ;;  %v1427_v33 = vsel %vm5334_vm6, %v3707_v39, %v1426_v57 }
  0x67   : > { %v739_v11 = vrot.slane %v738_v24, 4  ;;  %v1428_v47 = vrot.slane %v1426_v57, 4  ;;  %v1440_v48 = vrot.slane %v5385_v35, 5  ;;  %v3709_v8 = vrot.slane %v5373_v5, 9 }
  0x68   : > { %v734_v61 = vsel %vm5127_vm3, %v729_v31, %v733_v22  ;;  %v1434_v13 = vsel %vm5334_vm6, %v3708_v49, %v1433_v26  ;;  %v1435_v2 = vrot.slane %v1433_v26, 4  ;;  %v1443_v39 = vrot.slane %v5388_v18, 5 }
  0x69   : > { %v744_v9 = vsel %vm5127_vm3, %v739_v11, %v743_v44  ;;  %v1430_v34 = vsel %vm5334_vm6, %v1428_v47, %v1429_v60  ;;  %v1442_v20 = vrot.slane %v1440_v48, 4  ;;  %v3710_v24 = vrot.slane %v5405_v1, 9 }
  0x6a   : > { %v5625_v25 = vcombine.low %v734_v61, %v744_v9  ;;  %v5627_v62 = vcombine.low %v1427_v33, %v1430_v34  ;;  %v1437_v22 = vsel %vm5334_vm6, %v1435_v2, %v1436_v23  ;;  %v1447_v57 = vrot.slane %v5415_v12, 5  ;;  %v4956_v2 = vld [vmem:[%s6175_s2 + $0x48] sm:$0xff]  }
  0x6b   : > { %v5631_v38 = vcombine.low %v1434_v13, %v1437_v22  ;;  %v1450_v44 = vrot.slane %v5418_v7, 5  ;;  %v1441_v18 = vsel %vm5334_vm6, %v3709_v8, %v1440_v48  ;;  %v1444_v60 = vsel %vm5334_vm6, %v1442_v20, %v1443_v39 }
  0x6c   : > { %4317 = vmatmul.mubr.msk.bf16.gmra.mrb[28].mxu1 %vm826_vm2, %v5625_v25  ;;  %4501 = vmatmul.mubr.msk.bf16.gmra.mrb[12].mxu0 %vm826_vm2, %v5627_v62  ;;  %v1449_v49 = vrot.slane %v1447_v57, 4  ;;  %v1454_v31 = vrot.slane %v5453_v58, 5  ;;  %v1461_v26 = vrot.slane %v5485_v41, 5  ;;  %v1448_v23 = vsel %vm5334_vm6, %v3710_v24, %v1447_v57 }
  0x6d   : > { %4328 = vmatprep.mubr.msk.bf16.mxu1 %vm826_vm2, %v3663_v28  ;;  %4504 = vmatprep.mubr.msk.bf16.mxu0 %vm826_vm2, %v5631_v38  ;;  %v5653_v28 = vcombine.low %v1441_v18, %v1444_v60  ;;  %v3711_v11 = vrot.slane %v5445_v45, 9  ;;  %v1457_v47 = vrot.slane %v5462_v0, 5  ;;  %v5659_v48 = vcombine.low %v5140_v42, %v5147_v46 }
  0x6e   : > { %v1451_v7 = vsel %vm5334_vm6, %v1449_v49, %v1450_v44  ;;  %v1456_v33 = vrot.slane %v1454_v31, 4  ;;  %v3712_v61 = vrot.slane %v5475_v21, 9  ;;  %v1463_v8 = vrot.slane %v1461_v26, 4 }
  0x6f   : > { %v5662_v13 = vcombine.low %v1448_v23, %v1451_v7  ;;  %v1464_v9 = vrot.slane %v5503_v59, 5  ;;  %v1468_v34 = vrot.slane %v5534_v56, 5  ;;  %v1455_v42 = vsel %vm5334_vm6, %v3711_v11, %v1454_v31  ;;  %v5785_v31 = vld [vmem:[%s6175_s2 + $0x60] sm:$0xff]  }
  0x70   : > { %v1458_v46 = vsel %vm5334_vm6, %v1456_v33, %v1457_v47  ;;  %v5684_v0 = vcombine.low %v5158_v53, %v5161_v54  ;;  %v1462_v59 = vsel %vm5334_vm6, %v3712_v61, %v1461_v26  ;;  %v5690_v20 = vcombine.low %v5295_v19, %v5300_v32  ;;  %v4962_v53 = vld [vmem:[%s6175_s2 + $0x50] sm:$0xff]  }
  0x71   : > { %v3713_v39 = vrot.slane %v5516_v17, 9  ;;  %v1475_v22 = vrot.slane %v5564_v3, 5  ;;  %v5703_v54 = vcombine.low %v5328_v4, %v5348_v27  ;;  %v5705_v19 = vcombine.low %v1455_v42, %v1458_v46 }
  0x72   : > { %v1470_v32 = vrot.slane %v1468_v34, 4  ;;  %v1471_v24 = vrot.slane %v5541_v30, 5  ;;  %v5715_v57 = vcombine.low %v5373_v5, %v5385_v35  ;;  %v5719_v44 = vcombine.low %v5405_v1, %v5415_v12 }
  0x73   : > { %v5723_v4 = vcombine.low %v5445_v45, %v5453_v58  ;;  %v5727_v27 = vcombine.low %v5475_v21, %v5485_v41  ;;  %v5731_v30 = vcombine.low %v5516_v17, %v5534_v56  ;;  %v5735_v5 = vcombine.low %v5177_v10, %v5185_v16  ;;  %v5746_v21 = vld [vmem:[%s5711_s6 + $0x4] sm:$0xf]  ;;  %v4968_v10 = vld [vmem:[%s6175_s2 + $0x58] sm:$0xff]  }
  0x74   : > { %4329 = vmatmul.mubr.msk.bf16.vlgmr.msra.gmra.mrb[0].mxu1 %vm826_vm2, %v5136_v37  ;;  %4505 = vmatmul.mubr.msk.bf16.gmra.mrb[16].mxu0 %vm826_vm2, %v5653_v28  ;;  %v5741_v1 = vcombine.low %v5553_v43, %v5564_v3  ;;  %v3714_v12 = vrot.slane %v5553_v43, 9  ;;  %v1477_v58 = vrot.slane %v1475_v22, 4  ;;  %v1478_v45 = vrot.slane %v5572_v40, 5  ;;  %v5769_v3 = vld [vmem:[%s5711_s6] sm:$0xf] }
  0x75   : > { %4361 = vmatpush3.bf16.msra.mxu1 %v5276_v55  ;;  %4332 = vmatprep.mubr.msk.bf16.mxu1 %vm826_vm2, %v5659_v48  ;;  %v1465_v55 = vsel %vm5334_vm6, %v1463_v8, %v1464_v9  ;;  %v1469_v16 = vsel %vm5334_vm6, %v3713_v39, %v1468_v34  ;;  %v1472_v41 = vsel %vm5334_vm6, %v1470_v32, %v1471_v24  ;;  %v2295_v40 = vrot.slane %v5746_v21, 5  ;;  %v346_v43 = vld [vmem:[%s5711_s6 + $0x8] sm:$0x1] }
  0x76   : > { %4508 = vmatprep.mubr.msk.bf16.mxu0 %vm826_vm2, %v5662_v13  ;;  %4362 = vmatprep.subr.bf16.mxu1 %v4956_v2  ;;  %v5737_v35 = vcombine.low %v1462_v59, %v1465_v55  ;;  %v1476_v17 = vsel %vm5334_vm6, %v3714_v12, %v1475_v22  ;;  %v1479_v56 = vsel %vm5334_vm6, %v1477_v58, %v1478_v45  ;;  %v2037_v26 = vshrl.u32 %v5769_v3, 16  ;;  %v6232_v22 = vld [vmem:[#allocation4_spill] sm:$0xff]  ;;  %v6233_v45 = vld [vmem:[#allocation17_spill] sm:$0xff] }
  0x77   : > { %v5774_v18 = vcombine.low %v5200_v36, %v5215_v51  ;;  %v5776_v60 = vcombine.low %v1469_v16, %v1472_v41  ;;  %v5780_v49 = vcombine.low %v5232_v6, %v5240_v15  ;;  %v2040_v23 = vshll.u32 %v5769_v3, 16  ;;  %v4976_v16 = vld [vmem:[%s6175_s2 + $0xf8] sm:$0xff]   ;;  %v4985_v41 = vld [vmem:[%s5088_s10 + $0x4] sm:$0xf] }
  0x78   : > { %v2046_v7 = vshll.u32 %v5746_v21, 16  ;;  %v2050_v36 = vshrl.u32 %v5746_v21, 16  ;;  %v5791_v51 = vcombine.low %v1476_v17, %v1479_v56  ;;  %v3817_v11 = vrot.slane %v5769_v3, 9  ;;  %v4980_v17 = vld [vmem:[%s6175_s2 + $0x100] sm:$0xff]   ;;  %v4986_v56 = vld [vmem:[%s5088_s10 + $0x8] sm:$0x1] }
  0x79   : > { %4363 = vmatpush3.bf16.msra.mxu1 %v4956_v2  ;;  %v2297_v6 = vrot.slane %v2295_v40, 4  ;;  %v2298_v15 = vrot.slane %v346_v43, 5  ;;  %v2039_v33 = vrot.slane %v2037_v26, 4  ;;  %v2042_v47 = vrot.slane %v2040_v23, 5  ;;  %v4987_v26 = vld [vmem:[%s5088_s10] sm:$0xf] }
  0x7a   : > { %4364 = vmatprep.subr.bf16.mxu1 %v4962_v53  ;;  %v2048_v61 = vrot.slane %v2046_v7, 5  ;;  %v2052_v2 = vrot.slane %v2050_v36, 4  ;;  %v2056_v34 = vshll.u32 %v346_v43, 16  ;;  %v2296_v42 = vsel %vm5334_vm6, %v3817_v11, %v2295_v40  ;;  %s3972_s10 = sshll.u32 %s6257_s15, 7 }
  0x7b   : > { %v2043_v8 = vor.u32 %v2042_v47, %v2039_v33  ;;  %v2299_v46 = vsel %vm5334_vm6, %v2297_v6, %v2298_v15  ;;  %v1370_v40 = vrot.slane %v4985_v41, 5  ;;  %v1373_v43 = vrot.slane %v4986_v56, 5  ;;  %v4975_v15 = vld [vmem:[%s6175_s2 + $0x68] sm:$0xff]   ;;  %v6234_v33 = vld [vmem:[#allocation9_spill] sm:$0xff]  ;;  %v6246_v41 = vld [vmem:[#allocation10_spill] sm:$0xff]  ;;  %s6114_s26 = scalar_lea.vmem %s6177_s4, %s3972_s10 }
  0x7c   : > { %4333 = vmatmul.mubr.msk.bf16.gmra.mrb[4].mxu1 %vm826_vm2, %v5684_v0  ;;  %4509 = vmatmul.mubr.msk.bf16.gmra.mrb[20].mxu0 %vm826_vm2, %v5705_v19  ;;  %v2053_v9 = vor.u32 %v2052_v2, %v2048_v61  ;;  %v2058_v39 = vrot.slane %v2056_v34, 5  ;;  %v5811_v32 = vcombine.low %v2296_v42, %v2299_v46  ;;  %v3699_v23 = vrot.slane %v4987_v26, 9  ;;  %v6235_v47 = vld [vmem:[#allocation11_spill] sm:$0xff]  ;;  %v4981_v2 = vld [vmem:[%s6175_s2 + $0x78] sm:$0xff]   ;;  %v4988_v34 = vld [vmem:[%s6175_s2 + $0x80] sm:$0xff]  }
  0x7d   : > { %4336 = vmatprep.mubr.msk.bf16.mxu1 %vm826_vm2, %v5735_v5  ;;  %4512 = vmatprep.mubr.msk.bf16.mxu0 %vm826_vm2, %v5737_v35  ;;  %v2044_v59 = vrot.slane %v2043_v8, 4  ;;  %v1372_v7 = vrot.slane %v1370_v40, 4  ;;  %v6236_v8 = vld [vmem:[#allocation13_spill] sm:$0xff]  ;;  %v6238_v42 = vld [vmem:[#allocation19_spill] sm:$0xff]  ;;  %v6249_v56 = vld [vmem:[#allocation16_spill] sm:$0xff] }
  0x7e   : > { %4365 = vmatpush3.bf16.msra.mxu1 %v4962_v53  ;;  %v2054_v55 = vrot.slane %v2053_v9, 4  ;;  %v5809_v53 = vcombine.low %v6232_v22, %v5271_v52  ;;  %v4969_v52 = vld [vmem:[%s6175_s2 + $0xe8] sm:$0xff]   ;;  %v1371_v36 = vsel %vm5334_vm6, %v3699_v23, %v1370_v40  ;;  %v5906_v9 = vcombine.low %v5769_v3, %v5746_v21  ;;  %v6239_v46 = vld [vmem:[#allocation21_spill] sm:$0xff]  ;;  %v5923_v3 = vld [vmem:[%s5711_s6 + $0x10] sm:$0xf] }
  0x7f   : > { %4366 = vmatprep.subr.bf16.mxu1 %v4968_v10  ;;  %v2049_v24 = vsel %vm5127_vm3, %v2044_v59, %v2048_v61  ;;  %v1374_v11 = vsel %vm5334_vm6, %v1372_v7, %v1373_v43  ;;  %v4979_v61 = vld [vmem:[%s6175_s2 + $0x70] sm:$0xff]   ;;  %v5920_v21 = vld [vmem:[%s5711_s6 + $0xc] sm:$0xf]  ;;  %v2780_v23 = vshrl.u32 %v5923_v3, 16  ;;  %v6250_v7 = vld [vmem:[#allocation18_spill] sm:$0xff]  ;;  %v3025_v29 = vrot.slane %v5923_v3, 5 }
  0x80   : > { %v2059_v12 = vsel %vm5127_vm3, %v2054_v55, %v2058_v39  ;;  %v3723_v6 = vcombine.low %v1371_v36, %v1374_v11  ;;  %v3855_v59 = vcombine.low %v5920_v21, %v5923_v3  ;;  %v6240_v55 = vld [vmem:[#allocation2_spill] sm:$0xff]  ;;  %v4982_v39 = vld [vmem:[%s6175_s2 + $0x108] sm:$0xff]   ;;  %v6247_v40 = vld [vmem:[#allocation12_spill] sm:$0xff]  ;;  %v2767_v43 = vshrl.u32 %v5920_v21, 16 }
  0x81   : > { %v5817_v58 = vcombine.low %v2049_v24, %v2059_v12  ;;  %v6241_v22 = vld [vmem:[#allocation3_spill] sm:$0xff]  ;;  %v6242_v24 = vld [vmem:[#allocation5_spill] sm:$0xff]  ;;  %v4983_v12 = vld [vmem:[%s6175_s2 + $0x110] sm:$0xff]   ;;  %v2770_v26 = vshll.u32 %v5920_v21, 16 }
  0x82   : > { %4367 = vmatpush3.bf16.msra.mxu1 %v4968_v10  ;;  %v4974_v10 = vld [vmem:[%s6175_s2 + $0xf0] sm:$0xff]   ;;  %v2769_v36 = vrot.slane %v2767_v43, 4 }
  0x83   : > { %4400 = vmatprep.subr.bf16.mxu1 %v5785_v31  ;;  %v2772_v11 = vrot.slane %v2770_v26, 5 }
  0x84   : > { %4337 = vmatmul.mubr.msk.bf16.gmra.mrb[8].mxu1 %vm826_vm2, %v5774_v18  ;;  %4513 = vmatmul.mubr.msk.bf16.gmra.mrb[24].mxu0 %vm826_vm2, %v5776_v60 }
  0x85   : > { %4340 = vmatprep.mubr.msk.bf16.mxu1 %vm826_vm2, %v5780_v49  ;;  %4516 = vmatprep.mubr.msk.bf16.mxu0 %vm826_vm2, %v5791_v51 }
  0x8c   : > { %4341 = vmatmul.mubr.msk.bf16.gmra.mrb[12].mxu1 %vm826_vm2, %v5809_v53  ;;  %4517 = vmatmul.mubr.msk.bf16.gmra.mrb[28].mxu0 %vm826_vm2, %v5811_v32 }
  0x8d   : > { %4344 = vmatprep.mubr.msk.bf16.mxu1 %vm826_vm2, %v5690_v20  ;;  %4528 = vmatprep.mubr.msk.bf16.mxu0 %vm826_vm2, %v5659_v48 }
  0x94   : > { %4345 = vmatmul.mubr.msk.bf16.gmra.mrb[16].mxu1 %vm826_vm2, %v5703_v54  ;;  %4529 = vmatmul.mubr.msk.bf16.vlgmr.msra.gmra.mrb[0].mxu0 %vm826_vm2, %v5684_v0 }
  0x95   : > { %4561 = vmatpush3.bf16.msra.mxu0 %v6233_v45  ;;  %4348 = vmatprep.mubr.msk.bf16.mxu1 %vm826_vm2, %v5715_v57  ;;  %v6243_v45 = vld [vmem:[#allocation6_spill] sm:$0xff] }
  0x96   : > { %4532 = vmatprep.mubr.msk.bf16.mxu0 %vm826_vm2, %v5735_v5  ;;  %4562 = vmatprep.subr.bf16.mxu0 %v4969_v52 }
  0x99   : > { %4563 = vmatpush3.bf16.msra.mxu0 %v4969_v52  ;;  %v4984_v52 = vld [vmem:[%s6175_s2 + $0x118] sm:$0xff]  }
  0x9a   : > { %4564 = vmatprep.subr.bf16.mxu0 %v4974_v10 }
  0x9c   : > { %4349 = vmatmul.mubr.msk.bf16.gmra.mrb[20].mxu1 %vm826_vm2, %v5719_v44  ;;  %4533 = vmatmul.mubr.msk.bf16.gmra.mrb[4].mxu0 %vm826_vm2, %v5774_v18 }
  0x9d   : > { %4352 = vmatprep.mubr.msk.bf16.mxu1 %vm826_vm2, %v5723_v4  ;;  %4536 = vmatprep.mubr.msk.bf16.mxu0 %vm826_vm2, %v5780_v49 }
  0x9e   : > { %4565 = vmatpush3.bf16.msra.mxu0 %v4974_v10  ;;  %v6244_v10 = vld [vmem:[#allocation7_spill] sm:$0xff] }
  0x9f   : > { %4566 = vmatprep.subr.bf16.mxu0 %v4976_v16 }
  0xa2   : > { %4567 = vmatpush3.bf16.msra.mxu0 %v4976_v16  ;;  %v6245_v16 = vld [vmem:[#allocation8_spill] sm:$0xff] }
  0xa3   : > { %4600 = vmatprep.subr.bf16.mxu0 %v4980_v17 }
  0xa4   : > { %4353 = vmatmul.mubr.msk.bf16.gmra.mrb[24].mxu1 %vm826_vm2, %v5727_v27  ;;  %4537 = vmatmul.mubr.msk.bf16.gmra.mrb[8].mxu0 %vm826_vm2, %v5809_v53 }
  0xa5   : > { %4356 = vmatprep.mubr.msk.bf16.mxu1 %vm826_vm2, %v5731_v30  ;;  %4540 = vmatprep.mubr.msk.bf16.mxu0 %vm826_vm2, %v5690_v20 }
  0xac   : > { %4357 = vmatmul.mubr.msk.bf16.gmra.mrb[28].mxu1 %vm826_vm2, %v5741_v1  ;;  %4541 = vmatmul.mubr.msk.bf16.gmra.mrb[12].mxu0 %vm826_vm2, %v5703_v54 }
  0xad   : > { %4368 = vmatprep.mubr.msk.bf16.mxu1 %vm826_vm2, %v3723_v6  ;;  %4544 = vmatprep.mubr.msk.bf16.mxu0 %vm826_vm2, %v5715_v57 }
  0xb4   : > { %4369 = vmatmul.mubr.msk.bf16.vlgmr.msra.gmra.mrb[0].mxu1 %vm826_vm2, %v6234_v33  ;;  %4545 = vmatmul.mubr.msk.bf16.gmra.mrb[16].mxu0 %vm826_vm2, %v5719_v44  ;;  %v5991_v33 = vld [vmem:[%s5711_s6 + $0x14] sm:$0x1] }
  0xb5   : > { %4401 = vmatpush3.bf16.msra.mxu1 %v5785_v31  ;;  %4372 = vmatprep.mubr.msk.bf16.mxu1 %vm826_vm2, %v6235_v47  ;;  %v6237_v31 = vld [vmem:[#allocation15_spill] sm:$0xff] }
  0xb6   : > { %4548 = vmatprep.mubr.msk.bf16.mxu0 %vm826_vm2, %v5723_v4  ;;  %4402 = vmatprep.subr.bf16.mxu1 %v4975_v15 }
  0xb9   : > { %4403 = vmatpush3.bf16.msra.mxu1 %v4975_v15  ;;  %v2782_v15 = vrot.slane %v2780_v23, 4 }
  0xba   : > { %4404 = vmatprep.subr.bf16.mxu1 %v4979_v61 }
  0xbc   : > { %4373 = vmatmul.mubr.msk.bf16.gmra.mrb[4].mxu1 %vm826_vm2, %v6236_v8  ;;  %4549 = vmatmul.mubr.msk.bf16.gmra.mrb[20].mxu0 %vm826_vm2, %v5727_v27 }
  0xbd   : > { %4376 = vmatprep.mubr.msk.bf16.mxu1 %vm826_vm2, %v6237_v31  ;;  %4552 = vmatprep.mubr.msk.bf16.mxu0 %vm826_vm2, %v5731_v30 }
  0xbe   : > { %4405 = vmatpush3.bf16.msra.mxu1 %v4979_v61  ;;  %v6251_v61 = vld [vmem:[#allocation20_spill] sm:$0xff] }
  0xbf   : > { %4406 = vmatprep.subr.bf16.mxu1 %v4981_v2 }
  0xc2   : > { %4407 = vmatpush3.bf16.msra.mxu1 %v4981_v2  ;;  %v2773_v2 = vor.u32 %v2772_v11, %v2769_v36 }
  0xc3   : > { %4640 = vmatprep.subr.bf16.mxu1 %v4988_v34 }
  0xc4   : > { %4377 = vmatmul.mubr.msk.bf16.gmra.mrb[8].mxu1 %vm826_vm2, %v6238_v42  ;;  %4553 = vmatmul.mubr.msk.bf16.gmra.mrb[24].mxu0 %vm826_vm2, %v5741_v1 }
  0xc5   : > { %4380 = vmatprep.mubr.msk.bf16.mxu1 %vm826_vm2, %v6239_v46  ;;  %4556 = vmatprep.mubr.msk.bf16.mxu0 %vm826_vm2, %v5906_v9 }
  0xcc   : > { %4381 = vmatmul.mubr.msk.bf16.gmra.mrb[12].mxu1 %vm826_vm2, %v5596_v50  ;;  %4557 = vmatmul.mubr.msk.bf16.gmra.mrb[28].mxu0 %vm826_vm2, %v3855_v59  ;;  %v2786_v59 = vshll.u32 %v5991_v33, 16 }
  0xcd   : > { %4384 = vmatprep.mubr.msk.bf16.mxu1 %vm826_vm2, %v5627_v62  ;;  %4568 = vmatprep.mubr.msk.bf16.mxu0 %vm826_vm2, %v6240_v55  ;;  %v4991_v55 = vld [vmem:[%s6175_s2 + $0x98] sm:$0xff]  }
  0xd4   : > { %4385 = vmatmul.mubr.msk.bf16.gmra.mrb[16].mxu1 %vm826_vm2, %v5631_v38  ;;  %4569 = vmatmul.mubr.msk.bf16.vlgmr.msra.gmra.mrb[0].mxu0 %vm826_vm2, %v6241_v22  ;;  %v2788_v22 = vrot.slane %v2786_v59, 5 }
  0xd5   : > { %4601 = vmatpush3.bf16.msra.mxu0 %v4980_v17  ;;  %4388 = vmatprep.mubr.msk.bf16.mxu1 %vm826_vm2, %v5653_v28  ;;  %v6248_v17 = vld [vmem:[#allocation14_spill] sm:$0xff] }
  0xd6   : > { %4572 = vmatprep.mubr.msk.bf16.mxu0 %vm826_vm2, %v6242_v24  ;;  %4602 = vmatprep.subr.bf16.mxu0 %v4982_v39 }
  0xd9   : > { %4603 = vmatpush3.bf16.msra.mxu0 %v4982_v39 }
  0xda   : > { %4604 = vmatprep.subr.bf16.mxu0 %v4983_v12 }
  0xdc   : > { %4389 = vmatmul.mubr.msk.bf16.gmra.mrb[20].mxu1 %vm826_vm2, %v5662_v13  ;;  %4573 = vmatmul.mubr.msk.bf16.gmra.mrb[4].mxu0 %vm826_vm2, %v6243_v45 }
  0xdd   : > { %4392 = vmatprep.mubr.msk.bf16.mxu1 %vm826_vm2, %v5705_v19  ;;  %4576 = vmatprep.mubr.msk.bf16.mxu0 %vm826_vm2, %v6244_v10 }
  0xde   : > { %4605 = vmatpush3.bf16.msra.mxu0 %v4983_v12 }
  0xdf   : > { %4606 = vmatprep.subr.bf16.mxu0 %v4984_v52 }
  0xe2   : > { %4607 = vmatpush3.bf16.msra.mxu0 %v4984_v52 }
  0xe4   : > { %4393 = vmatmul.mubr.msk.bf16.gmra.mrb[24].mxu1 %vm826_vm2, %v5737_v35  ;;  %4577 = vmatmul.mubr.msk.bf16.gmra.mrb[8].mxu0 %vm826_vm2, %v6245_v16 }
  0xe5   : > { %4396 = vmatprep.mubr.msk.bf16.mxu1 %vm826_vm2, %v5776_v60  ;;  %4580 = vmatprep.mubr.msk.bf16.mxu0 %vm826_vm2, %v6246_v41 }
  0xec   : > { %4397 = vmatmul.mubr.msk.bf16.gmra.mrb[28].mxu1 %vm826_vm2, %v5791_v51  ;;  %4581 = vmatmul.mubr.msk.bf16.gmra.mrb[12].mxu0 %vm826_vm2, %v6247_v40 }
  0xed   : > { %4408 = vmatprep.mubr.msk.bf16.mxu1 %vm826_vm2, %v5136_v37  ;;  %4584 = vmatprep.mubr.msk.bf16.mxu0 %vm826_vm2, %v6248_v17  ;;  %v2776_v37 = vshll.u32 %v5923_v3, 16 }
  0xef   : > { %v2778_v6 = vrot.slane %v2776_v37, 5 }
  0xf4   : > { %4409 = vmatmul.mubr.msk.bf16.vlgmr.msra.gmra.mrb[0].mxu1 %vm826_vm2, %v5659_v48  ;;  %4585 = vmatmul.mubr.msk.bf16.gmra.mrb[16].mxu0 %vm826_vm2, %v6249_v56  ;;  %v4989_v48 = vld [vmem:[%s6175_s2 + $0x88] sm:$0xff]  }
  0xf5   : > { %4644 = vmatpush3.bf16.msra.mxu1 %v4988_v34  ;;  %4412 = vmatprep.mubr.msk.bf16.mxu1 %vm826_vm2, %v5684_v0  ;;  %v4990_v0 = vld [vmem:[%s6175_s2 + $0x90] sm:$0xff]   ;;  %v2783_v34 = vor.u32 %v2782_v15, %v2778_v6 }
  0xf6   : > { %4588 = vmatprep.mubr.msk.bf16.mxu0 %vm826_vm2, %v6250_v7  ;;  %4641 = vmatprep.subr.bf16.mxu1 %v4989_v48 }
  0xf7   : > { %v2784_v39 = vrot.slane %v2783_v34, 4 }
  0xf9   : > { %4645 = vmatpush3.bf16.msra.mxu1 %v4989_v48  ;;  %v2789_v24 = vsel %vm5127_vm3, %v2784_v39, %v2788_v22 }
  0xfa   : > { %4642 = vmatprep.subr.bf16.mxu1 %v4990_v0 }
  0xfc   : > { %4413 = vmatmul.mubr.msk.bf16.gmra.mrb[4].mxu1 %vm826_vm2, %v5735_v5  ;;  %4589 = vmatmul.mubr.msk.bf16.gmra.mrb[20].mxu0 %vm826_vm2, %v6251_v61  ;;  %v2774_v5 = vrot.slane %v2773_v2, 4 }
  0xfd   : > { %4416 = vmatprep.mubr.msk.bf16.mxu1 %vm826_vm2, %v5774_v18  ;;  %4592 = vmatprep.mubr.msk.bf16.mxu0 %vm826_vm2, %v5598_v63 }
  0xfe   : > { %4646 = vmatpush3.bf16.msra.mxu1 %v4990_v0  ;;  %v2779_v18 = vsel %vm5127_vm3, %v2774_v5, %v2778_v6 }
  0xff   : > { %4643 = vmatprep.subr.bf16.mxu1 %v4991_v55  ;;  %v3884_v12 = vcombine.low %v2779_v18, %v2789_v24 }
 0x102   : > { %4647 = vmatpush3.bf16.msra.mxu1 %v4991_v55 }
 0x104   : > { %4417 = vmatmul.mubr.msk.bf16.gmra.mrb[8].mxu1 %vm826_vm2, %v5780_v49  ;;  %4593 = vmatmul.mubr.msk.bf16.gmra.mrb[24].mxu0 %vm826_vm2, %v5625_v25 }
 0x105   : > { %4420 = vmatprep.mubr.msk.bf16.mxu1 %vm826_vm2, %v5809_v53  ;;  %4596 = vmatprep.mubr.msk.bf16.mxu0 %vm826_vm2, %v5817_v58 }
 0x10c   : > { %4421 = vmatmul.mubr.msk.bf16.gmra.mrb[12].mxu1 %vm826_vm2, %v5690_v20  ;;  %4597 = vmatmul.mubr.msk.bf16.gmra.mrb[28].mxu0 %vm826_vm2, %v3884_v12 }
 0x10d   : > { %4424 = vmatprep.mubr.msk.bf16.mxu1 %vm826_vm2, %v5703_v54  ;;  %4608 = vmatprep.mubr.msk.bf16.mxu0 %vm826_vm2, %v6235_v47 }
 0x114   : > { %4425 = vmatmul.mubr.msk.bf16.gmra.mrb[16].mxu1 %vm826_vm2, %v5715_v57  ;;  %4609 = vmatmul.mubr.msk.bf16.vlgmr.msra.gmra.mrb[0].mxu0 %vm826_vm2, %v6236_v8 }
 0x115   : > { %4428 = vmatprep.mubr.msk.bf16.mxu1 %vm826_vm2, %v5719_v44  ;;  %4612 = vmatprep.mubr.msk.bf16.mxu0 %vm826_vm2, %v6237_v31 }
 0x11c   : > { %4429 = vmatmul.mubr.msk.bf16.gmra.mrb[20].mxu1 %vm826_vm2, %v5723_v4  ;;  %4613 = vmatmul.mubr.msk.bf16.gmra.mrb[4].mxu0 %vm826_vm2, %v6238_v42 }
 0x11d   : > { %4432 = vmatprep.mubr.msk.bf16.mxu1 %vm826_vm2, %v5727_v27  ;;  %4616 = vmatprep.mubr.msk.bf16.mxu0 %vm826_vm2, %v6239_v46 }
 0x124   : > { %4433 = vmatmul.mubr.msk.bf16.gmra.mrb[24].mxu1 %vm826_vm2, %v5731_v30  ;;  %4617 = vmatmul.mubr.msk.bf16.gmra.mrb[8].mxu0 %vm826_vm2, %v5596_v50  ;;  %v3905_v50 = vrot.slane %v5920_v21, 9 }
 0x125   : > { %4436 = vmatprep.mubr.msk.bf16.mxu1 %vm826_vm2, %v5741_v1  ;;  %4620 = vmatprep.mubr.msk.bf16.mxu0 %vm826_vm2, %v5627_v62  ;;  %v3027_v62 = vrot.slane %v3025_v29, 4 }
 0x12c   : > { %4437 = vmatmul.mubr.msk.bf16.gmra.mrb[28].mxu1 %vm826_vm2, %v5906_v9  ;;  %4621 = vmatmul.mubr.msk.bf16.gmra.mrb[12].mxu0 %vm826_vm2, %v5631_v38  ;;  %v3028_v38 = vrot.slane %v5991_v33, 5 }
 0x12d   : > { %4464 = vmatprep.mubr.msk.bf16.mxu1 %vm826_vm2, %v6247_v40  ;;  %4624 = vmatprep.mubr.msk.bf16.mxu0 %vm826_vm2, %v5653_v28  ;;  %v3026_v28 = vsel %vm5334_vm6, %v3905_v50, %v3025_v29 }
 0x134   : > { %4465 = vmatmul.mubr.msk.bf16.vlgmr.msra.gmra.mrb[16].mxu1 %vm826_vm2, %v6248_v17  ;;  %4625 = vmatmul.mubr.msk.bf16.gmra.mrb[16].mxu0 %vm826_vm2, %v5662_v13  ;;  %v3029_v13 = vsel %vm5334_vm6, %v3027_v62, %v3028_v38 }
 0x135   : > { %4468 = vmatprep.mubr.msk.bf16.mxu1 %vm826_vm2, %v6249_v56  ;;  %4628 = vmatprep.mubr.msk.bf16.mxu0 %vm826_vm2, %v5705_v19  ;;  %v3914_v20 = vcombine.low %v3026_v28, %v3029_v13 }
 0x13c   : > { %4469 = vmatmul.mubr.msk.bf16.gmra.mrb[20].mxu1 %vm826_vm2, %v6250_v7  ;;  %4629 = vmatmul.mubr.msk.bf16.gmra.mrb[20].mxu0 %vm826_vm2, %v5737_v35 }
 0x13d   : > { %4472 = vmatprep.mubr.msk.bf16.mxu1 %vm826_vm2, %v6251_v61  ;;  %4632 = vmatprep.mubr.msk.bf16.mxu0 %vm826_vm2, %v5776_v60 }
 0x144   : > { %4473 = vmatmul.mubr.msk.bf16.gmra.mrb[24].mxu1 %vm826_vm2, %v5598_v63  ;;  %4633 = vmatmul.mubr.msk.bf16.gmra.mrb[24].mxu0 %vm826_vm2, %v5791_v51 }
 0x145   : > { %4476 = vmatprep.mubr.msk.bf16.mxu1 %vm826_vm2, %v5625_v25  ;;  %4636 = vmatprep.mubr.msk.bf16.mxu0 %vm826_vm2, %v5811_v32 }
 0x14c   : > { %4477 = vmatmul.mubr.msk.bf16.gmra.mrb[28].mxu1 %vm826_vm2, %v5817_v58  ;;  %4637 = vmatmul.mubr.msk.bf16.gmra.mrb[28].mxu0 %vm826_vm2, %v3914_v20  ;;  %v6104_v58 = vld [vmem:[%s6176_s3] ss:$0 sm:$0xff] }
 0x1c7   : > { %v4410_v63 = vpop.f32.mrb[0].mxu1 }
 0x1c8   : > { %v1877_v54 = vpop.f32.mrb[1].mxu1 }
 0x1c9   : > { %v4411_v19 = vpop.f32.mrb[2].mxu1 }
 0x1ca   : > { %v1880_v57 = vpop.f32.mrb[3].mxu1 }
 0x1cf   : > { %v4414_v25 = vpop.f32.mrb[4].mxu1 }
 0x1d0   : > { %v1893_v44 = vpop.f32.mrb[5].mxu1 }
 0x1d1   : > { %v4415_v4 = vpop.f32.mrb[6].mxu1 }
 0x1d2   : > { %v1896_v27 = vpop.f32.mrb[7].mxu1 }
 0x1d7   : > { %v4418_v30 = vpop.f32.mrb[8].mxu1 }
 0x1d8   : > { %v1909_v35 = vpop.f32.mrb[9].mxu1 }
 0x1d9   : > { %v4419_v1 = vpop.f32.mrb[10].mxu1 }
 0x1da   : > { %v1912_v60 = vpop.f32.mrb[11].mxu1 }
 0x1df   : > { %v6093_v14 = vpop.f32.mrb[12].mxu1 }
 0x1e0   : > { %v6095_v49 = vpop.f32.mrb[13].mxu1 }
 0x1e1   : > { %v6097_v51 = vpop.f32.mrb[14].mxu1 }
 0x1e2   : > { %v6099_v53 = vpop.f32.mrb[15].mxu1 }
 0x1e7   : > { %v4610_v32 = vpop.f32.mrb[0].mxu0 }
 0x1e8   : > { %v4648_v47 = vadd.f32 %v4610_v32, %v4410_v63  ;;  %v3103_v8 = vpop.f32.mrb[1].mxu0 }
 0x1e9   : > { %v4649_v31 = vadd.f32 %v3103_v8, %v1877_v54  ;;  %v4611_v9 = vpop.f32.mrb[2].mxu0 }
 0x1ea   : > { %v3271_v42 = vadd.f32 %v4648_v47, %v6104_v58  ;;  %v4650_v46 = vadd.f32 %v4611_v9, %v4411_v19  ;;  %v3106_v21 = vpop.f32.mrb[3].mxu0 }
 0x1eb   : > { %v3269_v3 = vadd.f32 %v4649_v31, %v6104_v58  ;;  %v4651_v52 = vadd.f32 %v3106_v21, %v1880_v57 }
 0x1ec   : > { %v3272_v45 = vadd.f32 %v4650_v46, %v6104_v58  ;;  %v3303_v16 = vmax.f32 %v3271_v42, 0.0 }
 0x1ed   : > { %v3270_v10 = vadd.f32 %v4651_v52, %v6104_v58  ;;  %v3301_v40 = vmax.f32 %v3269_v3, 0.0 }
 0x1ee   : > { %v3304_v41 = vmax.f32 %v3272_v45, 0.0 }
 0x1ef   : > { %v3302_v17 = vmax.f32 %v3270_v10, 0.0  ;;  %v4614_v56 = vpop.f32.mrb[4].mxu0 }
 0x1f0   : > { %v4013_v43 = vpack.c.bf16 %v3304_v41, %v3303_v16  ;;  %v4652_v26 = vadd.f32 %v4614_v56, %v4414_v25  ;;  %v3119_v23 = vpop.f32.mrb[5].mxu0 }
 0x1f1   : > { %v4008_v37 = vpack.c.bf16 %v3302_v17, %v3301_v40  ;;  %v4653_v7 = vadd.f32 %v3119_v23, %v1893_v44  ;;  %v4615_v48 = vpop.f32.mrb[6].mxu0 }
 0x1f2   : > { %4085 = vst [vmem:[%s6114_s26 + $0x8] sm:$0xff] %v4013_v43   ;;  %v3275_v36 = vadd.f32 %v4652_v26, %v6104_v58  ;;  %v4654_v11 = vadd.f32 %v4615_v48, %v4415_v4  ;;  %v3122_v6 = vpop.f32.mrb[7].mxu0 }
 0x1f3   : > { %4009 = vst [vmem:[%s6114_s26] sm:$0xff] %v4008_v37   ;;  %v3273_v15 = vadd.f32 %v4653_v7, %v6104_v58  ;;  %v4655_v33 = vadd.f32 %v3122_v6, %v1896_v27 }
 0x1f4   : > { %v3276_v0 = vadd.f32 %v4654_v11, %v6104_v58  ;;  %v3307_v2 = vmax.f32 %v3275_v36, 0.0 }
 0x1f5   : > { %v3274_v61 = vadd.f32 %v4655_v33, %v6104_v58  ;;  %v3305_v59 = vmax.f32 %v3273_v15, 0.0 }
 0x1f6   : > { %v3308_v34 = vmax.f32 %v3276_v0, 0.0 }
 0x1f7   : > { %v3306_v55 = vmax.f32 %v3274_v61, 0.0  ;;  %v4618_v5 = vpop.f32.mrb[8].mxu0 }
 0x1f8   : > { %v4023_v39 = vpack.c.bf16 %v3308_v34, %v3307_v2  ;;  %v4656_v22 = vadd.f32 %v4618_v5, %v4418_v30  ;;  %v3135_v18 = vpop.f32.mrb[9].mxu0 }
 0x1f9   : > { %v4018_v24 = vpack.c.bf16 %v3306_v55, %v3305_v59  ;;  %v4657_v12 = vadd.f32 %v3135_v18, %v1909_v35  ;;  %v4619_v29 = vpop.f32.mrb[10].mxu0 }
 0x1fa   : > { %4087 = vst [vmem:[%s6114_s26 + $0x18] sm:$0xff] %v4023_v39   ;;  %v3279_v50 = vadd.f32 %v4656_v22, %v6104_v58  ;;  %v4658_v62 = vadd.f32 %v4619_v29, %v4419_v1  ;;  %v3138_v38 = vpop.f32.mrb[11].mxu0 }
 0x1fb   : > { %4086 = vst [vmem:[%s6114_s26 + $0x10] sm:$0xff] %v4018_v24   ;;  %v3277_v28 = vadd.f32 %v4657_v12, %v6104_v58  ;;  %v4659_v13 = vadd.f32 %v3138_v38, %v1912_v60 }
 0x1fc   : > { %v3280_v20 = vadd.f32 %v4658_v62, %v6104_v58  ;;  %v3311_v54 = vmax.f32 %v3279_v50, 0.0 }
 0x1fd   : > { %v3278_v63 = vadd.f32 %v4659_v13, %v6104_v58  ;;  %v3309_v57 = vmax.f32 %v3277_v28, 0.0 }
 0x1fe   : > { %v3312_v19 = vmax.f32 %v3280_v20, 0.0 }
 0x1ff   : > { %v3310_v25 = vmax.f32 %v3278_v63, 0.0  ;;  %v4622_v44 = vpop.f32.mrb[12].mxu0 }
 0x200   : > { %v4033_v4 = vpack.c.bf16 %v3312_v19, %v3311_v54  ;;  %v4660_v27 = vadd.f32 %v4622_v44, %v6093_v14  ;;  %v3151_v30 = vpop.f32.mrb[13].mxu0 }
 0x201   : > { %v4028_v35 = vpack.c.bf16 %v3310_v25, %v3309_v57  ;;  %v4661_v1 = vadd.f32 %v3151_v30, %v6095_v49  ;;  %v4623_v32 = vpop.f32.mrb[14].mxu0 }
 0x202   : > { %4089 = vst [vmem:[%s6114_s26 + $0x28] sm:$0xff] %v4033_v4   ;;  %v3283_v60 = vadd.f32 %v4660_v27, %v6104_v58  ;;  %v4662_v47 = vadd.f32 %v4623_v32, %v6097_v51  ;;  %v3154_v8 = vpop.f32.mrb[15].mxu0 }
 0x203   : > { %4088 = vst [vmem:[%s6114_s26 + $0x20] sm:$0xff] %v4028_v35   ;;  %v3281_v31 = vadd.f32 %v4661_v1, %v6104_v58  ;;  %v4663_v9 = vadd.f32 %v3154_v8, %v6099_v53 }
 0x204   : > { %v3284_v42 = vadd.f32 %v4662_v47, %v6104_v58  ;;  %v3315_v46 = vmax.f32 %v3283_v60, 0.0 }
 0x205   : > { %v3282_v14 = vadd.f32 %v4663_v9, %v6104_v58  ;;  %v3313_v49 = vmax.f32 %v3281_v31, 0.0 }
 0x206   : > { %v3316_v21 = vmax.f32 %v3284_v42, 0.0 }
 0x207   : > { %v3314_v3 = vmax.f32 %v3282_v14, 0.0  ;;  %v4466_v52 = vpop.f32.mrb[16].mxu1  ;;  %v4626_v45 = vpop.f32.mrb[16].mxu0 }
 0x208   : > { %v4043_v10 = vpack.c.bf16 %v3316_v21, %v3315_v46  ;;  %v4664_v51 = vadd.f32 %v4626_v45, %v4466_v52  ;;  %v2197_v16 = vpop.f32.mrb[17].mxu1  ;;  %v3167_v41 = vpop.f32.mrb[17].mxu0 }
 0x209   : > { %v4038_v40 = vpack.c.bf16 %v3314_v3, %v3313_v49  ;;  %v4665_v17 = vadd.f32 %v3167_v41, %v2197_v16  ;;  %v4467_v56 = vpop.f32.mrb[18].mxu1  ;;  %v4627_v53 = vpop.f32.mrb[18].mxu0 }
 0x20a   : > { %4091 = vst [vmem:[%s6114_s26 + $0x38] sm:$0xff] %v4043_v10   ;;  %v3287_v43 = vadd.f32 %v4664_v51, %v6104_v58  ;;  %v4666_v26 = vadd.f32 %v4627_v53, %v4467_v56  ;;  %v2200_v23 = vpop.f32.mrb[19].mxu1  ;;  %v3170_v37 = vpop.f32.mrb[19].mxu0 }
 0x20b   : > { %4090 = vst [vmem:[%s6114_s26 + $0x30] sm:$0xff] %v4038_v40   ;;  %v3285_v7 = vadd.f32 %v4665_v17, %v6104_v58  ;;  %v4667_v48 = vadd.f32 %v3170_v37, %v2200_v23 }
 0x20c   : > { %v3288_v36 = vadd.f32 %v4666_v26, %v6104_v58  ;;  %v3319_v6 = vmax.f32 %v3287_v43, 0.0 }
 0x20d   : > { %v3286_v11 = vadd.f32 %v4667_v48, %v6104_v58  ;;  %v3317_v33 = vmax.f32 %v3285_v7, 0.0 }
 0x20e   : > { %v3320_v15 = vmax.f32 %v3288_v36, 0.0 }
 0x20f   : > { %v3318_v0 = vmax.f32 %v3286_v11, 0.0  ;;  %v4470_v61 = vpop.f32.mrb[20].mxu1  ;;  %v4630_v2 = vpop.f32.mrb[20].mxu0 }
 0x210   : > { %v4053_v34 = vpack.c.bf16 %v3320_v15, %v3319_v6  ;;  %v4668_v59 = vadd.f32 %v4630_v2, %v4470_v61  ;;  %v2213_v55 = vpop.f32.mrb[21].mxu1  ;;  %v3183_v5 = vpop.f32.mrb[21].mxu0 }
 0x211   : > { %v4048_v39 = vpack.c.bf16 %v3318_v0, %v3317_v33  ;;  %v4669_v22 = vadd.f32 %v3183_v5, %v2213_v55  ;;  %v4471_v18 = vpop.f32.mrb[22].mxu1  ;;  %v4631_v24 = vpop.f32.mrb[22].mxu0 }
 0x212   : > { %4093 = vst [vmem:[%s6114_s26 + $0x48] sm:$0xff] %v4053_v34   ;;  %v3291_v12 = vadd.f32 %v4668_v59, %v6104_v58  ;;  %v4670_v29 = vadd.f32 %v4631_v24, %v4471_v18  ;;  %v2216_v50 = vpop.f32.mrb[23].mxu1  ;;  %v3186_v62 = vpop.f32.mrb[23].mxu0 }
 0x213   : > { %4092 = vst [vmem:[%s6114_s26 + $0x40] sm:$0xff] %v4048_v39   ;;  %v3289_v38 = vadd.f32 %v4669_v22, %v6104_v58  ;;  %v4671_v28 = vadd.f32 %v3186_v62, %v2216_v50 }
 0x214   : > { %v3292_v13 = vadd.f32 %v4670_v29, %v6104_v58  ;;  %v3323_v63 = vmax.f32 %v3291_v12, 0.0 }
 0x215   : > { %v3290_v20 = vadd.f32 %v4671_v28, %v6104_v58  ;;  %v3321_v19 = vmax.f32 %v3289_v38, 0.0 }
 0x216   : > { %v3324_v54 = vmax.f32 %v3292_v13, 0.0 }
 0x217   : > { %v3322_v57 = vmax.f32 %v3290_v20, 0.0  ;;  %v4474_v25 = vpop.f32.mrb[24].mxu1  ;;  %v4634_v44 = vpop.f32.mrb[24].mxu0 }
 0x218   : > { %v4063_v4 = vpack.c.bf16 %v3324_v54, %v3323_v63  ;;  %v4672_v27 = vadd.f32 %v4634_v44, %v4474_v25  ;;  %v2229_v30 = vpop.f32.mrb[25].mxu1  ;;  %v3199_v35 = vpop.f32.mrb[25].mxu0 }
 0x219   : > { %v4058_v1 = vpack.c.bf16 %v3322_v57, %v3321_v19  ;;  %v4673_v32 = vadd.f32 %v3199_v35, %v2229_v30  ;;  %v4475_v60 = vpop.f32.mrb[26].mxu1  ;;  %v4635_v47 = vpop.f32.mrb[26].mxu0 }
 0x21a   : > { %4095 = vst [vmem:[%s6114_s26 + $0x58] sm:$0xff] %v4063_v4   ;;  %v3295_v8 = vadd.f32 %v4672_v27, %v6104_v58  ;;  %v4674_v31 = vadd.f32 %v4635_v47, %v4475_v60  ;;  %v2232_v9 = vpop.f32.mrb[27].mxu1  ;;  %v3202_v42 = vpop.f32.mrb[27].mxu0 }
 0x21b   : > { %4094 = vst [vmem:[%s6114_s26 + $0x50] sm:$0xff] %v4058_v1   ;;  %v3293_v14 = vadd.f32 %v4673_v32, %v6104_v58  ;;  %v4675_v46 = vadd.f32 %v3202_v42, %v2232_v9 }
 0x21c   : > { %v3296_v21 = vadd.f32 %v4674_v31, %v6104_v58  ;;  %v3327_v3 = vmax.f32 %v3295_v8, 0.0 }
 0x21d   : > { %v3294_v49 = vadd.f32 %v4675_v46, %v6104_v58  ;;  %v3325_v45 = vmax.f32 %v3293_v14, 0.0 }
 0x21e   : > { %v3328_v52 = vmax.f32 %v3296_v21, 0.0 }
 0x21f   : > { %v3326_v10 = vmax.f32 %v3294_v49, 0.0  ;;  %v4478_v51 = vpop.f32.mrb[28].mxu1  ;;  %v4638_v16 = vpop.f32.mrb[28].mxu0 }
 0x220   : > { %v4073_v41 = vpack.c.bf16 %v3328_v52, %v3327_v3  ;;  %v4676_v40 = vadd.f32 %v4638_v16, %v4478_v51  ;;  %v2245_v17 = vpop.f32.mrb[29].mxu1  ;;  %v3215_v56 = vpop.f32.mrb[29].mxu0 }
 0x221   : > { %v4068_v53 = vpack.c.bf16 %v3326_v10, %v3325_v45  ;;  %v4677_v43 = vadd.f32 %v3215_v56, %v2245_v17  ;;  %v4479_v26 = vpop.f32.mrb[30].mxu1  ;;  %v4639_v23 = vpop.f32.mrb[30].mxu0 }
 0x222   : > { %4097 = vst [vmem:[%s6114_s26 + $0x68] sm:$0xff] %v4073_v41   ;;  %v3299_v37 = vadd.f32 %v4676_v40, %v6104_v58  ;;  %v4678_v7 = vadd.f32 %v4639_v23, %v4479_v26  ;;  %v2248_v48 = vpop.f32.mrb[31].mxu1  ;;  %v3218_v36 = vpop.f32.mrb[31].mxu0 }
 0x223   : > { %4096 = vst [vmem:[%s6114_s26 + $0x60] sm:$0xff] %v4068_v53   ;;  %v3297_v11 = vadd.f32 %v4677_v43, %v6104_v58  ;;  %v4679_v6 = vadd.f32 %v3218_v36, %v2248_v48 }
 0x224   : > { %v3300_v15 = vadd.f32 %v4678_v7, %v6104_v58  ;;  %v3331_v0 = vmax.f32 %v3299_v37, 0.0 }
 0x225   : > { %v3298_v33 = vadd.f32 %v4679_v6, %v6104_v58  ;;  %v3329_v2 = vmax.f32 %v3297_v11, 0.0 }
 0x226   : > { %v3332_v61 = vmax.f32 %v3300_v15, 0.0 }
 0x227   : > { %v3330_v34 = vmax.f32 %v3298_v33, 0.0 }
 0x228   : > { %v4083_v59 = vpack.c.bf16 %v3332_v61, %v3331_v0 }
 0x229   : > { %v4078_v55 = vpack.c.bf16 %v3330_v34, %v3329_v2 }
 0x22a   : > { %4099 = vst [vmem:[%s6114_s26 + $0x78] sm:$0xff] %v4083_v59  }
 0x22b   : > { %4098 = vst [vmem:[%s6114_s26 + $0x70] sm:$0xff] %v4078_v55  }
 0x22c PF: > { %s14_s17 = sadd.s32 1, %s5014_s17   ;;  %s6252_s15 = smov %s5010_s16 }
 0x22d   : > { %p11_p5 = scmp.ge.s32.totalorder %s14_s17, 4   ;;  %s6253_s16 = smov %s6255_s18 }
 0x22f   :  { %13 = sbr.rel (!%p11_p5) target bundleno = 2 (0x2), region = 77 }

// kernel: content_encoder_forward.26
= control target key start
LH: loop header
LB: loop body
LE: loop exit
PB: predicated region body
PF: predicated region fallthrough
CT: control target
= control target key end

     0   :  { %s783_s21 = smov 0   ;;  %s785_s22 = smov 0   ;;  %s842_s0 = inlined_call_operand.vmem [shape: bf16[2,64,128], index: 0, kind: input, shape index: {}]   ;;  %s843_s1 = inlined_call_operand.vmem [shape: f32[2,1,128], index: 1, kind: input, shape index: {}]   ;;  %s844_s2 = inlined_call_operand.vmem [shape: f32[2,1,128], index: 2, kind: input, shape index: {}]   ;;  %s845_s3 = inlined_call_operand.vmem [shape: f32[1,1,128], index: 3, kind: input, shape index: {}]   ;;  %s846_s4 = inlined_call_operand.vmem [shape: f32[1,1,128], index: 4, kind: input, shape index: {}]   ;;  %s847_s5 = inlined_call_operand.vmem [shape: bf16[2,64,128], index: 5, kind: input, shape index: {}]   ;;  %s848_s6 = inlined_call_operand.vmem [shape: bf16[2,64,128], index: 6, kind: output, shape index: {}]  }
   0x1   :  { %s787_s23 = smov 0  }
   0x2 LB: > { %s28_s24 = sadd.s32 1, %s742_s22  ;;  %p609_p0 = scmp.ge.s32.totalorder %s746_s23, 1  ;;  %s746_s23 = sphi %s787_s23, %s16_s23   ;;  %s742_s22 = sphi %s785_s22, %s850_s22   ;;  %s738_s21 = sphi %s783_s21, %s849_s21  }
   0x3   : > { %p30_p1 = scmp.ge.s32.totalorder %s28_s24, 2  ;;  %p266_p2 = scmp.lt.s32.totalorder %s746_s23, 3 }
   0x5   : > { %s852_s24 = smov (%p30_p1, %s28_s24), 0  ;;  %p267_p3 = pnand %p609_p0, %p266_p2 }
   0x6   : > { %p320_p4 = scmp.lt.s32.totalorder (!%p267_p3), %s738_s21, 1  ;;  %v390_v0 = vlaneseq (!%p267_p3)  ;;  %v387_v3 = vld [vmem:[%s845_s3] sm:$0x1] (!%p267_p3) }
   0x7   : > { %270 = sbr.rel (%p267_p3) target bundleno = 37 (0x25), region = 44  ;;  %v617_v29 = vld [vmem:[%s846_s4] ss:$0 sm:$0xff] (!%p267_p3) }
   0x8   : > { %v391_v1 = vshrl.u32 (!%p267_p3), %v390_v0, 7 }
   0xa   : > { %v392_v7 = vsub.s32 (!%p267_p3), 0, %v391_v1 }
   0xe   : > { %s854_s21 = smov (!%p320_p4, %s738_s21), 1 }
   0xf   : > { %s801_s25 = sshll.u32 %s854_s21, 5  ;;  %s331_s28 = scalar_lea.vmem %s843_s1, %s854_s21 }
  0x10   : > { %s327_s7 = scalar_lea.vmem %s842_s0, %s801_s25  ;;  %s334_s10 = scalar_lea.vmem %s844_s2, %s854_s21  ;;  %v616_v2 = vld [vmem:[%s331_s28] ss:$0 sm:$0xff] }
  0x11   : > { %s820_s15 = scalar_lea.vmem %s847_s5, %s801_s25  ;;  %v640_v4 = vld [vmem:[%s327_s7] sm:$0xff]   ;;  %v691_v5 = vld [vmem:[%s327_s7 + $0x8] sm:$0xff]   ;;  %v692_v6 = vld [vmem:[%s327_s7 + $0x10] sm:$0xff]   ;;  %s353_s20 = scalar_lea.vmem %s848_s6, %s801_s25 }
  0x12   : > { %v641_v8 = vunpack.c.l.bf16 %v640_v4  ;;  %v642_v9 = vunpack.c.h.bf16 %v640_v4  ;;  %v386_v10 = vld [vmem:[%s334_s10] sm:$0x1]  ;;  %v645_v12 = vunpack.c.l.bf16 %v691_v5  ;;  %v646_v13 = vunpack.c.h.bf16 %v691_v5  ;;  %v693_v14 = vld [vmem:[%s327_s7 + $0x18] sm:$0xff]   ;;  %v694_v18 = vld [vmem:[%s820_s15 + $0x8] sm:$0xff]  }
  0x13   : > { %v656_v11 = vld [vmem:[%s820_s15] sm:$0xff]   ;;  %v388_v15 = vmul.f32 %v387_v3, %v386_v10  ;;  %v649_v19 = vunpack.c.l.bf16 %v692_v6  ;;  %v695_v20 = vld [vmem:[%s820_s15 + $0x10] sm:$0xff]   ;;  %v661_v26 = vunpack.c.l.bf16 %v694_v18  ;;  %v662_v27 = vunpack.c.h.bf16 %v694_v18  ;;  %v696_v50 = vld [vmem:[%s820_s15 + $0x18] sm:$0xff]  }
  0x14   : > { %v657_v16 = vunpack.c.l.bf16 %v656_v11  ;;  %v658_v17 = vunpack.c.h.bf16 %v656_v11  ;;  %v378_v21 = vsub.f32 %v641_v8, %v616_v2  ;;  %v379_v22 = vsub.f32 %v642_v9, %v616_v2 }
  0x15   : > { %v380_v23 = vsub.f32 %v645_v12, %v616_v2  ;;  %v381_v24 = vsub.f32 %v646_v13, %v616_v2  ;;  %v393_v25 = vrot.slane %v388_v15, %v392_v7  ;;  %v650_v28 = vunpack.c.h.bf16 %v692_v6 }
  0x16   : > { %v382_v30 = vsub.f32 %v649_v19, %v616_v2  ;;  %v665_v31 = vunpack.c.l.bf16 %v695_v20  ;;  %v666_v32 = vunpack.c.h.bf16 %v695_v20  ;;  %v653_v33 = vunpack.c.l.bf16 %v693_v14 }
  0x17   : > { %v395_v34 = vmul.f32 %v393_v25, %v378_v21  ;;  %v396_v35 = vmul.f32 %v393_v25, %v379_v22  ;;  %v397_v36 = vmul.f32 %v393_v25, %v380_v23  ;;  %v398_v37 = vmul.f32 %v393_v25, %v381_v24 }
  0x18   : > { %v383_v38 = vsub.f32 %v650_v28, %v616_v2  ;;  %v399_v39 = vmul.f32 %v393_v25, %v382_v30  ;;  %v654_v40 = vunpack.c.h.bf16 %v693_v14  ;;  %v384_v41 = vsub.f32 %v653_v33, %v616_v2 }
  0x19   : > { %v410_v42 = vadd.f32 %v617_v29, %v395_v34  ;;  %v411_v43 = vadd.f32 %v617_v29, %v396_v35  ;;  %v412_v44 = vadd.f32 %v617_v29, %v397_v36  ;;  %v413_v45 = vadd.f32 %v617_v29, %v398_v37 }
  0x1a   : > { %v400_v46 = vmul.f32 %v393_v25, %v383_v38  ;;  %v414_v47 = vadd.f32 %v617_v29, %v399_v39  ;;  %v385_v48 = vsub.f32 %v654_v40, %v616_v2  ;;  %v401_v49 = vmul.f32 %v393_v25, %v384_v41 }
  0x1b   : > { %v434_v51 = vadd.f32 %v657_v16, %v410_v42  ;;  %v435_v52 = vadd.f32 %v658_v17, %v411_v43  ;;  %v436_v53 = vadd.f32 %v661_v26, %v412_v44  ;;  %v437_v54 = vadd.f32 %v662_v27, %v413_v45 }
  0x1c   : > { %v415_v55 = vadd.f32 %v617_v29, %v400_v46  ;;  %v438_v56 = vadd.f32 %v665_v31, %v414_v47  ;;  %v402_v57 = vmul.f32 %v393_v25, %v385_v48  ;;  %v416_v58 = vadd.f32 %v617_v29, %v401_v49 }
  0x1d   : > { %v674_v59 = vpack.c.bf16 %v435_v52, %v434_v51  ;;  %v679_v60 = vpack.c.bf16 %v437_v54, %v436_v53  ;;  %v669_v61 = vunpack.c.l.bf16 %v696_v50  ;;  %v670_v62 = vunpack.c.h.bf16 %v696_v50 }
  0x1e   : > { %v439_v63 = vadd.f32 %v666_v32, %v415_v55  ;;  %v417_v0 = vadd.f32 %v617_v29, %v402_v57 }
  0x1f   : > { %675 = vst [vmem:[%s353_s20] sm:$0xff] %v674_v59   ;;  %697 = vst [vmem:[%s353_s20 + $0x8] sm:$0xff] %v679_v60   ;;  %v440_v1 = vadd.f32 %v669_v61, %v416_v58 }
  0x20   : > { %v684_v2 = vpack.c.bf16 %v439_v63, %v438_v56  ;;  %v441_v3 = vadd.f32 %v670_v62, %v417_v0 }
  0x22   : > { %698 = vst [vmem:[%s353_s20 + $0x10] sm:$0xff] %v684_v2   ;;  %v689_v4 = vpack.c.bf16 %v441_v3, %v440_v1 }
  0x24   : > { %699 = vst [vmem:[%s353_s20 + $0x18] sm:$0xff] %v689_v4  }
  0x25 PF: > { %s16_s23 = sadd.s32 1, %s746_s23   ;;  %s849_s21 = smov %s742_s22 }
  0x26   : > { %p13_p5 = scmp.ge.s32.totalorder %s16_s23, 4   ;;  %s850_s22 = smov %s852_s24 }
  0x28   :  { %15 = sbr.rel (!%p13_p5) target bundleno = 2 (0x2), region = 83 }

// kernel: content_encoder_forward.24
= control target key start
LH: loop header
LB: loop body
LE: loop exit
PB: predicated region body
PF: predicated region fallthrough
CT: control target
= control target key end

     0   :  { %s659_s18 = smov 0   ;;  %s661_s19 = smov 0   ;;  %s713_s0 = inlined_call_operand.vmem [shape: bf16[2,64,128], index: 0, kind: input, shape index: {}]   ;;  %s714_s1 = inlined_call_operand.vmem [shape: f32[2,1,128], index: 1, kind: input, shape index: {}]   ;;  %s715_s2 = inlined_call_operand.vmem [shape: f32[2,1,128], index: 2, kind: input, shape index: {}]   ;;  %s716_s3 = inlined_call_operand.vmem [shape: f32[1,1,128], index: 3, kind: input, shape index: {}]   ;;  %s717_s4 = inlined_call_operand.vmem [shape: f32[1,1,128], index: 4, kind: input, shape index: {}]   ;;  %s718_s5 = inlined_call_operand.vmem [shape: bf16[2,64,128], index: 5, kind: output, shape index: {}]  }
   0x1   :  { %s663_s20 = smov 0  }
   0x2 LB: > { %s27_s21 = sadd.s32 1, %s623_s19  ;;  %p512_p0 = scmp.ge.s32.totalorder %s627_s20, 1  ;;  %s627_s20 = sphi %s663_s20, %s15_s20   ;;  %s623_s19 = sphi %s661_s19, %s720_s19   ;;  %s619_s18 = sphi %s659_s18, %s719_s18  }
   0x3   : > { %p29_p1 = scmp.ge.s32.totalorder %s27_s21, 2  ;;  %p224_p2 = scmp.lt.s32.totalorder %s627_s20, 3 }
   0x5   : > { %s722_s21 = smov (%p29_p1, %s27_s21), 0  ;;  %p225_p3 = pnand %p512_p0, %p224_p2 }
   0x6   : > { %p267_p4 = scmp.lt.s32.totalorder (!%p225_p3), %s619_s18, 1  ;;  %v327_v0 = vlaneseq (!%p225_p3)  ;;  %v324_v3 = vld [vmem:[%s716_s3] sm:$0x1] (!%p225_p3) }
   0x7   : > { %228 = sbr.rel (%p225_p3) target bundleno = 35 (0x23), region = 40  ;;  %v518_v26 = vld [vmem:[%s717_s4] ss:$0 sm:$0xff] (!%p225_p3) }
   0x8   : > { %v328_v1 = vshrl.u32 (!%p225_p3), %v327_v0, 7 }
   0xa   : > { %v329_v7 = vsub.s32 (!%p225_p3), 0, %v328_v1 }
   0xe   : > { %s724_s18 = smov (!%p267_p4, %s619_s18), 1 }
   0xf   : > { %s529_s22 = sshll.u32 %s724_s18, 5  ;;  %s278_s25 = scalar_lea.vmem %s714_s1, %s724_s18 }
  0x10   : > { %s274_s28 = scalar_lea.vmem %s713_s0, %s529_s22  ;;  %s281_s6 = scalar_lea.vmem %s715_s2, %s724_s18  ;;  %v517_v2 = vld [vmem:[%s278_s25] ss:$0 sm:$0xff] }
  0x11   : > { %v540_v4 = vld [vmem:[%s274_s28] sm:$0xff]   ;;  %v575_v5 = vld [vmem:[%s274_s28 + $0x8] sm:$0xff]   ;;  %v576_v6 = vld [vmem:[%s274_s28 + $0x10] sm:$0xff]   ;;  %s290_s13 = scalar_lea.vmem %s718_s5, %s529_s22 }
  0x12   : > { %v541_v8 = vunpack.c.l.bf16 %v540_v4  ;;  %v542_v9 = vunpack.c.h.bf16 %v540_v4  ;;  %v577_v10 = vld [vmem:[%s274_s28 + $0x18] sm:$0xff]   ;;  %v323_v11 = vld [vmem:[%s281_s6] sm:$0x1]  ;;  %v545_v12 = vunpack.c.l.bf16 %v575_v5  ;;  %v546_v13 = vunpack.c.h.bf16 %v575_v5 }
  0x13   : > { %v325_v14 = vmul.f32 %v324_v3, %v323_v11  ;;  %v549_v15 = vunpack.c.l.bf16 %v576_v6  ;;  %v550_v16 = vunpack.c.h.bf16 %v576_v6  ;;  %v553_v17 = vunpack.c.l.bf16 %v577_v10 }
  0x14   : > { %v315_v18 = vsub.f32 %v541_v8, %v517_v2  ;;  %v316_v19 = vsub.f32 %v542_v9, %v517_v2  ;;  %v317_v20 = vsub.f32 %v545_v12, %v517_v2  ;;  %v318_v21 = vsub.f32 %v546_v13, %v517_v2 }
  0x15   : > { %v330_v22 = vrot.slane %v325_v14, %v329_v7  ;;  %v319_v23 = vsub.f32 %v549_v15, %v517_v2  ;;  %v320_v24 = vsub.f32 %v550_v16, %v517_v2  ;;  %v554_v25 = vunpack.c.h.bf16 %v577_v10 }
  0x16   : > { %v321_v27 = vsub.f32 %v553_v17, %v517_v2 }
  0x17   : > { %v332_v28 = vmul.f32 %v330_v22, %v315_v18  ;;  %v333_v29 = vmul.f32 %v330_v22, %v316_v19  ;;  %v334_v30 = vmul.f32 %v330_v22, %v317_v20  ;;  %v335_v31 = vmul.f32 %v330_v22, %v318_v21 }
  0x18   : > { %v336_v32 = vmul.f32 %v330_v22, %v319_v23  ;;  %v337_v33 = vmul.f32 %v330_v22, %v320_v24  ;;  %v322_v34 = vsub.f32 %v554_v25, %v517_v2  ;;  %v338_v35 = vmul.f32 %v330_v22, %v321_v27 }
  0x19   : > { %v347_v36 = vadd.f32 %v518_v26, %v332_v28  ;;  %v348_v37 = vadd.f32 %v518_v26, %v333_v29  ;;  %v349_v38 = vadd.f32 %v518_v26, %v334_v30  ;;  %v350_v39 = vadd.f32 %v518_v26, %v335_v31 }
  0x1a   : > { %v351_v40 = vadd.f32 %v518_v26, %v336_v32  ;;  %v352_v41 = vadd.f32 %v518_v26, %v337_v33  ;;  %v339_v42 = vmul.f32 %v330_v22, %v322_v34  ;;  %v353_v43 = vadd.f32 %v518_v26, %v338_v35 }
  0x1b   : > { %v355_v44 = vmax.f32 %v347_v36, 0.0  ;;  %v356_v45 = vmax.f32 %v348_v37, 0.0  ;;  %v357_v46 = vmax.f32 %v349_v38, 0.0  ;;  %v358_v47 = vmax.f32 %v350_v39, 0.0 }
  0x1c   : > { %v359_v48 = vmax.f32 %v351_v40, 0.0  ;;  %v360_v49 = vmax.f32 %v352_v41, 0.0  ;;  %v354_v50 = vadd.f32 %v518_v26, %v339_v42  ;;  %v361_v51 = vmax.f32 %v353_v43, 0.0 }
  0x1d   : > { %v558_v52 = vpack.c.bf16 %v356_v45, %v355_v44  ;;  %v563_v53 = vpack.c.bf16 %v358_v47, %v357_v46 }
  0x1e   : > { %v568_v54 = vpack.c.bf16 %v360_v49, %v359_v48  ;;  %v362_v55 = vmax.f32 %v354_v50, 0.0 }
  0x1f   : > { %559 = vst [vmem:[%s290_s13] sm:$0xff] %v558_v52   ;;  %578 = vst [vmem:[%s290_s13 + $0x8] sm:$0xff] %v563_v53  }
  0x20   : > { %579 = vst [vmem:[%s290_s13 + $0x10] sm:$0xff] %v568_v54   ;;  %v573_v56 = vpack.c.bf16 %v362_v55, %v361_v51 }
  0x22   : > { %580 = vst [vmem:[%s290_s13 + $0x18] sm:$0xff] %v573_v56  }
  0x23 PF: > { %s15_s20 = sadd.s32 1, %s627_s20   ;;  %s719_s18 = smov %s623_s19 }
  0x24   : > { %p12_p5 = scmp.ge.s32.totalorder %s15_s20, 4   ;;  %s720_s19 = smov %s722_s21 }
  0x26   :  { %14 = sbr.rel (!%p12_p5) target bundleno = 2 (0x2), region = 76 }

// kernel: content_encoder_forward.22
= control target key start
LH: loop header
LB: loop body
LE: loop exit
PB: predicated region body
PF: predicated region fallthrough
CT: control target
= control target key end

     0   :  { %s3456_s15 = smov 0   ;;  %s3458_s16 = smov 0   ;;  %s4311_s0 = inlined_call_operand.vmem [shape: bf16[2,16,9,512], index: 0, kind: input, shape index: {}, may-alias: {0,1}]   ;;  %s4312_s1 = inlined_call_operand.vmem [shape: bf16[2,16,9,512], index: 1, kind: input, shape index: {}, may-alias: {0,1}]   ;;  %s4313_s2 = inlined_call_operand.vmem [shape: bf16[4,512,128], index: 2, kind: input, shape index: {}]   ;;  %s4314_s3 = inlined_call_operand.vmem [shape: f32[1,128], index: 3, kind: input, shape index: {}]   ;;  %s4315_s4 = inlined_call_operand.vmem [shape: bf16[2,8,8,128], index: 4, kind: output, shape index: {}]  }
   0x1   :  { %s3460_s17 = smov 0  }
   0x2 LB: > { %s26_s18 = sadd.s32 1, %s3425_s16  ;;  %p2513_p0 = scmp.ge.s32.totalorder %s3429_s17, 1  ;;  %s3429_s17 = sphi %s3460_s17, %s14_s17   ;;  %s3425_s16 = sphi %s3458_s16, %s4321_s16   ;;  %s3421_s15 = sphi %s3456_s15, %s4320_s15  }
   0x3   : > { %p28_p1 = scmp.ge.s32.totalorder %s26_s18, 2  ;;  %p206_p2 = scmp.lt.s32.totalorder %s3429_s17, 3 }
   0x5   : > { %s4323_s18 = smov (%p28_p1, %s26_s18), 0  ;;  %p207_p3 = pnand %p2513_p0, %p206_p2 }
   0x6   : > { %v3279_v0 = vld [vmem:[%s4313_s2 + $0x140] sm:$0xff] (!%p207_p3)   ;;  %v3283_v4 = vld [vmem:[%s4313_s2 + $0x148] sm:$0xff] (!%p207_p3)   ;;  %v3287_v8 = vld [vmem:[%s4313_s2 + $0x150] sm:$0xff] (!%p207_p3)   ;;  %p253_p4 = scmp.lt.s32.totalorder (!%p207_p3), %s3421_s15, 1  ;;  %vm387_vm0 = vsmask.f32 (!%p207_p3), 3328 }
   0x7   : > { %210 = sbr.rel (%p207_p3) target bundleno = 400 (0x190), region = 36  ;;  %v3280_v1 = vld [vmem:[%s4313_s2 + $0x1c0] sm:$0xff] (!%p207_p3)   ;;  %2935 = vmatprep.subr.bf16.mxu0 (!%p207_p3), %v3279_v0  ;;  %v3284_v5 = vld [vmem:[%s4313_s2 + $0x1c8] sm:$0xff] (!%p207_p3)   ;;  %v3288_v9 = vld [vmem:[%s4313_s2 + $0x1d0] sm:$0xff] (!%p207_p3)   ;;  %vm388_vm1 = vsmask.f32 (!%p207_p3), 7440 }
   0x8   : > { %v3281_v2 = vld [vmem:[%s4313_s2 + $0x100] sm:$0xff] (!%p207_p3)   ;;  %2975 = vmatprep.subr.bf16.mxu1 (!%p207_p3), %v3280_v1  ;;  %v3285_v6 = vld [vmem:[%s4313_s2 + $0x108] sm:$0xff] (!%p207_p3)   ;;  %v3289_v10 = vld [vmem:[%s4313_s2 + $0x110] sm:$0xff] (!%p207_p3)  }
   0x9   : > { %v3282_v3 = vld [vmem:[%s4313_s2 + $0x180] sm:$0xff] (!%p207_p3)   ;;  %2936 = vmatpush3.bf16.msra.mxu0 (!%p207_p3), %v3281_v2  ;;  %v3286_v7 = vld [vmem:[%s4313_s2 + $0x188] sm:$0xff] (!%p207_p3)   ;;  %v3290_v11 = vld [vmem:[%s4313_s2 + $0x190] sm:$0xff] (!%p207_p3)  }
   0xa   : > { %2976 = vmatpush3.bf16.msra.mxu1 (!%p207_p3), %v3282_v3  ;;  %2937 = vmatprep.subr.bf16.mxu0 (!%p207_p3), %v3283_v4  ;;  %v3291_v12 = vld [vmem:[%s4313_s2 + $0x158] sm:$0xff] (!%p207_p3)   ;;  %v3295_v16 = vld [vmem:[%s4313_s2 + $0x160] sm:$0xff] (!%p207_p3)   ;;  %v3299_v20 = vld [vmem:[%s4313_s2 + $0x168] sm:$0xff] (!%p207_p3)  }
   0xb   : > { %2977 = vmatprep.subr.bf16.mxu1 (!%p207_p3), %v3284_v5  ;;  %v3292_v13 = vld [vmem:[%s4313_s2 + $0x1d8] sm:$0xff] (!%p207_p3)   ;;  %v3296_v17 = vld [vmem:[%s4313_s2 + $0x1e0] sm:$0xff] (!%p207_p3)   ;;  %v3300_v21 = vld [vmem:[%s4313_s2 + $0x1e8] sm:$0xff] (!%p207_p3)  }
   0xc   : > { %v3293_v14 = vld [vmem:[%s4313_s2 + $0x118] sm:$0xff] (!%p207_p3)   ;;  %v3297_v18 = vld [vmem:[%s4313_s2 + $0x120] sm:$0xff] (!%p207_p3)   ;;  %v3301_v22 = vld [vmem:[%s4313_s2 + $0x128] sm:$0xff] (!%p207_p3)  }
   0xd   : > { %2938 = vmatpush3.bf16.msra.mxu0 (!%p207_p3), %v3285_v6  ;;  %v3294_v15 = vld [vmem:[%s4313_s2 + $0x198] sm:$0xff] (!%p207_p3)   ;;  %v3298_v19 = vld [vmem:[%s4313_s2 + $0x1a0] sm:$0xff] (!%p207_p3)   ;;  %v3302_v23 = vld [vmem:[%s4313_s2 + $0x1a8] sm:$0xff] (!%p207_p3)  }
   0xe   : > { %2978 = vmatpush3.bf16.msra.mxu1 %v3286_v7  ;;  %2939 = vmatprep.subr.bf16.mxu0 %v3287_v8  ;;  %s4325_s15 = smov (!%p253_p4, %s3421_s15), 1  ;;  %v3303_v24 = vld [vmem:[%s4313_s2 + $0x170] sm:$0xff]   ;;  %v3307_v28 = vld [vmem:[%s4313_s2 + $0x178] sm:$0xff]   ;;  %v3311_v62 = vld [vmem:[%s4313_s2 + $0x40] sm:$0xff]  }
   0xf   : > { %2979 = vmatprep.subr.bf16.mxu1 %v3288_v9  ;;  %v3304_v25 = vld [vmem:[%s4313_s2 + $0x1f0] sm:$0xff]   ;;  %s2907_s29 = sshll.u32 %s4325_s15, 9  ;;  %v3308_v29 = vld [vmem:[%s4313_s2 + $0x1f8] sm:$0xff]   ;;  %vm3617_vm2 = vmor %vm387_vm0, %vm388_vm1  ;;  %s2910_s5 = sshll.u32 %s4325_s15, 5 }
  0x10   : > { %v3305_v26 = vld [vmem:[%s4313_s2 + $0x130] sm:$0xff]   ;;  %s3576_s12 = scalar_lea.vmem %s4311_s0, %s2907_s29  ;;  %v3309_v30 = vld [vmem:[%s4313_s2 + $0x138] sm:$0xff]   ;;  %v3312_v4 = vld [vmem:[%s4313_s2 + $0xc0] sm:$0xff]   ;;  %s2909_s8 = sadd.s32 256, %s2907_s29 }
  0x11   : > { %2940 = vmatpush3.bf16.msra.mxu0 %v3289_v10  ;;  %v3306_v27 = vld [vmem:[%s4313_s2 + $0x1b0] sm:$0xff]   ;;  %v3310_v31 = vld [vmem:[%s4313_s2 + $0x1b8] sm:$0xff]   ;;  %v3585_v32 = vld [vmem:[%s3576_s12] sm:$0xff]  ;;  %s4132_s23 = scalar_lea.vmem %s4312_s1, %s2909_s8  ;;  %s4284_s7 = scalar_lea.vmem %s4315_s4, %s2910_s5 }
  0x12   : > { %2980 = vmatpush3.bf16.msra.mxu1 %v3290_v11  ;;  %2941 = vmatprep.subr.bf16.mxu0 %v3291_v12  ;;  %v289_v33 = vld [vmem:[%s3576_s12 + $0x10] sm:$0x11]  ;;  %v3589_v34 = vld [vmem:[%s3576_s12 + $0x20] sm:$0xff]  ;;  %v391_v38 = vshrl.u32 %v3585_v32, 16  ;;  %v394_v39 = vshll.u32 %v3585_v32, 16  ;;  %v3600_v42 = vld [vmem:[%s3576_s12 + $0x8] sm:$0xff] }
  0x13   : > { %2981 = vmatprep.subr.bf16.mxu1 %v3292_v13  ;;  %v293_v35 = vld [vmem:[%s3576_s12 + $0x30] sm:$0x11]  ;;  %v3593_v36 = vld [vmem:[%s3576_s12 + $0x40] sm:$0xff]  ;;  %v400_v40 = vshll.u32 %v289_v33, 16  ;;  %v419_v41 = vshrl.u32 %v3589_v34, 16  ;;  %v422_v44 = vshll.u32 %v3589_v34, 16 }
  0x14   : > { %v297_v37 = vld [vmem:[%s3576_s12 + $0x50] sm:$0x11]  ;;  %v393_v43 = vrot.slane %v391_v38, 4  ;;  %v428_v45 = vshll.u32 %v293_v35, 16  ;;  %v447_v46 = vshrl.u32 %v3593_v36, 16  ;;  %v396_v48 = vrot.slane %v394_v39, 5 }
  0x15   : > { %2942 = vmatpush3.bf16.msra.mxu0 %v3293_v14  ;;  %v290_v47 = vld [vmem:[%s3576_s12 + $0x18] sm:$0x11]  ;;  %v402_v49 = vrot.slane %v400_v40, 5  ;;  %v421_v50 = vrot.slane %v419_v41, 4  ;;  %v450_v51 = vshll.u32 %v3593_v36, 16  ;;  %v3607_v52 = vld [vmem:[%s3576_s12 + $0x28] sm:$0xff]  ;;  %v2745_v40 = vcombine.high %v3589_v34, %v3593_v36 }
  0x16   : > { %2982 = vmatpush3.bf16.msra.mxu1 %v3294_v15  ;;  %2943 = vmatprep.subr.bf16.mxu0 %v3295_v16  ;;  %v424_v53 = vrot.slane %v422_v44, 5  ;;  %v430_v54 = vrot.slane %v428_v45, 5  ;;  %v449_v55 = vrot.slane %v447_v46, 4  ;;  %v456_v56 = vshll.u32 %v297_v37, 16  ;;  %v294_v59 = vld [vmem:[%s3576_s12 + $0x38] sm:$0x11] }
  0x17   : > { %2983 = vmatprep.subr.bf16.mxu1 %v3296_v17  ;;  %v397_v57 = vor.u32 %v396_v48, %v393_v43  ;;  %v452_v58 = vrot.slane %v450_v51, 5  ;;  %v405_v60 = vshrl.u32 %v3600_v42, 16  ;;  %v408_v61 = vshll.u32 %v3600_v42, 16  ;;  %v3626_v7 = vld [vmem:[%s3576_s12 + $0x48] sm:$0xff]  ;;  %v298_v11 = vld [vmem:[%s3576_s12 + $0x58] sm:$0x11] }
  0x18   : > { %v425_v0 = vor.u32 %v424_v53, %v421_v50  ;;  %v458_v1 = vrot.slane %v456_v56, 5  ;;  %v414_v2 = vshll.u32 %v290_v47, 16  ;;  %v433_v3 = vshrl.u32 %v3607_v52, 16  ;;  %v3314_v45 = vld [vmem:[%s4313_s2 + $0x80] sm:$0xff]   ;;  %v3317_v46 = vld [vmem:[%s4313_s2 + $0x8] sm:$0xff]  }
  0x19   : > { %2944 = vmatpush3.bf16.msra.mxu0 %v3297_v18  ;;  %v398_v5 = vrot.slane %v397_v57, 4  ;;  %v453_v6 = vor.u32 %v452_v58, %v449_v55  ;;  %v407_v8 = vrot.slane %v405_v60, 4  ;;  %v410_v9 = vrot.slane %v408_v61, 5  ;;  %v3316_v50 = vld [vmem:[%s4313_s2 + $0xc8] sm:$0xff]   ;;  %v3676_v51 = vld [vmem:[%s3576_s12 + $0x60] sm:$0xff]  ;;  %v3319_v61 = vld [vmem:[%s4313_s2 + $0x50] sm:$0xff]  }
  0x1a   : > { %2984 = vmatpush3.bf16.msra.mxu1 %v3298_v19  ;;  %2945 = vmatprep.subr.bf16.mxu0 %v3299_v20  ;;  %v426_v10 = vrot.slane %v425_v0, 4  ;;  %v416_v12 = vrot.slane %v414_v2, 5  ;;  %v435_v13 = vrot.slane %v433_v3, 4  ;;  %v436_v14 = vshll.u32 %v3607_v52, 16  ;;  %v301_v53 = vld [vmem:[%s3576_s12 + $0x70] sm:$0x11] }
  0x1b   : > { %2985 = vmatprep.subr.bf16.mxu1 %v3300_v21  ;;  %v403_v15 = vsel %vm3617_vm2, %v398_v5, %v402_v49  ;;  %v454_v16 = vrot.slane %v453_v6, 4  ;;  %v411_v17 = vor.u32 %v410_v9, %v407_v8  ;;  %v442_v18 = vshll.u32 %v294_v59, 16  ;;  %v3685_v59 = vld [vmem:[%s3576_s12 + $0x68] sm:$0xff]  ;;  %v302_v60 = vld [vmem:[%s3576_s12 + $0x78] sm:$0x11] }
  0x1c   : > { %v3634_v19 = vsel %vm3617_vm2, %v426_v10, %v430_v54  ;;  %v438_v20 = vrot.slane %v436_v14, 5  ;;  %v461_v21 = vshrl.u32 %v3626_v7, 16  ;;  %v470_v37 = vshll.u32 %v298_v11, 16  ;;  %v3318_v8 = vld [vmem:[%s4313_s2 + $0x88] sm:$0xff]  }
  0x1d   : > { %2946 = vmatpush3.bf16.msra.mxu0 %v3301_v22  ;;  %v464_v22 = vshll.u32 %v3626_v7, 16  ;;  %v2747_v41 = vcombine.high %v3607_v52, %v3626_v7  ;;  %v2744_v47 = vcombine.low %v3589_v34, %v3593_v36  ;;  %v2746_v48 = vcombine.low %v3607_v52, %v3626_v7 }
  0x1e   : > { %2986 = vmatpush3.bf16.msra.mxu1 %v3302_v23  ;;  %2947 = vmatprep.subr.bf16.mxu0 %v3303_v24  ;;  %v3313_v23 = vld [vmem:[%s4313_s2] sm:$0xff]   ;;  %v3643_v24 = vsel %vm3617_vm2, %v454_v16, %v458_v1  ;;  %v463_v33 = vrot.slane %v461_v21, 4  ;;  %v472_v44 = vrot.slane %v470_v37, 5  ;;  %v475_v58 = vshrl.u32 %v3676_v51, 16  ;;  %v305_v37 = vld [vmem:[%s3576_s12 + $0x90] sm:$0x11] }
  0x1f   : > { %2987 = vmatprep.subr.bf16.mxu1 %v3304_v25  ;;  %v2584_v25 = vcombine.low %v403_v15, %v3634_v19  ;;  %v466_v35 = vrot.slane %v464_v22, 5  ;;  %v2857_v54 = vcombine.high %v3634_v19, %v3643_v24  ;;  %v484_v0 = vshll.u32 %v301_v53, 16  ;;  %v3323_v22 = vld [vmem:[%s4313_s2 + $0x58] sm:$0xff]  }
  0x20   : > { %v489_v1 = vshrl.u32 %v3685_v59, 16  ;;  %v492_v2 = vshll.u32 %v3685_v59, 16  ;;  %v498_v5 = vshll.u32 %v302_v60, 16  ;;  %v512_v53 = vshll.u32 %v305_v37, 16 }
  0x21   : > { %2948 = vmatpush3.bf16.msra.mxu0 %v3305_v26  ;;  %v2585_v26 = vcombine.high %v403_v15, %v3634_v19  ;;  %v467_v43 = vor.u32 %v466_v35, %v463_v33  ;;  %v486_v14 = vrot.slane %v484_v0, 5  ;;  %v3321_v15 = vld [vmem:[%s4313_s2 + $0x10] sm:$0xff]   ;;  %v3326_v33 = vld [vmem:[%s4313_s2 + $0x98] sm:$0xff]   ;;  %v3739_v35 = vld [vmem:[%s3576_s12 + $0x80] sm:$0xff] }
  0x22   : > { %2988 = vmatpush3.bf16.msra.mxu1 %v3306_v27  ;;  %2949 = vmatprep.subr.bf16.mxu0 %v3307_v28  ;;  %v412_v27 = vrot.slane %v411_v17, 4  ;;  %v3315_v28 = vld [vmem:[%s4313_s2 + $0x48] sm:$0xff]   ;;  %v491_v10 = vrot.slane %v489_v1, 4  ;;  %v494_v11 = vrot.slane %v492_v2, 5  ;;  %v310_v0 = vld [vmem:[%s3576_s12 + $0xb8] sm:$0x11] }
  0x23   : > { %2989 = vmatprep.subr.bf16.mxu1 %v3308_v29  ;;  %v2856_v29 = vcombine.low %v3634_v19, %v3643_v24  ;;  %967 = vmatprep.mubr.bf16.mxu0 %v2585_v26  ;;  %v468_v55 = vrot.slane %v467_v43, 4  ;;  %v3747_v43 = vld [vmem:[%s3576_s12 + $0xa0] sm:$0xff]  ;;  %v514_v2 = vrot.slane %v512_v53, 5 }
  0x24   : > { %v417_v38 = vsel %vm3617_vm2, %v412_v27, %v416_v12  ;;  %v3320_v12 = vld [vmem:[%s4313_s2 + $0xd0] sm:$0xff]   ;;  %v495_v17 = vor.u32 %v494_v11, %v491_v10  ;;  %v3325_v27 = vld [vmem:[%s4313_s2 + $0x18] sm:$0xff]  }
  0x25   : > { %2950 = vmatpush3.bf16.msra.mxu0 %v3309_v30  ;;  %v439_v30 = vor.u32 %v438_v20, %v435_v13  ;;  %v3696_v3 = vsel %vm3617_vm2, %v468_v55, %v472_v44  ;;  %v3322_v20 = vld [vmem:[%s4313_s2 + $0x90] sm:$0xff]   ;;  %v531_v55 = vshrl.u32 %v3747_v43, 16 }
  0x26   : > { %2990 = vmatpush3.bf16.msra.mxu1 %v3310_v31  ;;  %3015 = vmatprep.subr.bf16.mxu0 %v3311_v62  ;;  %v444_v31 = vrot.slane %v442_v18, 5  ;;  %v478_v62 = vshll.u32 %v3676_v51, 16  ;;  %v500_v18 = vrot.slane %v498_v5, 5  ;;  %v309_v44 = vld [vmem:[%s3576_s12 + $0xb0] sm:$0x11] }
  0x27   : > { %3055 = vmatprep.subr.bf16.mxu1 %v3312_v4  ;;  %v440_v39 = vrot.slane %v439_v30, 4  ;;  %v477_v4 = vrot.slane %v475_v58, 4  ;;  %v306_v58 = vld [vmem:[%s3576_s12 + $0x98] sm:$0x11] }
  0x28   : > { %968 = vmatmul.mubr.bf16.vlgmr.msra.gmra.mrb[0].mxu0 %v2584_v25  ;;  %v480_v9 = vrot.slane %v478_v62, 5  ;;  %v3324_v25 = vld [vmem:[%s4313_s2 + $0xd8] sm:$0xff]   ;;  %v3759_v62 = vld [vmem:[%s3576_s12 + $0xa8] sm:$0xff] }
  0x29   : > { %3016 = vmatpush3.bf16.msra.mxu0 %v3313_v23  ;;  %v3670_v49 = vsel %vm3617_vm2, %v440_v39, %v444_v31  ;;  %v496_v23 = vrot.slane %v495_v17, 4  ;;  %v548_v17 = vshll.u32 %v3759_v62, 16 }
  0x2a   : > { %3017 = vmatprep.subr.bf16.mxu0 %v3315_v28  ;;  %v2586_v56 = vcombine.low %v417_v38, %v3670_v49  ;;  %v2587_v57 = vcombine.high %v417_v38, %v3670_v49  ;;  %v2858_v6 = vcombine.low %v3670_v49, %v3696_v3  ;;  %v481_v13 = vor.u32 %v480_v9, %v477_v4 }
  0x2b   : > { %v2859_v16 = vcombine.high %v3670_v49, %v3696_v3  ;;  %v3731_v30 = vsel %vm3617_vm2, %v496_v23, %v500_v18  ;;  %v533_v4 = vrot.slane %v531_v55, 4  ;;  %v554_v18 = vshll.u32 %v310_v0, 16  ;;  %v3332_v0 = vld [vmem:[%s4313_s2 + $0xe8] sm:$0xff]  }
  0x2c   : > { %1032 = vmatprep.mubr.bf16.mxu1 %v2587_v57  ;;  %v482_v21 = vrot.slane %v481_v13, 4  ;;  %v2591_v38 = vcombine.high %v3696_v3, %v3731_v30  ;;  %v2590_v39 = vcombine.low %v3696_v3, %v3731_v30  ;;  %v540_v57 = vshll.u32 %v309_v44, 16  ;;  %v3327_v13 = vld [vmem:[%s4313_s2 + $0x60] sm:$0xff]  }
  0x2d   : > { %3018 = vmatpush3.bf16.msra.mxu0 %v3317_v46  ;;  %1033 = vmatmul.mubr.bf16.vlgmr.msra.gmra.mrb[0].mxu1 %v2586_v56  ;;  %v506_v46 = vshll.u32 %v3739_v35, 16  ;;  %v534_v56 = vshll.u32 %v3747_v43, 16 }
  0x2e   : > { %3019 = vmatprep.subr.bf16.mxu0 %v3319_v61  ;;  %3056 = vmatpush3.bf16.msra.mxu1 %v3314_v45  ;;  %v3722_v26 = vsel %vm3617_vm2, %v482_v21, %v486_v14  ;;  %v503_v45 = vshrl.u32 %v3739_v35, 16 }
  0x2f   : > { %3057 = vmatprep.subr.bf16.mxu1 %v3316_v50  ;;  %v2589_v28 = vcombine.high %v3643_v24, %v3722_v26  ;;  %v2588_v31 = vcombine.low %v3643_v24, %v3722_v26  ;;  %v3753_v50 = vld [vmem:[%s3576_s12 + $0x88] sm:$0xff]  ;;  %1040 = vmatprep.mubr.bf16.mxu1 %v2591_v38  ;;  %v508_v61 = vrot.slane %v506_v46, 5  ;;  %v536_v5 = vrot.slane %v534_v56, 5 }
  0x30   : > { %v505_v60 = vrot.slane %v503_v45, 4  ;;  %v517_v1 = vshrl.u32 %v3753_v50, 16  ;;  %v520_v11 = vshll.u32 %v3753_v50, 16  ;;  %v3330_v45 = vld [vmem:[%s4313_s2 + $0xa0] sm:$0xff]   ;;  %v2749_v46 = vcombine.high %v3676_v51, %v3739_v35 }
  0x31   : > { %3020 = vmatpush3.bf16.msra.mxu0 %v3321_v15  ;;  %975 = vmatprep.mubr.bf16.mxu0 %v2589_v28  ;;  %v537_v14 = vor.u32 %v536_v5, %v533_v4  ;;  %v545_v15 = vshrl.u32 %v3759_v62, 16  ;;  %v2751_v53 = vcombine.high %v3685_v59, %v3753_v50 }
  0x32   : > { %3058 = vmatpush3.bf16.msra.mxu1 %v3318_v8  ;;  %3021 = vmatprep.subr.bf16.mxu0 %v3323_v22  ;;  %v542_v8 = vrot.slane %v540_v57, 5  ;;  %v509_v9 = vor.u32 %v508_v61, %v505_v60  ;;  %v519_v10 = vrot.slane %v517_v1, 4  ;;  %v522_v22 = vrot.slane %v520_v11, 5  ;;  %v3823_v11 = vld [vmem:[%s3576_s12 + $0xc0] sm:$0xff] }
  0x33   : > { %3059 = vmatprep.subr.bf16.mxu1 %v3320_v12  ;;  %976 = vmatmul.mubr.bf16.gmra.mrb[4].mxu0 %v2588_v31  ;;  %v526_v12 = vshll.u32 %v306_v58, 16  ;;  %v547_v28 = vrot.slane %v545_v15, 4  ;;  %v550_v31 = vrot.slane %v548_v17, 5  ;;  %v3331_v58 = vld [vmem:[%s4313_s2 + $0x68] sm:$0xff]   ;;  %v2748_v60 = vcombine.low %v3676_v51, %v3739_v35 }
  0x34   : > { %v510_v21 = vrot.slane %v509_v9, 4  ;;  %v523_v38 = vor.u32 %v522_v22, %v519_v10  ;;  %v2750_v1 = vcombine.low %v3685_v59, %v3753_v50  ;;  %v3334_v10 = vld [vmem:[%s4313_s2 + $0xa8] sm:$0xff]   ;;  %v562_v22 = vshll.u32 %v3823_v11, 16 }
  0x35   : > { %3022 = vmatpush3.bf16.msra.mxu0 %v3325_v27  ;;  %1041 = vmatmul.mubr.bf16.gmra.mrb[4].mxu1 %v2590_v39  ;;  %v528_v23 = vrot.slane %v526_v12, 5  ;;  %v538_v27 = vrot.slane %v537_v14, 4  ;;  %v551_v44 = vor.u32 %v550_v31, %v547_v28  ;;  %v313_v12 = vld [vmem:[%s3576_s12 + $0xd0] sm:$0x11] }
  0x36   : > { %3060 = vmatpush3.bf16.msra.mxu1 %v3322_v20  ;;  %v3328_v20 = vld [vmem:[%s4313_s2 + $0xe0] sm:$0xff]   ;;  %3023 = vmatprep.subr.bf16.mxu0 %v3327_v13  ;;  %v3777_v37 = vsel %vm3617_vm2, %v510_v21, %v514_v2  ;;  %v524_v56 = vrot.slane %v523_v38, 4  ;;  %v559_v21 = vshrl.u32 %v3823_v11, 16 }
  0x37   : > { %3061 = vmatprep.subr.bf16.mxu1 %v3324_v25  ;;  %v3329_v25 = vld [vmem:[%s4313_s2 + $0x20] sm:$0xff]   ;;  %v3781_v39 = vsel %vm3617_vm2, %v538_v27, %v542_v8  ;;  %v552_v61 = vrot.slane %v551_v44, 4  ;;  %v2861_v2 = vcombine.high %v3722_v26, %v3777_v37  ;;  %v3333_v8 = vld [vmem:[%s4313_s2 + $0x28] sm:$0xff]   ;;  %v564_v44 = vrot.slane %v562_v22, 5 }
  0x38   : > { %v2593_v55 = vcombine.high %v3777_v37, %v3781_v39  ;;  %v2592_v57 = vcombine.low %v3777_v37, %v3781_v39  ;;  %v3810_v5 = vsel %vm3617_vm2, %v524_v56, %v528_v23  ;;  %v3841_v23 = vld [vmem:[%s3576_s12 + $0xc8] sm:$0xff]  ;;  %v561_v38 = vrot.slane %v559_v21, 4 }
  0x39   : > { %3024 = vmatpush3.bf16.msra.mxu0 %v3329_v25  ;;  %v2863_v13 = vcombine.high %v3731_v30, %v3810_v5  ;;  %v568_v25 = vshll.u32 %v313_v12, 16  ;;  %v573_v56 = vshrl.u32 %v3841_v23, 16  ;;  %v576_v12 = vshll.u32 %v3841_v23, 16 }
  0x3a   : > { %3062 = vmatpush3.bf16.msra.mxu1 %v3326_v33  ;;  %v556_v33 = vrot.slane %v554_v18, 5  ;;  %983 = vmatprep.mubr.bf16.mxu0 %v2593_v55  ;;  %v3835_v18 = vld [vmem:[%s3576_s12 + $0xe0] sm:$0xff]  ;;  %v318_v55 = vld [vmem:[%s3576_s12 + $0xf8] sm:$0x11] }
  0x3b   : > { %3063 = vmatprep.subr.bf16.mxu1 %v3328_v20  ;;  %3025 = vmatprep.subr.bf16.mxu0 %v3331_v58  ;;  %v317_v20 = vld [vmem:[%s3576_s12 + $0xf0] sm:$0x11]  ;;  %v587_v27 = vshrl.u32 %v3835_v18, 16  ;;  %v590_v28 = vshll.u32 %v3835_v18, 16  ;;  %v610_v4 = vshll.u32 %v318_v55, 16 }
  0x3c   : > { %v3817_v9 = vsel %vm3617_vm2, %v552_v61, %v556_v33  ;;  %984 = vmatmul.mubr.bf16.gmra.mrb[8].mxu0 %v2592_v57  ;;  %v596_v31 = vshll.u32 %v317_v20, 16  ;;  %v314_v33 = vld [vmem:[%s3576_s12 + $0xd8] sm:$0x11]  ;;  %v570_v57 = vrot.slane %v568_v25, 5 }
  0x3d   : > { %v2595_v15 = vcombine.high %v3810_v5, %v3817_v9  ;;  %v2594_v17 = vcombine.low %v3810_v5, %v3817_v9  ;;  %3026 = vmatpush3.bf16.msra.mxu0 %v3333_v8  ;;  %v589_v58 = vrot.slane %v587_v27, 4  ;;  %v592_v61 = vrot.slane %v590_v28, 5  ;;  %v3337_v28 = vld [vmem:[%s4313_s2 + $0x30] sm:$0xff]  }
  0x3e   : > { %3064 = vmatpush3.bf16.msra.mxu1 %v3330_v45  ;;  %v3847_v45 = vld [vmem:[%s3576_s12 + $0xe8] sm:$0xff]  ;;  %v565_v8 = vor.u32 %v564_v44, %v561_v38  ;;  %v582_v14 = vshll.u32 %v314_v33, 16  ;;  %v578_v27 = vrot.slane %v576_v12, 5  ;;  %v3338_v12 = vld [vmem:[%s4313_s2 + $0xb0] sm:$0xff]  }
  0x3f   : > { %3065 = vmatprep.subr.bf16.mxu1 %v3332_v0  ;;  %1048 = vmatprep.mubr.bf16.mxu1 %v2595_v15  ;;  %v598_v0 = vrot.slane %v596_v31, 5  ;;  %v3335_v15 = vld [vmem:[%s4313_s2 + $0x70] sm:$0xff]   ;;  %v593_v20 = vor.u32 %v592_v61, %v589_v58  ;;  %v601_v21 = vshrl.u32 %v3847_v45, 16  ;;  %v604_v22 = vshll.u32 %v3847_v45, 16 }
  0x40   : > { %1049 = vmatmul.mubr.bf16.gmra.mrb[8].mxu1 %v2594_v17  ;;  %v3336_v17 = vld [vmem:[%s4313_s2 + $0xf0] sm:$0xff]   ;;  %v566_v25 = vrot.slane %v565_v8, 4  ;;  %3027 = vmatprep.subr.bf16.mxu0 %v3335_v15  ;;  %v584_v33 = vrot.slane %v582_v14, 5  ;;  %v612_v8 = vrot.slane %v610_v4, 5  ;;  %v2633_v14 = vcombine.high %v3585_v32, %v3589_v34 }
  0x41   : > { %v594_v31 = vrot.slane %v593_v20, 4  ;;  %v603_v38 = vrot.slane %v601_v21, 4  ;;  %v606_v44 = vrot.slane %v604_v22, 5  ;;  %3028 = vmatpush3.bf16.msra.mxu0 %v3337_v28  ;;  %v2752_v4 = vcombine.low %v3747_v43, %v3823_v11  ;;  %v3340_v21 = vld [vmem:[%s4313_s2 + $0xf8] sm:$0xff]  }
  0x42   : > { %3066 = vmatpush3.bf16.msra.mxu1 %v3334_v10  ;;  %v575_v10 = vrot.slane %v573_v56, 4  ;;  %v3865_v56 = vsel %vm3617_vm2, %v566_v25, %v570_v57  ;;  %v2754_v22 = vcombine.low %v3759_v62, %v3841_v23  ;;  %v3341_v28 = vld [vmem:[%s4313_s2 + $0x38] sm:$0xff]  }
  0x43   : > { %3067 = vmatprep.subr.bf16.mxu1 %v3336_v17  ;;  %v3869_v58 = vsel %vm3617_vm2, %v594_v31, %v598_v0  ;;  %v607_v61 = vor.u32 %v606_v44, %v603_v38  ;;  %v3339_v0 = vld [vmem:[%s4313_s2 + $0x78] sm:$0xff]   ;;  %v2865_v17 = vcombine.high %v3781_v39, %v3865_v56  ;;  %v2864_v25 = vcombine.low %v3781_v39, %v3865_v56 }
  0x44   : > { %v579_v55 = vor.u32 %v578_v27, %v575_v10  ;;  %v2597_v15 = vcombine.high %v3865_v56, %v3869_v58  ;;  %v2596_v10 = vcombine.low %v3865_v56, %v3869_v58  ;;  %3029 = vmatprep.subr.bf16.mxu0 %v3339_v0  ;;  %v3342_v38 = vld [vmem:[%s4313_s2 + $0xb8] sm:$0xff]   ;;  %v3347_v0 = vld [vmem:[%s4313_s2 + $0x248] sm:$0xff]  }
  0x45   : > { %v608_v20 = vrot.slane %v607_v61, 4  ;;  %3030 = vmatpush3.bf16.msra.mxu0 %v3341_v28  ;;  %v3348_v28 = vld [vmem:[%s4313_s2 + $0x2c8] sm:$0xff]  }
  0x46   : > { %v580_v57 = vrot.slane %v579_v55, 4  ;;  %3068 = vmatpush3.bf16.msra.mxu1 %v3338_v12  ;;  %991 = vmatprep.mubr.bf16.mxu0 %v2597_v15  ;;  %v3343_v12 = vld [vmem:[%s4313_s2 + $0x240] sm:$0xff]  }
  0x47   : > { %v3903_v31 = vsel %vm3617_vm2, %v608_v20, %v612_v8  ;;  %992 = vmatmul.mubr.bf16.gmra.mrb[12].mxu0 %v2596_v10  ;;  %3069 = vmatprep.subr.bf16.mxu1 %v3340_v21  ;;  %v2635_v8 = vcombine.high %v3600_v42, %v3607_v52  ;;  %v3344_v15 = vld [vmem:[%s4313_s2 + $0x2c0] sm:$0xff]   ;;  %v2637_v10 = vcombine.high %v3593_v36, %v3676_v51  ;;  %v3349_v21 = vld [vmem:[%s4313_s2 + $0x208] sm:$0xff]  }
  0x48   : > { %v3896_v27 = vsel %vm3617_vm2, %v580_v57, %v584_v33  ;;  %1369 = vmatprep.mubr.bf16.mxu0 %v2633_v14  ;;  %3095 = vmatprep.subr.bf16.mxu0 %v3343_v12  ;;  %v2632_v57 = vcombine.low %v3585_v32, %v3589_v34  ;;  %v3345_v14 = vld [vmem:[%s4313_s2 + $0x200] sm:$0xff]   ;;  %v2634_v20 = vcombine.low %v3600_v42, %v3607_v52  ;;  %v3350_v42 = vld [vmem:[%s4313_s2 + $0x288] sm:$0xff]   ;;  %v3353_v12 = vld [vmem:[%s4313_s2 + $0x210] sm:$0xff]  }
  0x49   : > { %v2867_v44 = vcombine.high %v3817_v9, %v3896_v27  ;;  %v2866_v33 = vcombine.low %v3817_v9, %v3896_v27  ;;  %v2599_v55 = vcombine.high %v3896_v27, %v3903_v31  ;;  %v2598_v61 = vcombine.low %v3896_v27, %v3903_v31  ;;  %v3346_v32 = vld [vmem:[%s4313_s2 + $0x280] sm:$0xff]   ;;  %v3382_v34 = vld [vmem:[%s4313_s2 + $0x388] sm:$0xff]   ;;  %v3387_v52 = vld [vmem:[%s4313_s2 + $0x358] sm:$0xff]  }
  0x4a   : > { %3070 = vmatpush3.bf16.msra.mxu1 %v3342_v38  ;;  %v2639_v38 = vcombine.high %v3626_v7, %v3685_v59 }
  0x4b   : > { %1056 = vmatprep.mubr.bf16.mxu1 %v2599_v55  ;;  %3135 = vmatprep.subr.bf16.mxu1 %v3344_v15  ;;  %v3351_v55 = vld [vmem:[%s4313_s2 + $0x250] sm:$0xff]   ;;  %v3355_v15 = vld [vmem:[%s4313_s2 + $0x258] sm:$0xff]  }
  0x4c   : > { %1057 = vmatmul.mubr.bf16.gmra.mrb[12].mxu1 %v2598_v61  ;;  %v2636_v61 = vcombine.low %v3593_v36, %v3676_v51  ;;  %v3383_v36 = vld [vmem:[%s4313_s2 + $0x350] sm:$0xff]   ;;  %v2755_v51 = vcombine.high %v3759_v62, %v3841_v23 }
  0x4d   : > { %1434 = vmatprep.mubr.bf16.mxu1 %v2635_v8  ;;  %v3352_v8 = vld [vmem:[%s4313_s2 + $0x2d0] sm:$0xff]  }
  0x4f   : > { %1370 = vmatmul.mubr.bf16.vlgmr.msra.gmra.mrb[16].mxu0 %v2632_v57  ;;  %v2641_v57 = vcombine.high %v3739_v35, %v3747_v43 }
  0x50   : > { %3096 = vmatpush3.bf16.msra.mxu0 %v3345_v14  ;;  %1377 = vmatprep.mubr.bf16.mxu0 %v2637_v10  ;;  %v2638_v14 = vcombine.low %v3626_v7, %v3685_v59  ;;  %v3354_v10 = vld [vmem:[%s4313_s2 + $0x290] sm:$0xff]   ;;  %v2753_v7 = vcombine.high %v3747_v43, %v3823_v11  ;;  %v3395_v59 = vld [vmem:[%s4313_s2 + $0x368] sm:$0xff]  }
  0x51   : > { %3097 = vmatprep.subr.bf16.mxu0 %v3347_v0  ;;  %v3357_v0 = vld [vmem:[%s4313_s2 + $0x218] sm:$0xff]  }
  0x54   : > { %1435 = vmatmul.mubr.bf16.vlgmr.msra.gmra.mrb[16].mxu1 %v2634_v20  ;;  %3098 = vmatpush3.bf16.msra.mxu0 %v3349_v21  ;;  %v3356_v20 = vld [vmem:[%s4313_s2 + $0x2d8] sm:$0xff]  }
  0x55   : > { %3136 = vmatpush3.bf16.msra.mxu1 %v3346_v32  ;;  %1442 = vmatprep.mubr.bf16.mxu1 %v2639_v38  ;;  %v2643_v32 = vcombine.high %v3753_v50, %v3759_v62  ;;  %v3358_v21 = vld [vmem:[%s4313_s2 + $0x298] sm:$0xff]   ;;  %v2640_v38 = vcombine.low %v3739_v35, %v3747_v43  ;;  %v3396_v43 = vld [vmem:[%s4313_s2 + $0x3e8] sm:$0xff]  }
  0x56   : > { %3137 = vmatprep.subr.bf16.mxu1 %v3348_v28  ;;  %3099 = vmatprep.subr.bf16.mxu0 %v3351_v55  ;;  %v3359_v28 = vld [vmem:[%s4313_s2 + $0x260] sm:$0xff]   ;;  %v3390_v35 = vld [vmem:[%s4313_s2 + $0x398] sm:$0xff]  }
  0x57   : > { %1378 = vmatmul.mubr.bf16.gmra.mrb[20].mxu0 %v2636_v61  ;;  %v3361_v55 = vld [vmem:[%s4313_s2 + $0x220] sm:$0xff]   ;;  %v3363_v61 = vld [vmem:[%s4313_s2 + $0x268] sm:$0xff]  }
  0x58   : > { %3100 = vmatpush3.bf16.msra.mxu0 %v3353_v12  ;;  %1385 = vmatprep.mubr.bf16.mxu0 %v2641_v57  ;;  %v2642_v12 = vcombine.low %v3753_v50, %v3759_v62  ;;  %v3365_v57 = vld [vmem:[%s4313_s2 + $0x228] sm:$0xff]   ;;  %v3394_v50 = vld [vmem:[%s4313_s2 + $0x3a0] sm:$0xff]  }
  0x59   : > { %3138 = vmatpush3.bf16.msra.mxu1 %v3350_v42  ;;  %3101 = vmatprep.subr.bf16.mxu0 %v3355_v15  ;;  %v3360_v42 = vld [vmem:[%s4313_s2 + $0x2e0] sm:$0xff]  }
  0x5a   : > { %3139 = vmatprep.subr.bf16.mxu1 %v3352_v8  ;;  %v2645_v8 = vcombine.high %v3823_v11, %v3835_v18  ;;  %v3362_v15 = vld [vmem:[%s4313_s2 + $0x2a0] sm:$0xff]  }
  0x5c   : > { %1443 = vmatmul.mubr.bf16.gmra.mrb[20].mxu1 %v2638_v14  ;;  %3102 = vmatpush3.bf16.msra.mxu0 %v3357_v0  ;;  %v3364_v14 = vld [vmem:[%s4313_s2 + $0x2e8] sm:$0xff]  }
  0x5d   : > { %3140 = vmatpush3.bf16.msra.mxu1 %v3354_v10  ;;  %1450 = vmatprep.mubr.bf16.mxu1 %v2643_v32  ;;  %v2647_v10 = vcombine.high %v3841_v23, %v3847_v45  ;;  %v3366_v0 = vld [vmem:[%s4313_s2 + $0x2a8] sm:$0xff]   ;;  %v2644_v32 = vcombine.low %v3823_v11, %v3835_v18 }
  0x5e   : > { %3141 = vmatprep.subr.bf16.mxu1 %v3356_v20  ;;  %3103 = vmatprep.subr.bf16.mxu0 %v3359_v28  ;;  %v3367_v20 = vld [vmem:[%s4313_s2 + $0x270] sm:$0xff]  }
  0x5f   : > { %1386 = vmatmul.mubr.bf16.gmra.mrb[24].mxu0 %v2640_v38  ;;  %v3369_v28 = vld [vmem:[%s4313_s2 + $0x230] sm:$0xff]   ;;  %v3371_v38 = vld [vmem:[%s4313_s2 + $0x278] sm:$0xff]  }
  0x60   : > { %3104 = vmatpush3.bf16.msra.mxu0 %v3361_v55  ;;  %1393 = vmatprep.mubr.bf16.mxu0 %v2645_v8  ;;  %v3370_v55 = vld [vmem:[%s4313_s2 + $0x2b0] sm:$0xff]   ;;  %v3372_v8 = vld [vmem:[%s4313_s2 + $0x2f8] sm:$0xff]  }
  0x61   : > { %3142 = vmatpush3.bf16.msra.mxu1 %v3358_v21  ;;  %3105 = vmatprep.subr.bf16.mxu0 %v3363_v61  ;;  %v3368_v21 = vld [vmem:[%s4313_s2 + $0x2f0] sm:$0xff]   ;;  %v3373_v61 = vld [vmem:[%s4313_s2 + $0x238] sm:$0xff]  }
  0x62   : > { %3143 = vmatprep.subr.bf16.mxu1 %v3360_v42  ;;  %v2646_v42 = vcombine.low %v3841_v23, %v3847_v45  ;;  %v3405_v23 = vld [vmem:[%s4313_s2 + $0x338] sm:$0xff]  }
  0x64   : > { %1451 = vmatmul.mubr.bf16.gmra.mrb[24].mxu1 %v2642_v12  ;;  %3106 = vmatpush3.bf16.msra.mxu0 %v3365_v57  ;;  %v3374_v12 = vld [vmem:[%s4313_s2 + $0x2b8] sm:$0xff]   ;;  %v3376_v57 = vld [vmem:[%s4313_s2 + $0x3c0] sm:$0xff]  }
  0x65   : > { %3144 = vmatpush3.bf16.msra.mxu1 %v3362_v15  ;;  %1458 = vmatprep.mubr.bf16.mxu1 %v2647_v10  ;;  %v3375_v15 = vld [vmem:[%s4313_s2 + $0x340] sm:$0xff]  }
  0x66   : > { %3145 = vmatprep.subr.bf16.mxu1 %v3364_v14  ;;  %3107 = vmatprep.subr.bf16.mxu0 %v3367_v20  ;;  %v3377_v14 = vld [vmem:[%s4313_s2 + $0x300] sm:$0xff]   ;;  %v3385_v20 = vld [vmem:[%s4313_s2 + $0x310] sm:$0xff]  }
  0x67   : > { %1394 = vmatmul.mubr.bf16.gmra.mrb[28].mxu0 %v2644_v32  ;;  %v3378_v10 = vld [vmem:[%s4313_s2 + $0x380] sm:$0xff]  }
  0x68   : > { %3108 = vmatpush3.bf16.msra.mxu0 %v3369_v28  ;;  %1794 = vmatprep.mubr.bf16.mxu0 %v2745_v40  ;;  %v3379_v40 = vld [vmem:[%s4313_s2 + $0x348] sm:$0xff]   ;;  %v3392_v32 = vld [vmem:[%s4313_s2 + $0x3e0] sm:$0xff]  }
  0x69   : > { %3146 = vmatpush3.bf16.msra.mxu1 %v3366_v0  ;;  %3109 = vmatprep.subr.bf16.mxu0 %v3371_v38  ;;  %v3381_v0 = vld [vmem:[%s4313_s2 + $0x308] sm:$0xff]  }
  0x6a   : > { %3147 = vmatprep.subr.bf16.mxu1 %v3368_v21  ;;  %v3393_v21 = vld [vmem:[%s4313_s2 + $0x320] sm:$0xff]   ;;  %v320_v28 = vld [vmem:[%s4132_s23 + $0x8] sm:$0xff] }
  0x6b   : > { %v3397_v38 = vld [vmem:[%s4313_s2 + $0x328] sm:$0xff]   ;;  %v2759_v11 = vcombine.high %v3847_v45, %v320_v28  ;;  %v2758_v62 = vcombine.low %v3847_v45, %v320_v28  ;;  %v3406_v45 = vld [vmem:[%s4313_s2 + $0x3b8] sm:$0xff]  }
  0x6c   : > { %1459 = vmatmul.mubr.bf16.gmra.mrb[28].mxu1 %v2646_v42  ;;  %3110 = vmatpush3.bf16.msra.mxu0 %v3373_v61 }
  0x6d   : > { %3148 = vmatpush3.bf16.msra.mxu1 %v3370_v55  ;;  %1859 = vmatprep.mubr.bf16.mxu1 %v2747_v41  ;;  %v3380_v41 = vld [vmem:[%s4313_s2 + $0x3c8] sm:$0xff]  }
  0x6e   : > { %3149 = vmatprep.subr.bf16.mxu1 %v3372_v8  ;;  %3175 = vmatprep.subr.bf16.mxu0 %v3375_v15  ;;  %v3398_v55 = vld [vmem:[%s4313_s2 + $0x3a8] sm:$0xff]   ;;  %v3400_v8 = vld [vmem:[%s4313_s2 + $0x3f0] sm:$0xff]   ;;  %v3403_v15 = vld [vmem:[%s4313_s2 + $0x378] sm:$0xff]  }
  0x6f   : > { %1795 = vmatmul.mubr.bf16.vlgmr.msra.gmra.mrb[32].mxu0 %v2744_v47  ;;  %v3384_v47 = vld [vmem:[%s4313_s2 + $0x3d0] sm:$0xff]  }
  0x70   : > { %3176 = vmatpush3.bf16.msra.mxu0 %v3377_v14  ;;  %1802 = vmatprep.mubr.bf16.mxu0 %v2749_v46  ;;  %v3389_v46 = vld [vmem:[%s4313_s2 + $0x318] sm:$0xff]  }
  0x71   : > { %3150 = vmatpush3.bf16.msra.mxu1 %v3374_v12  ;;  %3177 = vmatprep.subr.bf16.mxu0 %v3379_v40  ;;  %v3401_v12 = vld [vmem:[%s4313_s2 + $0x330] sm:$0xff]   ;;  %v3404_v14 = vld [vmem:[%s4313_s2 + $0x3f8] sm:$0xff]   ;;  %v1915_v40 = vshrl.u32 %v320_v28, 16 }
  0x72   : > { %3215 = vmatprep.subr.bf16.mxu1 %v3376_v57 }
  0x74   : > { %1860 = vmatmul.mubr.bf16.vlgmr.msra.gmra.mrb[32].mxu1 %v2746_v48  ;;  %3178 = vmatpush3.bf16.msra.mxu0 %v3381_v0  ;;  %v3386_v48 = vld [vmem:[%s4313_s2 + $0x390] sm:$0xff]  }
  0x75   : > { %3216 = vmatpush3.bf16.msra.mxu1 %v3378_v10  ;;  %1867 = vmatprep.mubr.bf16.mxu1 %v2751_v53  ;;  %v3388_v53 = vld [vmem:[%s4313_s2 + $0x3d8] sm:$0xff]   ;;  %v1918_v10 = vshll.u32 %v320_v28, 16 }
  0x76   : > { %3217 = vmatprep.subr.bf16.mxu1 %v3380_v41  ;;  %3179 = vmatprep.subr.bf16.mxu0 %v3383_v36 }
  0x77   : > { %1803 = vmatmul.mubr.bf16.gmra.mrb[36].mxu0 %v2748_v60  ;;  %v3391_v60 = vld [vmem:[%s4313_s2 + $0x360] sm:$0xff]  }
  0x78   : > { %3180 = vmatpush3.bf16.msra.mxu0 %v3385_v20  ;;  %1810 = vmatprep.mubr.bf16.mxu0 %v2753_v7  ;;  %v1920_v20 = vrot.slane %v1918_v10, 5 }
  0x79   : > { %3218 = vmatpush3.bf16.msra.mxu1 %v3382_v34  ;;  %3181 = vmatprep.subr.bf16.mxu0 %v3387_v52  ;;  %v321_v34 = vld [vmem:[%s4132_s23 + $0x10] sm:$0x11]  ;;  %v322_v52 = vld [vmem:[%s4132_s23 + $0x18] sm:$0x11] }
  0x7a   : > { %3219 = vmatprep.subr.bf16.mxu1 %v3384_v47  ;;  %v1910_v36 = vshll.u32 %v321_v34, 16  ;;  %v1917_v47 = vrot.slane %v1915_v40, 4 }
  0x7c   : > { %1868 = vmatmul.mubr.bf16.gmra.mrb[36].mxu1 %v2750_v1  ;;  %3182 = vmatpush3.bf16.msra.mxu0 %v3389_v46  ;;  %v319_v1 = vld [vmem:[%s4132_s23] sm:$0xff]  ;;  %v1912_v24 = vrot.slane %v1910_v36, 5 }
  0x7d   : > { %3220 = vmatpush3.bf16.msra.mxu1 %v3386_v48  ;;  %1875 = vmatprep.mubr.bf16.mxu1 %v2755_v51  ;;  %v2757_v42 = vcombine.high %v3835_v18, %v319_v1  ;;  %v2756_v61 = vcombine.low %v3835_v18, %v319_v1  ;;  %v3402_v18 = vld [vmem:[%s4313_s2 + $0x3b0] sm:$0xff]   ;;  %v1904_v57 = vshll.u32 %v319_v1, 16 }
  0x7e   : > { %3221 = vmatprep.subr.bf16.mxu1 %v3388_v53  ;;  %3183 = vmatprep.subr.bf16.mxu0 %v3391_v60 }
  0x7f   : > { %1811 = vmatmul.mubr.bf16.gmra.mrb[40].mxu0 %v2752_v4  ;;  %v3399_v4 = vld [vmem:[%s4313_s2 + $0x370] sm:$0xff]   ;;  %v1906_v41 = vrot.slane %v1904_v57, 5 }
  0x80   : > { %3184 = vmatpush3.bf16.msra.mxu0 %v3393_v21  ;;  %1818 = vmatprep.mubr.bf16.mxu0 %v2757_v42 }
  0x81   : > { %3222 = vmatpush3.bf16.msra.mxu1 %v3390_v35  ;;  %3185 = vmatprep.subr.bf16.mxu0 %v3395_v59 }
  0x82   : > { %3223 = vmatprep.subr.bf16.mxu1 %v3392_v32 }
  0x84   : > { %1876 = vmatmul.mubr.bf16.gmra.mrb[40].mxu1 %v2754_v22  ;;  %3186 = vmatpush3.bf16.msra.mxu0 %v3397_v38  ;;  %v1901_v22 = vshrl.u32 %v319_v1, 16 }
  0x85   : > { %3224 = vmatpush3.bf16.msra.mxu1 %v3394_v50  ;;  %1883 = vmatprep.mubr.bf16.mxu1 %v2759_v11 }
  0x86   : > { %3225 = vmatprep.subr.bf16.mxu1 %v3396_v43  ;;  %3187 = vmatprep.subr.bf16.mxu0 %v3399_v4  ;;  %v1903_v0 = vrot.slane %v1901_v22, 4 }
  0x87   : > { %1819 = vmatmul.mubr.bf16.gmra.mrb[44].mxu0 %v2756_v61 }
  0x88   : > { %3188 = vmatpush3.bf16.msra.mxu0 %v3401_v12  ;;  %2253 = vmatprep.mubr.bf16.mxu0 %v2857_v54  ;;  %v1907_v54 = vor.u32 %v1906_v41, %v1903_v0 }
  0x89   : > { %3226 = vmatpush3.bf16.msra.mxu1 %v3398_v55  ;;  %3189 = vmatprep.subr.bf16.mxu0 %v3403_v15 }
  0x8a   : > { %3227 = vmatprep.subr.bf16.mxu1 %v3400_v8  ;;  %v1908_v19 = vrot.slane %v1907_v54, 4 }
  0x8c   : > { %1884 = vmatmul.mubr.bf16.gmra.mrb[44].mxu1 %v2758_v62  ;;  %3190 = vmatpush3.bf16.msra.mxu0 %v3405_v23  ;;  %v1913_v49 = vsel %vm3617_vm2, %v1908_v19, %v1912_v24 }
  0x8d   : > { %3228 = vmatpush3.bf16.msra.mxu1 %v3402_v18  ;;  %2318 = vmatprep.mubr.bf16.mxu1 %v2859_v16  ;;  %v1924_v16 = vshll.u32 %v322_v52, 16 }
  0x8e   : > { %3229 = vmatprep.subr.bf16.mxu1 %v3404_v14 }
  0x8f   : > { %2254 = vmatmul.mubr.bf16.vlgmr.msra.gmra.mrb[48].mxu0 %v2856_v29  ;;  %v1921_v29 = vor.u32 %v1920_v20, %v1917_v47 }
  0x90   : > { %2261 = vmatprep.mubr.bf16.mxu0 %v2861_v2  ;;  %v4318_v2 = vcombine.low %v3722_v26, %v3777_v37  ;;  %v2869_v26 = vcombine.high %v3869_v58, %v1913_v49 }
  0x91   : > { %3230 = vmatpush3.bf16.msra.mxu1 %v3406_v45  ;;  %v1922_v3 = vrot.slane %v1921_v29, 4 }
  0x94   : > { %2319 = vmatmul.mubr.bf16.vlgmr.msra.gmra.mrb[48].mxu1 %v2858_v6  ;;  %v1926_v6 = vrot.slane %v1924_v16, 5 }
  0x95   : > { %2326 = vmatprep.mubr.bf16.mxu1 %v2863_v13  ;;  %v4319_v13 = vcombine.low %v3731_v30, %v3810_v5  ;;  %v2868_v30 = vcombine.low %v3869_v58, %v1913_v49 }
  0x96   : > { %v1927_v37 = vsel %vm3617_vm2, %v1922_v3, %v1926_v6 }
  0x97   : > { %2262 = vmatmul.mubr.bf16.gmra.mrb[52].mxu0 %v4318_v2  ;;  %v2870_v5 = vcombine.low %v3903_v31, %v1927_v37 }
  0x98   : > { %2269 = vmatprep.mubr.bf16.mxu0 %v2865_v17  ;;  %v2871_v17 = vcombine.high %v3903_v31, %v1927_v37 }
  0x9c   : > { %2327 = vmatmul.mubr.bf16.gmra.mrb[52].mxu1 %v4319_v13 }
  0x9d   : > { %2334 = vmatprep.mubr.bf16.mxu1 %v2867_v44 }
  0x9f   : > { %2270 = vmatmul.mubr.bf16.gmra.mrb[56].mxu0 %v2864_v25 }
  0xa0   : > { %2277 = vmatprep.mubr.bf16.mxu0 %v2869_v26 }
  0xa4   : > { %2335 = vmatmul.mubr.bf16.gmra.mrb[56].mxu1 %v2866_v33 }
  0xa5   : > { %2342 = vmatprep.mubr.bf16.mxu1 %v2871_v17 }
  0xa7   : > { %2278 = vmatmul.mubr.bf16.gmra.mrb[60].mxu0 %v2868_v30 }
  0xac   : > { %2343 = vmatmul.mubr.bf16.gmra.mrb[60].mxu1 %v2870_v5 }
  0xfb   : > { %v2951_v63 = vpop.f32.mrb[0].mxu0 }
  0xfc   : > { %v2952_v44 = vpop.f32.mrb[1].mxu0 }
  0xfd   : > { %v2953_v7 = vadd.f32 %v2952_v44, %v2951_v63  ;;  %v2954_v48 = vpop.f32.mrb[2].mxu0 }
  0xfe   : > { %v2955_v39 = vpop.f32.mrb[3].mxu0 }
  0xff   : > { %v2956_v56 = vadd.f32 %v2955_v39, %v2954_v48 }
 0x100   : > { %v2991_v25 = vpop.f32.mrb[0].mxu1 }
 0x101   : > { %v2992_v46 = vpop.f32.mrb[1].mxu1 }
 0x102   : > { %v2993_v53 = vadd.f32 %v2992_v46, %v2991_v25  ;;  %v2994_v51 = vpop.f32.mrb[2].mxu1 }
 0x103   : > { %v2995_v35 = vpop.f32.mrb[3].mxu1 }
 0x104   : > { %v1035_v9 = vadd.f32 %v2993_v53, %v2953_v7  ;;  %v2996_v27 = vadd.f32 %v2995_v35, %v2994_v51 }
 0x106   : > { %v1038_v33 = vadd.f32 %v2996_v27, %v2956_v56  ;;  %v2957_v58 = vpop.f32.mrb[4].mxu0 }
 0x107   : > { %v2958_v32 = vpop.f32.mrb[5].mxu0 }
 0x108   : > { %v2997_v60 = vpop.f32.mrb[4].mxu1  ;;  %v2959_v21 = vadd.f32 %v2958_v32, %v2957_v58  ;;  %v2960_v59 = vpop.f32.mrb[6].mxu0 }
 0x109   : > { %v2998_v31 = vpop.f32.mrb[5].mxu1  ;;  %v2961_v28 = vpop.f32.mrb[7].mxu0 }
 0x10a   : > { %v2999_v50 = vadd.f32 %v2998_v31, %v2997_v60  ;;  %v3000_v1 = vpop.f32.mrb[6].mxu1  ;;  %v2962_v38 = vadd.f32 %v2961_v28, %v2960_v59 }
 0x10b   : > { %v3001_v42 = vpop.f32.mrb[7].mxu1 }
 0x10c   : > { %v1043_v43 = vadd.f32 %v2999_v50, %v2959_v21  ;;  %v3002_v11 = vadd.f32 %v3001_v42, %v3000_v1 }
 0x10e   : > { %v1046_v4 = vadd.f32 %v3002_v11, %v2962_v38 }
 0x10f   : > { %v2963_v55 = vpop.f32.mrb[8].mxu0 }
 0x110   : > { %v2964_v61 = vpop.f32.mrb[9].mxu0 }
 0x111   : > { %v2965_v8 = vadd.f32 %v2964_v61, %v2963_v55  ;;  %v2966_v12 = vpop.f32.mrb[10].mxu0 }
 0x112   : > { %v2967_v15 = vpop.f32.mrb[11].mxu0 }
 0x113   : > { %v3003_v62 = vpop.f32.mrb[8].mxu1  ;;  %v2968_v18 = vadd.f32 %v2967_v15, %v2966_v12 }
 0x114   : > { %v3004_v23 = vpop.f32.mrb[9].mxu1 }
 0x115   : > { %v3005_v22 = vadd.f32 %v3004_v23, %v3003_v62  ;;  %v3006_v57 = vpop.f32.mrb[10].mxu1 }
 0x116   : > { %v3007_v14 = vpop.f32.mrb[11].mxu1 }
 0x117   : > { %v1051_v45 = vadd.f32 %v3005_v22, %v2965_v8  ;;  %v3008_v40 = vadd.f32 %v3007_v14, %v3006_v57 }
 0x119   : > { %v1054_v10 = vadd.f32 %v3008_v40, %v2968_v18 }
 0x11a   : > { %v2969_v0 = vpop.f32.mrb[12].mxu0 }
 0x11b   : > { %v2970_v41 = vpop.f32.mrb[13].mxu0 }
 0x11c   : > { %v2971_v34 = vadd.f32 %v2970_v41, %v2969_v0  ;;  %v2972_v54 = vpop.f32.mrb[14].mxu0 }
 0x11d   : > { %v2973_v36 = vpop.f32.mrb[15].mxu0 }
 0x11e   : > { %v2974_v20 = vadd.f32 %v2973_v36, %v2972_v54 }
 0x11f   : > { %v3009_v47 = vpop.f32.mrb[12].mxu1 }
 0x120   : > { %v3010_v52 = vpop.f32.mrb[13].mxu1 }
 0x121   : > { %v3011_v19 = vadd.f32 %v3010_v52, %v3009_v47  ;;  %v3012_v24 = vpop.f32.mrb[14].mxu1 }
 0x122   : > { %v3013_v29 = vpop.f32.mrb[15].mxu1  ;;  %v3031_v49 = vpop.f32.mrb[16].mxu0 }
 0x123   : > { %v1059_v16 = vadd.f32 %v3011_v19, %v2971_v34  ;;  %v3014_v2 = vadd.f32 %v3013_v29, %v3012_v24  ;;  %v3032_v3 = vpop.f32.mrb[17].mxu0 }
 0x124   : > { %v3033_v13 = vadd.f32 %v3032_v3, %v3031_v49  ;;  %v3034_v26 = vpop.f32.mrb[18].mxu0 }
 0x125   : > { %v1062_v6 = vadd.f32 %v3014_v2, %v2974_v20  ;;  %v3035_v37 = vpop.f32.mrb[19].mxu0 }
 0x126   : > { %v1372_v30 = vadd.f32 %v3033_v13, %v1035_v9  ;;  %v3036_v5 = vadd.f32 %v3035_v37, %v3034_v26 }
 0x127   : > { %v3071_v17 = vpop.f32.mrb[16].mxu1 }
 0x128   : > { %v3072_v63 = vpop.f32.mrb[17].mxu1  ;;  %v1375_v48 = vadd.f32 %v3036_v5, %v1038_v33 }
 0x129   : > { %v3073_v44 = vadd.f32 %v3072_v63, %v3071_v17  ;;  %v3074_v7 = vpop.f32.mrb[18].mxu1 }
 0x12a   : > { %v3075_v39 = vpop.f32.mrb[19].mxu1  ;;  %v3037_v46 = vpop.f32.mrb[20].mxu0 }
 0x12b   : > { %v4231_v56 = vadd.f32 %v3073_v44, %v1372_v30  ;;  %v3076_v25 = vadd.f32 %v3075_v39, %v3074_v7  ;;  %v3038_v53 = vpop.f32.mrb[21].mxu0 }
 0x12c   : > { %v3039_v35 = vadd.f32 %v3038_v53, %v3037_v46  ;;  %v3040_v27 = vpop.f32.mrb[22].mxu0 }
 0x12d   : > { %v4233_v51 = vadd.f32 %v3076_v25, %v1375_v48  ;;  %v3041_v58 = vpop.f32.mrb[23].mxu0 }
 0x12e   : > { %v1380_v32 = vadd.f32 %v3039_v35, %v1043_v43  ;;  %v3042_v21 = vadd.f32 %v3041_v58, %v3040_v27 }
 0x12f   : > { %v3077_v60 = vpop.f32.mrb[20].mxu1 }
 0x130   : > { %v3078_v9 = vpop.f32.mrb[21].mxu1  ;;  %v1383_v50 = vadd.f32 %v3042_v21, %v1046_v4 }
 0x131   : > { %v3079_v31 = vadd.f32 %v3078_v9, %v3077_v60  ;;  %v3080_v59 = vpop.f32.mrb[22].mxu1 }
 0x132   : > { %v3081_v1 = vpop.f32.mrb[23].mxu1  ;;  %v3043_v38 = vpop.f32.mrb[24].mxu0 }
 0x133   : > { %v4235_v33 = vadd.f32 %v3079_v31, %v1380_v32  ;;  %v3082_v28 = vadd.f32 %v3081_v1, %v3080_v59  ;;  %v3044_v42 = vpop.f32.mrb[25].mxu0 }
 0x134   : > { %v3045_v55 = vadd.f32 %v3044_v42, %v3043_v38  ;;  %v3046_v61 = vpop.f32.mrb[26].mxu0 }
 0x135   : > { %v4237_v11 = vadd.f32 %v3082_v28, %v1383_v50  ;;  %v3047_v8 = vpop.f32.mrb[27].mxu0 }
 0x136   : > { %v1388_v15 = vadd.f32 %v3045_v55, %v1051_v45  ;;  %v3048_v62 = vadd.f32 %v3047_v8, %v3046_v61 }
 0x137   : > { %v3083_v12 = vpop.f32.mrb[24].mxu1 }
 0x138   : > { %v3084_v43 = vpop.f32.mrb[25].mxu1  ;;  %v1391_v22 = vadd.f32 %v3048_v62, %v1054_v10 }
 0x139   : > { %v3085_v18 = vadd.f32 %v3084_v43, %v3083_v12  ;;  %v3086_v23 = vpop.f32.mrb[26].mxu1 }
 0x13a   : > { %v3087_v57 = vpop.f32.mrb[27].mxu1  ;;  %v3049_v40 = vpop.f32.mrb[28].mxu0 }
 0x13b   : > { %v4239_v4 = vadd.f32 %v3085_v18, %v1388_v15  ;;  %v3088_v14 = vadd.f32 %v3087_v57, %v3086_v23  ;;  %v3050_v0 = vpop.f32.mrb[29].mxu0 }
 0x13c   : > { %v3051_v34 = vadd.f32 %v3050_v0, %v3049_v40  ;;  %v3052_v54 = vpop.f32.mrb[30].mxu0 }
 0x13d   : > { %v4241_v41 = vadd.f32 %v3088_v14, %v1391_v22  ;;  %v3053_v36 = vpop.f32.mrb[31].mxu0 }
 0x13e   : > { %v1396_v20 = vadd.f32 %v3051_v34, %v1059_v16  ;;  %v3054_v52 = vadd.f32 %v3053_v36, %v3052_v54 }
 0x13f   : > { %v3089_v47 = vpop.f32.mrb[28].mxu1 }
 0x140   : > { %v3090_v45 = vpop.f32.mrb[29].mxu1  ;;  %v1399_v29 = vadd.f32 %v3054_v52, %v1062_v6 }
 0x141   : > { %v3091_v19 = vadd.f32 %v3090_v45, %v3089_v47  ;;  %v3092_v24 = vpop.f32.mrb[30].mxu1 }
 0x142   : > { %v3093_v2 = vpop.f32.mrb[31].mxu1  ;;  %v3111_v3 = vpop.f32.mrb[32].mxu0 }
 0x143   : > { %v4243_v10 = vadd.f32 %v3091_v19, %v1396_v20  ;;  %v3094_v49 = vadd.f32 %v3093_v2, %v3092_v24  ;;  %v3112_v13 = vpop.f32.mrb[33].mxu0 }
 0x144   : > { %v3113_v37 = vadd.f32 %v3112_v13, %v3111_v3  ;;  %v3114_v17 = vpop.f32.mrb[34].mxu0 }
 0x145   : > { %v4245_v26 = vadd.f32 %v3094_v49, %v1399_v29  ;;  %v3115_v30 = vpop.f32.mrb[35].mxu0 }
 0x146   : > { %v3116_v63 = vadd.f32 %v3115_v30, %v3114_v17 }
 0x147   : > { %v3151_v5 = vpop.f32.mrb[32].mxu1 }
 0x148   : > { %v3152_v44 = vpop.f32.mrb[33].mxu1 }
 0x149   : > { %v3153_v16 = vadd.f32 %v3152_v44, %v3151_v5  ;;  %v3154_v7 = vpop.f32.mrb[34].mxu1 }
 0x14a   : > { %v3155_v48 = vpop.f32.mrb[35].mxu1  ;;  %v3117_v6 = vpop.f32.mrb[36].mxu0 }
 0x14b   : > { %v1862_v39 = vadd.f32 %v3153_v16, %v3113_v37  ;;  %v3156_v25 = vadd.f32 %v3155_v48, %v3154_v7  ;;  %v3118_v46 = vpop.f32.mrb[37].mxu0 }
 0x14c   : > { %v3119_v27 = vadd.f32 %v3118_v46, %v3117_v6  ;;  %v3120_v58 = vpop.f32.mrb[38].mxu0 }
 0x14d   : > { %v4248_v53 = vadd.f32 %v1862_v39, %v4231_v56  ;;  %v1865_v35 = vadd.f32 %v3156_v25, %v3116_v63  ;;  %v3121_v60 = vpop.f32.mrb[39].mxu0 }
 0x14e   : > { %v3122_v9 = vadd.f32 %v3121_v60, %v3120_v58 }
 0x14f   : > { %v4251_v32 = vadd.f32 %v1865_v35, %v4233_v51  ;;  %v3157_v21 = vpop.f32.mrb[36].mxu1 }
 0x150   : > { %v3158_v31 = vpop.f32.mrb[37].mxu1 }
 0x151   : > { %v3159_v59 = vadd.f32 %v3158_v31, %v3157_v21  ;;  %v3160_v50 = vpop.f32.mrb[38].mxu1 }
 0x152   : > { %v3161_v1 = vpop.f32.mrb[39].mxu1  ;;  %v3123_v42 = vpop.f32.mrb[40].mxu0 }
 0x153   : > { %v1870_v28 = vadd.f32 %v3159_v59, %v3119_v27  ;;  %v3162_v38 = vadd.f32 %v3161_v1, %v3160_v50  ;;  %v3124_v55 = vpop.f32.mrb[41].mxu0 }
 0x154   : > { %v3125_v8 = vadd.f32 %v3124_v55, %v3123_v42  ;;  %v3126_v12 = vpop.f32.mrb[42].mxu0 }
 0x155   : > { %v4254_v56 = vadd.f32 %v1870_v28, %v4235_v33  ;;  %v1873_v61 = vadd.f32 %v3162_v38, %v3122_v9  ;;  %v3127_v15 = vpop.f32.mrb[43].mxu0 }
 0x156   : > { %v3128_v43 = vadd.f32 %v3127_v15, %v3126_v12 }
 0x157   : > { %v4257_v51 = vadd.f32 %v1873_v61, %v4237_v11  ;;  %v3163_v62 = vpop.f32.mrb[40].mxu1 }
 0x158   : > { %v3164_v18 = vpop.f32.mrb[41].mxu1 }
 0x159   : > { %v3165_v23 = vadd.f32 %v3164_v18, %v3163_v62  ;;  %v3166_v22 = vpop.f32.mrb[42].mxu1 }
 0x15a   : > { %v3167_v57 = vpop.f32.mrb[43].mxu1  ;;  %v3129_v0 = vpop.f32.mrb[44].mxu0 }
 0x15b   : > { %v1878_v14 = vadd.f32 %v3165_v23, %v3125_v8  ;;  %v3168_v40 = vadd.f32 %v3167_v57, %v3166_v22  ;;  %v3130_v34 = vpop.f32.mrb[45].mxu0 }
 0x15c   : > { %v3131_v36 = vadd.f32 %v3130_v34, %v3129_v0  ;;  %v3132_v47 = vpop.f32.mrb[46].mxu0 }
 0x15d   : > { %v4260_v33 = vadd.f32 %v1878_v14, %v4239_v4  ;;  %v1881_v54 = vadd.f32 %v3168_v40, %v3128_v43  ;;  %v3133_v20 = vpop.f32.mrb[47].mxu0 }
 0x15e   : > { %v3134_v45 = vadd.f32 %v3133_v20, %v3132_v47 }
 0x15f   : > { %v4263_v11 = vadd.f32 %v1881_v54, %v4241_v41  ;;  %v3169_v52 = vpop.f32.mrb[44].mxu1 }
 0x160   : > { %v3170_v19 = vpop.f32.mrb[45].mxu1 }
 0x161   : > { %v3171_v24 = vadd.f32 %v3170_v19, %v3169_v52  ;;  %v3172_v29 = vpop.f32.mrb[46].mxu1 }
 0x162   : > { %v3173_v2 = vpop.f32.mrb[47].mxu1  ;;  %v3191_v13 = vpop.f32.mrb[48].mxu0 }
 0x163   : > { %v1886_v49 = vadd.f32 %v3171_v24, %v3131_v36  ;;  %v3174_v3 = vadd.f32 %v3173_v2, %v3172_v29  ;;  %v3192_v37 = vpop.f32.mrb[49].mxu0 }
 0x164   : > { %v3193_v30 = vadd.f32 %v3192_v37, %v3191_v13  ;;  %v3194_v5 = vpop.f32.mrb[50].mxu0 }
 0x165   : > { %v4266_v4 = vadd.f32 %v1886_v49, %v4243_v10  ;;  %v1889_v17 = vadd.f32 %v3174_v3, %v3134_v45  ;;  %v3195_v63 = vpop.f32.mrb[51].mxu0  ;;  %v4274_v10 = vld [vmem:[%s4314_s3] ss:$0 sm:$0xff] }
 0x166   : > { %v3196_v16 = vadd.f32 %v3195_v63, %v3194_v5 }
 0x167   : > { %v4269_v41 = vadd.f32 %v1889_v17, %v4245_v26  ;;  %v3231_v44 = vpop.f32.mrb[48].mxu1 }
 0x168   : > { %v3232_v7 = vpop.f32.mrb[49].mxu1 }
 0x169   : > { %v3233_v48 = vadd.f32 %v3232_v7, %v3231_v44  ;;  %v3234_v39 = vpop.f32.mrb[50].mxu1 }
 0x16a   : > { %v3235_v25 = vpop.f32.mrb[51].mxu1  ;;  %v3197_v35 = vpop.f32.mrb[52].mxu0 }
 0x16b   : > { %v2321_v6 = vadd.f32 %v3233_v48, %v3193_v30  ;;  %v3236_v46 = vadd.f32 %v3235_v25, %v3234_v39  ;;  %v3198_v27 = vpop.f32.mrb[53].mxu0 }
 0x16c   : > { %v3199_v60 = vadd.f32 %v3198_v27, %v3197_v35  ;;  %v3200_v21 = vpop.f32.mrb[54].mxu0 }
 0x16d   : > { %v2351_v58 = vadd.f32 %v2321_v6, %v4248_v53  ;;  %v2324_v26 = vadd.f32 %v3236_v46, %v3196_v16  ;;  %v3201_v9 = vpop.f32.mrb[55].mxu0 }
 0x16e   : > { %v3202_v1 = vadd.f32 %v3201_v9, %v3200_v21 }
 0x16f   : > { %v2366_v31 = vadd.f32 %v4274_v10, %v2351_v58  ;;  %v2352_v59 = vadd.f32 %v2324_v26, %v4251_v32  ;;  %v3237_v50 = vpop.f32.mrb[52].mxu1 }
 0x170   : > { %v3238_v28 = vpop.f32.mrb[53].mxu1 }
 0x171   : > { %v2367_v38 = vadd.f32 %v4274_v10, %v2352_v59  ;;  %v3239_v42 = vadd.f32 %v3238_v28, %v3237_v50  ;;  %v3240_v55 = vpop.f32.mrb[54].mxu1  ;;  %v2374_v8 = vmax.f32 %v2366_v31, 0.0 }
 0x172   : > { %v3241_v61 = vpop.f32.mrb[55].mxu1  ;;  %v3203_v62 = vpop.f32.mrb[56].mxu0 }
 0x173   : > { %v2375_v12 = vmax.f32 %v2367_v38, 0.0  ;;  %v2329_v53 = vadd.f32 %v3239_v42, %v3199_v60  ;;  %v3242_v15 = vadd.f32 %v3241_v61, %v3240_v55  ;;  %v3204_v32 = vpop.f32.mrb[57].mxu0 }
 0x174   : > { %v3205_v22 = vadd.f32 %v3204_v32, %v3203_v62  ;;  %v3206_v57 = vpop.f32.mrb[58].mxu0 }
 0x175   : > { %v2914_v43 = vpack.c.bf16 %v2375_v12, %v2374_v8  ;;  %v2353_v18 = vadd.f32 %v2329_v53, %v4254_v56  ;;  %v2332_v23 = vadd.f32 %v3242_v15, %v3202_v1  ;;  %v3207_v14 = vpop.f32.mrb[59].mxu0 }
 0x176   : > { %v3208_v54 = vadd.f32 %v3207_v14, %v3206_v57 }
 0x177   : > { %2915 = vst [vmem:[%s4284_s7] sm:$0xff] %v2914_v43   ;;  %v2368_v40 = vadd.f32 %v4274_v10, %v2353_v18  ;;  %v2354_v0 = vadd.f32 %v2332_v23, %v4257_v51  ;;  %v3243_v34 = vpop.f32.mrb[56].mxu1 }
 0x178   : > { %v3244_v36 = vpop.f32.mrb[57].mxu1 }
 0x179   : > { %v2369_v47 = vadd.f32 %v4274_v10, %v2354_v0  ;;  %v3245_v20 = vadd.f32 %v3244_v36, %v3243_v34  ;;  %v3246_v52 = vpop.f32.mrb[58].mxu1  ;;  %v2376_v19 = vmax.f32 %v2368_v40, 0.0 }
 0x17a   : > { %v3247_v45 = vpop.f32.mrb[59].mxu1  ;;  %v3209_v2 = vpop.f32.mrb[60].mxu0 }
 0x17b   : > { %v2377_v56 = vmax.f32 %v2369_v47, 0.0  ;;  %v2337_v24 = vadd.f32 %v3245_v20, %v3205_v22  ;;  %v3248_v29 = vadd.f32 %v3247_v45, %v3246_v52  ;;  %v3210_v49 = vpop.f32.mrb[61].mxu0 }
 0x17c   : > { %v3211_v51 = vadd.f32 %v3210_v49, %v3209_v2  ;;  %v3212_v17 = vpop.f32.mrb[62].mxu0 }
 0x17d   : > { %v2919_v3 = vpack.c.bf16 %v2377_v56, %v2376_v19  ;;  %v2355_v13 = vadd.f32 %v2337_v24, %v4260_v33  ;;  %v2340_v37 = vadd.f32 %v3248_v29, %v3208_v54  ;;  %v3213_v30 = vpop.f32.mrb[63].mxu0 }
 0x17e   : > { %v3214_v16 = vadd.f32 %v3213_v30, %v3212_v17 }
 0x17f   : > { %2932 = vst [vmem:[%s4284_s7 + $0x8] sm:$0xff] %v2919_v3   ;;  %v2370_v5 = vadd.f32 %v4274_v10, %v2355_v13  ;;  %v2356_v63 = vadd.f32 %v2340_v37, %v4263_v11  ;;  %v3249_v44 = vpop.f32.mrb[60].mxu1 }
 0x180   : > { %v3250_v7 = vpop.f32.mrb[61].mxu1 }
 0x181   : > { %v2371_v48 = vadd.f32 %v4274_v10, %v2356_v63  ;;  %v3251_v39 = vadd.f32 %v3250_v7, %v3249_v44  ;;  %v3252_v25 = vpop.f32.mrb[62].mxu1  ;;  %v2378_v33 = vmax.f32 %v2370_v5, 0.0 }
 0x182   : > { %v3253_v6 = vpop.f32.mrb[63].mxu1 }
 0x183   : > { %v2379_v46 = vmax.f32 %v2371_v48, 0.0  ;;  %v2345_v35 = vadd.f32 %v3251_v39, %v3211_v51  ;;  %v3254_v27 = vadd.f32 %v3253_v6, %v3252_v25 }
 0x185   : > { %v2924_v58 = vpack.c.bf16 %v2379_v46, %v2378_v33  ;;  %v2357_v26 = vadd.f32 %v2345_v35, %v4266_v4  ;;  %v2348_v60 = vadd.f32 %v3254_v27, %v3214_v16 }
 0x187   : > { %2933 = vst [vmem:[%s4284_s7 + $0x10] sm:$0xff] %v2924_v58   ;;  %v2372_v11 = vadd.f32 %v4274_v10, %v2357_v26  ;;  %v2358_v21 = vadd.f32 %v2348_v60, %v4269_v41 }
 0x189   : > { %v2373_v9 = vadd.f32 %v4274_v10, %v2358_v21  ;;  %v2380_v31 = vmax.f32 %v2372_v11, 0.0 }
 0x18b   : > { %v2381_v59 = vmax.f32 %v2373_v9, 0.0 }
 0x18d   : > { %v2929_v50 = vpack.c.bf16 %v2381_v59, %v2380_v31 }
 0x18f   : > { %2934 = vst [vmem:[%s4284_s7 + $0x18] sm:$0xff] %v2929_v50  }
 0x190 PF: > { %s14_s17 = sadd.s32 1, %s3429_s17   ;;  %s4320_s15 = smov %s3425_s16 }
 0x191   : > { %p11_p5 = scmp.ge.s32.totalorder %s14_s17, 4   ;;  %s4321_s16 = smov %s4323_s18 }
 0x193   :  { %13 = sbr.rel (!%p11_p5) target bundleno = 2 (0x2), region = 72 }

// kernel: content_encoder_forward.23
= control target key start
LH: loop header
LB: loop body
LE: loop exit
PB: predicated region body
PF: predicated region fallthrough
CT: control target
= control target key end

     0   :  { %s2986_s21 = smov 0   ;;  %s2988_s22 = smov 0   ;;  %s3535_s0 = inlined_call_operand.vmem [shape: bf16[2,16,10,128], index: 0, kind: input, shape index: {}, may-alias: {0,1}]   ;;  %s3536_s1 = inlined_call_operand.vmem [shape: bf16[2,16,10,128], index: 1, kind: input, shape index: {}, may-alias: {0,1}]   ;;  %s3537_s2 = inlined_call_operand.vmem [shape: bf16[9,128,128], index: 2, kind: input, shape index: {}]   ;;  %s3538_s3 = inlined_call_operand.vmem [shape: f32[1,128], index: 3, kind: input, shape index: {}]   ;;  %s3539_s4 = inlined_call_operand.vmem [shape: bf16[2,8,8,128], index: 4, kind: output, shape index: {0}]   ;;  %s3540_s5 = inlined_call_operand.vmem [shape: f32[2,1,128], index: 5, kind: output, shape index: {1}]   ;;  %s3541_s6 = inlined_call_operand.vmem [shape: f32[2,1,128], index: 6, kind: output, shape index: {2}]  }
   0x1   :  { %s2990_s23 = smov 0  }
   0x2 LB: > { %s29_s24 = sadd.s32 1, %s2944_s22  ;;  %p2142_p0 = scmp.ge.s32.totalorder %s2948_s23, 1  ;;  %s2948_s23 = sphi %s2990_s23, %s17_s23   ;;  %s2944_s22 = sphi %s2988_s22, %s3547_s22   ;;  %s2940_s21 = sphi %s2986_s21, %s3546_s21  }
   0x3   : > { %p31_p1 = scmp.ge.s32.totalorder %s29_s24, 2  ;;  %p261_p2 = scmp.lt.s32.totalorder %s2948_s23, 3 }
   0x5   : > { %s3549_s24 = smov (%p31_p1, %s29_s24), 0  ;;  %p262_p3 = pnand %p2142_p0, %p261_p2 }
   0x6   : > { %v2846_v0 = vld [vmem:[%s3537_s2 + $0x40] sm:$0xff] (!%p262_p3)   ;;  %v2848_v2 = vld [vmem:[%s3537_s2 + $0x48] sm:$0xff] (!%p262_p3)   ;;  %p318_p4 = scmp.lt.s32.totalorder (!%p262_p3), %s2940_s21, 1  ;;  %v2850_v4 = vld [vmem:[%s3537_s2 + $0x50] sm:$0xff] (!%p262_p3)   ;;  %vm394_vm0 = vsmask.f32 (!%p262_p3), 3328 }
   0x7   : > { %265 = sbr.rel (%p262_p3) target bundleno = 427 (0x1ab), region = 36  ;;  %v2847_v1 = vld [vmem:[%s3537_s2 + $0x100] sm:$0xff] (!%p262_p3)   ;;  %2525 = vmatprep.subr.bf16.mxu1 (!%p262_p3), %v2846_v0  ;;  %v2849_v3 = vld [vmem:[%s3537_s2 + $0x108] sm:$0xff] (!%p262_p3)   ;;  %v2851_v5 = vld [vmem:[%s3537_s2 + $0x110] sm:$0xff] (!%p262_p3)   ;;  %vm395_vm1 = vsmask.f32 (!%p262_p3), 7440 }
   0x8   : > { %2621 = vmatprep.subr.bf16.mxu0 (!%p262_p3), %v2847_v1  ;;  %2526 = vmatpush3.bf16.msra.mxu1 (!%p262_p3), %v2846_v0  ;;  %v2852_v6 = vld [vmem:[%s3537_s2 + $0x58] sm:$0xff] (!%p262_p3)   ;;  %v2854_v8 = vld [vmem:[%s3537_s2 + $0x60] sm:$0xff] (!%p262_p3)   ;;  %v2856_v10 = vld [vmem:[%s3537_s2 + $0x68] sm:$0xff] (!%p262_p3)   ;;  %vm800_vm3 = vcmask (!%p262_p3), 1042432   ;;  %vm801_vm4 = vcmask (!%p262_p3), 1046532  }
   0x9   : > { %2622 = vmatpush3.bf16.msra.mxu0 (!%p262_p3), %v2847_v1  ;;  %2527 = vmatprep.subr.bf16.mxu1 (!%p262_p3), %v2848_v2  ;;  %v2853_v7 = vld [vmem:[%s3537_s2 + $0x118] sm:$0xff] (!%p262_p3)   ;;  %v2855_v9 = vld [vmem:[%s3537_s2 + $0x120] sm:$0xff] (!%p262_p3)   ;;  %v2857_v14 = vld [vmem:[%s3537_s2 + $0x128] sm:$0xff] (!%p262_p3)  }
   0xa   : > { %2623 = vmatprep.subr.bf16.mxu0 (!%p262_p3), %v2849_v3  ;;  %v2858_v22 = vld [vmem:[%s3537_s2 + $0x70] sm:$0xff] (!%p262_p3)   ;;  %v2860_v38 = vld [vmem:[%s3537_s2 + $0x78] sm:$0xff] (!%p262_p3)   ;;  %vm3095_vm2 = vmor (!%p262_p3), %vm394_vm0, %vm395_vm1 }
   0xb   : > { %v2859_v23 = vld [vmem:[%s3537_s2 + $0x130] sm:$0xff] (!%p262_p3)   ;;  %v2861_v48 = vld [vmem:[%s3537_s2 + $0x138] sm:$0xff] (!%p262_p3)   ;;  %v2862_v62 = vld [vmem:[%s3537_s2] sm:$0xff] (!%p262_p3)  }
   0xc   : > { %2528 = vmatpush3.bf16.msra.mxu1 (!%p262_p3), %v2848_v2  ;;  %vm3218_vm5 = vmor (!%p262_p3), %vm800_vm3, %vm801_vm4  ;;  %v2890_v39 = vld [vmem:[%s3537_s2 + $0xa8] sm:$0xff] (!%p262_p3)  }
   0xd   : > { %2624 = vmatpush3.bf16.msra.mxu0 (!%p262_p3), %v2849_v3  ;;  %2529 = vmatprep.subr.bf16.mxu1 (!%p262_p3), %v2850_v4  ;;  %v2863_v3 = vld [vmem:[%s3537_s2 + $0x140] sm:$0xff] (!%p262_p3)  }
   0xe   : > { %s3551_s21 = smov (!%p318_p4, %s2940_s21), 1  ;;  %2625 = vmatprep.subr.bf16.mxu0 %v2851_v5 }
   0xf   : > { %s2389_s17 = sshll.u32 %s3551_s21, 7  ;;  %s2392_s18 = sshll.u32 %s3551_s21, 5 }
  0x10   : > { %2530 = vmatpush3.bf16.msra.mxu1 %v2850_v4  ;;  %s3042_s28 = scalar_lea.vmem %s3535_s0, %s2389_s17  ;;  %s3140_s29 = sadd.s32 64, %s2389_s17 }
  0x11   : > { %2626 = vmatpush3.bf16.msra.mxu0 %v2851_v5  ;;  %2531 = vmatprep.subr.bf16.mxu1 %v2852_v6  ;;  %v3048_v11 = vld [vmem:[%s3042_s28] sm:$0xf]  ;;  %v3051_v12 = vld [vmem:[%s3042_s28 + $0x4] sm:$0x1]  ;;  %v3054_v13 = vld [vmem:[%s3042_s28 + $0x8] sm:$0xf]  ;;  %s3180_s15 = scalar_lea.vmem %s3536_s1, %s3140_s29  ;;  %s349_s20 = scalar_lea.vmem %s3539_s4, %s2392_s18 }
  0x12   : > { %2627 = vmatprep.subr.bf16.mxu0 %v2853_v7  ;;  %v3060_v15 = vld [vmem:[%s3042_s28 + $0xc] sm:$0x1]  ;;  %v398_v16 = vshrl.u32 %v3048_v11, 16  ;;  %v401_v17 = vshll.u32 %v3048_v11, 16  ;;  %v407_v18 = vshll.u32 %v3051_v12, 16  ;;  %v412_v19 = vshrl.u32 %v3054_v13, 16  ;;  %s353_s26 = scalar_lea.vmem %s3540_s5, %s3551_s21  ;;  %s356_s30 = scalar_lea.vmem %s3541_s6, %s3551_s21 }
  0x13   : > { %v415_v20 = vshll.u32 %v3054_v13, 16  ;;  %v421_v21 = vshll.u32 %v3060_v15, 16  ;;  %v3075_v30 = vld [vmem:[%s3042_s28 + $0x10] sm:$0xf]  ;;  %v3078_v31 = vld [vmem:[%s3042_s28 + $0x14] sm:$0x1] }
  0x14   : > { %2532 = vmatpush3.bf16.msra.mxu1 %v2852_v6  ;;  %v400_v24 = vrot.slane %v398_v16, 4  ;;  %v403_v25 = vrot.slane %v401_v17, 5  ;;  %v409_v26 = vrot.slane %v407_v18, 5  ;;  %v414_v27 = vrot.slane %v412_v19, 4  ;;  %v3081_v33 = vld [vmem:[%s3042_s28 + $0x18] sm:$0xf] }
  0x15   : > { %2628 = vmatpush3.bf16.msra.mxu0 %v2853_v7  ;;  %2533 = vmatprep.subr.bf16.mxu1 %v2854_v8  ;;  %v417_v28 = vrot.slane %v415_v20, 5  ;;  %v423_v29 = vrot.slane %v421_v21, 5  ;;  %v3084_v34 = vld [vmem:[%s3042_s28 + $0x1c] sm:$0x1]  ;;  %v426_v35 = vshrl.u32 %v3075_v30, 16  ;;  %v429_v36 = vshll.u32 %v3075_v30, 16 }
  0x16   : > { %2629 = vmatprep.subr.bf16.mxu0 %v2855_v9  ;;  %v404_v32 = vor.u32 %v403_v25, %v400_v24  ;;  %v2241_v37 = vcombine.low %v3054_v13, %v3075_v30  ;;  %v435_v41 = vshll.u32 %v3078_v31, 16  ;;  %v440_v42 = vshrl.u32 %v3081_v33, 16  ;;  %v3107_v52 = vld [vmem:[%s3042_s28 + $0x20] sm:$0xf]  ;;  %v3112_v56 = vld [vmem:[%s3042_s28 + $0x24] sm:$0x1] }
  0x17   : > { %v418_v40 = vor.u32 %v417_v28, %v414_v27  ;;  %v443_v43 = vshll.u32 %v3081_v33, 16  ;;  %v428_v45 = vrot.slane %v426_v35, 4  ;;  %v431_v46 = vrot.slane %v429_v36, 5  ;;  %v2864_v17 = vld [vmem:[%s3537_s2 + $0x8] sm:$0xff]   ;;  %v2868_v35 = vld [vmem:[%s3537_s2 + $0x18] sm:$0xff]  }
  0x18   : > { %2534 = vmatpush3.bf16.msra.mxu1 %v2854_v8  ;;  %v405_v44 = vrot.slane %v404_v32, 4  ;;  %v449_v47 = vshll.u32 %v3084_v34, 16  ;;  %v442_v50 = vrot.slane %v440_v42, 4  ;;  %v437_v55 = vrot.slane %v435_v41, 5  ;;  %v2865_v24 = vld [vmem:[%s3537_s2 + $0x148] sm:$0xff]   ;;  %v2867_v32 = vld [vmem:[%s3537_s2 + $0x150] sm:$0xff]  }
  0x19   : > { %2630 = vmatpush3.bf16.msra.mxu0 %v2855_v9  ;;  %2535 = vmatprep.subr.bf16.mxu1 %v2856_v10  ;;  %v419_v49 = vrot.slane %v418_v40, 4  ;;  %v445_v51 = vrot.slane %v443_v43, 5  ;;  %v432_v54 = vor.u32 %v431_v46, %v428_v45  ;;  %v454_v60 = vshrl.u32 %v3107_v52, 16  ;;  %v3152_v25 = vld [vmem:[%s3042_s28 + $0x28] sm:$0xf] }
  0x1a   : > { %2631 = vmatprep.subr.bf16.mxu0 %v2857_v14  ;;  %v410_v53 = vsel %vm3095_vm2, %v405_v44, %v409_v26  ;;  %v451_v59 = vrot.slane %v449_v47, 5  ;;  %v457_v0 = vshll.u32 %v3107_v52, 16  ;;  %v463_v1 = vshll.u32 %v3112_v56, 16  ;;  %v3156_v27 = vld [vmem:[%s3042_s28 + $0x2c] sm:$0x1] }
  0x1b   : > { %v424_v57 = vsel %vm3095_vm2, %v419_v49, %v423_v29  ;;  %v446_v58 = vor.u32 %v445_v51, %v442_v50  ;;  %v433_v63 = vrot.slane %v432_v54, 4  ;;  %v456_v4 = vrot.slane %v454_v60, 4  ;;  %v3171_v42 = vld [vmem:[%s3042_s28 + $0x34] sm:$0x1]  ;;  %v2869_v54 = vld [vmem:[%s3537_s2 + $0x158] sm:$0xff]  }
  0x1c   : > { %2536 = vmatpush3.bf16.msra.mxu1 %v2856_v10  ;;  %v2165_v61 = vcombine.low %v410_v53, %v424_v57  ;;  %v459_v6 = vrot.slane %v457_v0, 5  ;;  %v2242_v7 = vcombine.low %v3081_v33, %v3107_v52  ;;  %v465_v16 = vrot.slane %v463_v1, 5  ;;  %v3186_v53 = vld [vmem:[%s3042_s28 + $0x38] sm:$0xf]  ;;  %v3201_v0 = vld [vmem:[%s3180_s15] sm:$0xf] }
  0x1d   : > { %2632 = vmatpush3.bf16.msra.mxu0 %v2857_v14  ;;  %2537 = vmatprep.subr.bf16.mxu1 %v2858_v22  ;;  %v447_v2 = vrot.slane %v446_v58, 4  ;;  %v438_v5 = vsel %vm3095_vm2, %v433_v63, %v437_v55  ;;  %v809_v19 = vrot.slane %v3060_v15, 5  ;;  %v813_v20 = vrot.slane %v3078_v31, 5  ;;  %v2870_v55 = vld [vmem:[%s3537_s2 + $0x20] sm:$0xff]   ;;  %v3195_v58 = vld [vmem:[%s3042_s28 + $0x3c] sm:$0x1] }
  0x1e   : > { %2633 = vmatprep.subr.bf16.mxu0 %v2859_v23  ;;  %2541 = vmatprep.mubr.bf16.mxu1 %v2165_v61  ;;  %v2269_v9 = vcombine.low %v424_v57, %v438_v5  ;;  %v460_v14 = vor.u32 %v459_v6, %v456_v4  ;;  %v2190_v26 = vrot.slane %v3054_v13, 9  ;;  %v468_v28 = vshrl.u32 %v3152_v25, 16  ;;  %v3204_v1 = vld [vmem:[%s3180_s15 + $0x4] sm:$0x1]  ;;  %v2873_v15 = vld [vmem:[%s3537_s2 + $0x168] sm:$0xff]  }
  0x1f   : > { %v452_v8 = vsel %vm3095_vm2, %v447_v2, %v451_v59  ;;  %v471_v29 = vshll.u32 %v3152_v25, 16  ;;  %v477_v36 = vshll.u32 %v3156_v27, 16  ;;  %v491_v45 = vshll.u32 %v3171_v42, 16 }
  0x20   : > { %2538 = vmatpush3.bf16.msra.mxu1 %v2858_v22  ;;  %v3131_v10 = vcombine.low %v438_v5, %v452_v8  ;;  %2637 = vmatprep.mubr.bf16.mxu0 %v2269_v9  ;;  %v461_v18 = vrot.slane %v460_v14, 4  ;;  %v2866_v22 = vld [vmem:[%s3537_s2 + $0x10] sm:$0xff]   ;;  %v470_v40 = vrot.slane %v468_v28, 4  ;;  %v2191_v46 = vrot.slane %v3075_v30, 9  ;;  %v2872_v28 = vld [vmem:[%s3537_s2 + $0x28] sm:$0xff]  }
  0x21   : > { %2634 = vmatpush3.bf16.msra.mxu0 %v2859_v23  ;;  %2539 = vmatprep.subr.bf16.mxu1 %v2860_v38  ;;  %v473_v41 = vrot.slane %v471_v29, 5  ;;  %v479_v49 = vrot.slane %v477_v36, 5  ;;  %v493_v57 = vrot.slane %v491_v45, 5  ;;  %v496_v59 = vshrl.u32 %v3186_v53, 16 }
  0x22   : > { %2635 = vmatprep.subr.bf16.mxu0 %v2861_v48  ;;  %v466_v21 = vsel %vm3095_vm2, %v461_v18, %v465_v16  ;;  %v499_v60 = vshll.u32 %v3186_v53, 16  ;;  %v505_v63 = vshll.u32 %v3195_v58, 16  ;;  %v1138_v4 = vshrl.u32 %v3201_v0, 16  ;;  %v2871_v16 = vld [vmem:[%s3537_s2 + $0x160] sm:$0xff]  }
  0x23   : > { %v2270_v23 = vcombine.low %v452_v8, %v466_v21  ;;  %v498_v2 = vrot.slane %v496_v59, 4  ;;  %v1141_v5 = vshll.u32 %v3201_v0, 16  ;;  %v1147_v14 = vshll.u32 %v3204_v1, 16  ;;  %v2879_v59 = vld [vmem:[%s3537_s2 + $0x80] sm:$0xff]  }
  0x24   : > { %2540 = vmatpush3.bf16.msra.mxu1 %v2860_v38  ;;  %v3168_v38 = vld [vmem:[%s3042_s28 + $0x30] sm:$0xf]  ;;  %v507_v9 = vrot.slane %v505_v63, 5  ;;  %v3240_v45 = vsel %vm3218_vm5, %v2190_v26, %v809_v19  ;;  %v805_v26 = vrot.slane %v3051_v12, 5  ;;  %v2192_v12 = vrot.slane %v3081_v33, 9 }
  0x25   : > { %2636 = vmatpush3.bf16.msra.mxu0 %v2861_v48  ;;  %2549 = vmatprep.subr.bf16.mxu1 %v2862_v62  ;;  %v482_v43 = vshrl.u32 %v3168_v38, 16  ;;  %v485_v44 = vshll.u32 %v3168_v38, 16  ;;  %v2243_v47 = vcombine.low %v3152_v25, %v3168_v38  ;;  %v474_v48 = vor.u32 %v473_v41, %v470_v40  ;;  %v3286_v63 = vld [vmem:[%s3180_s15 + $0x8] sm:$0xf] }
  0x26   : > { %2645 = vmatprep.subr.bf16.mxu0 %v2863_v3  ;;  %v1149_v41 = vrot.slane %v1147_v14, 5  ;;  %v2880_v14 = vld [vmem:[%s3537_s2 + $0x180] sm:$0xff]  }
  0x27   : > { %2542 = vmatmul.mubr.bf16.vlgmr.msra.gmra.mrb[0].mxu1 %v3131_v10  ;;  %v484_v50 = vrot.slane %v482_v43, 4  ;;  %v487_v51 = vrot.slane %v485_v44, 5  ;;  %v475_v61 = vrot.slane %v474_v48, 4  ;;  %v3246_v48 = vsel %vm3218_vm5, %v2191_v46, %v813_v20 }
  0x28   : > { %2550 = vmatpush3.bf16.msra.mxu1 %v2862_v62  ;;  %2638 = vmatmul.mubr.bf16.vlgmr.msra.gmra.mrb[0].mxu0 %v2270_v23  ;;  %v1143_v23 = vrot.slane %v1141_v5, 5  ;;  %v2298_v20 = vcombine.low %v3240_v45, %v3246_v48  ;;  %v817_v46 = vrot.slane %v3084_v34, 5  ;;  %v2193_v34 = vrot.slane %v3107_v52, 9  ;;  %v377_v5 = vld [vmem:[%s3180_s15 + $0xc] sm:$0x1] }
  0x29   : > { %2551 = vmatprep.subr.bf16.mxu1 %v2864_v17  ;;  %2646 = vmatpush3.bf16.msra.mxu0 %v2863_v3  ;;  %v488_v62 = vor.u32 %v487_v51, %v484_v50  ;;  %v501_v3 = vrot.slane %v499_v60, 5  ;;  %v480_v6 = vsel %vm3095_vm2, %v475_v61, %v479_v49  ;;  %v2874_v49 = vld [vmem:[%s3537_s2 + $0x30] sm:$0xff]   ;;  %v821_v51 = vrot.slane %v3112_v56, 5 }
  0x2a   : > { %2647 = vmatprep.subr.bf16.mxu0 %v2865_v24  ;;  %v2189_v56 = vrot.slane %v3048_v11, 9  ;;  %v2194_v60 = vrot.slane %v3152_v25, 9  ;;  %v825_v61 = vrot.slane %v3156_v27, 5  ;;  %v2882_v27 = vld [vmem:[%s3537_s2 + $0x88] sm:$0xff]  }
  0x2b   : > { %v489_v8 = vrot.slane %v488_v62, 4  ;;  %v502_v18 = vor.u32 %v501_v3, %v498_v2  ;;  %v2195_v62 = vrot.slane %v3168_v38, 9  ;;  %v1301_v2 = vrot.slane %v3204_v1, 5 }
  0x2c   : > { %2552 = vmatpush3.bf16.msra.mxu1 %v2864_v17  ;;  %v3214_v17 = vcombine.low %v466_v21, %v480_v6  ;;  %v2244_v21 = vcombine.low %v3186_v53, %v3201_v0  ;;  %v3292_v3 = vcombine.low %v3075_v30, %v3081_v33  ;;  %v3306_v1 = vsel %vm3218_vm5, %v2192_v12, %v817_v46  ;;  %v2907_v30 = vld [vmem:[%s3537_s2 + $0x1e0] sm:$0xff]   ;;  %v2921_v33 = vld [vmem:[%s3537_s2 + $0x218] sm:$0xff]  }
  0x2d   : > { %2553 = vmatprep.subr.bf16.mxu1 %v2866_v22  ;;  %2648 = vmatpush3.bf16.msra.mxu0 %v2865_v24  ;;  %v494_v29 = vsel %vm3095_vm2, %v489_v8, %v493_v57  ;;  %v503_v36 = vrot.slane %v502_v18, 4  ;;  %v2877_v57 = vld [vmem:[%s3537_s2 + $0x178] sm:$0xff]   ;;  %v3302_v8 = vcombine.low %v3107_v52, %v3152_v25  ;;  %v3353_v46 = vcombine.low %v3168_v38, %v3186_v53  ;;  %v2888_v24 = vld [vmem:[%s3537_s2 + $0xa0] sm:$0xff]   ;;  %v2924_v25 = vld [vmem:[%s3537_s2 + $0x230] sm:$0xff]  }
  0x2e   : > { %2649 = vmatprep.subr.bf16.mxu0 %v2867_v32  ;;  %2545 = vmatprep.mubr.bf16.mxu1 %v3214_v17  ;;  %v2922_v52 = vld [vmem:[%s3537_s2 + $0x220] sm:$0xff]   ;;  %v2925_v38 = vld [vmem:[%s3537_s2 + $0x238] sm:$0xff]  }
  0x2f   : > { %v508_v43 = vsel %vm3095_vm2, %v503_v36, %v507_v9  ;;  %v1750_v9 = vrot.slane %v377_v5, 5  ;;  %v1596_v36 = vshll.u32 %v3286_v63, 16 }
  0x30   : > { %2554 = vmatpush3.bf16.msra.mxu1 %v2866_v22  ;;  %v1140_v22 = vrot.slane %v1138_v4, 4  ;;  %v3251_v50 = vcombine.low %v494_v29, %v508_v43  ;;  %v829_v4 = vrot.slane %v3171_v42, 5  ;;  %v3310_v42 = vsel %vm3218_vm5, %v2193_v34, %v821_v51  ;;  %v2885_v34 = vld [vmem:[%s3537_s2 + $0x190] sm:$0xff]  }
  0x31   : > { %2555 = vmatprep.subr.bf16.mxu1 %v2868_v35  ;;  %2650 = vmatpush3.bf16.msra.mxu0 %v2867_v32  ;;  %v2177_v32 = vcombine.low %v3048_v11, %v3054_v13  ;;  %v2281_v11 = vrot.slane %v3201_v0, 9  ;;  %v2908_v13 = vld [vmem:[%s3537_s2 + $0xe8] sm:$0xff]  }
  0x32   : > { %2651 = vmatprep.subr.bf16.mxu0 %v2869_v54  ;;  %v1144_v40 = vor.u32 %v1143_v23, %v1140_v22  ;;  %2546 = vmatmul.mubr.bf16.gmra.mrb[4].mxu1 %v3251_v50  ;;  %v1593_v22 = vshrl.u32 %v3286_v63, 16  ;;  %v2884_v23 = vld [vmem:[%s3537_s2 + $0x90] sm:$0xff]  }
  0x33   : > { %2565 = vmatprep.mubr.bf16.mxu1 %v2177_v32 }
  0x34   : > { %2556 = vmatpush3.bf16.msra.mxu1 %v2868_v35  ;;  %v2271_v35 = vcombine.low %v480_v6, %v494_v29  ;;  %v1145_v44 = vrot.slane %v1144_v40, 4  ;;  %v2360_v6 = vrot.slane %v3286_v63, 9  ;;  %v3334_v29 = vsel %vm3218_vm5, %v2195_v62, %v829_v4  ;;  %v2896_v62 = vld [vmem:[%s3537_s2 + $0xb8] sm:$0xff]  }
  0x35   : > { %2557 = vmatprep.subr.bf16.mxu1 %v2870_v55  ;;  %2652 = vmatpush3.bf16.msra.mxu0 %v2869_v54  ;;  %v2876_v54 = vld [vmem:[%s3537_s2 + $0x38] sm:$0xff]   ;;  %v2299_v40 = vcombine.low %v3306_v1, %v3310_v42  ;;  %v1595_v32 = vrot.slane %v1593_v22, 4  ;;  %v3404_v4 = vcombine.low %v3246_v48, %v3306_v1  ;;  %v2902_v48 = vld [vmem:[%s3537_s2 + $0xd0] sm:$0xff]   ;;  %v2906_v22 = vld [vmem:[%s3537_s2 + $0xe0] sm:$0xff]  }
  0x36   : > { %2641 = vmatprep.mubr.bf16.mxu0 %v2271_v35  ;;  %2653 = vmatprep.subr.bf16.mxu0 %v2871_v16  ;;  %v3258_v31 = vsel %vm3095_vm2, %v1145_v44, %v1149_v41  ;;  %v3321_v18 = vsel %vm3218_vm5, %v2360_v6, %v1750_v9  ;;  %v2196_v41 = vrot.slane %v3186_v53, 9  ;;  %v806_v44 = vsel %vm3218_vm5, %v2189_v56, %v805_v26  ;;  %v2900_v6 = vld [vmem:[%s3537_s2 + $0xc8] sm:$0xff]  }
  0x37   : > { %v2272_v19 = vcombine.low %v508_v43, %v3258_v31  ;;  %v833_v43 = vrot.slane %v3195_v58, 5  ;;  %v2213_v58 = vcombine.low %v806_v44, %v3240_v45  ;;  %v2901_v9 = vld [vmem:[%s3537_s2 + $0x1c8] sm:$0xff]  }
  0x38   : > { %2558 = vmatpush3.bf16.msra.mxu1 %v2870_v55  ;;  %v2875_v55 = vld [vmem:[%s3537_s2 + $0x170] sm:$0xff]  }
  0x39   : > { %2559 = vmatprep.subr.bf16.mxu1 %v2872_v28  ;;  %2654 = vmatpush3.bf16.msra.mxu0 %v2871_v16  ;;  %v3317_v16 = vsel %vm3218_vm5, %v2281_v11, %v1301_v2  ;;  %v2894_v11 = vld [vmem:[%s3537_s2 + $0x1b0] sm:$0xff]   ;;  %v2898_v2 = vld [vmem:[%s3537_s2 + $0xc0] sm:$0xff]  }
  0x3a   : > { %2655 = vmatprep.subr.bf16.mxu0 %v2873_v15  ;;  %2642 = vmatmul.mubr.bf16.gmra.mrb[4].mxu0 %v2272_v19  ;;  %v2377_v35 = vcombine.low %v3317_v16, %v3321_v18 }
  0x3b   : > { %2661 = vmatprep.mubr.bf16.mxu0 %v2298_v20  ;;  %v1602_v20 = vshll.u32 %v377_v5, 16 }
  0x3c   : > { %2560 = vmatpush3.bf16.msra.mxu1 %v2872_v28  ;;  %v3330_v28 = vsel %vm3218_vm5, %v2194_v60, %v825_v61  ;;  %v2893_v60 = vld [vmem:[%s3537_s2 + $0xb0] sm:$0xff]   ;;  %v2891_v61 = vld [vmem:[%s3537_s2 + $0x1a8] sm:$0xff]  }
  0x3d   : > { %2561 = vmatprep.subr.bf16.mxu1 %v2874_v49  ;;  %2656 = vmatpush3.bf16.msra.mxu0 %v2873_v15  ;;  %v2883_v15 = vld [vmem:[%s3537_s2 + $0x188] sm:$0xff]   ;;  %v2300_v19 = vcombine.low %v3330_v28, %v3334_v29  ;;  %v1604_v26 = vrot.slane %v1602_v20, 5  ;;  %v3408_v5 = vcombine.low %v3310_v42, %v3330_v28  ;;  %v2904_v42 = vld [vmem:[%s3537_s2 + $0xd8] sm:$0xff]  }
  0x3e   : > { %2657 = vmatprep.subr.bf16.mxu0 %v2875_v55  ;;  %v2913_v28 = vld [vmem:[%s3537_s2 + $0xf8] sm:$0xff]  }
  0x40   : > { %2562 = vmatpush3.bf16.msra.mxu1 %v2874_v49  ;;  %v1598_v49 = vrot.slane %v1596_v36, 5  ;;  %v2914_v36 = vld [vmem:[%s3537_s2 + $0x1f8] sm:$0xff]  }
  0x41   : > { %2563 = vmatprep.subr.bf16.mxu1 %v2876_v54  ;;  %2658 = vmatpush3.bf16.msra.mxu0 %v2875_v55  ;;  %v834_v55 = vsel %vm3218_vm5, %v2196_v41, %v833_v43  ;;  %v2920_v41 = vld [vmem:[%s3537_s2 + $0x210] sm:$0xff]  }
  0x42   : > { %2659 = vmatprep.subr.bf16.mxu0 %v2877_v57  ;;  %v1599_v51 = vor.u32 %v1598_v49, %v1595_v32  ;;  %v2301_v56 = vcombine.low %v834_v55, %v3317_v16  ;;  %v3425_v1 = vcombine.low %v3334_v29, %v834_v55  ;;  %v2917_v29 = vld [vmem:[%s3537_s2 + $0x200] sm:$0xff]  }
  0x44   : > { %2564 = vmatpush3.bf16.msra.mxu1 %v2876_v54  ;;  %v2886_v54 = vld [vmem:[%s3537_s2 + $0x98] sm:$0xff]   ;;  %v1600_v12 = vrot.slane %v1599_v51, 4 }
  0x45   : > { %2573 = vmatprep.subr.bf16.mxu1 %v2879_v59  ;;  %2660 = vmatpush3.bf16.msra.mxu0 %v2877_v57 }
  0x46   : > { %2669 = vmatprep.subr.bf16.mxu0 %v2880_v14  ;;  %v1605_v45 = vsel %vm3095_vm2, %v1600_v12, %v1604_v26 }
  0x47   : > { %2566 = vmatmul.mubr.bf16.vlgmr.msra.gmra.mrb[0].mxu1 %v3292_v3  ;;  %v3369_v57 = vcombine.low %v3258_v31, %v1605_v45  ;;  %v2889_v31 = vld [vmem:[%s3537_s2 + $0x1a0] sm:$0xff]  }
  0x48   : > { %2574 = vmatpush3.bf16.msra.mxu1 %v2879_v59  ;;  %2569 = vmatprep.mubr.bf16.mxu1 %v3302_v8  ;;  %v2887_v59 = vld [vmem:[%s3537_s2 + $0x198] sm:$0xff]  }
  0x49   : > { %2575 = vmatprep.subr.bf16.mxu1 %v2882_v27  ;;  %2662 = vmatmul.mubr.bf16.vlgmr.msra.gmra.mrb[0].mxu0 %v2299_v40  ;;  %v2918_v40 = vld [vmem:[%s3537_s2 + $0x208] sm:$0xff]  }
  0x4a   : > { %2670 = vmatpush3.bf16.msra.mxu0 %v2880_v14  ;;  %2665 = vmatprep.mubr.bf16.mxu0 %v2300_v19  ;;  %v2903_v14 = vld [vmem:[%s3537_s2 + $0x1d0] sm:$0xff]  }
  0x4b   : > { %2671 = vmatprep.subr.bf16.mxu0 %v2883_v15 }
  0x4c   : > { %2576 = vmatpush3.bf16.msra.mxu1 %v2882_v27  ;;  %v2899_v27 = vld [vmem:[%s3537_s2 + $0x1c0] sm:$0xff]  }
  0x4d   : > { %2577 = vmatprep.subr.bf16.mxu1 %v2884_v23 }
  0x4e   : > { %2672 = vmatpush3.bf16.msra.mxu0 %v2883_v15 }
  0x4f   : > { %2570 = vmatmul.mubr.bf16.gmra.mrb[4].mxu1 %v3353_v46  ;;  %2673 = vmatprep.subr.bf16.mxu0 %v2885_v34 }
  0x50   : > { %2578 = vmatpush3.bf16.msra.mxu1 %v2884_v23  ;;  %2589 = vmatprep.mubr.bf16.mxu1 %v2213_v58  ;;  %v2905_v23 = vld [vmem:[%s3537_s2 + $0x1d8] sm:$0xff]  }
  0x51   : > { %2579 = vmatprep.subr.bf16.mxu1 %v2886_v54  ;;  %2666 = vmatmul.mubr.bf16.gmra.mrb[4].mxu0 %v2301_v56 }
  0x52   : > { %2674 = vmatpush3.bf16.msra.mxu0 %v2885_v34  ;;  %2685 = vmatprep.mubr.bf16.mxu0 %v3292_v3  ;;  %v2897_v3 = vld [vmem:[%s3537_s2 + $0x1b8] sm:$0xff]  }
  0x53   : > { %2675 = vmatprep.subr.bf16.mxu0 %v2887_v59 }
  0x54   : > { %2580 = vmatpush3.bf16.msra.mxu1 %v2886_v54  ;;  %v2386_v54 = vld [vmem:[%s3538_s3] ss:$0 sm:$0xff] }
  0x55   : > { %2581 = vmatprep.subr.bf16.mxu1 %v2888_v24 }
  0x56   : > { %2676 = vmatpush3.bf16.msra.mxu0 %v2887_v59 }
  0x57   : > { %2677 = vmatprep.subr.bf16.mxu0 %v2889_v31 }
  0x58   : > { %2582 = vmatpush3.bf16.msra.mxu1 %v2888_v24 }
  0x59   : > { %2583 = vmatprep.subr.bf16.mxu1 %v2890_v39 }
  0x5a   : > { %2678 = vmatpush3.bf16.msra.mxu0 %v2889_v31 }
  0x5b   : > { %2679 = vmatprep.subr.bf16.mxu0 %v2891_v61 }
  0x5c   : > { %2584 = vmatpush3.bf16.msra.mxu1 %v2890_v39 }
  0x5d   : > { %2585 = vmatprep.subr.bf16.mxu1 %v2893_v60 }
  0x5e   : > { %2680 = vmatpush3.bf16.msra.mxu0 %v2891_v61 }
  0x5f   : > { %2681 = vmatprep.subr.bf16.mxu0 %v2894_v11 }
  0x60   : > { %2586 = vmatpush3.bf16.msra.mxu1 %v2893_v60 }
  0x61   : > { %2587 = vmatprep.subr.bf16.mxu1 %v2896_v62 }
  0x62   : > { %2682 = vmatpush3.bf16.msra.mxu0 %v2894_v11 }
  0x63   : > { %2683 = vmatprep.subr.bf16.mxu0 %v2897_v3 }
  0x64   : > { %2588 = vmatpush3.bf16.msra.mxu1 %v2896_v62 }
  0x65   : > { %2597 = vmatprep.subr.bf16.mxu1 %v2898_v2 }
  0x66   : > { %2684 = vmatpush3.bf16.msra.mxu0 %v2897_v3 }
  0x67   : > { %2590 = vmatmul.mubr.bf16.vlgmr.msra.gmra.mrb[0].mxu1 %v3404_v4  ;;  %2693 = vmatprep.subr.bf16.mxu0 %v2899_v27 }
  0x68   : > { %2598 = vmatpush3.bf16.msra.mxu1 %v2898_v2  ;;  %2593 = vmatprep.mubr.bf16.mxu1 %v3408_v5 }
  0x69   : > { %2599 = vmatprep.subr.bf16.mxu1 %v2900_v6  ;;  %2686 = vmatmul.mubr.bf16.vlgmr.msra.gmra.mrb[0].mxu0 %v3302_v8  ;;  %v2326_v8 = vcombine.low %v3201_v0, %v3286_v63  ;;  %v2909_v63 = vld [vmem:[%s3537_s2 + $0x1e8] sm:$0xff]  }
  0x6a   : > { %2694 = vmatpush3.bf16.msra.mxu0 %v2899_v27  ;;  %2689 = vmatprep.mubr.bf16.mxu0 %v3353_v46 }
  0x6b   : > { %2695 = vmatprep.subr.bf16.mxu0 %v2901_v9 }
  0x6c   : > { %2600 = vmatpush3.bf16.msra.mxu1 %v2900_v6 }
  0x6d   : > { %2601 = vmatprep.subr.bf16.mxu1 %v2902_v48 }
  0x6e   : > { %2696 = vmatpush3.bf16.msra.mxu0 %v2901_v9 }
  0x6f   : > { %2594 = vmatmul.mubr.bf16.gmra.mrb[4].mxu1 %v3425_v1  ;;  %2697 = vmatprep.subr.bf16.mxu0 %v2903_v14 }
  0x70   : > { %2602 = vmatpush3.bf16.msra.mxu1 %v2902_v48  ;;  %2613 = vmatprep.mubr.bf16.mxu1 %v2241_v37  ;;  %v2910_v37 = vld [vmem:[%s3537_s2 + $0xf0] sm:$0xff]  }
  0x71   : > { %2603 = vmatprep.subr.bf16.mxu1 %v2904_v42  ;;  %2690 = vmatmul.mubr.bf16.gmra.mrb[4].mxu0 %v2326_v8 }
  0x72   : > { %2698 = vmatpush3.bf16.msra.mxu0 %v2903_v14  ;;  %2709 = vmatprep.mubr.bf16.mxu0 %v3131_v10  ;;  %v2912_v10 = vld [vmem:[%s3537_s2 + $0x1f0] sm:$0xff]  }
  0x73   : > { %2699 = vmatprep.subr.bf16.mxu0 %v2905_v23 }
  0x74   : > { %2604 = vmatpush3.bf16.msra.mxu1 %v2904_v42 }
  0x75   : > { %2605 = vmatprep.subr.bf16.mxu1 %v2906_v22 }
  0x76   : > { %2700 = vmatpush3.bf16.msra.mxu0 %v2905_v23 }
  0x77   : > { %2701 = vmatprep.subr.bf16.mxu0 %v2907_v30 }
  0x78   : > { %2606 = vmatpush3.bf16.msra.mxu1 %v2906_v22 }
  0x79   : > { %2607 = vmatprep.subr.bf16.mxu1 %v2908_v13 }
  0x7a   : > { %2702 = vmatpush3.bf16.msra.mxu0 %v2907_v30 }
  0x7b   : > { %2703 = vmatprep.subr.bf16.mxu0 %v2909_v63 }
  0x7c   : > { %2608 = vmatpush3.bf16.msra.mxu1 %v2908_v13 }
  0x7d   : > { %2609 = vmatprep.subr.bf16.mxu1 %v2910_v37 }
  0x7e   : > { %2704 = vmatpush3.bf16.msra.mxu0 %v2909_v63 }
  0x7f   : > { %2705 = vmatprep.subr.bf16.mxu0 %v2912_v10 }
  0x80   : > { %2610 = vmatpush3.bf16.msra.mxu1 %v2910_v37 }
  0x81   : > { %2611 = vmatprep.subr.bf16.mxu1 %v2913_v28 }
  0x82   : > { %2706 = vmatpush3.bf16.msra.mxu0 %v2912_v10 }
  0x83   : > { %2707 = vmatprep.subr.bf16.mxu0 %v2914_v36 }
  0x84   : > { %2612 = vmatpush3.bf16.msra.mxu1 %v2913_v28 }
  0x85   : > { %2741 = vmatprep.subr.bf16.mxu1 %v2917_v29 }
  0x86   : > { %2708 = vmatpush3.bf16.msra.mxu0 %v2914_v36 }
  0x87   : > { %2614 = vmatmul.mubr.bf16.vlgmr.msra.gmra.mrb[0].mxu1 %v2242_v7  ;;  %2717 = vmatprep.subr.bf16.mxu0 %v2917_v29  ;;  %v2923_v7 = vld [vmem:[%s3537_s2 + $0x228] sm:$0xff]  }
  0x88   : > { %2749 = vmatpush3.bf16.msra.mxu1 %v2917_v29  ;;  %2617 = vmatprep.mubr.bf16.mxu1 %v2243_v47  ;;  %v2950_v47 = vmov 0.0  }
  0x89   : > { %2742 = vmatprep.subr.bf16.mxu1 %v2918_v40  ;;  %2710 = vmatmul.mubr.bf16.vlgmr.msra.gmra.mrb[0].mxu0 %v3214_v17  ;;  %1928 = vst [vmem:[#allocation2] sm:$0x1] %v2950_v47  ;;  %1929 = vst [vmem:[#allocation3] sm:$0x1] %v2950_v47 }
  0x8a   : > { %2718 = vmatpush3.bf16.msra.mxu0 %v2917_v29  ;;  %2713 = vmatprep.mubr.bf16.mxu0 %v3251_v50 }
  0x8b   : > { %2719 = vmatprep.subr.bf16.mxu0 %v2918_v40 }
  0x8c   : > { %2750 = vmatpush3.bf16.msra.mxu1 %v2918_v40 }
  0x8d   : > { %2743 = vmatprep.subr.bf16.mxu1 %v2920_v41 }
  0x8e   : > { %2720 = vmatpush3.bf16.msra.mxu0 %v2918_v40 }
  0x8f   : > { %2618 = vmatmul.mubr.bf16.gmra.mrb[4].mxu1 %v2244_v21  ;;  %2721 = vmatprep.subr.bf16.mxu0 %v2920_v41 }
  0x90   : > { %2751 = vmatpush3.bf16.msra.mxu1 %v2920_v41  ;;  %2737 = vmatprep.mubr.bf16.mxu1 %v3425_v1 }
  0x91   : > { %2744 = vmatprep.subr.bf16.mxu1 %v2921_v33  ;;  %2714 = vmatmul.mubr.bf16.gmra.mrb[4].mxu0 %v3369_v57 }
  0x92   : > { %2722 = vmatpush3.bf16.msra.mxu0 %v2920_v41  ;;  %2733 = vmatprep.mubr.bf16.mxu0 %v3404_v4 }
  0x93   : > { %2723 = vmatprep.subr.bf16.mxu0 %v2921_v33 }
  0x94   : > { %2752 = vmatpush3.bf16.msra.mxu1 %v2921_v33 }
  0x95   : > { %2745 = vmatprep.subr.bf16.mxu1 %v2922_v52 }
  0x96   : > { %2724 = vmatpush3.bf16.msra.mxu0 %v2921_v33 }
  0x97   : > { %2725 = vmatprep.subr.bf16.mxu0 %v2922_v52 }
  0x98   : > { %2753 = vmatpush3.bf16.msra.mxu1 %v2922_v52 }
  0x99   : > { %2746 = vmatprep.subr.bf16.mxu1 %v2923_v7 }
  0x9a   : > { %2726 = vmatpush3.bf16.msra.mxu0 %v2922_v52 }
  0x9b   : > { %2727 = vmatprep.subr.bf16.mxu0 %v2923_v7 }
  0x9c   : > { %2754 = vmatpush3.bf16.msra.mxu1 %v2923_v7 }
  0x9d   : > { %2747 = vmatprep.subr.bf16.mxu1 %v2924_v25 }
  0x9e   : > { %2728 = vmatpush3.bf16.msra.mxu0 %v2923_v7 }
  0x9f   : > { %2729 = vmatprep.subr.bf16.mxu0 %v2924_v25 }
  0xa0   : > { %2755 = vmatpush3.bf16.msra.mxu1 %v2924_v25 }
  0xa1   : > { %2748 = vmatprep.subr.bf16.mxu1 %v2925_v38 }
  0xa2   : > { %2730 = vmatpush3.bf16.msra.mxu0 %v2924_v25 }
  0xa3   : > { %2731 = vmatprep.subr.bf16.mxu0 %v2925_v38 }
  0xa4   : > { %2756 = vmatpush3.bf16.msra.mxu1 %v2925_v38 }
  0xa6   : > { %2732 = vmatpush3.bf16.msra.mxu0 %v2925_v38 }
  0xa7   : > { %2738 = vmatmul.mubr.bf16.vlgmr.msra.gmra.mrb[8].mxu1 %v2377_v35 }
  0xa9   : > { %2734 = vmatmul.mubr.bf16.vlgmr.msra.gmra.mrb[0].mxu0 %v3408_v5 }
 0x15a   : > { %v2615_v53 = vpop.f32.mrb[0].mxu1 }
 0x15b   : > { %v1098_v0 = vpop.f32.mrb[1].mxu1 }
 0x15c   : > { %v2616_v17 = vpop.f32.mrb[2].mxu1 }
 0x15d   : > { %v1101_v21 = vpop.f32.mrb[3].mxu1 }
 0x162   : > { %v2619_v50 = vpop.f32.mrb[4].mxu1 }
 0x163   : > { %v1114_v32 = vpop.f32.mrb[5].mxu1 }
 0x164   : > { %v2620_v43 = vpop.f32.mrb[6].mxu1  ;;  %v2715_v49 = vpop.f32.mrb[4].mxu0 }
 0x165   : > { %v1117_v44 = vpop.f32.mrb[7].mxu1  ;;  %v2761_v15 = vadd.f32 %v2715_v49, %v2619_v50  ;;  %v1724_v19 = vpop.f32.mrb[5].mxu0 }
 0x166   : > { %v2763_v16 = vadd.f32 %v1724_v19, %v1114_v32  ;;  %v2716_v18 = vpop.f32.mrb[6].mxu0 }
 0x167   : > { %v2765_v35 = vadd.f32 %v2716_v18, %v2620_v43  ;;  %v1727_v20 = vpop.f32.mrb[7].mxu0  ;;  %v1930_v18 = vld [vmem:[#allocation2] sm:$0x1] }
 0x168   : > { %v2767_v46 = vadd.f32 %v1727_v20, %v1117_v44 }
 0x17a   : > { %v2739_v51 = vpop.f32.mrb[8].mxu1 }
 0x17b   : > { %v2762_v58 = vadd.f32 %v2761_v15, %v2739_v51  ;;  %v1870_v26 = vpop.f32.mrb[9].mxu1 }
 0x17c   : > { %v2764_v55 = vadd.f32 %v2763_v16, %v1870_v26  ;;  %v2740_v12 = vpop.f32.mrb[10].mxu1  ;;  %v2735_v57 = vpop.f32.mrb[0].mxu0 }
 0x17d   : > { %v2766_v34 = vadd.f32 %v2765_v35, %v2740_v12  ;;  %v1873_v45 = vpop.f32.mrb[11].mxu1  ;;  %v1906_v24 = vadd.f32 %v2762_v58, %v2386_v54  ;;  %v2757_v39 = vadd.f32 %v2735_v57, %v2615_v53  ;;  %v1854_v31 = vpop.f32.mrb[1].mxu0 }
 0x17e   : > { %v2768_v56 = vadd.f32 %v2767_v46, %v1873_v45  ;;  %v1904_v60 = vadd.f32 %v2764_v55, %v2386_v54  ;;  %v2758_v62 = vadd.f32 %v1854_v31, %v1098_v0  ;;  %v2736_v11 = vpop.f32.mrb[2].mxu0  ;;  %v1946_v46 = vld [vmem:[#allocation3] sm:$0x1] }
 0x17f   : > { %v1907_v59 = vadd.f32 %v2766_v34, %v2386_v54  ;;  %v2759_v3 = vadd.f32 %v2736_v11, %v2616_v17  ;;  %v1857_v4 = vpop.f32.mrb[3].mxu0  ;;  %v1902_v48 = vadd.f32 %v2757_v39, %v2386_v54  ;;  %v1953_v7 = vmul.f32 %v1906_v24, %v1906_v24 }
 0x180   : > { %v1905_v61 = vadd.f32 %v2768_v56, %v2386_v54  ;;  %v1900_v6 = vadd.f32 %v2758_v62, %v2386_v54  ;;  %v2760_v27 = vadd.f32 %v1857_v4, %v1101_v21  ;;  %v1951_v29 = vmul.f32 %v1904_v60, %v1904_v60 }
 0x181   : > { %v2411_v2 = vpack.c.bf16 %v1907_v59, %v1906_v24  ;;  %v1903_v9 = vadd.f32 %v2759_v3, %v2386_v54  ;;  %v1949_v13 = vmul.f32 %v1902_v48, %v1902_v48  ;;  %v1954_v47 = vmul.f32 %v1907_v59, %v1907_v59 }
 0x182   : > { %v2406_v5 = vpack.c.bf16 %v1905_v61, %v1904_v60  ;;  %v1901_v1 = vadd.f32 %v2760_v27, %v2386_v54  ;;  %v1947_v14 = vmul.f32 %v1900_v6, %v1900_v6  ;;  %v1952_v33 = vmul.f32 %v1905_v61, %v1905_v61 }
 0x183   : > { %2416 = vst [vmem:[%s349_s20 + $0x18] sm:$0xff] %v2411_v2   ;;  %v2401_v42 = vpack.c.bf16 %v1903_v9, %v1902_v48  ;;  %v1950_v63 = vmul.f32 %v1903_v9, %v1903_v9 }
 0x184   : > { %2415 = vst [vmem:[%s349_s20 + $0x10] sm:$0xff] %v2406_v5   ;;  %v2396_v8 = vpack.c.bf16 %v1901_v1, %v1900_v6  ;;  %v1931_v22 = vadd.f32 %v1901_v1, %v1900_v6  ;;  %v1948_v23 = vmul.f32 %v1901_v1, %v1901_v1 }
 0x185   : > { %2414 = vst [vmem:[%s349_s20 + $0x8] sm:$0xff] %v2401_v42  }
 0x186   : > { %2397 = vst [vmem:[%s349_s20] sm:$0xff] %v2396_v8   ;;  %v1932_v30 = vadd.f32 %v1931_v22, %v1902_v48  ;;  %v1955_v37 = vadd.f32 %v1948_v23, %v1947_v14 }
 0x188   : > { %v1956_v28 = vadd.f32 %v1955_v37, %v1949_v13  ;;  %v1933_v10 = vadd.f32 %v1932_v30, %v1903_v9 }
 0x18a   : > { %v1934_v36 = vadd.f32 %v1933_v10, %v1904_v60  ;;  %v1957_v40 = vadd.f32 %v1956_v28, %v1950_v63 }
 0x18c   : > { %v1935_v41 = vadd.f32 %v1934_v36, %v1905_v61  ;;  %v1958_v52 = vadd.f32 %v1957_v40, %v1951_v29 }
 0x18e   : > { %v1936_v25 = vadd.f32 %v1935_v41, %v1906_v24  ;;  %v1959_v38 = vadd.f32 %v1958_v52, %v1952_v33 }
 0x190   : > { %v1937_v53 = vadd.f32 %v1936_v25, %v1907_v59  ;;  %v1960_v0 = vadd.f32 %v1959_v38, %v1953_v7 }
 0x192   : > { %v1938_v17 = vrot.slane %v1937_v53, 4  ;;  %v1961_v21 = vadd.f32 %v1960_v0, %v1954_v47 }
 0x194   : > { %v1939_v50 = vadd.f32 %v1938_v17, %v1937_v53  ;;  %v1962_v32 = vrot.slane %v1961_v21, 4 }
 0x196   : > { %v1940_v43 = vrot.slane %v1939_v50, 2  ;;  %v1963_v44 = vadd.f32 %v1962_v32, %v1961_v21 }
 0x198   : > { %v1941_v49 = vadd.f32 %v1940_v43, %v1939_v50  ;;  %v1964_v15 = vrot.slane %v1963_v44, 2 }
 0x19a   : > { %v1942_v19 = vrot.slane %v1941_v49, 1  ;;  %v1965_v16 = vadd.f32 %v1964_v15, %v1963_v44 }
 0x19c   : > { %v1943_v35 = vadd.f32 %v1942_v19, %v1941_v49  ;;  %v1966_v20 = vrot.slane %v1965_v16, 1 }
 0x19e   : > { %v1944_v51 = vadd.f32 %v1943_v35, %v1930_v18  ;;  %v1967_v58 = vadd.f32 %v1966_v20, %v1965_v16 }
 0x1a0   : > { %1945 = vst [vmem:[#allocation2] sm:$0x1] %v1944_v51  ;;  %v1968_v26 = vadd.f32 %v1967_v58, %v1946_v46 }
 0x1a2   : > { %1969 = vst [vmem:[#allocation3] sm:$0x1] %v1968_v26 }
 0x1a7   : > { %v1973_v54 = vld [vmem:[#allocation2] sm:$0x1] }
 0x1a8   : > { %1974 = vst [vmem:[%s353_s26] sm:$0x1] %v1973_v54 }
 0x1a9   : > { %v1975_v55 = vld [vmem:[#allocation3] sm:$0x1] }
 0x1aa   : > { %1976 = vst [vmem:[%s356_s30] sm:$0x1] %v1975_v55 }
 0x1ab PF: > { %s17_s23 = sadd.s32 1, %s2948_s23   ;;  %s3546_s21 = smov %s2944_s22 }
 0x1ac   : > { %p14_p5 = scmp.ge.s32.totalorder %s17_s23, 4   ;;  %s3547_s22 = smov %s3549_s24 }
 0x1ae   :  { %16 = sbr.rel (!%p14_p5) target bundleno = 2 (0x2), region = 109 }

// kernel: content_encoder_forward.31
= control target key start
LH: loop header
LB: loop body
LE: loop exit
PB: predicated region body
PF: predicated region fallthrough
CT: control target
= control target key end

     0   :  { %s2786_s15 = smov 0   ;;  %s2788_s16 = smov 0   ;;  %s3345_s0 = inlined_call_operand.vmem [shape: bf16[2,16,10,128], index: 0, kind: input, shape index: {}, may-alias: {0,1}]   ;;  %s3346_s1 = inlined_call_operand.vmem [shape: bf16[2,16,10,128], index: 1, kind: input, shape index: {}, may-alias: {0,1}]   ;;  %s3347_s2 = inlined_call_operand.vmem [shape: bf16[9,128,64], index: 2, kind: input, shape index: {}]   ;;  %s3348_s3 = inlined_call_operand.vmem [shape: f32[1,64], index: 3, kind: input, shape index: {}]   ;;  %s3349_s4 = inlined_call_operand.vmem [shape: bf16[2,8,8,64], index: 4, kind: output, shape index: {}]  }
   0x1   :  { %s2790_s17 = smov 0  }
   0x2 LB: > { %s26_s18 = sadd.s32 1, %s2755_s16  ;;  %p1977_p0 = scmp.ge.s32.totalorder %s2759_s17, 1  ;;  %s2759_s17 = sphi %s2790_s17, %s14_s17   ;;  %s2755_s16 = sphi %s2788_s16, %s3355_s16   ;;  %s2751_s15 = sphi %s2786_s15, %s3354_s15  }
   0x3   : > { %p28_p1 = scmp.ge.s32.totalorder %s26_s18, 2  ;;  %p206_p2 = scmp.lt.s32.totalorder %s2759_s17, 3 }
   0x5   : > { %s3357_s18 = smov (%p28_p1, %s26_s18), 0  ;;  %p207_p3 = pnand %p1977_p0, %p206_p2 }
   0x6   : > { %v2657_v0 = vld [vmem:[%s3347_s2 + $0x40] sm:$0xff] (!%p207_p3)   ;;  %v2659_v2 = vld [vmem:[%s3347_s2 + $0x48] sm:$0xff] (!%p207_p3)   ;;  %p253_p4 = scmp.lt.s32.totalorder (!%p207_p3), %s2751_s15, 1  ;;  %v2661_v4 = vld [vmem:[%s3347_s2 + $0x50] sm:$0xff] (!%p207_p3)   ;;  %vm323_vm0 = vsmask.f32 (!%p207_p3), 3328 }
   0x7   : > { %210 = sbr.rel (%p207_p3) target bundleno = 393 (0x189), region = 36  ;;  %v2658_v1 = vld [vmem:[%s3347_s2 + $0x100] sm:$0xff] (!%p207_p3)   ;;  %2337 = vmatprep.subr.bf16.mxu1 (!%p207_p3), %v2657_v0  ;;  %v2660_v3 = vld [vmem:[%s3347_s2 + $0x108] sm:$0xff] (!%p207_p3)   ;;  %v2662_v5 = vld [vmem:[%s3347_s2 + $0x110] sm:$0xff] (!%p207_p3)   ;;  %vm324_vm1 = vsmask.f32 (!%p207_p3), 7440 }
   0x8   : > { %2433 = vmatprep.subr.bf16.mxu0 (!%p207_p3), %v2658_v1  ;;  %2338 = vmatpush3.bf16.msra.mxu1 (!%p207_p3), %v2657_v0  ;;  %v2663_v6 = vld [vmem:[%s3347_s2 + $0x58] sm:$0xff] (!%p207_p3)   ;;  %v2665_v8 = vld [vmem:[%s3347_s2 + $0x60] sm:$0xff] (!%p207_p3)   ;;  %v2667_v10 = vld [vmem:[%s3347_s2 + $0x68] sm:$0xff] (!%p207_p3)   ;;  %vm729_vm3 = vcmask (!%p207_p3), 1042432   ;;  %vm730_vm4 = vcmask (!%p207_p3), 1046532   ;;  %vm1853_vm6 = vcmask (!%p207_p3), 519168  }
   0x9   : > { %2434 = vmatpush3.bf16.msra.mxu0 (!%p207_p3), %v2658_v1  ;;  %2339 = vmatprep.subr.bf16.mxu1 (!%p207_p3), %v2659_v2  ;;  %v2664_v7 = vld [vmem:[%s3347_s2 + $0x118] sm:$0xff] (!%p207_p3)   ;;  %v2666_v9 = vld [vmem:[%s3347_s2 + $0x120] sm:$0xff] (!%p207_p3)   ;;  %v2668_v14 = vld [vmem:[%s3347_s2 + $0x128] sm:$0xff] (!%p207_p3)  }
   0xa   : > { %2435 = vmatprep.subr.bf16.mxu0 (!%p207_p3), %v2660_v3  ;;  %v2669_v22 = vld [vmem:[%s3347_s2 + $0x70] sm:$0xff] (!%p207_p3)   ;;  %v2671_v38 = vld [vmem:[%s3347_s2 + $0x78] sm:$0xff] (!%p207_p3)   ;;  %vm2895_vm2 = vmor (!%p207_p3), %vm323_vm0, %vm324_vm1 }
   0xb   : > { %v2670_v23 = vld [vmem:[%s3347_s2 + $0x130] sm:$0xff] (!%p207_p3)   ;;  %v2672_v48 = vld [vmem:[%s3347_s2 + $0x138] sm:$0xff] (!%p207_p3)   ;;  %v2673_v62 = vld [vmem:[%s3347_s2] sm:$0xff] (!%p207_p3)  }
   0xc   : > { %2340 = vmatpush3.bf16.msra.mxu1 (!%p207_p3), %v2659_v2  ;;  %vm3018_vm5 = vmor (!%p207_p3), %vm729_vm3, %vm730_vm4  ;;  %v2701_v39 = vld [vmem:[%s3347_s2 + $0xa8] sm:$0xff] (!%p207_p3)  }
   0xd   : > { %2436 = vmatpush3.bf16.msra.mxu0 (!%p207_p3), %v2660_v3  ;;  %2341 = vmatprep.subr.bf16.mxu1 (!%p207_p3), %v2661_v4  ;;  %v2674_v3 = vld [vmem:[%s3347_s2 + $0x140] sm:$0xff] (!%p207_p3)  }
   0xe   : > { %s3359_s15 = smov (!%p253_p4, %s2751_s15), 1  ;;  %2437 = vmatprep.subr.bf16.mxu0 %v2662_v5 }
   0xf   : > { %s2224_s9 = sshll.u32 %s3359_s15, 7  ;;  %s2227_s21 = sshll.u32 %s3359_s15, 5 }
  0x10   : > { %2342 = vmatpush3.bf16.msra.mxu1 %v2661_v4  ;;  %s2842_s20 = scalar_lea.vmem %s3345_s0, %s2224_s9  ;;  %s2940_s14 = sadd.s32 64, %s2224_s9 }
  0x11   : > { %2438 = vmatpush3.bf16.msra.mxu0 %v2662_v5  ;;  %2343 = vmatprep.subr.bf16.mxu1 %v2663_v6  ;;  %v2848_v11 = vld [vmem:[%s2842_s20] sm:$0xf]  ;;  %v2851_v12 = vld [vmem:[%s2842_s20 + $0x4] sm:$0x1]  ;;  %v2854_v13 = vld [vmem:[%s2842_s20 + $0x8] sm:$0xf]  ;;  %s2980_s29 = scalar_lea.vmem %s3346_s1, %s2940_s14  ;;  %s3318_s9 = scalar_lea.vmem %s3349_s4, %s2227_s21 }
  0x12   : > { %2439 = vmatprep.subr.bf16.mxu0 %v2664_v7  ;;  %v2860_v15 = vld [vmem:[%s2842_s20 + $0xc] sm:$0x1]  ;;  %v327_v16 = vshrl.u32 %v2848_v11, 16  ;;  %v330_v17 = vshll.u32 %v2848_v11, 16  ;;  %v336_v18 = vshll.u32 %v2851_v12, 16  ;;  %v341_v19 = vshrl.u32 %v2854_v13, 16 }
  0x13   : > { %v344_v20 = vshll.u32 %v2854_v13, 16  ;;  %v350_v21 = vshll.u32 %v2860_v15, 16  ;;  %v2875_v30 = vld [vmem:[%s2842_s20 + $0x10] sm:$0xf]  ;;  %v2878_v31 = vld [vmem:[%s2842_s20 + $0x14] sm:$0x1] }
  0x14   : > { %2344 = vmatpush3.bf16.msra.mxu1 %v2663_v6  ;;  %v329_v24 = vrot.slane %v327_v16, 4  ;;  %v332_v25 = vrot.slane %v330_v17, 5  ;;  %v338_v26 = vrot.slane %v336_v18, 5  ;;  %v343_v27 = vrot.slane %v341_v19, 4  ;;  %v2881_v33 = vld [vmem:[%s2842_s20 + $0x18] sm:$0xf] }
  0x15   : > { %2440 = vmatpush3.bf16.msra.mxu0 %v2664_v7  ;;  %2345 = vmatprep.subr.bf16.mxu1 %v2665_v8  ;;  %v346_v28 = vrot.slane %v344_v20, 5  ;;  %v352_v29 = vrot.slane %v350_v21, 5  ;;  %v2884_v34 = vld [vmem:[%s2842_s20 + $0x1c] sm:$0x1]  ;;  %v355_v35 = vshrl.u32 %v2875_v30, 16  ;;  %v358_v36 = vshll.u32 %v2875_v30, 16 }
  0x16   : > { %2441 = vmatprep.subr.bf16.mxu0 %v2666_v9  ;;  %v333_v32 = vor.u32 %v332_v25, %v329_v24  ;;  %v2076_v37 = vcombine.low %v2854_v13, %v2875_v30  ;;  %v364_v41 = vshll.u32 %v2878_v31, 16  ;;  %v369_v42 = vshrl.u32 %v2881_v33, 16  ;;  %v2907_v52 = vld [vmem:[%s2842_s20 + $0x20] sm:$0xf]  ;;  %v2912_v56 = vld [vmem:[%s2842_s20 + $0x24] sm:$0x1] }
  0x17   : > { %v347_v40 = vor.u32 %v346_v28, %v343_v27  ;;  %v372_v43 = vshll.u32 %v2881_v33, 16  ;;  %v357_v45 = vrot.slane %v355_v35, 4  ;;  %v360_v46 = vrot.slane %v358_v36, 5  ;;  %v2675_v17 = vld [vmem:[%s3347_s2 + $0x8] sm:$0xff]   ;;  %v2679_v35 = vld [vmem:[%s3347_s2 + $0x18] sm:$0xff]  }
  0x18   : > { %2346 = vmatpush3.bf16.msra.mxu1 %v2665_v8  ;;  %v334_v44 = vrot.slane %v333_v32, 4  ;;  %v378_v47 = vshll.u32 %v2884_v34, 16  ;;  %v371_v50 = vrot.slane %v369_v42, 4  ;;  %v366_v55 = vrot.slane %v364_v41, 5  ;;  %v2676_v24 = vld [vmem:[%s3347_s2 + $0x148] sm:$0xff]   ;;  %v2678_v32 = vld [vmem:[%s3347_s2 + $0x150] sm:$0xff]  }
  0x19   : > { %2442 = vmatpush3.bf16.msra.mxu0 %v2666_v9  ;;  %2347 = vmatprep.subr.bf16.mxu1 %v2667_v10  ;;  %v348_v49 = vrot.slane %v347_v40, 4  ;;  %v374_v51 = vrot.slane %v372_v43, 5  ;;  %v361_v54 = vor.u32 %v360_v46, %v357_v45  ;;  %v383_v60 = vshrl.u32 %v2907_v52, 16  ;;  %v2952_v25 = vld [vmem:[%s2842_s20 + $0x28] sm:$0xf] }
  0x1a   : > { %2443 = vmatprep.subr.bf16.mxu0 %v2668_v14  ;;  %v339_v53 = vsel %vm2895_vm2, %v334_v44, %v338_v26  ;;  %v380_v59 = vrot.slane %v378_v47, 5  ;;  %v386_v0 = vshll.u32 %v2907_v52, 16  ;;  %v392_v1 = vshll.u32 %v2912_v56, 16  ;;  %v2956_v27 = vld [vmem:[%s2842_s20 + $0x2c] sm:$0x1] }
  0x1b   : > { %v353_v57 = vsel %vm2895_vm2, %v348_v49, %v352_v29  ;;  %v375_v58 = vor.u32 %v374_v51, %v371_v50  ;;  %v362_v63 = vrot.slane %v361_v54, 4  ;;  %v385_v4 = vrot.slane %v383_v60, 4  ;;  %v2971_v42 = vld [vmem:[%s2842_s20 + $0x34] sm:$0x1]  ;;  %v2680_v54 = vld [vmem:[%s3347_s2 + $0x158] sm:$0xff]  }
  0x1c   : > { %2348 = vmatpush3.bf16.msra.mxu1 %v2667_v10  ;;  %v2000_v61 = vcombine.low %v339_v53, %v353_v57  ;;  %v388_v6 = vrot.slane %v386_v0, 5  ;;  %v2077_v7 = vcombine.low %v2881_v33, %v2907_v52  ;;  %v394_v16 = vrot.slane %v392_v1, 5  ;;  %v2986_v53 = vld [vmem:[%s2842_s20 + $0x38] sm:$0xf]  ;;  %v3001_v0 = vld [vmem:[%s2980_s29] sm:$0xf] }
  0x1d   : > { %2444 = vmatpush3.bf16.msra.mxu0 %v2668_v14  ;;  %2349 = vmatprep.subr.bf16.mxu1 %v2669_v22  ;;  %v376_v2 = vrot.slane %v375_v58, 4  ;;  %v367_v5 = vsel %vm2895_vm2, %v362_v63, %v366_v55  ;;  %v738_v19 = vrot.slane %v2860_v15, 5  ;;  %v742_v20 = vrot.slane %v2878_v31, 5  ;;  %v2681_v55 = vld [vmem:[%s3347_s2 + $0x20] sm:$0xff]   ;;  %v2995_v58 = vld [vmem:[%s2842_s20 + $0x3c] sm:$0x1] }
  0x1e   : > { %2445 = vmatprep.subr.bf16.mxu0 %v2670_v23  ;;  %2353 = vmatprep.mubr.bf16.mxu1 %v2000_v61  ;;  %v2104_v9 = vcombine.low %v353_v57, %v367_v5  ;;  %v389_v14 = vor.u32 %v388_v6, %v385_v4  ;;  %v2025_v26 = vrot.slane %v2854_v13, 9  ;;  %v397_v28 = vshrl.u32 %v2952_v25, 16  ;;  %v3004_v1 = vld [vmem:[%s2980_s29 + $0x4] sm:$0x1]  ;;  %v2684_v15 = vld [vmem:[%s3347_s2 + $0x168] sm:$0xff]  }
  0x1f   : > { %v381_v8 = vsel %vm2895_vm2, %v376_v2, %v380_v59  ;;  %v400_v29 = vshll.u32 %v2952_v25, 16  ;;  %v406_v36 = vshll.u32 %v2956_v27, 16  ;;  %v420_v45 = vshll.u32 %v2971_v42, 16 }
  0x20   : > { %2350 = vmatpush3.bf16.msra.mxu1 %v2669_v22  ;;  %v2931_v10 = vcombine.low %v367_v5, %v381_v8  ;;  %2449 = vmatprep.mubr.bf16.mxu0 %v2104_v9  ;;  %v390_v18 = vrot.slane %v389_v14, 4  ;;  %v2677_v22 = vld [vmem:[%s3347_s2 + $0x10] sm:$0xff]   ;;  %v399_v40 = vrot.slane %v397_v28, 4  ;;  %v2026_v46 = vrot.slane %v2875_v30, 9  ;;  %v2683_v28 = vld [vmem:[%s3347_s2 + $0x28] sm:$0xff]  }
  0x21   : > { %2446 = vmatpush3.bf16.msra.mxu0 %v2670_v23  ;;  %2351 = vmatprep.subr.bf16.mxu1 %v2671_v38  ;;  %v402_v41 = vrot.slane %v400_v29, 5  ;;  %v408_v49 = vrot.slane %v406_v36, 5  ;;  %v422_v57 = vrot.slane %v420_v45, 5  ;;  %v425_v59 = vshrl.u32 %v2986_v53, 16 }
  0x22   : > { %2447 = vmatprep.subr.bf16.mxu0 %v2672_v48  ;;  %v395_v21 = vsel %vm2895_vm2, %v390_v18, %v394_v16  ;;  %v428_v60 = vshll.u32 %v2986_v53, 16  ;;  %v434_v63 = vshll.u32 %v2995_v58, 16  ;;  %v1067_v4 = vshrl.u32 %v3001_v0, 16  ;;  %v2682_v16 = vld [vmem:[%s3347_s2 + $0x160] sm:$0xff]  }
  0x23   : > { %v2105_v23 = vcombine.low %v381_v8, %v395_v21  ;;  %v427_v2 = vrot.slane %v425_v59, 4  ;;  %v1070_v5 = vshll.u32 %v3001_v0, 16  ;;  %v1076_v14 = vshll.u32 %v3004_v1, 16  ;;  %v2690_v59 = vld [vmem:[%s3347_s2 + $0x80] sm:$0xff]  }
  0x24   : > { %2352 = vmatpush3.bf16.msra.mxu1 %v2671_v38  ;;  %v2968_v38 = vld [vmem:[%s2842_s20 + $0x30] sm:$0xf]  ;;  %v436_v9 = vrot.slane %v434_v63, 5  ;;  %v3040_v45 = vsel %vm3018_vm5, %v2025_v26, %v738_v19  ;;  %v734_v26 = vrot.slane %v2851_v12, 5  ;;  %v2027_v12 = vrot.slane %v2881_v33, 9 }
  0x25   : > { %2448 = vmatpush3.bf16.msra.mxu0 %v2672_v48  ;;  %2361 = vmatprep.subr.bf16.mxu1 %v2673_v62  ;;  %v411_v43 = vshrl.u32 %v2968_v38, 16  ;;  %v414_v44 = vshll.u32 %v2968_v38, 16  ;;  %v2078_v47 = vcombine.low %v2952_v25, %v2968_v38  ;;  %v403_v48 = vor.u32 %v402_v41, %v399_v40  ;;  %v3086_v63 = vld [vmem:[%s2980_s29 + $0x8] sm:$0xf] }
  0x26   : > { %2457 = vmatprep.subr.bf16.mxu0 %v2674_v3  ;;  %v1078_v41 = vrot.slane %v1076_v14, 5  ;;  %v2691_v14 = vld [vmem:[%s3347_s2 + $0x180] sm:$0xff]  }
  0x27   : > { %2354 = vmatmul.mubr.bf16.vlgmr.msra.gmra.mrb[0].mxu1 %v2931_v10  ;;  %v413_v50 = vrot.slane %v411_v43, 4  ;;  %v416_v51 = vrot.slane %v414_v44, 5  ;;  %v404_v61 = vrot.slane %v403_v48, 4  ;;  %v3046_v48 = vsel %vm3018_vm5, %v2026_v46, %v742_v20 }
  0x28   : > { %2362 = vmatpush3.bf16.msra.mxu1 %v2673_v62  ;;  %2450 = vmatmul.mubr.bf16.vlgmr.msra.gmra.mrb[0].mxu0 %v2105_v23  ;;  %v1072_v23 = vrot.slane %v1070_v5, 5  ;;  %v2133_v20 = vcombine.low %v3040_v45, %v3046_v48  ;;  %v746_v46 = vrot.slane %v2884_v34, 5  ;;  %v2028_v34 = vrot.slane %v2907_v52, 9  ;;  %v306_v5 = vld [vmem:[%s2980_s29 + $0xc] sm:$0x1] }
  0x29   : > { %2363 = vmatprep.subr.bf16.mxu1 %v2675_v17  ;;  %2458 = vmatpush3.bf16.msra.mxu0 %v2674_v3  ;;  %v417_v62 = vor.u32 %v416_v51, %v413_v50  ;;  %v430_v3 = vrot.slane %v428_v60, 5  ;;  %v409_v6 = vsel %vm2895_vm2, %v404_v61, %v408_v49  ;;  %v2685_v49 = vld [vmem:[%s3347_s2 + $0x30] sm:$0xff]   ;;  %v750_v51 = vrot.slane %v2912_v56, 5 }
  0x2a   : > { %2459 = vmatprep.subr.bf16.mxu0 %v2676_v24  ;;  %v2024_v56 = vrot.slane %v2848_v11, 9  ;;  %v2029_v60 = vrot.slane %v2952_v25, 9  ;;  %v754_v61 = vrot.slane %v2956_v27, 5  ;;  %v2693_v27 = vld [vmem:[%s3347_s2 + $0x88] sm:$0xff]  }
  0x2b   : > { %v418_v8 = vrot.slane %v417_v62, 4  ;;  %v431_v18 = vor.u32 %v430_v3, %v427_v2  ;;  %v2030_v62 = vrot.slane %v2968_v38, 9  ;;  %v1230_v2 = vrot.slane %v3004_v1, 5 }
  0x2c   : > { %2364 = vmatpush3.bf16.msra.mxu1 %v2675_v17  ;;  %v3014_v17 = vcombine.low %v395_v21, %v409_v6  ;;  %v2079_v21 = vcombine.low %v2986_v53, %v3001_v0  ;;  %v3092_v3 = vcombine.low %v2875_v30, %v2881_v33  ;;  %v3106_v1 = vsel %vm3018_vm5, %v2027_v12, %v746_v46  ;;  %v2718_v30 = vld [vmem:[%s3347_s2 + $0x1e0] sm:$0xff]   ;;  %v2732_v33 = vld [vmem:[%s3347_s2 + $0x218] sm:$0xff]  }
  0x2d   : > { %2365 = vmatprep.subr.bf16.mxu1 %v2677_v22  ;;  %2460 = vmatpush3.bf16.msra.mxu0 %v2676_v24  ;;  %v423_v29 = vsel %vm2895_vm2, %v418_v8, %v422_v57  ;;  %v432_v36 = vrot.slane %v431_v18, 4  ;;  %v2688_v57 = vld [vmem:[%s3347_s2 + $0x178] sm:$0xff]   ;;  %v3102_v8 = vcombine.low %v2907_v52, %v2952_v25  ;;  %v3153_v46 = vcombine.low %v2968_v38, %v2986_v53  ;;  %v2699_v24 = vld [vmem:[%s3347_s2 + $0xa0] sm:$0xff]   ;;  %v2735_v25 = vld [vmem:[%s3347_s2 + $0x230] sm:$0xff]  }
  0x2e   : > { %2461 = vmatprep.subr.bf16.mxu0 %v2678_v32  ;;  %2357 = vmatprep.mubr.bf16.mxu1 %v3014_v17  ;;  %v2733_v52 = vld [vmem:[%s3347_s2 + $0x220] sm:$0xff]   ;;  %v2736_v38 = vld [vmem:[%s3347_s2 + $0x238] sm:$0xff]  }
  0x2f   : > { %v437_v43 = vsel %vm2895_vm2, %v432_v36, %v436_v9  ;;  %v1679_v9 = vrot.slane %v306_v5, 5  ;;  %v1525_v36 = vshll.u32 %v3086_v63, 16 }
  0x30   : > { %2366 = vmatpush3.bf16.msra.mxu1 %v2677_v22  ;;  %v1069_v22 = vrot.slane %v1067_v4, 4  ;;  %v3051_v50 = vcombine.low %v423_v29, %v437_v43  ;;  %v758_v4 = vrot.slane %v2971_v42, 5  ;;  %v3110_v42 = vsel %vm3018_vm5, %v2028_v34, %v750_v51  ;;  %v2696_v34 = vld [vmem:[%s3347_s2 + $0x190] sm:$0xff]  }
  0x31   : > { %2367 = vmatprep.subr.bf16.mxu1 %v2679_v35  ;;  %2462 = vmatpush3.bf16.msra.mxu0 %v2678_v32  ;;  %v2012_v32 = vcombine.low %v2848_v11, %v2854_v13  ;;  %v2116_v11 = vrot.slane %v3001_v0, 9  ;;  %v2719_v13 = vld [vmem:[%s3347_s2 + $0xe8] sm:$0xff]  }
  0x32   : > { %2463 = vmatprep.subr.bf16.mxu0 %v2680_v54  ;;  %v1073_v40 = vor.u32 %v1072_v23, %v1069_v22  ;;  %2358 = vmatmul.mubr.bf16.gmra.mrb[4].mxu1 %v3051_v50  ;;  %v1522_v22 = vshrl.u32 %v3086_v63, 16  ;;  %v2695_v23 = vld [vmem:[%s3347_s2 + $0x90] sm:$0xff]  }
  0x33   : > { %2377 = vmatprep.mubr.bf16.mxu1 %v2012_v32 }
  0x34   : > { %2368 = vmatpush3.bf16.msra.mxu1 %v2679_v35  ;;  %v2106_v35 = vcombine.low %v409_v6, %v423_v29  ;;  %v1074_v44 = vrot.slane %v1073_v40, 4  ;;  %v2195_v6 = vrot.slane %v3086_v63, 9  ;;  %v3134_v29 = vsel %vm3018_vm5, %v2030_v62, %v758_v4  ;;  %v2707_v62 = vld [vmem:[%s3347_s2 + $0xb8] sm:$0xff]  }
  0x35   : > { %2369 = vmatprep.subr.bf16.mxu1 %v2681_v55  ;;  %2464 = vmatpush3.bf16.msra.mxu0 %v2680_v54  ;;  %v2687_v54 = vld [vmem:[%s3347_s2 + $0x38] sm:$0xff]   ;;  %v2134_v40 = vcombine.low %v3106_v1, %v3110_v42  ;;  %v1524_v32 = vrot.slane %v1522_v22, 4  ;;  %v3204_v4 = vcombine.low %v3046_v48, %v3106_v1  ;;  %v2713_v48 = vld [vmem:[%s3347_s2 + $0xd0] sm:$0xff]   ;;  %v2717_v22 = vld [vmem:[%s3347_s2 + $0xe0] sm:$0xff]  }
  0x36   : > { %2453 = vmatprep.mubr.bf16.mxu0 %v2106_v35  ;;  %2465 = vmatprep.subr.bf16.mxu0 %v2682_v16  ;;  %v3058_v31 = vsel %vm2895_vm2, %v1074_v44, %v1078_v41  ;;  %v3121_v18 = vsel %vm3018_vm5, %v2195_v6, %v1679_v9  ;;  %v2031_v41 = vrot.slane %v2986_v53, 9  ;;  %v735_v44 = vsel %vm3018_vm5, %v2024_v56, %v734_v26  ;;  %v2711_v6 = vld [vmem:[%s3347_s2 + $0xc8] sm:$0xff]  }
  0x37   : > { %v2107_v19 = vcombine.low %v437_v43, %v3058_v31  ;;  %v762_v43 = vrot.slane %v2995_v58, 5  ;;  %v2048_v58 = vcombine.low %v735_v44, %v3040_v45  ;;  %v2712_v9 = vld [vmem:[%s3347_s2 + $0x1c8] sm:$0xff]  }
  0x38   : > { %2370 = vmatpush3.bf16.msra.mxu1 %v2681_v55  ;;  %v2686_v55 = vld [vmem:[%s3347_s2 + $0x170] sm:$0xff]  }
  0x39   : > { %2371 = vmatprep.subr.bf16.mxu1 %v2683_v28  ;;  %2466 = vmatpush3.bf16.msra.mxu0 %v2682_v16  ;;  %v3117_v16 = vsel %vm3018_vm5, %v2116_v11, %v1230_v2  ;;  %v2705_v11 = vld [vmem:[%s3347_s2 + $0x1b0] sm:$0xff]   ;;  %v2709_v2 = vld [vmem:[%s3347_s2 + $0xc0] sm:$0xff]  }
  0x3a   : > { %2467 = vmatprep.subr.bf16.mxu0 %v2684_v15  ;;  %2454 = vmatmul.mubr.bf16.gmra.mrb[4].mxu0 %v2107_v19  ;;  %v2212_v35 = vcombine.low %v3117_v16, %v3121_v18 }
  0x3b   : > { %2473 = vmatprep.mubr.bf16.mxu0 %v2133_v20  ;;  %v1531_v20 = vshll.u32 %v306_v5, 16 }
  0x3c   : > { %2372 = vmatpush3.bf16.msra.mxu1 %v2683_v28  ;;  %v3130_v28 = vsel %vm3018_vm5, %v2029_v60, %v754_v61  ;;  %v2704_v60 = vld [vmem:[%s3347_s2 + $0xb0] sm:$0xff]   ;;  %v2702_v61 = vld [vmem:[%s3347_s2 + $0x1a8] sm:$0xff]  }
  0x3d   : > { %2373 = vmatprep.subr.bf16.mxu1 %v2685_v49  ;;  %2468 = vmatpush3.bf16.msra.mxu0 %v2684_v15  ;;  %v2694_v15 = vld [vmem:[%s3347_s2 + $0x188] sm:$0xff]   ;;  %v2135_v19 = vcombine.low %v3130_v28, %v3134_v29  ;;  %v1533_v26 = vrot.slane %v1531_v20, 5  ;;  %v3208_v5 = vcombine.low %v3110_v42, %v3130_v28  ;;  %v2715_v42 = vld [vmem:[%s3347_s2 + $0xd8] sm:$0xff]  }
  0x3e   : > { %2469 = vmatprep.subr.bf16.mxu0 %v2686_v55  ;;  %v2724_v28 = vld [vmem:[%s3347_s2 + $0xf8] sm:$0xff]  }
  0x40   : > { %2374 = vmatpush3.bf16.msra.mxu1 %v2685_v49  ;;  %v1527_v49 = vrot.slane %v1525_v36, 5  ;;  %v2725_v36 = vld [vmem:[%s3347_s2 + $0x1f8] sm:$0xff]  }
  0x41   : > { %2375 = vmatprep.subr.bf16.mxu1 %v2687_v54  ;;  %2470 = vmatpush3.bf16.msra.mxu0 %v2686_v55  ;;  %v763_v55 = vsel %vm3018_vm5, %v2031_v41, %v762_v43  ;;  %v2731_v41 = vld [vmem:[%s3347_s2 + $0x210] sm:$0xff]  }
  0x42   : > { %2471 = vmatprep.subr.bf16.mxu0 %v2688_v57  ;;  %v1528_v51 = vor.u32 %v1527_v49, %v1524_v32  ;;  %v2136_v56 = vcombine.low %v763_v55, %v3117_v16  ;;  %v3225_v1 = vcombine.low %v3134_v29, %v763_v55  ;;  %v2728_v29 = vld [vmem:[%s3347_s2 + $0x200] sm:$0xff]  }
  0x44   : > { %2376 = vmatpush3.bf16.msra.mxu1 %v2687_v54  ;;  %v2697_v54 = vld [vmem:[%s3347_s2 + $0x98] sm:$0xff]   ;;  %v1529_v12 = vrot.slane %v1528_v51, 4 }
  0x45   : > { %2385 = vmatprep.subr.bf16.mxu1 %v2690_v59  ;;  %2472 = vmatpush3.bf16.msra.mxu0 %v2688_v57 }
  0x46   : > { %2481 = vmatprep.subr.bf16.mxu0 %v2691_v14  ;;  %v1534_v45 = vsel %vm2895_vm2, %v1529_v12, %v1533_v26 }
  0x47   : > { %2378 = vmatmul.mubr.bf16.vlgmr.msra.gmra.mrb[0].mxu1 %v3092_v3  ;;  %v3169_v57 = vcombine.low %v3058_v31, %v1534_v45  ;;  %v2700_v31 = vld [vmem:[%s3347_s2 + $0x1a0] sm:$0xff]  }
  0x48   : > { %2386 = vmatpush3.bf16.msra.mxu1 %v2690_v59  ;;  %2381 = vmatprep.mubr.bf16.mxu1 %v3102_v8  ;;  %v2698_v59 = vld [vmem:[%s3347_s2 + $0x198] sm:$0xff]  }
  0x49   : > { %2387 = vmatprep.subr.bf16.mxu1 %v2693_v27  ;;  %2474 = vmatmul.mubr.bf16.vlgmr.msra.gmra.mrb[0].mxu0 %v2134_v40  ;;  %v2729_v40 = vld [vmem:[%s3347_s2 + $0x208] sm:$0xff]  }
  0x4a   : > { %2482 = vmatpush3.bf16.msra.mxu0 %v2691_v14  ;;  %2477 = vmatprep.mubr.bf16.mxu0 %v2135_v19  ;;  %v2714_v14 = vld [vmem:[%s3347_s2 + $0x1d0] sm:$0xff]  }
  0x4b   : > { %2483 = vmatprep.subr.bf16.mxu0 %v2694_v15 }
  0x4c   : > { %2388 = vmatpush3.bf16.msra.mxu1 %v2693_v27  ;;  %v2710_v27 = vld [vmem:[%s3347_s2 + $0x1c0] sm:$0xff]  }
  0x4d   : > { %2389 = vmatprep.subr.bf16.mxu1 %v2695_v23 }
  0x4e   : > { %2484 = vmatpush3.bf16.msra.mxu0 %v2694_v15 }
  0x4f   : > { %2382 = vmatmul.mubr.bf16.gmra.mrb[4].mxu1 %v3153_v46  ;;  %2485 = vmatprep.subr.bf16.mxu0 %v2696_v34 }
  0x50   : > { %2390 = vmatpush3.bf16.msra.mxu1 %v2695_v23  ;;  %2401 = vmatprep.mubr.bf16.mxu1 %v2048_v58  ;;  %v2716_v23 = vld [vmem:[%s3347_s2 + $0x1d8] sm:$0xff]  }
  0x51   : > { %2391 = vmatprep.subr.bf16.mxu1 %v2697_v54  ;;  %2478 = vmatmul.mubr.bf16.gmra.mrb[4].mxu0 %v2136_v56 }
  0x52   : > { %2486 = vmatpush3.bf16.msra.mxu0 %v2696_v34  ;;  %2497 = vmatprep.mubr.bf16.mxu0 %v3092_v3  ;;  %v2708_v3 = vld [vmem:[%s3347_s2 + $0x1b8] sm:$0xff]  }
  0x53   : > { %2487 = vmatprep.subr.bf16.mxu0 %v2698_v59 }
  0x54   : > { %2392 = vmatpush3.bf16.msra.mxu1 %v2697_v54 }
  0x55   : > { %2393 = vmatprep.subr.bf16.mxu1 %v2699_v24 }
  0x56   : > { %2488 = vmatpush3.bf16.msra.mxu0 %v2698_v59 }
  0x57   : > { %2489 = vmatprep.subr.bf16.mxu0 %v2700_v31 }
  0x58   : > { %2394 = vmatpush3.bf16.msra.mxu1 %v2699_v24 }
  0x59   : > { %2395 = vmatprep.subr.bf16.mxu1 %v2701_v39 }
  0x5a   : > { %2490 = vmatpush3.bf16.msra.mxu0 %v2700_v31 }
  0x5b   : > { %2491 = vmatprep.subr.bf16.mxu0 %v2702_v61 }
  0x5c   : > { %2396 = vmatpush3.bf16.msra.mxu1 %v2701_v39 }
  0x5d   : > { %2397 = vmatprep.subr.bf16.mxu1 %v2704_v60 }
  0x5e   : > { %2492 = vmatpush3.bf16.msra.mxu0 %v2702_v61 }
  0x5f   : > { %2493 = vmatprep.subr.bf16.mxu0 %v2705_v11 }
  0x60   : > { %2398 = vmatpush3.bf16.msra.mxu1 %v2704_v60 }
  0x61   : > { %2399 = vmatprep.subr.bf16.mxu1 %v2707_v62 }
  0x62   : > { %2494 = vmatpush3.bf16.msra.mxu0 %v2705_v11 }
  0x63   : > { %2495 = vmatprep.subr.bf16.mxu0 %v2708_v3 }
  0x64   : > { %2400 = vmatpush3.bf16.msra.mxu1 %v2707_v62 }
  0x65   : > { %2409 = vmatprep.subr.bf16.mxu1 %v2709_v2 }
  0x66   : > { %2496 = vmatpush3.bf16.msra.mxu0 %v2708_v3 }
  0x67   : > { %2402 = vmatmul.mubr.bf16.vlgmr.msra.gmra.mrb[0].mxu1 %v3204_v4  ;;  %2505 = vmatprep.subr.bf16.mxu0 %v2710_v27 }
  0x68   : > { %2410 = vmatpush3.bf16.msra.mxu1 %v2709_v2  ;;  %2405 = vmatprep.mubr.bf16.mxu1 %v3208_v5 }
  0x69   : > { %2411 = vmatprep.subr.bf16.mxu1 %v2711_v6  ;;  %2498 = vmatmul.mubr.bf16.vlgmr.msra.gmra.mrb[0].mxu0 %v3102_v8  ;;  %v2161_v8 = vcombine.low %v3001_v0, %v3086_v63  ;;  %v2720_v63 = vld [vmem:[%s3347_s2 + $0x1e8] sm:$0xff]  }
  0x6a   : > { %2506 = vmatpush3.bf16.msra.mxu0 %v2710_v27  ;;  %2501 = vmatprep.mubr.bf16.mxu0 %v3153_v46 }
  0x6b   : > { %2507 = vmatprep.subr.bf16.mxu0 %v2712_v9 }
  0x6c   : > { %2412 = vmatpush3.bf16.msra.mxu1 %v2711_v6 }
  0x6d   : > { %2413 = vmatprep.subr.bf16.mxu1 %v2713_v48 }
  0x6e   : > { %2508 = vmatpush3.bf16.msra.mxu0 %v2712_v9 }
  0x6f   : > { %2406 = vmatmul.mubr.bf16.gmra.mrb[4].mxu1 %v3225_v1  ;;  %2509 = vmatprep.subr.bf16.mxu0 %v2714_v14 }
  0x70   : > { %2414 = vmatpush3.bf16.msra.mxu1 %v2713_v48  ;;  %2425 = vmatprep.mubr.bf16.mxu1 %v2076_v37  ;;  %v2721_v37 = vld [vmem:[%s3347_s2 + $0xf0] sm:$0xff]  }
  0x71   : > { %2415 = vmatprep.subr.bf16.mxu1 %v2715_v42  ;;  %2502 = vmatmul.mubr.bf16.gmra.mrb[4].mxu0 %v2161_v8 }
  0x72   : > { %2510 = vmatpush3.bf16.msra.mxu0 %v2714_v14  ;;  %2521 = vmatprep.mubr.bf16.mxu0 %v2931_v10  ;;  %v2723_v10 = vld [vmem:[%s3347_s2 + $0x1f0] sm:$0xff]  }
  0x73   : > { %2511 = vmatprep.subr.bf16.mxu0 %v2716_v23 }
  0x74   : > { %2416 = vmatpush3.bf16.msra.mxu1 %v2715_v42 }
  0x75   : > { %2417 = vmatprep.subr.bf16.mxu1 %v2717_v22 }
  0x76   : > { %2512 = vmatpush3.bf16.msra.mxu0 %v2716_v23 }
  0x77   : > { %2513 = vmatprep.subr.bf16.mxu0 %v2718_v30 }
  0x78   : > { %2418 = vmatpush3.bf16.msra.mxu1 %v2717_v22 }
  0x79   : > { %2419 = vmatprep.subr.bf16.mxu1 %v2719_v13 }
  0x7a   : > { %2514 = vmatpush3.bf16.msra.mxu0 %v2718_v30 }
  0x7b   : > { %2515 = vmatprep.subr.bf16.mxu0 %v2720_v63 }
  0x7c   : > { %2420 = vmatpush3.bf16.msra.mxu1 %v2719_v13 }
  0x7d   : > { %2421 = vmatprep.subr.bf16.mxu1 %v2721_v37 }
  0x7e   : > { %2516 = vmatpush3.bf16.msra.mxu0 %v2720_v63 }
  0x7f   : > { %2517 = vmatprep.subr.bf16.mxu0 %v2723_v10 }
  0x80   : > { %2422 = vmatpush3.bf16.msra.mxu1 %v2721_v37 }
  0x81   : > { %2423 = vmatprep.subr.bf16.mxu1 %v2724_v28 }
  0x82   : > { %2518 = vmatpush3.bf16.msra.mxu0 %v2723_v10 }
  0x83   : > { %2519 = vmatprep.subr.bf16.mxu0 %v2725_v36 }
  0x84   : > { %2424 = vmatpush3.bf16.msra.mxu1 %v2724_v28 }
  0x85   : > { %2553 = vmatprep.subr.bf16.mxu1 %v2728_v29 }
  0x86   : > { %2520 = vmatpush3.bf16.msra.mxu0 %v2725_v36 }
  0x87   : > { %2426 = vmatmul.mubr.bf16.vlgmr.msra.gmra.mrb[0].mxu1 %v2077_v7  ;;  %2529 = vmatprep.subr.bf16.mxu0 %v2728_v29  ;;  %v2734_v7 = vld [vmem:[%s3347_s2 + $0x228] sm:$0xff]  }
  0x88   : > { %2561 = vmatpush3.bf16.msra.mxu1 %v2728_v29  ;;  %2429 = vmatprep.mubr.bf16.mxu1 %v2078_v47 }
  0x89   : > { %2554 = vmatprep.subr.bf16.mxu1 %v2729_v40  ;;  %2522 = vmatmul.mubr.bf16.vlgmr.msra.gmra.mrb[0].mxu0 %v3014_v17 }
  0x8a   : > { %2530 = vmatpush3.bf16.msra.mxu0 %v2728_v29  ;;  %2525 = vmatprep.mubr.bf16.mxu0 %v3051_v50 }
  0x8b   : > { %2531 = vmatprep.subr.bf16.mxu0 %v2729_v40 }
  0x8c   : > { %2562 = vmatpush3.bf16.msra.mxu1 %v2729_v40 }
  0x8d   : > { %2555 = vmatprep.subr.bf16.mxu1 %v2731_v41 }
  0x8e   : > { %2532 = vmatpush3.bf16.msra.mxu0 %v2729_v40 }
  0x8f   : > { %2430 = vmatmul.mubr.bf16.gmra.mrb[4].mxu1 %v2079_v21  ;;  %2533 = vmatprep.subr.bf16.mxu0 %v2731_v41 }
  0x90   : > { %2563 = vmatpush3.bf16.msra.mxu1 %v2731_v41  ;;  %2549 = vmatprep.mubr.bf16.mxu1 %v3225_v1 }
  0x91   : > { %2556 = vmatprep.subr.bf16.mxu1 %v2732_v33  ;;  %2526 = vmatmul.mubr.bf16.gmra.mrb[4].mxu0 %v3169_v57 }
  0x92   : > { %2534 = vmatpush3.bf16.msra.mxu0 %v2731_v41  ;;  %2545 = vmatprep.mubr.bf16.mxu0 %v3204_v4 }
  0x93   : > { %2535 = vmatprep.subr.bf16.mxu0 %v2732_v33 }
  0x94   : > { %2564 = vmatpush3.bf16.msra.mxu1 %v2732_v33 }
  0x95   : > { %2557 = vmatprep.subr.bf16.mxu1 %v2733_v52 }
  0x96   : > { %2536 = vmatpush3.bf16.msra.mxu0 %v2732_v33 }
  0x97   : > { %2537 = vmatprep.subr.bf16.mxu0 %v2733_v52 }
  0x98   : > { %2565 = vmatpush3.bf16.msra.mxu1 %v2733_v52 }
  0x99   : > { %2558 = vmatprep.subr.bf16.mxu1 %v2734_v7 }
  0x9a   : > { %2538 = vmatpush3.bf16.msra.mxu0 %v2733_v52 }
  0x9b   : > { %2539 = vmatprep.subr.bf16.mxu0 %v2734_v7 }
  0x9c   : > { %2566 = vmatpush3.bf16.msra.mxu1 %v2734_v7 }
  0x9d   : > { %2559 = vmatprep.subr.bf16.mxu1 %v2735_v25 }
  0x9e   : > { %2540 = vmatpush3.bf16.msra.mxu0 %v2734_v7 }
  0x9f   : > { %2541 = vmatprep.subr.bf16.mxu0 %v2735_v25 }
  0xa0   : > { %2567 = vmatpush3.bf16.msra.mxu1 %v2735_v25 }
  0xa1   : > { %2560 = vmatprep.subr.bf16.mxu1 %v2736_v38 }
  0xa2   : > { %2542 = vmatpush3.bf16.msra.mxu0 %v2735_v25 }
  0xa3   : > { %2543 = vmatprep.subr.bf16.mxu0 %v2736_v38 }
  0xa4   : > { %2568 = vmatpush3.bf16.msra.mxu1 %v2736_v38 }
  0xa6   : > { %2544 = vmatpush3.bf16.msra.mxu0 %v2736_v38 }
  0xa7   : > { %2550 = vmatmul.mubr.bf16.vlgmr.msra.gmra.mrb[8].mxu1 %v2212_v35  ;;  %v2221_v35 = vld [vmem:[%s3348_s3] ss:$0 sm:$0xff] }
  0xa9   : > { %2546 = vmatmul.mubr.bf16.vlgmr.msra.gmra.mrb[0].mxu0 %v3208_v5 }
 0x15a   : > { %v2427_v47 = vpop.f32.mrb[0].mxu1 }
 0x15b   : > { %v1027_v53 = vpop.f32.mrb[1].mxu1 }
 0x15c   : > { %v2428_v0 = vpop.f32.mrb[2].mxu1 }
 0x15d   : > { %v1030_v17 = vpop.f32.mrb[3].mxu1 }
 0x162   : > { %v2431_v21 = vpop.f32.mrb[4].mxu1 }
 0x163   : > { %v1043_v50 = vpop.f32.mrb[5].mxu1 }
 0x164   : > { %v2432_v32 = vpop.f32.mrb[6].mxu1  ;;  %v2527_v44 = vpop.f32.mrb[4].mxu0 }
 0x165   : > { %v1046_v43 = vpop.f32.mrb[7].mxu1  ;;  %v2573_v49 = vadd.f32 %v2527_v44, %v2431_v21  ;;  %v1653_v15 = vpop.f32.mrb[5].mxu0 }
 0x166   : > { %v2575_v19 = vadd.f32 %v1653_v15, %v1043_v50  ;;  %v2528_v20 = vpop.f32.mrb[6].mxu0 }
 0x167   : > { %v2577_v46 = vadd.f32 %v2528_v20, %v2432_v32  ;;  %v1656_v16 = vpop.f32.mrb[7].mxu0 }
 0x168   : > { %v2579_v18 = vadd.f32 %v1656_v16, %v1046_v43 }
 0x17a   : > { %v2551_v51 = vpop.f32.mrb[8].mxu1 }
 0x17b   : > { %v2574_v58 = vadd.f32 %v2573_v49, %v2551_v51  ;;  %v1799_v26 = vpop.f32.mrb[9].mxu1 }
 0x17c   : > { %v2576_v54 = vadd.f32 %v2575_v19, %v1799_v26  ;;  %v2552_v55 = vpop.f32.mrb[10].mxu1  ;;  %v2547_v24 = vpop.f32.mrb[0].mxu0 }
 0x17d   : > { %v1835_v12 = vadd.f32 %v2574_v58, %v2221_v35  ;;  %v2578_v34 = vadd.f32 %v2577_v46, %v2552_v55  ;;  %v1802_v45 = vpop.f32.mrb[11].mxu1  ;;  %v2569_v31 = vadd.f32 %v2547_v24, %v2427_v47  ;;  %v1783_v60 = vpop.f32.mrb[1].mxu0 }
 0x17e   : > { %v1833_v56 = vadd.f32 %v2576_v54, %v2221_v35  ;;  %v2580_v57 = vadd.f32 %v2579_v18, %v1802_v45  ;;  %v2570_v2 = vadd.f32 %v1783_v60, %v1027_v53  ;;  %v2548_v3 = vpop.f32.mrb[2].mxu0 }
 0x17f   : > { %v1843_v59 = vmax.f32 %v1835_v12, 0.0  ;;  %v1836_v39 = vadd.f32 %v2578_v34, %v2221_v35  ;;  %v1831_v5 = vadd.f32 %v2569_v31, %v2221_v35  ;;  %v2571_v27 = vadd.f32 %v2548_v3, %v2428_v0  ;;  %v1786_v48 = vpop.f32.mrb[3].mxu0 }
 0x180   : > { %v1841_v61 = vmax.f32 %v1833_v56, 0.0  ;;  %v1834_v62 = vadd.f32 %v2580_v57, %v2221_v35  ;;  %v1829_v1 = vadd.f32 %v2570_v2, %v2221_v35  ;;  %v2572_v14 = vadd.f32 %v1786_v48, %v1030_v17 }
 0x181   : > { %v1851_v11 = vpack.c.bf16 %v1843_v59, %v1843_v59  ;;  %v1844_v4 = vmax.f32 %v1836_v39, 0.0  ;;  %v1839_v8 = vmax.f32 %v1831_v5, 0.0  ;;  %v1832_v22 = vadd.f32 %v2571_v27, %v2221_v35 }
 0x182   : > { %v1849_v6 = vpack.c.bf16 %v1841_v61, %v1841_v61  ;;  %v1842_v9 = vmax.f32 %v1834_v62, 0.0  ;;  %v1837_v13 = vmax.f32 %v1829_v1, 0.0  ;;  %v1830_v30 = vadd.f32 %v2572_v14, %v2221_v35 }
 0x183   : > { %1860 = vst.msk [vmem:[%s3318_s9 + $0x18] sm:$0xf] %vm1853_vm6, %v1851_v11  ;;  %v1852_v42 = vpack.c.bf16 %v1844_v4, %v1844_v4  ;;  %v1847_v37 = vpack.c.bf16 %v1839_v8, %v1839_v8  ;;  %v1840_v63 = vmax.f32 %v1832_v22, 0.0 }
 0x184   : > { %1858 = vst.msk [vmem:[%s3318_s9 + $0x10] sm:$0xf] %vm1853_vm6, %v1849_v6  ;;  %v1850_v23 = vpack.c.bf16 %v1842_v9, %v1842_v9  ;;  %v1845_v28 = vpack.c.bf16 %v1837_v13, %v1837_v13  ;;  %v1838_v10 = vmax.f32 %v1830_v30, 0.0 }
 0x185   : > { %1861 = vst.msk [vmem:[%s3318_s9 + $0x1c] sm:$0xf] %vm1853_vm6, %v1852_v42  ;;  %1856 = vst.msk [vmem:[%s3318_s9 + $0x8] sm:$0xf] %vm1853_vm6, %v1847_v37  ;;  %v1848_v29 = vpack.c.bf16 %v1840_v63, %v1840_v63 }
 0x186   : > { %1859 = vst.msk [vmem:[%s3318_s9 + $0x14] sm:$0xf] %vm1853_vm6, %v1850_v23  ;;  %1854 = vst.msk [vmem:[%s3318_s9] sm:$0xf] %vm1853_vm6, %v1845_v28  ;;  %v1846_v36 = vpack.c.bf16 %v1838_v10, %v1838_v10 }
 0x187   : > { %1857 = vst.msk [vmem:[%s3318_s9 + $0xc] sm:$0xf] %vm1853_vm6, %v1848_v29 }
 0x188   : > { %1855 = vst.msk [vmem:[%s3318_s9 + $0x4] sm:$0xf] %vm1853_vm6, %v1846_v36 }
 0x189 PF: > { %s14_s17 = sadd.s32 1, %s2759_s17   ;;  %s3354_s15 = smov %s2755_s16 }
 0x18a   : > { %p11_p5 = scmp.ge.s32.totalorder %s14_s17, 4   ;;  %s3355_s16 = smov %s3357_s18 }
 0x18c   :  { %13 = sbr.rel (!%p11_p5) target bundleno = 2 (0x2), region = 77 }

// kernel: content_encoder_forward.33
= control target key start
LH: loop header
LB: loop body
LE: loop exit
PB: predicated region body
PF: predicated region fallthrough
CT: control target
= control target key end

     0   :  { %s2533_s21 = smov 0   ;;  %s2535_s22 = smov 0   ;;  %s3004_s0 = inlined_call_operand.vmem [shape: bf16[2,16,10,64], index: 0, kind: input, shape index: {}, may-alias: {0,1}]   ;;  %s3005_s1 = inlined_call_operand.vmem [shape: bf16[2,16,10,64], index: 1, kind: input, shape index: {}, may-alias: {0,1}]   ;;  %s3006_s2 = inlined_call_operand.vmem [shape: bf16[9,64,64], index: 2, kind: input, shape index: {}]   ;;  %s3007_s3 = inlined_call_operand.vmem [shape: f32[1,64], index: 3, kind: input, shape index: {}]   ;;  %s3008_s4 = inlined_call_operand.vmem [shape: bf16[2,8,8,64], index: 4, kind: output, shape index: {0}]   ;;  %s3009_s5 = inlined_call_operand.vmem [shape: f32[2,1,64], index: 5, kind: output, shape index: {1}]   ;;  %s3010_s6 = inlined_call_operand.vmem [shape: f32[2,1,64], index: 6, kind: output, shape index: {2}]  }
   0x1   :  { %s2537_s23 = smov 0  }
   0x2 LB: > { %s29_s24 = sadd.s32 1, %s2491_s22  ;;  %p1928_p0 = scmp.ge.s32.totalorder %s2495_s23, 1  ;;  %s2495_s23 = sphi %s2537_s23, %s17_s23   ;;  %s2491_s22 = sphi %s2535_s22, %s3016_s22   ;;  %s2487_s21 = sphi %s2533_s21, %s3015_s21  }
   0x3   : > { %p31_p1 = scmp.ge.s32.totalorder %s29_s24, 2  ;;  %p261_p2 = scmp.lt.s32.totalorder %s2495_s23, 3 }
   0x5   : > { %s3018_s24 = smov (%p31_p1, %s29_s24), 0  ;;  %p262_p3 = pnand %p1928_p0, %p261_p2 }
   0x6   : > { %v2429_v0 = vld [vmem:[%s3006_s2 + $0x20] sm:$0xff] (!%p262_p3)   ;;  %p318_p4 = scmp.lt.s32.totalorder (!%p262_p3), %s2487_s21, 1  ;;  %v2431_v2 = vld [vmem:[%s3006_s2 + $0x28] sm:$0xff] (!%p262_p3)   ;;  %v2433_v4 = vld [vmem:[%s3006_s2 + $0x30] sm:$0xff] (!%p262_p3)   ;;  %vm386_vm0 = vsmask.f32 (!%p262_p3), 3328 }
   0x7   : > { %265 = sbr.rel (%p262_p3) target bundleno = 362 (0x16a), region = 36  ;;  %v2430_v1 = vld [vmem:[%s3006_s2 + $0x80] sm:$0xff] (!%p262_p3)   ;;  %2188 = vmatprep.subr.bf16.mxu1 (!%p262_p3), %v2429_v0  ;;  %v2432_v3 = vld [vmem:[%s3006_s2 + $0x88] sm:$0xff] (!%p262_p3)   ;;  %v2434_v5 = vld [vmem:[%s3006_s2 + $0x90] sm:$0xff] (!%p262_p3)   ;;  %vm387_vm1 = vsmask.f32 (!%p262_p3), 7440 }
   0x8   : > { %2252 = vmatprep.subr.bf16.mxu0 (!%p262_p3), %v2430_v1  ;;  %2189 = vmatpush3.bf16.msra.mxu1 (!%p262_p3), %v2429_v0  ;;  %v2435_v6 = vld [vmem:[%s3006_s2 + $0x38] sm:$0xff] (!%p262_p3)   ;;  %v2627_v34 = vld [vmem:[%s3006_s2] sm:$0xff] (!%p262_p3)   ;;  %vm2631_vm2 = vmor (!%p262_p3), %vm386_vm0, %vm387_vm1  ;;  %vm546_vm3 = vcmask (!%p262_p3), 523264   ;;  %vm753_vm4 = vcmask (!%p262_p3), 1042432   ;;  %vm754_vm5 = vcmask (!%p262_p3), 1046532   ;;  %vm1696_vm7 = vcmask (!%p262_p3), 516096  }
   0x9   : > { %2253 = vmatpush3.bf16.msra.mxu0 (!%p262_p3), %v2430_v1  ;;  %2190 = vmatprep.subr.bf16.mxu1 (!%p262_p3), %v2431_v2  ;;  %v2436_v7 = vld [vmem:[%s3006_s2 + $0x98] sm:$0xff] (!%p262_p3)   ;;  %v2641_v40 = vld [vmem:[%s3006_s2 + $0xa0] sm:$0xff] (!%p262_p3)   ;;  %vm2724_vm6 = vmor (!%p262_p3), %vm753_vm4, %vm754_vm5  ;;  %vm1683_vm8 = vcmask (!%p262_p3), 519168  }
   0xa   : > { %2254 = vmatprep.subr.bf16.mxu0 (!%p262_p3), %v2432_v3 }
   0xc   : > { %2191 = vmatpush3.bf16.msra.mxu1 (!%p262_p3), %v2431_v2 }
   0xd   : > { %2255 = vmatpush3.bf16.msra.mxu0 (!%p262_p3), %v2432_v3  ;;  %2192 = vmatprep.subr.bf16.mxu1 (!%p262_p3), %v2433_v4 }
   0xe   : > { %s3020_s21 = smov (!%p318_p4, %s2487_s21), 1  ;;  %2256 = vmatprep.subr.bf16.mxu0 %v2434_v5 }
   0xf   : > { %s2111_s11 = sshll.u32 %s3020_s21, 7  ;;  %s2114_s28 = sshll.u32 %s3020_s21, 5 }
  0x10   : > { %s2577_s16 = scalar_lea.vmem %s3004_s0, %s2111_s11  ;;  %2193 = vmatpush3.bf16.msra.mxu1 %v2433_v4  ;;  %s2113_s29 = sadd.s32 64, %s2111_s11 }
  0x11   : > { %v2586_v8 = vld [vmem:[%s2577_s16] sm:$0xf]  ;;  %v2589_v9 = vld [vmem:[%s2577_s16 + $0x4] sm:$0x1]  ;;  %v2592_v10 = vld [vmem:[%s2577_s16 + $0x8] sm:$0xf]  ;;  %2257 = vmatpush3.bf16.msra.mxu0 %v2434_v5  ;;  %2194 = vmatprep.subr.bf16.mxu1 %v2435_v6  ;;  %s2691_s10 = scalar_lea.vmem %s3005_s1, %s2113_s29  ;;  %s2949_s7 = scalar_lea.vmem %s3008_s4, %s2114_s28 }
  0x12   : > { %v2595_v11 = vld [vmem:[%s2577_s16 + $0xc] sm:$0x1]  ;;  %v390_v12 = vshrl.u32 %v2586_v8, 16  ;;  %v393_v13 = vshll.u32 %v2586_v8, 16  ;;  %v399_v14 = vshll.u32 %v2589_v9, 16  ;;  %v404_v15 = vshrl.u32 %v2592_v10, 16  ;;  %2258 = vmatprep.subr.bf16.mxu0 %v2436_v7  ;;  %s353_s11 = scalar_lea.vmem %s3009_s5, %s3020_s21  ;;  %s356_s14 = scalar_lea.vmem %s3010_s6, %s3020_s21 }
  0x13   : > { %v407_v16 = vshll.u32 %v2592_v10, 16  ;;  %v413_v17 = vshll.u32 %v2595_v11, 16  ;;  %v2604_v18 = vld [vmem:[%s2577_s16 + $0x10] sm:$0xf]  ;;  %v2607_v19 = vld [vmem:[%s2577_s16 + $0x14] sm:$0x1] }
  0x14   : > { %v392_v20 = vrot.slane %v390_v12, 4  ;;  %v395_v21 = vrot.slane %v393_v13, 5  ;;  %v401_v22 = vrot.slane %v399_v14, 5  ;;  %v406_v23 = vrot.slane %v404_v15, 4  ;;  %v2610_v24 = vld [vmem:[%s2577_s16 + $0x18] sm:$0xf]  ;;  %2195 = vmatpush3.bf16.msra.mxu1 %v2435_v6 }
  0x15   : > { %v409_v25 = vrot.slane %v407_v16, 5  ;;  %v415_v26 = vrot.slane %v413_v17, 5  ;;  %v2613_v27 = vld [vmem:[%s2577_s16 + $0x1c] sm:$0x1]  ;;  %v2616_v28 = vld [vmem:[%s2577_s16 + $0x20] sm:$0xf]  ;;  %2259 = vmatpush3.bf16.msra.mxu0 %v2436_v7  ;;  %2204 = vmatprep.subr.bf16.mxu1 %v2627_v34 }
  0x16   : > { %v396_v29 = vor.u32 %v395_v21, %v392_v20  ;;  %v2619_v30 = vld [vmem:[%s2577_s16 + $0x24] sm:$0x1]  ;;  %v418_v31 = vshrl.u32 %v2604_v18, 16  ;;  %v421_v32 = vshll.u32 %v2604_v18, 16  ;;  %v427_v33 = vshll.u32 %v2607_v19, 16  ;;  %2268 = vmatprep.subr.bf16.mxu0 %v2641_v40  ;;  %v2439_v17 = vld [vmem:[%s3006_s2 + $0x8] sm:$0xff]  }
  0x17   : > { %v410_v36 = vor.u32 %v409_v25, %v406_v23  ;;  %v432_v37 = vshrl.u32 %v2610_v24, 16  ;;  %v435_v38 = vshll.u32 %v2610_v24, 16  ;;  %v441_v39 = vshll.u32 %v2613_v27, 16  ;;  %v2660_v2 = vld [vmem:[%s2577_s16 + $0x28] sm:$0xf] }
  0x18   : > { %v397_v41 = vrot.slane %v396_v29, 4  ;;  %v420_v42 = vrot.slane %v418_v31, 4  ;;  %v423_v43 = vrot.slane %v421_v32, 5  ;;  %v429_v45 = vrot.slane %v427_v33, 5  ;;  %v2663_v3 = vld [vmem:[%s2577_s16 + $0x2c] sm:$0x1] }
  0x19   : > { %v411_v44 = vrot.slane %v410_v36, 4  ;;  %v434_v46 = vrot.slane %v432_v37, 4  ;;  %v437_v47 = vrot.slane %v435_v38, 5  ;;  %v446_v50 = vshrl.u32 %v2616_v28, 16  ;;  %v2666_v4 = vld [vmem:[%s2577_s16 + $0x30] sm:$0xf] }
  0x1a   : > { %v402_v48 = vsel %vm2631_vm2, %v397_v41, %v401_v22  ;;  %v424_v49 = vor.u32 %v423_v43, %v420_v42  ;;  %v449_v51 = vshll.u32 %v2616_v28, 16  ;;  %v443_v54 = vrot.slane %v441_v39, 5  ;;  %v2673_v13 = vld [vmem:[%s2577_s16 + $0x34] sm:$0x1]  ;;  %v2676_v14 = vld [vmem:[%s2577_s16 + $0x38] sm:$0xf] }
  0x1b   : > { %v416_v52 = vsel %vm2631_vm2, %v411_v44, %v415_v26  ;;  %v438_v53 = vor.u32 %v437_v47, %v434_v46  ;;  %v455_v55 = vshll.u32 %v2619_v30, 16  ;;  %v448_v58 = vrot.slane %v446_v50, 4  ;;  %v2686_v22 = vld [vmem:[%s2577_s16 + $0x3c] sm:$0x1]  ;;  %v2440_v23 = vld [vmem:[%s3006_s2 + $0xa8] sm:$0xff]   ;;  %v2441_v38 = vld [vmem:[%s3006_s2 + $0x10] sm:$0xff]  }
  0x1c   : > { %v1943_v56 = vcombine.low %v402_v48, %v416_v52  ;;  %v425_v57 = vrot.slane %v424_v49, 4  ;;  %v451_v59 = vrot.slane %v449_v51, 5  ;;  %v762_v60 = vrot.slane %v2595_v11, 5  ;;  %v2709_v44 = vld [vmem:[%s2691_s10] sm:$0xf] }
  0x1d   : > { %v439_v61 = vrot.slane %v438_v53, 4  ;;  %v457_v62 = vrot.slane %v455_v55, 5  ;;  %v766_v63 = vrot.slane %v2607_v19, 5  ;;  %v460_v7 = vshrl.u32 %v2660_v2, 16 }
  0x1e   : > { %2196 = vmatprep.mubr.msk.bf16.mxu1 %vm546_vm3, %v1943_v56  ;;  %v430_v0 = vsel %vm2631_vm2, %v425_v57, %v429_v45  ;;  %v452_v1 = vor.u32 %v451_v59, %v448_v58  ;;  %v463_v12 = vshll.u32 %v2660_v2, 16  ;;  %v469_v20 = vshll.u32 %v2663_v3, 16  ;;  %v2712_v45 = vld [vmem:[%s2691_s10 + $0x4] sm:$0x1] }
  0x1f   : > { %v444_v5 = vsel %vm2631_vm2, %v439_v61, %v443_v54  ;;  %v2023_v6 = vcombine.low %v416_v52, %v430_v0  ;;  %v474_v21 = vshrl.u32 %v2666_v4, 16  ;;  %v462_v25 = vrot.slane %v460_v7, 4 }
  0x20   : > { %v453_v15 = vrot.slane %v452_v1, 4  ;;  %v2678_v16 = vcombine.low %v430_v0, %v444_v5  ;;  %v465_v26 = vrot.slane %v463_v12, 5  ;;  %v477_v29 = vshll.u32 %v2666_v4, 16 }
  0x21   : > { %2260 = vmatprep.mubr.msk.bf16.mxu0 %vm546_vm3, %v2023_v6  ;;  %v483_v31 = vshll.u32 %v2673_v13, 16  ;;  %v471_v33 = vrot.slane %v469_v20, 5  ;;  %v476_v36 = vrot.slane %v474_v21, 4  ;;  %v488_v37 = vshrl.u32 %v2676_v14, 16 }
  0x22   : > { %v458_v32 = vsel %vm2631_vm2, %v453_v15, %v457_v62  ;;  %2197 = vmatmul.mubr.msk.bf16.vlgmr.msra.gmra.mrb[0].mxu1 %vm546_vm3, %v2678_v16  ;;  %v466_v41 = vor.u32 %v465_v26, %v462_v25  ;;  %v479_v42 = vrot.slane %v477_v29, 5  ;;  %v491_v47 = vshll.u32 %v2676_v14, 16 }
  0x23   : > { %v2024_v39 = vcombine.low %v444_v5, %v458_v32  ;;  %2205 = vmatpush3.bf16.msra.mxu1 %v2627_v34  ;;  %v485_v43 = vrot.slane %v483_v31, 5  ;;  %v490_v46 = vrot.slane %v488_v37, 4  ;;  %v497_v48 = vshll.u32 %v2686_v22, 16 }
  0x24   : > { %2206 = vmatprep.subr.bf16.mxu1 %v2439_v17  ;;  %v1043_v49 = vshrl.u32 %v2709_v44, 16  ;;  %v467_v50 = vrot.slane %v466_v41, 4  ;;  %v480_v51 = vor.u32 %v479_v42, %v476_v36  ;;  %v1046_v34 = vshll.u32 %v2709_v44, 16  ;;  %v2448_v36 = vld [vmem:[%s3006_s2 + $0xc0] sm:$0xff]  }
  0x25   : > { %2261 = vmatmul.mubr.msk.bf16.vlgmr.msra.gmra.mrb[0].mxu0 %vm546_vm3, %v2024_v39  ;;  %v1052_v52 = vshll.u32 %v2712_v45, 16  ;;  %v770_v53 = vrot.slane %v2613_v27, 5  ;;  %v493_v54 = vrot.slane %v491_v47, 5  ;;  %v1968_v57 = vrot.slane %v2592_v10, 9  ;;  %v2442_v27 = vld [vmem:[%s3006_s2 + $0xb0] sm:$0xff]   ;;  %v2449_v47 = vld [vmem:[%s3006_s2 + $0x48] sm:$0xff]  }
  0x26   : > { %2269 = vmatpush3.bf16.msra.mxu0 %v2641_v40  ;;  %v1045_v55 = vrot.slane %v1043_v49, 4  ;;  %v472_v58 = vsel %vm2631_vm2, %v467_v50, %v471_v33  ;;  %v481_v59 = vrot.slane %v480_v51, 4  ;;  %v1048_v61 = vrot.slane %v1046_v34, 5  ;;  %v2443_v40 = vld [vmem:[%s3006_s2 + $0x18] sm:$0xff]   ;;  %v2447_v33 = vld [vmem:[%s3006_s2 + $0x40] sm:$0xff]  }
  0x27   : > { %2270 = vmatprep.subr.bf16.mxu0 %v2440_v23  ;;  %2207 = vmatpush3.bf16.msra.mxu1 %v2439_v17  ;;  %v2737_v62 = vcombine.low %v458_v32, %v472_v58  ;;  %v494_v0 = vor.u32 %v493_v54, %v490_v46  ;;  %v499_v1 = vrot.slane %v497_v48, 5  ;;  %v1969_v5 = vrot.slane %v2604_v18, 9 }
  0x28   : > { %2208 = vmatprep.subr.bf16.mxu1 %v2441_v38  ;;  %v774_v6 = vrot.slane %v2619_v30, 5  ;;  %v486_v7 = vsel %vm2631_vm2, %v481_v59, %v485_v43  ;;  %v1049_v12 = vor.u32 %v1048_v61, %v1045_v55  ;;  %v1054_v15 = vrot.slane %v1052_v52, 5  ;;  %v2450_v52 = vld [vmem:[%s3006_s2 + $0xc8] sm:$0xff]  }
  0x29   : > { %2200 = vmatprep.mubr.msk.bf16.mxu1 %vm546_vm3, %v2737_v62  ;;  %v2025_v17 = vcombine.low %v472_v58, %v486_v7  ;;  %v495_v20 = vrot.slane %v494_v0, 4  ;;  %v2749_v21 = vsel %vm2724_vm6, %v1968_v57, %v762_v60  ;;  %v2755_v30 = vsel %vm2724_vm6, %v1969_v5, %v766_v63  ;;  %v2458_v5 = vld [vmem:[%s3006_s2 + $0xe0] sm:$0xff]  }
  0x2a   : > { %2271 = vmatpush3.bf16.msra.mxu0 %v2440_v23  ;;  %v1050_v25 = vrot.slane %v1049_v12, 4  ;;  %v2444_v23 = vld [vmem:[%s3006_s2 + $0xb8] sm:$0xff]   ;;  %v1970_v60 = vrot.slane %v2610_v24, 9  ;;  %v1971_v19 = vrot.slane %v2616_v28, 9  ;;  %v1955_v29 = vcombine.low %v2586_v8, %v2592_v10  ;;  %v2460_v12 = vld [vmem:[%s3006_s2 + $0xe8] sm:$0xff]  }
  0x2b   : > { %2272 = vmatprep.subr.bf16.mxu0 %v2442_v27  ;;  %2209 = vmatpush3.bf16.msra.mxu1 %v2441_v38  ;;  %v500_v11 = vsel %vm2631_vm2, %v495_v20, %v499_v1  ;;  %v2044_v31 = vcombine.low %v2749_v21, %v2755_v30  ;;  %v1972_v37 = vrot.slane %v2660_v2, 9  ;;  %v778_v38 = vrot.slane %v2663_v3, 5  ;;  %v2457_v1 = vld [vmem:[%s3006_s2 + $0x60] sm:$0xff]   ;;  %v2461_v20 = vld [vmem:[%s3006_s2 + $0x70] sm:$0xff]  }
  0x2c   : > { %2264 = vmatprep.mubr.msk.bf16.mxu0 %vm546_vm3, %v2025_v17  ;;  %2210 = vmatprep.subr.bf16.mxu1 %v2443_v40  ;;  %v2765_v26 = vcombine.low %v486_v7, %v500_v11  ;;  %v2769_v63 = vsel %vm2631_vm2, %v1050_v25, %v1054_v15  ;;  %v771_v39 = vsel %vm2724_vm6, %v1970_v60, %v770_v53  ;;  %v1973_v42 = vrot.slane %v2666_v4, 9  ;;  %v2459_v7 = vld [vmem:[%s3006_s2 + $0x68] sm:$0xff]   ;;  %v2463_v25 = vld [vmem:[%s3006_s2 + $0xf0] sm:$0xff]   ;;  %v2464_v60 = vld [vmem:[%s3006_s2 + $0x78] sm:$0xff]  }
  0x2d   : > { %v2026_v32 = vcombine.low %v500_v11, %v2769_v63  ;;  %v775_v41 = vsel %vm2724_vm6, %v1971_v19, %v774_v6  ;;  %v782_v43 = vrot.slane %v2673_v13, 5  ;;  %v1956_v46 = vcombine.low %v2604_v18, %v2610_v24  ;;  %v2870_v17 = vld [vmem:[%s2691_s10 + $0x8] sm:$0xf] }
  0x2e   : > { %2273 = vmatpush3.bf16.msra.mxu0 %v2442_v27  ;;  %2201 = vmatmul.mubr.msk.bf16.gmra.mrb[4].mxu1 %vm546_vm3, %v2765_v26  ;;  %v2045_v3 = vcombine.low %v771_v39, %v775_v41  ;;  %v779_v48 = vsel %vm2724_vm6, %v1972_v37, %v778_v38  ;;  %v1974_v49 = vrot.slane %v2676_v14, 9  ;;  %v786_v50 = vrot.slane %v2686_v22, 5  ;;  %v2453_v22 = vld [vmem:[%s3006_s2 + $0x50] sm:$0xff]   ;;  %v2455_v27 = vld [vmem:[%s3006_s2 + $0x58] sm:$0xff]  }
  0x2f   : > { %2274 = vmatprep.subr.bf16.mxu0 %v2444_v23  ;;  %2265 = vmatmul.mubr.msk.bf16.gmra.mrb[4].mxu0 %vm546_vm3, %v2026_v32  ;;  %v2804_v13 = vsel %vm2724_vm6, %v1973_v42, %v782_v43  ;;  %v2035_v51 = vrot.slane %v2709_v44, 9  ;;  %v1182_v34 = vrot.slane %v2712_v45, 5  ;;  %v1957_v53 = vcombine.low %v2616_v28, %v2660_v2  ;;  %v2465_v32 = vld [vmem:[%s3006_s2 + $0xf8] sm:$0xff]  }
  0x30   : > { %2211 = vmatpush3.bf16.msra.mxu1 %v2443_v40  ;;  %2212 = vmatprep.mubr.msk.bf16.mxu1 %vm546_vm3, %v1955_v29  ;;  %v758_v54 = vrot.slane %v2589_v9, 5  ;;  %v2046_v55 = vcombine.low %v779_v48, %v2804_v13  ;;  %v1967_v57 = vrot.slane %v2586_v8, 9  ;;  %v787_v45 = vsel %vm2724_vm6, %v1974_v49, %v786_v50  ;;  %v2454_v8 = vld [vmem:[%s3006_s2 + $0xd0] sm:$0xff]   ;;  %v2456_v40 = vld [vmem:[%s3006_s2 + $0xd8] sm:$0xff]  }
  0x31   : > { %2276 = vmatprep.mubr.msk.bf16.mxu0 %vm546_vm3, %v2044_v31  ;;  %2220 = vmatprep.subr.bf16.mxu1 %v2447_v33  ;;  %v2827_v9 = vsel %vm2724_vm6, %v2035_v51, %v1182_v34  ;;  %v1958_v58 = vcombine.low %v2666_v4, %v2676_v14  ;;  %v2856_v6 = vcombine.low %v2755_v30, %v771_v39  ;;  %v1423_v30 = vshll.u32 %v2870_v17, 16  ;;  %v377_v31 = vld [vmem:[%s2691_s10 + $0xc] sm:$0x1] }
  0x32   : > { %2275 = vmatpush3.bf16.msra.mxu0 %v2444_v23  ;;  %v759_v59 = vsel %vm2724_vm6, %v1967_v57, %v758_v54  ;;  %v2047_v61 = vcombine.low %v787_v45, %v2827_v9  ;;  %v2865_v15 = vcombine.low %v775_v41, %v779_v48  ;;  %v1986_v23 = vcombine.low %v2804_v13, %v787_v45  ;;  %v2108_v57 = vld [vmem:[%s3007_s3] ss:$0 sm:$0xff] }
  0x33   : > { %2284 = vmatprep.subr.bf16.mxu0 %v2448_v36  ;;  %v1983_v0 = vcombine.low %v759_v59, %v2749_v21  ;;  %v1420_v21 = vshrl.u32 %v2870_v17, 16  ;;  %v2064_v11 = vcombine.low %v2709_v44, %v2870_v17  ;;  %v1425_v29 = vrot.slane %v1423_v30, 5 }
  0x34   : > { %v1429_v38 = vshll.u32 %v377_v31, 16  ;;  %v2005_v42 = vcombine.low %v2660_v2, %v2666_v4  ;;  %v2006_v2 = vcombine.low %v2676_v14, %v2709_v44  ;;  %v2090_v4 = vrot.slane %v2870_v17, 9 }
  0x35   : > { %v1422_v19 = vrot.slane %v1420_v21, 4  ;;  %v2497_v44 = vmov 0.0  }
  0x36   : > { %2213 = vmatmul.mubr.msk.bf16.vlgmr.msra.gmra.mrb[0].mxu1 %vm546_vm3, %v1956_v46  ;;  %v1431_v41 = vrot.slane %v1429_v38, 5  ;;  %1697 = vst.msk [vmem:[#allocation2] sm:$0x1] %vm1696_vm7, %v2497_v44  ;;  %1698 = vst.msk [vmem:[#allocation3] sm:$0x1] %vm1696_vm7, %v2497_v44 }
  0x37   : > { %2277 = vmatmul.mubr.msk.bf16.vlgmr.msra.gmra.mrb[0].mxu0 %vm546_vm3, %v2045_v3  ;;  %2221 = vmatpush3.bf16.msra.mxu1 %v2447_v33  ;;  %v2003_v33 = vcombine.low %v2592_v10, %v2604_v18  ;;  %v1426_v37 = vor.u32 %v1425_v29, %v1422_v19  ;;  %v2004_v10 = vcombine.low %v2610_v24, %v2616_v28  ;;  %v2469_v18 = vld [vmem:[%s3006_s2 + $0x108] sm:$0xff]   ;;  %v2471_v28 = vld [vmem:[%s3006_s2 + $0x110] sm:$0xff]  }
  0x38   : > { %2285 = vmatpush3.bf16.msra.mxu0 %v2448_v36  ;;  %2222 = vmatprep.subr.bf16.mxu1 %v2449_v47  ;;  %v2468_v36 = vld [vmem:[%s3006_s2 + $0x100] sm:$0xff]  }
  0x39   : > { %2286 = vmatprep.subr.bf16.mxu0 %v2450_v52  ;;  %2216 = vmatprep.mubr.msk.bf16.mxu1 %vm546_vm3, %v1957_v53  ;;  %v1427_v39 = vrot.slane %v1426_v37, 4 }
  0x3a   : > { %2280 = vmatprep.mubr.msk.bf16.mxu0 %vm546_vm3, %v2046_v55 }
  0x3b   : > { %2223 = vmatpush3.bf16.msra.mxu1 %v2449_v47  ;;  %v1432_v24 = vsel %vm2631_vm2, %v1427_v39, %v1431_v41 }
  0x3c   : > { %2287 = vmatpush3.bf16.msra.mxu0 %v2450_v52  ;;  %2224 = vmatprep.subr.bf16.mxu1 %v2453_v22  ;;  %v2081_v35 = vcombine.low %v2769_v63, %v1432_v24 }
  0x3d   : > { %2288 = vmatprep.subr.bf16.mxu0 %v2454_v8 }
  0x3e   : > { %2217 = vmatmul.mubr.msk.bf16.gmra.mrb[4].mxu1 %vm546_vm3, %v1958_v58 }
  0x3f   : > { %2281 = vmatmul.mubr.msk.bf16.gmra.mrb[4].mxu0 %vm546_vm3, %v2047_v61  ;;  %2225 = vmatpush3.bf16.msra.mxu1 %v2453_v22 }
  0x40   : > { %2289 = vmatpush3.bf16.msra.mxu0 %v2454_v8  ;;  %2226 = vmatprep.subr.bf16.mxu1 %v2455_v27 }
  0x41   : > { %2290 = vmatprep.subr.bf16.mxu0 %v2456_v40  ;;  %2228 = vmatprep.mubr.msk.bf16.mxu1 %vm546_vm3, %v1983_v0 }
  0x42   : > { %2292 = vmatprep.mubr.msk.bf16.mxu0 %vm546_vm3, %v1956_v46 }
  0x43   : > { %2227 = vmatpush3.bf16.msra.mxu1 %v2455_v27 }
  0x44   : > { %2291 = vmatpush3.bf16.msra.mxu0 %v2456_v40  ;;  %2236 = vmatprep.subr.bf16.mxu1 %v2457_v1 }
  0x45   : > { %2300 = vmatprep.subr.bf16.mxu0 %v2458_v5 }
  0x46   : > { %2229 = vmatmul.mubr.msk.bf16.vlgmr.msra.gmra.mrb[0].mxu1 %vm546_vm3, %v2856_v6 }
  0x47   : > { %2293 = vmatmul.mubr.msk.bf16.vlgmr.msra.gmra.mrb[0].mxu0 %vm546_vm3, %v1957_v53  ;;  %2237 = vmatpush3.bf16.msra.mxu1 %v2457_v1 }
  0x48   : > { %2301 = vmatpush3.bf16.msra.mxu0 %v2458_v5  ;;  %2238 = vmatprep.subr.bf16.mxu1 %v2459_v7 }
  0x49   : > { %2302 = vmatprep.subr.bf16.mxu0 %v2460_v12  ;;  %2232 = vmatprep.mubr.msk.bf16.mxu1 %vm546_vm3, %v2865_v15 }
  0x4a   : > { %2296 = vmatprep.mubr.msk.bf16.mxu0 %vm546_vm3, %v1958_v58 }
  0x4b   : > { %2239 = vmatpush3.bf16.msra.mxu1 %v2459_v7 }
  0x4c   : > { %2303 = vmatpush3.bf16.msra.mxu0 %v2460_v12  ;;  %2240 = vmatprep.subr.bf16.mxu1 %v2461_v20 }
  0x4d   : > { %2304 = vmatprep.subr.bf16.mxu0 %v2463_v25 }
  0x4e   : > { %2233 = vmatmul.mubr.msk.bf16.gmra.mrb[4].mxu1 %vm546_vm3, %v1986_v23 }
  0x4f   : > { %2297 = vmatmul.mubr.msk.bf16.gmra.mrb[4].mxu0 %vm546_vm3, %v2064_v11  ;;  %2241 = vmatpush3.bf16.msra.mxu1 %v2461_v20 }
  0x50   : > { %2305 = vmatpush3.bf16.msra.mxu0 %v2463_v25  ;;  %2242 = vmatprep.subr.bf16.mxu1 %v2464_v60 }
  0x51   : > { %2306 = vmatprep.subr.bf16.mxu0 %v2465_v32  ;;  %2244 = vmatprep.mubr.msk.bf16.mxu1 %vm546_vm3, %v2003_v33 }
  0x52   : > { %2308 = vmatprep.mubr.msk.bf16.mxu0 %vm546_vm3, %v2678_v16  ;;  %v1547_v16 = vrot.slane %v377_v31, 5 }
  0x53   : > { %2243 = vmatpush3.bf16.msra.mxu1 %v2464_v60 }
  0x54   : > { %2307 = vmatpush3.bf16.msra.mxu0 %v2465_v32  ;;  %2332 = vmatprep.subr.bf16.mxu1 %v2468_v36 }
  0x55   : > { %2316 = vmatprep.subr.bf16.mxu0 %v2468_v36 }
  0x56   : > { %2245 = vmatmul.mubr.msk.bf16.vlgmr.msra.gmra.mrb[0].mxu1 %vm546_vm3, %v2004_v10 }
  0x57   : > { %2309 = vmatmul.mubr.msk.bf16.vlgmr.msra.gmra.mrb[0].mxu0 %vm546_vm3, %v2737_v62  ;;  %2336 = vmatpush3.bf16.msra.mxu1 %v2468_v36  ;;  %v2472_v62 = vld [vmem:[%s3006_s2 + $0x118] sm:$0xff]  }
  0x58   : > { %2317 = vmatpush3.bf16.msra.mxu0 %v2468_v36  ;;  %2333 = vmatprep.subr.bf16.mxu1 %v2469_v18 }
  0x59   : > { %2318 = vmatprep.subr.bf16.mxu0 %v2469_v18  ;;  %2248 = vmatprep.mubr.msk.bf16.mxu1 %vm546_vm3, %v2005_v42 }
  0x5a   : > { %2312 = vmatprep.mubr.msk.bf16.mxu0 %vm546_vm3, %v2765_v26  ;;  %v1548_v26 = vsel %vm2724_vm6, %v2090_v4, %v1547_v16 }
  0x5b   : > { %2337 = vmatpush3.bf16.msra.mxu1 %v2469_v18  ;;  %v2099_v14 = vcombine.low %v2827_v9, %v1548_v26 }
  0x5c   : > { %2319 = vmatpush3.bf16.msra.mxu0 %v2469_v18  ;;  %2334 = vmatprep.subr.bf16.mxu1 %v2471_v28 }
  0x5d   : > { %2320 = vmatprep.subr.bf16.mxu0 %v2471_v28 }
  0x5e   : > { %2249 = vmatmul.mubr.msk.bf16.gmra.mrb[4].mxu1 %vm546_vm3, %v2006_v2 }
  0x5f   : > { %2313 = vmatmul.mubr.msk.bf16.gmra.mrb[4].mxu0 %vm546_vm3, %v2081_v35  ;;  %2338 = vmatpush3.bf16.msra.mxu1 %v2471_v28 }
  0x60   : > { %2321 = vmatpush3.bf16.msra.mxu0 %v2471_v28  ;;  %2335 = vmatprep.subr.bf16.mxu1 %v2472_v62 }
  0x61   : > { %2322 = vmatprep.subr.bf16.mxu0 %v2472_v62  ;;  %2324 = vmatprep.mubr.msk.bf16.mxu0 %vm546_vm3, %v2856_v6 }
  0x62   : > { %2328 = vmatprep.mubr.msk.bf16.mxu1 %vm546_vm3, %v1986_v23 }
  0x63   : > { %2339 = vmatpush3.bf16.msra.mxu1 %v2472_v62 }
  0x64   : > { %2323 = vmatpush3.bf16.msra.mxu0 %v2472_v62 }
  0x66   : > { %2329 = vmatmul.mubr.msk.bf16.vlgmr.msra.gmra.mrb[8].mxu1 %vm546_vm3, %v2099_v14 }
  0x67   : > { %2325 = vmatmul.mubr.msk.bf16.vlgmr.msra.gmra.mrb[0].mxu0 %vm546_vm3, %v2865_v15 }
 0x129   : > { %v2246_v56 = vpop.f32.mrb[0].mxu1 }
 0x12a   : > { %v1003_v63 = vpop.f32.mrb[1].mxu1 }
 0x12b   : > { %v2247_v43 = vpop.f32.mrb[2].mxu1 }
 0x12c   : > { %v1006_v3 = vpop.f32.mrb[3].mxu1 }
 0x131   : > { %v2250_v46 = vpop.f32.mrb[4].mxu1 }
 0x132   : > { %v2314_v47 = vpop.f32.mrb[4].mxu0  ;;  %v1019_v48 = vpop.f32.mrb[5].mxu1 }
 0x133   : > { %v2344_v13 = vadd.f32 %v2314_v47, %v2250_v46  ;;  %v1521_v49 = vpop.f32.mrb[5].mxu0  ;;  %v2251_v50 = vpop.f32.mrb[6].mxu1 }
 0x134   : > { %v2346_v51 = vadd.f32 %v1521_v49, %v1019_v48  ;;  %v2315_v34 = vpop.f32.mrb[6].mxu0  ;;  %v1022_v52 = vpop.f32.mrb[7].mxu1 }
 0x135   : > { %v2348_v53 = vadd.f32 %v2315_v34, %v2251_v50  ;;  %v1524_v54 = vpop.f32.mrb[7].mxu0 }
 0x136   : > { %v2350_v55 = vadd.f32 %v1524_v54, %v1022_v52 }
 0x139   : > { %v2330_v22 = vpop.f32.mrb[8].mxu1 }
 0x13a   : > { %v2326_v45 = vpop.f32.mrb[0].mxu0  ;;  %v2345_v9 = vadd.f32 %v2344_v13, %v2330_v22  ;;  %v1637_v8 = vpop.f32.mrb[9].mxu1 }
 0x13b   : > { %v2340_v58 = vadd.f32 %v2326_v45, %v2246_v56  ;;  %v1621_v59 = vpop.f32.mrb[1].mxu0  ;;  %v2347_v61 = vadd.f32 %v2346_v51, %v1637_v8  ;;  %v2331_v27 = vpop.f32.mrb[10].mxu1 }
 0x13c   : > { %v1673_v40 = vadd.f32 %v2345_v9, %v2108_v57  ;;  %v2341_v0 = vadd.f32 %v1621_v59, %v1003_v63  ;;  %v2327_v1 = vpop.f32.mrb[2].mxu0  ;;  %v2349_v5 = vadd.f32 %v2348_v53, %v2331_v27  ;;  %v1640_v6 = vpop.f32.mrb[11].mxu1 }
 0x13d   : > { %v1669_v7 = vadd.f32 %v2340_v58, %v2108_v57  ;;  %v1671_v12 = vadd.f32 %v2347_v61, %v2108_v57  ;;  %v2342_v15 = vadd.f32 %v2327_v1, %v2247_v43  ;;  %v1624_v17 = vpop.f32.mrb[3].mxu0  ;;  %v2351_v20 = vadd.f32 %v2350_v55, %v1640_v6 }
 0x13e   : > { %v1681_v21 = vpack.c.bf16 %v1673_v40, %v1673_v40  ;;  %v1667_v30 = vadd.f32 %v2341_v0, %v2108_v57  ;;  %v1674_v19 = vadd.f32 %v2349_v5, %v2108_v57  ;;  %v2343_v29 = vadd.f32 %v1624_v17, %v1006_v3 }
 0x13f   : > { %v1677_v25 = vpack.c.bf16 %v1669_v7, %v1669_v7  ;;  %v1679_v23 = vpack.c.bf16 %v1671_v12, %v1671_v12  ;;  %v1670_v60 = vadd.f32 %v2342_v15, %v2108_v57  ;;  %v1672_v31 = vadd.f32 %v2351_v20, %v2108_v57  ;;  %v1699_v15 = vld [vmem:[#allocation2] sm:$0x1] }
 0x140   : > { %1690 = vst.msk [vmem:[%s2949_s7 + $0x18] sm:$0xf] %vm1683_vm8, %v1681_v21  ;;  %v1675_v11 = vpack.c.bf16 %v1667_v30, %v1667_v30  ;;  %v1725_v33 = vmul.f32 %v1667_v30, %v1667_v30  ;;  %v1682_v36 = vpack.c.bf16 %v1674_v19, %v1674_v19  ;;  %v1668_v37 = vadd.f32 %v2343_v29, %v2108_v57  ;;  %v1724_v21 = vld [vmem:[#allocation3] sm:$0x1] }
 0x141   : > { %1686 = vst.msk [vmem:[%s2949_s7 + $0x8] sm:$0xf] %vm1683_vm8, %v1677_v25  ;;  %1688 = vst.msk [vmem:[%s2949_s7 + $0x10] sm:$0xf] %vm1683_vm8, %v1679_v23  ;;  %v1678_v32 = vpack.c.bf16 %v1670_v60, %v1670_v60  ;;  %v1727_v38 = vmul.f32 %v1669_v7, %v1669_v7  ;;  %v1680_v10 = vpack.c.bf16 %v1672_v31, %v1672_v31  ;;  %v1700_v18 = vsel %vm546_vm3, %v1667_v30, 0.0 }
 0x142   : > { %1684 = vst.msk [vmem:[%s2949_s7] sm:$0xf] %vm1683_vm8, %v1675_v11  ;;  %1691 = vst.msk [vmem:[%s2949_s7 + $0x1c] sm:$0xf] %vm1683_vm8, %v1682_v36  ;;  %v1676_v39 = vpack.c.bf16 %v1668_v37, %v1668_v37  ;;  %v1701_v41 = vsel %vm546_vm3, %v1668_v37, 0.0  ;;  %v1726_v42 = vmul.f32 %v1668_v37, %v1668_v37  ;;  %v1703_v28 = vsel %vm546_vm3, %v1669_v7, 0.0 }
 0x143   : > { %1687 = vst.msk [vmem:[%s2949_s7 + $0xc] sm:$0xf] %vm1683_vm8, %v1678_v32  ;;  %v1702_v24 = vadd.f32 %v1701_v41, %v1700_v18  ;;  %1689 = vst.msk [vmem:[%s2949_s7 + $0x14] sm:$0xf] %vm1683_vm8, %v1680_v10  ;;  %v1733_v2 = vsel %vm546_vm3, %v1725_v33, 0.0  ;;  %v1728_v4 = vmul.f32 %v1670_v60, %v1670_v60  ;;  %v1736_v26 = vsel %vm546_vm3, %v1727_v38, 0.0 }
 0x144   : > { %1685 = vst.msk [vmem:[%s2949_s7 + $0x4] sm:$0xf] %vm1683_vm8, %v1676_v39  ;;  %v1734_v16 = vsel %vm546_vm3, %v1726_v42, 0.0  ;;  %v1729_v14 = vmul.f32 %v1671_v12, %v1671_v12  ;;  %v1705_v44 = vsel %vm546_vm3, %v1670_v60, 0.0  ;;  %v1707_v43 = vsel %vm546_vm3, %v1671_v12, 0.0 }
 0x145   : > { %v1704_v35 = vadd.f32 %v1703_v28, %v1702_v24  ;;  %v1735_v62 = vadd.f32 %v1734_v16, %v1733_v2  ;;  %v1738_v3 = vsel %vm546_vm3, %v1728_v4, 0.0  ;;  %v1730_v46 = vmul.f32 %v1672_v31, %v1672_v31 }
 0x146   : > { %v1731_v13 = vmul.f32 %v1673_v40, %v1673_v40  ;;  %v1740_v49 = vsel %vm546_vm3, %v1729_v14, 0.0  ;;  %v1709_v50 = vsel %vm546_vm3, %v1672_v31, 0.0  ;;  %v1711_v52 = vsel %vm546_vm3, %v1673_v40, 0.0 }
 0x147   : > { %v1737_v56 = vadd.f32 %v1736_v26, %v1735_v62  ;;  %v1706_v63 = vadd.f32 %v1705_v44, %v1704_v35  ;;  %v1732_v53 = vmul.f32 %v1674_v19, %v1674_v19  ;;  %v1742_v54 = vsel %vm546_vm3, %v1730_v46, 0.0 }
 0x148   : > { %v1744_v22 = vsel %vm546_vm3, %v1731_v13, 0.0  ;;  %v1713_v45 = vsel %vm546_vm3, %v1674_v19, 0.0 }
 0x149   : > { %v1708_v47 = vadd.f32 %v1707_v43, %v1706_v63  ;;  %v1739_v48 = vadd.f32 %v1738_v3, %v1737_v56  ;;  %v1746_v58 = vsel %vm546_vm3, %v1732_v53, 0.0 }
 0x14b   : > { %v1710_v51 = vadd.f32 %v1709_v50, %v1708_v47  ;;  %v1741_v34 = vadd.f32 %v1740_v49, %v1739_v48 }
 0x14d   : > { %v1712_v55 = vadd.f32 %v1711_v52, %v1710_v51  ;;  %v1743_v57 = vadd.f32 %v1742_v54, %v1741_v34 }
 0x14f   : > { %v1714_v9 = vadd.f32 %v1713_v45, %v1712_v55  ;;  %v1745_v8 = vadd.f32 %v1744_v22, %v1743_v57 }
 0x151   : > { %v1715_v59 = vrot.slane %v1714_v9, 4  ;;  %v1747_v61 = vadd.f32 %v1746_v58, %v1745_v8 }
 0x153   : > { %v1716_v27 = vadd.f32 %v1715_v59, %v1714_v9  ;;  %v1748_v0 = vrot.slane %v1747_v61, 4 }
 0x155   : > { %v1717_v1 = vrot.slane %v1716_v27, 2  ;;  %v1749_v40 = vadd.f32 %v1748_v0, %v1747_v61 }
 0x157   : > { %v1718_v5 = vadd.f32 %v1717_v1, %v1716_v27  ;;  %v1750_v6 = vrot.slane %v1749_v40, 2 }
 0x159   : > { %v1719_v7 = vrot.slane %v1718_v5, 1  ;;  %v1751_v12 = vadd.f32 %v1750_v6, %v1749_v40 }
 0x15b   : > { %v1720_v17 = vadd.f32 %v1719_v7, %v1718_v5  ;;  %v1752_v20 = vrot.slane %v1751_v12, 1 }
 0x15d   : > { %v1721_v30 = vadd.f32 %v1720_v17, %v1699_v15  ;;  %v1753_v25 = vadd.f32 %v1752_v20, %v1751_v12 }
 0x15f   : > { %1723 = vst.msk [vmem:[#allocation2] sm:$0x1] %vm1696_vm7, %v1721_v30  ;;  %v1754_v23 = vadd.f32 %v1753_v25, %v1724_v21 }
 0x161   : > { %1755 = vst.msk [vmem:[#allocation3] sm:$0x1] %vm1696_vm7, %v1754_v23 }
 0x166   : > { %v1759_v11 = vld [vmem:[#allocation2] sm:$0x1] }
 0x167   : > { %1760 = vst.msk [vmem:[%s353_s11] sm:$0x1] %vm1696_vm7, %v1759_v11 }
 0x168   : > { %v1761_v60 = vld [vmem:[#allocation3] sm:$0x1] }
 0x169   : > { %1762 = vst.msk [vmem:[%s356_s14] sm:$0x1] %vm1696_vm7, %v1761_v60 }
 0x16a PF: > { %s17_s23 = sadd.s32 1, %s2495_s23   ;;  %s3015_s21 = smov %s2491_s22 }
 0x16b   : > { %p14_p5 = scmp.ge.s32.totalorder %s17_s23, 4   ;;  %s3016_s22 = smov %s3018_s24 }
 0x16d   :  { %16 = sbr.rel (!%p14_p5) target bundleno = 2 (0x2), region = 109 }

// kernel: content_encoder_forward.32
= control target key start
LH: loop header
LB: loop body
LE: loop exit
PB: predicated region body
PF: predicated region fallthrough
CT: control target
= control target key end

     0   :  { %s2337_s15 = smov 0   ;;  %s2339_s16 = smov 0   ;;  %s2768_s0 = inlined_call_operand.vmem [shape: bf16[2,16,10,64], index: 0, kind: input, shape index: {}, may-alias: {0,1}]   ;;  %s2769_s1 = inlined_call_operand.vmem [shape: bf16[2,16,10,64], index: 1, kind: input, shape index: {}, may-alias: {0,1}]   ;;  %s2770_s2 = inlined_call_operand.vmem [shape: bf16[9,64,64], index: 2, kind: input, shape index: {}]   ;;  %s2771_s3 = inlined_call_operand.vmem [shape: f32[1,64], index: 3, kind: input, shape index: {}]   ;;  %s2772_s4 = inlined_call_operand.vmem [shape: bf16[2,8,8,64], index: 4, kind: output, shape index: {}]  }
   0x1   :  { %s2341_s17 = smov 0  }
   0x2 LB: > { %s26_s18 = sadd.s32 1, %s2306_s16  ;;  %p1744_p0 = scmp.ge.s32.totalorder %s2310_s17, 1  ;;  %s2310_s17 = sphi %s2341_s17, %s14_s17   ;;  %s2306_s16 = sphi %s2339_s16, %s2778_s16   ;;  %s2302_s15 = sphi %s2337_s15, %s2777_s15  }
   0x3   : > { %p28_p1 = scmp.ge.s32.totalorder %s26_s18, 2  ;;  %p206_p2 = scmp.lt.s32.totalorder %s2310_s17, 3 }
   0x5   : > { %s2780_s18 = smov (%p28_p1, %s26_s18), 0  ;;  %p207_p3 = pnand %p1744_p0, %p206_p2 }
   0x6   : > { %v2244_v0 = vld [vmem:[%s2770_s2 + $0x20] sm:$0xff] (!%p207_p3)   ;;  %p253_p4 = scmp.lt.s32.totalorder (!%p207_p3), %s2302_s15, 1  ;;  %v2246_v2 = vld [vmem:[%s2770_s2 + $0x28] sm:$0xff] (!%p207_p3)   ;;  %v2248_v4 = vld [vmem:[%s2770_s2 + $0x30] sm:$0xff] (!%p207_p3)   ;;  %vm315_vm0 = vsmask.f32 (!%p207_p3), 3328 }
   0x7   : > { %210 = sbr.rel (%p207_p3) target bundleno = 327 (0x147), region = 36  ;;  %v2245_v1 = vld [vmem:[%s2770_s2 + $0x80] sm:$0xff] (!%p207_p3)   ;;  %2004 = vmatprep.subr.bf16.mxu1 (!%p207_p3), %v2244_v0  ;;  %v2247_v3 = vld [vmem:[%s2770_s2 + $0x88] sm:$0xff] (!%p207_p3)   ;;  %v2249_v5 = vld [vmem:[%s2770_s2 + $0x90] sm:$0xff] (!%p207_p3)   ;;  %vm316_vm1 = vsmask.f32 (!%p207_p3), 7440 }
   0x8   : > { %2068 = vmatprep.subr.bf16.mxu0 (!%p207_p3), %v2245_v1  ;;  %2005 = vmatpush3.bf16.msra.mxu1 (!%p207_p3), %v2244_v0  ;;  %v2250_v6 = vld [vmem:[%s2770_s2 + $0x38] sm:$0xff] (!%p207_p3)   ;;  %v2431_v34 = vld [vmem:[%s2770_s2] sm:$0xff] (!%p207_p3)   ;;  %vm2435_vm2 = vmor (!%p207_p3), %vm315_vm0, %vm316_vm1  ;;  %vm475_vm3 = vcmask (!%p207_p3), 523264   ;;  %vm682_vm4 = vcmask (!%p207_p3), 1042432   ;;  %vm683_vm5 = vcmask (!%p207_p3), 1046532   ;;  %vm1620_vm7 = vcmask (!%p207_p3), 519168  }
   0x9   : > { %2069 = vmatpush3.bf16.msra.mxu0 (!%p207_p3), %v2245_v1  ;;  %2006 = vmatprep.subr.bf16.mxu1 (!%p207_p3), %v2246_v2  ;;  %v2251_v7 = vld [vmem:[%s2770_s2 + $0x98] sm:$0xff] (!%p207_p3)   ;;  %v2445_v40 = vld [vmem:[%s2770_s2 + $0xa0] sm:$0xff] (!%p207_p3)   ;;  %vm2528_vm6 = vmor (!%p207_p3), %vm682_vm4, %vm683_vm5 }
   0xa   : > { %2070 = vmatprep.subr.bf16.mxu0 (!%p207_p3), %v2247_v3 }
   0xc   : > { %2007 = vmatpush3.bf16.msra.mxu1 (!%p207_p3), %v2246_v2 }
   0xd   : > { %2071 = vmatpush3.bf16.msra.mxu0 (!%p207_p3), %v2247_v3  ;;  %2008 = vmatprep.subr.bf16.mxu1 (!%p207_p3), %v2248_v4 }
   0xe   : > { %s2782_s15 = smov (!%p253_p4, %s2302_s15), 1  ;;  %2072 = vmatprep.subr.bf16.mxu0 %v2249_v5 }
   0xf   : > { %s1927_s29 = sshll.u32 %s2782_s15, 7  ;;  %s1930_s10 = sshll.u32 %s2782_s15, 5 }
  0x10   : > { %s2381_s8 = scalar_lea.vmem %s2768_s0, %s1927_s29  ;;  %2009 = vmatpush3.bf16.msra.mxu1 %v2248_v4  ;;  %s1929_s21 = sadd.s32 64, %s1927_s29 }
  0x11   : > { %v2390_v8 = vld [vmem:[%s2381_s8] sm:$0xf]  ;;  %v2393_v9 = vld [vmem:[%s2381_s8 + $0x4] sm:$0x1]  ;;  %v2396_v10 = vld [vmem:[%s2381_s8 + $0x8] sm:$0xf]  ;;  %2073 = vmatpush3.bf16.msra.mxu0 %v2249_v5  ;;  %2010 = vmatprep.subr.bf16.mxu1 %v2250_v6  ;;  %s2495_s26 = scalar_lea.vmem %s2769_s1, %s1929_s21  ;;  %s284_s13 = scalar_lea.vmem %s2772_s4, %s1930_s10 }
  0x12   : > { %v2399_v11 = vld [vmem:[%s2381_s8 + $0xc] sm:$0x1]  ;;  %v319_v12 = vshrl.u32 %v2390_v8, 16  ;;  %v322_v13 = vshll.u32 %v2390_v8, 16  ;;  %v328_v14 = vshll.u32 %v2393_v9, 16  ;;  %v333_v15 = vshrl.u32 %v2396_v10, 16  ;;  %2074 = vmatprep.subr.bf16.mxu0 %v2251_v7 }
  0x13   : > { %v336_v16 = vshll.u32 %v2396_v10, 16  ;;  %v342_v17 = vshll.u32 %v2399_v11, 16  ;;  %v2408_v18 = vld [vmem:[%s2381_s8 + $0x10] sm:$0xf]  ;;  %v2411_v19 = vld [vmem:[%s2381_s8 + $0x14] sm:$0x1] }
  0x14   : > { %v321_v20 = vrot.slane %v319_v12, 4  ;;  %v324_v21 = vrot.slane %v322_v13, 5  ;;  %v330_v22 = vrot.slane %v328_v14, 5  ;;  %v335_v23 = vrot.slane %v333_v15, 4  ;;  %v2414_v24 = vld [vmem:[%s2381_s8 + $0x18] sm:$0xf]  ;;  %2011 = vmatpush3.bf16.msra.mxu1 %v2250_v6 }
  0x15   : > { %v338_v25 = vrot.slane %v336_v16, 5  ;;  %v344_v26 = vrot.slane %v342_v17, 5  ;;  %v2417_v27 = vld [vmem:[%s2381_s8 + $0x1c] sm:$0x1]  ;;  %v2420_v28 = vld [vmem:[%s2381_s8 + $0x20] sm:$0xf]  ;;  %2075 = vmatpush3.bf16.msra.mxu0 %v2251_v7  ;;  %2020 = vmatprep.subr.bf16.mxu1 %v2431_v34 }
  0x16   : > { %v325_v29 = vor.u32 %v324_v21, %v321_v20  ;;  %v2423_v30 = vld [vmem:[%s2381_s8 + $0x24] sm:$0x1]  ;;  %v347_v31 = vshrl.u32 %v2408_v18, 16  ;;  %v350_v32 = vshll.u32 %v2408_v18, 16  ;;  %v356_v33 = vshll.u32 %v2411_v19, 16  ;;  %2084 = vmatprep.subr.bf16.mxu0 %v2445_v40  ;;  %v2254_v17 = vld [vmem:[%s2770_s2 + $0x8] sm:$0xff]  }
  0x17   : > { %v339_v36 = vor.u32 %v338_v25, %v335_v23  ;;  %v361_v37 = vshrl.u32 %v2414_v24, 16  ;;  %v364_v38 = vshll.u32 %v2414_v24, 16  ;;  %v370_v39 = vshll.u32 %v2417_v27, 16  ;;  %v2464_v2 = vld [vmem:[%s2381_s8 + $0x28] sm:$0xf] }
  0x18   : > { %v326_v41 = vrot.slane %v325_v29, 4  ;;  %v349_v42 = vrot.slane %v347_v31, 4  ;;  %v352_v43 = vrot.slane %v350_v32, 5  ;;  %v358_v45 = vrot.slane %v356_v33, 5  ;;  %v2467_v3 = vld [vmem:[%s2381_s8 + $0x2c] sm:$0x1] }
  0x19   : > { %v340_v44 = vrot.slane %v339_v36, 4  ;;  %v363_v46 = vrot.slane %v361_v37, 4  ;;  %v366_v47 = vrot.slane %v364_v38, 5  ;;  %v375_v50 = vshrl.u32 %v2420_v28, 16  ;;  %v2470_v4 = vld [vmem:[%s2381_s8 + $0x30] sm:$0xf] }
  0x1a   : > { %v331_v48 = vsel %vm2435_vm2, %v326_v41, %v330_v22  ;;  %v353_v49 = vor.u32 %v352_v43, %v349_v42  ;;  %v378_v51 = vshll.u32 %v2420_v28, 16  ;;  %v372_v54 = vrot.slane %v370_v39, 5  ;;  %v2477_v13 = vld [vmem:[%s2381_s8 + $0x34] sm:$0x1]  ;;  %v2480_v14 = vld [vmem:[%s2381_s8 + $0x38] sm:$0xf] }
  0x1b   : > { %v345_v52 = vsel %vm2435_vm2, %v340_v44, %v344_v26  ;;  %v367_v53 = vor.u32 %v366_v47, %v363_v46  ;;  %v384_v55 = vshll.u32 %v2423_v30, 16  ;;  %v377_v58 = vrot.slane %v375_v50, 4  ;;  %v2490_v22 = vld [vmem:[%s2381_s8 + $0x3c] sm:$0x1]  ;;  %v2255_v23 = vld [vmem:[%s2770_s2 + $0xa8] sm:$0xff]   ;;  %v2256_v38 = vld [vmem:[%s2770_s2 + $0x10] sm:$0xff]  }
  0x1c   : > { %v1759_v56 = vcombine.low %v331_v48, %v345_v52  ;;  %v354_v57 = vrot.slane %v353_v49, 4  ;;  %v380_v59 = vrot.slane %v378_v51, 5  ;;  %v691_v60 = vrot.slane %v2399_v11, 5  ;;  %v2513_v44 = vld [vmem:[%s2495_s26] sm:$0xf] }
  0x1d   : > { %v368_v61 = vrot.slane %v367_v53, 4  ;;  %v386_v62 = vrot.slane %v384_v55, 5  ;;  %v695_v63 = vrot.slane %v2411_v19, 5  ;;  %v389_v7 = vshrl.u32 %v2464_v2, 16 }
  0x1e   : > { %2012 = vmatprep.mubr.msk.bf16.mxu1 %vm475_vm3, %v1759_v56  ;;  %v359_v0 = vsel %vm2435_vm2, %v354_v57, %v358_v45  ;;  %v381_v1 = vor.u32 %v380_v59, %v377_v58  ;;  %v392_v12 = vshll.u32 %v2464_v2, 16  ;;  %v398_v20 = vshll.u32 %v2467_v3, 16  ;;  %v2516_v45 = vld [vmem:[%s2495_s26 + $0x4] sm:$0x1] }
  0x1f   : > { %v373_v5 = vsel %vm2435_vm2, %v368_v61, %v372_v54  ;;  %v1839_v6 = vcombine.low %v345_v52, %v359_v0  ;;  %v403_v21 = vshrl.u32 %v2470_v4, 16  ;;  %v391_v25 = vrot.slane %v389_v7, 4 }
  0x20   : > { %v382_v15 = vrot.slane %v381_v1, 4  ;;  %v2482_v16 = vcombine.low %v359_v0, %v373_v5  ;;  %v394_v26 = vrot.slane %v392_v12, 5  ;;  %v406_v29 = vshll.u32 %v2470_v4, 16 }
  0x21   : > { %2076 = vmatprep.mubr.msk.bf16.mxu0 %vm475_vm3, %v1839_v6  ;;  %v412_v31 = vshll.u32 %v2477_v13, 16  ;;  %v400_v33 = vrot.slane %v398_v20, 5  ;;  %v405_v36 = vrot.slane %v403_v21, 4  ;;  %v417_v37 = vshrl.u32 %v2480_v14, 16 }
  0x22   : > { %v387_v32 = vsel %vm2435_vm2, %v382_v15, %v386_v62  ;;  %2013 = vmatmul.mubr.msk.bf16.vlgmr.msra.gmra.mrb[0].mxu1 %vm475_vm3, %v2482_v16  ;;  %v395_v41 = vor.u32 %v394_v26, %v391_v25  ;;  %v408_v42 = vrot.slane %v406_v29, 5  ;;  %v420_v47 = vshll.u32 %v2480_v14, 16 }
  0x23   : > { %v1840_v39 = vcombine.low %v373_v5, %v387_v32  ;;  %2021 = vmatpush3.bf16.msra.mxu1 %v2431_v34  ;;  %v414_v43 = vrot.slane %v412_v31, 5  ;;  %v419_v46 = vrot.slane %v417_v37, 4  ;;  %v426_v48 = vshll.u32 %v2490_v22, 16 }
  0x24   : > { %2022 = vmatprep.subr.bf16.mxu1 %v2254_v17  ;;  %v972_v49 = vshrl.u32 %v2513_v44, 16  ;;  %v396_v50 = vrot.slane %v395_v41, 4  ;;  %v409_v51 = vor.u32 %v408_v42, %v405_v36  ;;  %v975_v34 = vshll.u32 %v2513_v44, 16  ;;  %v2263_v36 = vld [vmem:[%s2770_s2 + $0xc0] sm:$0xff]  }
  0x25   : > { %2077 = vmatmul.mubr.msk.bf16.vlgmr.msra.gmra.mrb[0].mxu0 %vm475_vm3, %v1840_v39  ;;  %v981_v52 = vshll.u32 %v2516_v45, 16  ;;  %v699_v53 = vrot.slane %v2417_v27, 5  ;;  %v422_v54 = vrot.slane %v420_v47, 5  ;;  %v1784_v57 = vrot.slane %v2396_v10, 9  ;;  %v2257_v27 = vld [vmem:[%s2770_s2 + $0xb0] sm:$0xff]   ;;  %v2264_v47 = vld [vmem:[%s2770_s2 + $0x48] sm:$0xff]  }
  0x26   : > { %2085 = vmatpush3.bf16.msra.mxu0 %v2445_v40  ;;  %v974_v55 = vrot.slane %v972_v49, 4  ;;  %v401_v58 = vsel %vm2435_vm2, %v396_v50, %v400_v33  ;;  %v410_v59 = vrot.slane %v409_v51, 4  ;;  %v977_v61 = vrot.slane %v975_v34, 5  ;;  %v2258_v40 = vld [vmem:[%s2770_s2 + $0x18] sm:$0xff]   ;;  %v2262_v33 = vld [vmem:[%s2770_s2 + $0x40] sm:$0xff]  }
  0x27   : > { %2086 = vmatprep.subr.bf16.mxu0 %v2255_v23  ;;  %2023 = vmatpush3.bf16.msra.mxu1 %v2254_v17  ;;  %v2541_v62 = vcombine.low %v387_v32, %v401_v58  ;;  %v423_v0 = vor.u32 %v422_v54, %v419_v46  ;;  %v428_v1 = vrot.slane %v426_v48, 5  ;;  %v1785_v5 = vrot.slane %v2408_v18, 9 }
  0x28   : > { %2024 = vmatprep.subr.bf16.mxu1 %v2256_v38  ;;  %v703_v6 = vrot.slane %v2423_v30, 5  ;;  %v415_v7 = vsel %vm2435_vm2, %v410_v59, %v414_v43  ;;  %v978_v12 = vor.u32 %v977_v61, %v974_v55  ;;  %v983_v15 = vrot.slane %v981_v52, 5  ;;  %v2265_v52 = vld [vmem:[%s2770_s2 + $0xc8] sm:$0xff]  }
  0x29   : > { %2016 = vmatprep.mubr.msk.bf16.mxu1 %vm475_vm3, %v2541_v62  ;;  %v1841_v17 = vcombine.low %v401_v58, %v415_v7  ;;  %v424_v20 = vrot.slane %v423_v0, 4  ;;  %v2553_v21 = vsel %vm2528_vm6, %v1784_v57, %v691_v60  ;;  %v2559_v30 = vsel %vm2528_vm6, %v1785_v5, %v695_v63  ;;  %v2273_v5 = vld [vmem:[%s2770_s2 + $0xe0] sm:$0xff]  }
  0x2a   : > { %2087 = vmatpush3.bf16.msra.mxu0 %v2255_v23  ;;  %v979_v25 = vrot.slane %v978_v12, 4  ;;  %v2259_v23 = vld [vmem:[%s2770_s2 + $0xb8] sm:$0xff]   ;;  %v1786_v60 = vrot.slane %v2414_v24, 9  ;;  %v1787_v19 = vrot.slane %v2420_v28, 9  ;;  %v1771_v29 = vcombine.low %v2390_v8, %v2396_v10  ;;  %v2275_v12 = vld [vmem:[%s2770_s2 + $0xe8] sm:$0xff]  }
  0x2b   : > { %2088 = vmatprep.subr.bf16.mxu0 %v2257_v27  ;;  %2025 = vmatpush3.bf16.msra.mxu1 %v2256_v38  ;;  %v429_v11 = vsel %vm2435_vm2, %v424_v20, %v428_v1  ;;  %v1860_v31 = vcombine.low %v2553_v21, %v2559_v30  ;;  %v1788_v37 = vrot.slane %v2464_v2, 9  ;;  %v707_v38 = vrot.slane %v2467_v3, 5  ;;  %v2272_v1 = vld [vmem:[%s2770_s2 + $0x60] sm:$0xff]   ;;  %v2276_v20 = vld [vmem:[%s2770_s2 + $0x70] sm:$0xff]  }
  0x2c   : > { %2080 = vmatprep.mubr.msk.bf16.mxu0 %vm475_vm3, %v1841_v17  ;;  %2026 = vmatprep.subr.bf16.mxu1 %v2258_v40  ;;  %v2569_v26 = vcombine.low %v415_v7, %v429_v11  ;;  %v2573_v63 = vsel %vm2435_vm2, %v979_v25, %v983_v15  ;;  %v700_v39 = vsel %vm2528_vm6, %v1786_v60, %v699_v53  ;;  %v1789_v42 = vrot.slane %v2470_v4, 9  ;;  %v2274_v7 = vld [vmem:[%s2770_s2 + $0x68] sm:$0xff]   ;;  %v2278_v25 = vld [vmem:[%s2770_s2 + $0xf0] sm:$0xff]   ;;  %v2279_v60 = vld [vmem:[%s2770_s2 + $0x78] sm:$0xff]  }
  0x2d   : > { %v1842_v32 = vcombine.low %v429_v11, %v2573_v63  ;;  %v704_v41 = vsel %vm2528_vm6, %v1787_v19, %v703_v6  ;;  %v711_v43 = vrot.slane %v2477_v13, 5  ;;  %v1772_v46 = vcombine.low %v2408_v18, %v2414_v24  ;;  %v2674_v17 = vld [vmem:[%s2495_s26 + $0x8] sm:$0xf] }
  0x2e   : > { %2089 = vmatpush3.bf16.msra.mxu0 %v2257_v27  ;;  %2017 = vmatmul.mubr.msk.bf16.gmra.mrb[4].mxu1 %vm475_vm3, %v2569_v26  ;;  %v1861_v3 = vcombine.low %v700_v39, %v704_v41  ;;  %v708_v48 = vsel %vm2528_vm6, %v1788_v37, %v707_v38  ;;  %v1790_v49 = vrot.slane %v2480_v14, 9  ;;  %v715_v50 = vrot.slane %v2490_v22, 5  ;;  %v2268_v22 = vld [vmem:[%s2770_s2 + $0x50] sm:$0xff]   ;;  %v2270_v27 = vld [vmem:[%s2770_s2 + $0x58] sm:$0xff]  }
  0x2f   : > { %2090 = vmatprep.subr.bf16.mxu0 %v2259_v23  ;;  %2081 = vmatmul.mubr.msk.bf16.gmra.mrb[4].mxu0 %vm475_vm3, %v1842_v32  ;;  %v2608_v13 = vsel %vm2528_vm6, %v1789_v42, %v711_v43  ;;  %v1851_v51 = vrot.slane %v2513_v44, 9  ;;  %v1111_v34 = vrot.slane %v2516_v45, 5  ;;  %v1773_v53 = vcombine.low %v2420_v28, %v2464_v2  ;;  %v2280_v32 = vld [vmem:[%s2770_s2 + $0xf8] sm:$0xff]  }
  0x30   : > { %2027 = vmatpush3.bf16.msra.mxu1 %v2258_v40  ;;  %2028 = vmatprep.mubr.msk.bf16.mxu1 %vm475_vm3, %v1771_v29  ;;  %v687_v54 = vrot.slane %v2393_v9, 5  ;;  %v1862_v55 = vcombine.low %v708_v48, %v2608_v13  ;;  %v1783_v57 = vrot.slane %v2390_v8, 9  ;;  %v716_v45 = vsel %vm2528_vm6, %v1790_v49, %v715_v50  ;;  %v2269_v8 = vld [vmem:[%s2770_s2 + $0xd0] sm:$0xff]   ;;  %v2271_v40 = vld [vmem:[%s2770_s2 + $0xd8] sm:$0xff]  }
  0x31   : > { %2092 = vmatprep.mubr.msk.bf16.mxu0 %vm475_vm3, %v1860_v31  ;;  %2036 = vmatprep.subr.bf16.mxu1 %v2262_v33  ;;  %v2631_v9 = vsel %vm2528_vm6, %v1851_v51, %v1111_v34  ;;  %v1774_v58 = vcombine.low %v2470_v4, %v2480_v14  ;;  %v2660_v6 = vcombine.low %v2559_v30, %v700_v39  ;;  %v1352_v30 = vshll.u32 %v2674_v17, 16  ;;  %v306_v31 = vld [vmem:[%s2495_s26 + $0xc] sm:$0x1] }
  0x32   : > { %2091 = vmatpush3.bf16.msra.mxu0 %v2259_v23  ;;  %v688_v59 = vsel %vm2528_vm6, %v1783_v57, %v687_v54  ;;  %v1863_v61 = vcombine.low %v716_v45, %v2631_v9  ;;  %v2669_v15 = vcombine.low %v704_v41, %v708_v48  ;;  %v1802_v23 = vcombine.low %v2608_v13, %v716_v45 }
  0x33   : > { %2100 = vmatprep.subr.bf16.mxu0 %v2263_v36  ;;  %v1799_v0 = vcombine.low %v688_v59, %v2553_v21  ;;  %v1349_v21 = vshrl.u32 %v2674_v17, 16  ;;  %v1880_v11 = vcombine.low %v2513_v44, %v2674_v17  ;;  %v1354_v29 = vrot.slane %v1352_v30, 5 }
  0x34   : > { %v1358_v38 = vshll.u32 %v306_v31, 16  ;;  %v1821_v42 = vcombine.low %v2464_v2, %v2470_v4  ;;  %v1822_v2 = vcombine.low %v2480_v14, %v2513_v44  ;;  %v1906_v4 = vrot.slane %v2674_v17, 9 }
  0x35   : > { %v1351_v19 = vrot.slane %v1349_v21, 4 }
  0x36   : > { %2029 = vmatmul.mubr.msk.bf16.vlgmr.msra.gmra.mrb[0].mxu1 %vm475_vm3, %v1772_v46  ;;  %v1360_v41 = vrot.slane %v1358_v38, 5 }
  0x37   : > { %2093 = vmatmul.mubr.msk.bf16.vlgmr.msra.gmra.mrb[0].mxu0 %vm475_vm3, %v1861_v3  ;;  %2037 = vmatpush3.bf16.msra.mxu1 %v2262_v33  ;;  %v1819_v33 = vcombine.low %v2396_v10, %v2408_v18  ;;  %v1355_v37 = vor.u32 %v1354_v29, %v1351_v19  ;;  %v1820_v10 = vcombine.low %v2414_v24, %v2420_v28  ;;  %v2284_v18 = vld [vmem:[%s2770_s2 + $0x108] sm:$0xff]   ;;  %v2286_v28 = vld [vmem:[%s2770_s2 + $0x110] sm:$0xff]  }
  0x38   : > { %2101 = vmatpush3.bf16.msra.mxu0 %v2263_v36  ;;  %2038 = vmatprep.subr.bf16.mxu1 %v2264_v47  ;;  %v2283_v36 = vld [vmem:[%s2770_s2 + $0x100] sm:$0xff]  }
  0x39   : > { %2102 = vmatprep.subr.bf16.mxu0 %v2265_v52  ;;  %2032 = vmatprep.mubr.msk.bf16.mxu1 %vm475_vm3, %v1773_v53  ;;  %v1356_v39 = vrot.slane %v1355_v37, 4 }
  0x3a   : > { %2096 = vmatprep.mubr.msk.bf16.mxu0 %vm475_vm3, %v1862_v55  ;;  %v1924_v55 = vld [vmem:[%s2771_s3] ss:$0 sm:$0xff] }
  0x3b   : > { %2039 = vmatpush3.bf16.msra.mxu1 %v2264_v47  ;;  %v1361_v24 = vsel %vm2435_vm2, %v1356_v39, %v1360_v41 }
  0x3c   : > { %2103 = vmatpush3.bf16.msra.mxu0 %v2265_v52  ;;  %2040 = vmatprep.subr.bf16.mxu1 %v2268_v22  ;;  %v1897_v35 = vcombine.low %v2573_v63, %v1361_v24 }
  0x3d   : > { %2104 = vmatprep.subr.bf16.mxu0 %v2269_v8 }
  0x3e   : > { %2033 = vmatmul.mubr.msk.bf16.gmra.mrb[4].mxu1 %vm475_vm3, %v1774_v58 }
  0x3f   : > { %2097 = vmatmul.mubr.msk.bf16.gmra.mrb[4].mxu0 %vm475_vm3, %v1863_v61  ;;  %2041 = vmatpush3.bf16.msra.mxu1 %v2268_v22 }
  0x40   : > { %2105 = vmatpush3.bf16.msra.mxu0 %v2269_v8  ;;  %2042 = vmatprep.subr.bf16.mxu1 %v2270_v27 }
  0x41   : > { %2106 = vmatprep.subr.bf16.mxu0 %v2271_v40  ;;  %2044 = vmatprep.mubr.msk.bf16.mxu1 %vm475_vm3, %v1799_v0 }
  0x42   : > { %2108 = vmatprep.mubr.msk.bf16.mxu0 %vm475_vm3, %v1772_v46 }
  0x43   : > { %2043 = vmatpush3.bf16.msra.mxu1 %v2270_v27 }
  0x44   : > { %2107 = vmatpush3.bf16.msra.mxu0 %v2271_v40  ;;  %2052 = vmatprep.subr.bf16.mxu1 %v2272_v1 }
  0x45   : > { %2116 = vmatprep.subr.bf16.mxu0 %v2273_v5 }
  0x46   : > { %2045 = vmatmul.mubr.msk.bf16.vlgmr.msra.gmra.mrb[0].mxu1 %vm475_vm3, %v2660_v6 }
  0x47   : > { %2109 = vmatmul.mubr.msk.bf16.vlgmr.msra.gmra.mrb[0].mxu0 %vm475_vm3, %v1773_v53  ;;  %2053 = vmatpush3.bf16.msra.mxu1 %v2272_v1 }
  0x48   : > { %2117 = vmatpush3.bf16.msra.mxu0 %v2273_v5  ;;  %2054 = vmatprep.subr.bf16.mxu1 %v2274_v7 }
  0x49   : > { %2118 = vmatprep.subr.bf16.mxu0 %v2275_v12  ;;  %2048 = vmatprep.mubr.msk.bf16.mxu1 %vm475_vm3, %v2669_v15 }
  0x4a   : > { %2112 = vmatprep.mubr.msk.bf16.mxu0 %vm475_vm3, %v1774_v58 }
  0x4b   : > { %2055 = vmatpush3.bf16.msra.mxu1 %v2274_v7 }
  0x4c   : > { %2119 = vmatpush3.bf16.msra.mxu0 %v2275_v12  ;;  %2056 = vmatprep.subr.bf16.mxu1 %v2276_v20 }
  0x4d   : > { %2120 = vmatprep.subr.bf16.mxu0 %v2278_v25 }
  0x4e   : > { %2049 = vmatmul.mubr.msk.bf16.gmra.mrb[4].mxu1 %vm475_vm3, %v1802_v23 }
  0x4f   : > { %2113 = vmatmul.mubr.msk.bf16.gmra.mrb[4].mxu0 %vm475_vm3, %v1880_v11  ;;  %2057 = vmatpush3.bf16.msra.mxu1 %v2276_v20 }
  0x50   : > { %2121 = vmatpush3.bf16.msra.mxu0 %v2278_v25  ;;  %2058 = vmatprep.subr.bf16.mxu1 %v2279_v60 }
  0x51   : > { %2122 = vmatprep.subr.bf16.mxu0 %v2280_v32  ;;  %2060 = vmatprep.mubr.msk.bf16.mxu1 %vm475_vm3, %v1819_v33 }
  0x52   : > { %2124 = vmatprep.mubr.msk.bf16.mxu0 %vm475_vm3, %v2482_v16  ;;  %v1476_v16 = vrot.slane %v306_v31, 5 }
  0x53   : > { %2059 = vmatpush3.bf16.msra.mxu1 %v2279_v60 }
  0x54   : > { %2123 = vmatpush3.bf16.msra.mxu0 %v2280_v32  ;;  %2148 = vmatprep.subr.bf16.mxu1 %v2283_v36 }
  0x55   : > { %2132 = vmatprep.subr.bf16.mxu0 %v2283_v36 }
  0x56   : > { %2061 = vmatmul.mubr.msk.bf16.vlgmr.msra.gmra.mrb[0].mxu1 %vm475_vm3, %v1820_v10 }
  0x57   : > { %2125 = vmatmul.mubr.msk.bf16.vlgmr.msra.gmra.mrb[0].mxu0 %vm475_vm3, %v2541_v62  ;;  %2152 = vmatpush3.bf16.msra.mxu1 %v2283_v36  ;;  %v2287_v62 = vld [vmem:[%s2770_s2 + $0x118] sm:$0xff]  }
  0x58   : > { %2133 = vmatpush3.bf16.msra.mxu0 %v2283_v36  ;;  %2149 = vmatprep.subr.bf16.mxu1 %v2284_v18 }
  0x59   : > { %2134 = vmatprep.subr.bf16.mxu0 %v2284_v18  ;;  %2064 = vmatprep.mubr.msk.bf16.mxu1 %vm475_vm3, %v1821_v42 }
  0x5a   : > { %2128 = vmatprep.mubr.msk.bf16.mxu0 %vm475_vm3, %v2569_v26  ;;  %v1477_v26 = vsel %vm2528_vm6, %v1906_v4, %v1476_v16 }
  0x5b   : > { %2153 = vmatpush3.bf16.msra.mxu1 %v2284_v18  ;;  %v1915_v14 = vcombine.low %v2631_v9, %v1477_v26 }
  0x5c   : > { %2135 = vmatpush3.bf16.msra.mxu0 %v2284_v18  ;;  %2150 = vmatprep.subr.bf16.mxu1 %v2286_v28 }
  0x5d   : > { %2136 = vmatprep.subr.bf16.mxu0 %v2286_v28 }
  0x5e   : > { %2065 = vmatmul.mubr.msk.bf16.gmra.mrb[4].mxu1 %vm475_vm3, %v1822_v2 }
  0x5f   : > { %2129 = vmatmul.mubr.msk.bf16.gmra.mrb[4].mxu0 %vm475_vm3, %v1897_v35  ;;  %2154 = vmatpush3.bf16.msra.mxu1 %v2286_v28 }
  0x60   : > { %2137 = vmatpush3.bf16.msra.mxu0 %v2286_v28  ;;  %2151 = vmatprep.subr.bf16.mxu1 %v2287_v62 }
  0x61   : > { %2138 = vmatprep.subr.bf16.mxu0 %v2287_v62  ;;  %2140 = vmatprep.mubr.msk.bf16.mxu0 %vm475_vm3, %v2660_v6 }
  0x62   : > { %2144 = vmatprep.mubr.msk.bf16.mxu1 %vm475_vm3, %v1802_v23 }
  0x63   : > { %2155 = vmatpush3.bf16.msra.mxu1 %v2287_v62 }
  0x64   : > { %2139 = vmatpush3.bf16.msra.mxu0 %v2287_v62 }
  0x66   : > { %2145 = vmatmul.mubr.msk.bf16.vlgmr.msra.gmra.mrb[8].mxu1 %vm475_vm3, %v1915_v14 }
  0x67   : > { %2141 = vmatmul.mubr.msk.bf16.vlgmr.msra.gmra.mrb[0].mxu0 %vm475_vm3, %v2669_v15 }
 0x129   : > { %v2062_v44 = vpop.f32.mrb[0].mxu1 }
 0x12a   : > { %v932_v56 = vpop.f32.mrb[1].mxu1 }
 0x12b   : > { %v2063_v63 = vpop.f32.mrb[2].mxu1 }
 0x12c   : > { %v935_v43 = vpop.f32.mrb[3].mxu1 }
 0x131   : > { %v2066_v3 = vpop.f32.mrb[4].mxu1 }
 0x132   : > { %v2130_v46 = vpop.f32.mrb[4].mxu0  ;;  %v948_v47 = vpop.f32.mrb[5].mxu1 }
 0x133   : > { %v2160_v48 = vadd.f32 %v2130_v46, %v2066_v3  ;;  %v1450_v13 = vpop.f32.mrb[5].mxu0  ;;  %v2067_v49 = vpop.f32.mrb[6].mxu1 }
 0x134   : > { %v2162_v50 = vadd.f32 %v1450_v13, %v948_v47  ;;  %v2131_v51 = vpop.f32.mrb[6].mxu0  ;;  %v951_v34 = vpop.f32.mrb[7].mxu1 }
 0x135   : > { %v2164_v52 = vadd.f32 %v2131_v51, %v2067_v49  ;;  %v1453_v53 = vpop.f32.mrb[7].mxu0 }
 0x136   : > { %v2166_v54 = vadd.f32 %v1453_v53, %v951_v34 }
 0x139   : > { %v2146_v57 = vpop.f32.mrb[8].mxu1 }
 0x13a   : > { %v2142_v22 = vpop.f32.mrb[0].mxu0  ;;  %v2161_v45 = vadd.f32 %v2160_v48, %v2146_v57  ;;  %v1566_v9 = vpop.f32.mrb[9].mxu1 }
 0x13b   : > { %v2156_v8 = vadd.f32 %v2142_v22, %v2062_v44  ;;  %v1550_v58 = vpop.f32.mrb[1].mxu0  ;;  %v2163_v59 = vadd.f32 %v2162_v50, %v1566_v9  ;;  %v2147_v61 = vpop.f32.mrb[10].mxu1 }
 0x13c   : > { %v1602_v27 = vadd.f32 %v2161_v45, %v1924_v55  ;;  %v2157_v40 = vadd.f32 %v1550_v58, %v932_v56  ;;  %v2143_v0 = vpop.f32.mrb[2].mxu0  ;;  %v2165_v1 = vadd.f32 %v2164_v52, %v2147_v61  ;;  %v1569_v5 = vpop.f32.mrb[11].mxu1 }
 0x13d   : > { %v1598_v6 = vadd.f32 %v2156_v8, %v1924_v55  ;;  %v1600_v7 = vadd.f32 %v2163_v59, %v1924_v55  ;;  %v2158_v12 = vadd.f32 %v2143_v0, %v2063_v63  ;;  %v1553_v15 = vpop.f32.mrb[3].mxu0  ;;  %v2167_v17 = vadd.f32 %v2166_v54, %v1569_v5 }
 0x13e   : > { %v1610_v20 = vmax.f32 %v1602_v27, 0.0  ;;  %v1596_v21 = vadd.f32 %v2157_v40, %v1924_v55  ;;  %v1603_v30 = vadd.f32 %v2165_v1, %v1924_v55  ;;  %v2159_v25 = vadd.f32 %v1553_v15, %v935_v43 }
 0x13f   : > { %v1606_v23 = vmax.f32 %v1598_v6, 0.0  ;;  %v1608_v11 = vmax.f32 %v1600_v7, 0.0  ;;  %v1599_v60 = vadd.f32 %v2158_v12, %v1924_v55  ;;  %v1601_v19 = vadd.f32 %v2167_v17, %v1924_v55 }
 0x140   : > { %v1618_v29 = vpack.c.bf16 %v1610_v20, %v1610_v20  ;;  %v1604_v31 = vmax.f32 %v1596_v21, 0.0  ;;  %v1611_v32 = vmax.f32 %v1603_v30, 0.0  ;;  %v1597_v33 = vadd.f32 %v2159_v25, %v1924_v55 }
 0x141   : > { %v1614_v36 = vpack.c.bf16 %v1606_v23, %v1606_v23  ;;  %v1616_v37 = vpack.c.bf16 %v1608_v11, %v1608_v11  ;;  %v1607_v38 = vmax.f32 %v1599_v60, 0.0  ;;  %v1609_v10 = vmax.f32 %v1601_v19, 0.0 }
 0x142   : > { %1627 = vst.msk [vmem:[%s284_s13 + $0x18] sm:$0xf] %vm1620_vm7, %v1618_v29  ;;  %v1612_v18 = vpack.c.bf16 %v1604_v31, %v1604_v31  ;;  %v1619_v39 = vpack.c.bf16 %v1611_v32, %v1611_v32  ;;  %v1605_v41 = vmax.f32 %v1597_v33, 0.0 }
 0x143   : > { %1623 = vst.msk [vmem:[%s284_s13 + $0x8] sm:$0xf] %vm1620_vm7, %v1614_v36  ;;  %1625 = vst.msk [vmem:[%s284_s13 + $0x10] sm:$0xf] %vm1620_vm7, %v1616_v37  ;;  %v1615_v42 = vpack.c.bf16 %v1607_v38, %v1607_v38  ;;  %v1617_v24 = vpack.c.bf16 %v1609_v10, %v1609_v10 }
 0x144   : > { %1621 = vst.msk [vmem:[%s284_s13] sm:$0xf] %vm1620_vm7, %v1612_v18  ;;  %1628 = vst.msk [vmem:[%s284_s13 + $0x1c] sm:$0xf] %vm1620_vm7, %v1619_v39  ;;  %v1613_v28 = vpack.c.bf16 %v1605_v41, %v1605_v41 }
 0x145   : > { %1624 = vst.msk [vmem:[%s284_s13 + $0xc] sm:$0xf] %vm1620_vm7, %v1615_v42  ;;  %1626 = vst.msk [vmem:[%s284_s13 + $0x14] sm:$0xf] %vm1620_vm7, %v1617_v24 }
 0x146   : > { %1622 = vst.msk [vmem:[%s284_s13 + $0x4] sm:$0xf] %vm1620_vm7, %v1613_v28 }
 0x147 PF: > { %s14_s17 = sadd.s32 1, %s2310_s17   ;;  %s2777_s15 = smov %s2306_s16 }
 0x148   : > { %p11_p5 = scmp.ge.s32.totalorder %s14_s17, 4   ;;  %s2778_s16 = smov %s2780_s18 }
 0x14a   :  { %13 = sbr.rel (!%p11_p5) target bundleno = 2 (0x2), region = 77 }

// kernel: content_encoder_forward.34
= control target key start
LH: loop header
LB: loop body
LE: loop exit
PB: predicated region body
PF: predicated region fallthrough
CT: control target
= control target key end

     0   :  { %s585_s18 = smov 0   ;;  %s587_s19 = smov 0   ;;  %s639_s0 = inlined_call_operand.vmem [shape: bf16[2,32,128], index: 0, kind: input, shape index: {}]   ;;  %s640_s1 = inlined_call_operand.vmem [shape: f32[2,1,128], index: 1, kind: input, shape index: {}]   ;;  %s641_s2 = inlined_call_operand.vmem [shape: f32[2,1,128], index: 2, kind: input, shape index: {}]   ;;  %s642_s3 = inlined_call_operand.vmem [shape: f32[1,1,128], index: 3, kind: input, shape index: {}]   ;;  %s643_s4 = inlined_call_operand.vmem [shape: f32[1,1,128], index: 4, kind: input, shape index: {}]   ;;  %s644_s5 = inlined_call_operand.vmem [shape: bf16[2,32,128], index: 5, kind: output, shape index: {}]  }
   0x1   :  { %s589_s20 = smov 0  }
   0x2 LB: > { %s27_s21 = sadd.s32 1, %s549_s19  ;;  %p468_p0 = scmp.ge.s32.totalorder %s553_s20, 1  ;;  %s553_s20 = sphi %s589_s20, %s15_s20   ;;  %s549_s19 = sphi %s587_s19, %s646_s19   ;;  %s545_s18 = sphi %s585_s18, %s645_s18  }
   0x3   : > { %p29_p1 = scmp.ge.s32.totalorder %s27_s21, 2  ;;  %p224_p2 = scmp.lt.s32.totalorder %s553_s20, 3 }
   0x5   : > { %s648_s21 = smov (%p29_p1, %s27_s21), 0  ;;  %p225_p3 = pnand %p468_p0, %p224_p2 }
   0x6   : > { %p267_p4 = scmp.lt.s32.totalorder (!%p225_p3), %s545_s18, 1  ;;  %v315_v0 = vlaneseq (!%p225_p3)  ;;  %v312_v3 = vld [vmem:[%s642_s3] sm:$0x1] (!%p225_p3) }
   0x7   : > { %228 = sbr.rel (%p225_p3) target bundleno = 32 (0x20), region = 40  ;;  %v474_v18 = vld [vmem:[%s643_s4] ss:$0 sm:$0xff] (!%p225_p3) }
   0x8   : > { %v316_v1 = vshrl.u32 (!%p225_p3), %v315_v0, 7 }
   0xa   : > { %v317_v7 = vsub.s32 (!%p225_p3), 0, %v316_v1 }
   0xe   : > { %s650_s18 = smov (!%p267_p4, %s545_s18), 1 }
   0xf   : > { %s481_s22 = sshll.u32 %s650_s18, 4  ;;  %s278_s25 = scalar_lea.vmem %s640_s1, %s650_s18 }
  0x10   : > { %s274_s28 = scalar_lea.vmem %s639_s0, %s481_s22  ;;  %s281_s6 = scalar_lea.vmem %s641_s2, %s650_s18  ;;  %v473_v2 = vld [vmem:[%s278_s25] ss:$0 sm:$0xff] }
  0x11   : > { %v488_v4 = vld [vmem:[%s274_s28] sm:$0xff]   ;;  %v505_v5 = vld [vmem:[%s274_s28 + $0x8] sm:$0xff]   ;;  %s290_s13 = scalar_lea.vmem %s644_s5, %s481_s22 }
  0x12   : > { %v311_v6 = vld [vmem:[%s281_s6] sm:$0x1]  ;;  %v489_v8 = vunpack.c.l.bf16 %v488_v4  ;;  %v490_v9 = vunpack.c.h.bf16 %v488_v4  ;;  %v493_v10 = vunpack.c.l.bf16 %v505_v5  ;;  %v494_v11 = vunpack.c.h.bf16 %v505_v5 }
  0x13   : > { %v313_v12 = vmul.f32 %v312_v3, %v311_v6 }
  0x14   : > { %v307_v13 = vsub.f32 %v489_v8, %v473_v2  ;;  %v308_v14 = vsub.f32 %v490_v9, %v473_v2  ;;  %v309_v15 = vsub.f32 %v493_v10, %v473_v2  ;;  %v310_v16 = vsub.f32 %v494_v11, %v473_v2 }
  0x15   : > { %v318_v17 = vrot.slane %v313_v12, %v317_v7 }
  0x17   : > { %v320_v19 = vmul.f32 %v318_v17, %v307_v13  ;;  %v321_v20 = vmul.f32 %v318_v17, %v308_v14  ;;  %v322_v21 = vmul.f32 %v318_v17, %v309_v15  ;;  %v323_v22 = vmul.f32 %v318_v17, %v310_v16 }
  0x19   : > { %v331_v23 = vadd.f32 %v474_v18, %v320_v19  ;;  %v332_v24 = vadd.f32 %v474_v18, %v321_v20  ;;  %v333_v25 = vadd.f32 %v474_v18, %v322_v21  ;;  %v334_v26 = vadd.f32 %v474_v18, %v323_v22 }
  0x1b   : > { %v335_v27 = vmax.f32 %v331_v23, 0.0  ;;  %v336_v28 = vmax.f32 %v332_v24, 0.0  ;;  %v337_v29 = vmax.f32 %v333_v25, 0.0  ;;  %v338_v30 = vmax.f32 %v334_v26, 0.0 }
  0x1d   : > { %v498_v31 = vpack.c.bf16 %v336_v28, %v335_v27  ;;  %v503_v32 = vpack.c.bf16 %v338_v30, %v337_v29 }
  0x1f   : > { %499 = vst [vmem:[%s290_s13] sm:$0xff] %v498_v31   ;;  %506 = vst [vmem:[%s290_s13 + $0x8] sm:$0xff] %v503_v32  }
  0x20 PF: > { %s15_s20 = sadd.s32 1, %s553_s20   ;;  %s645_s18 = smov %s549_s19 }
  0x21   : > { %p12_p5 = scmp.ge.s32.totalorder %s15_s20, 4   ;;  %s646_s19 = smov %s648_s21 }
  0x23   :  { %14 = sbr.rel (!%p12_p5) target bundleno = 2 (0x2), region = 76 }

// kernel: tile.74
= control target key start
LH: loop header
LB: loop body
LE: loop exit
PB: predicated region body
PF: predicated region fallthrough
CT: control target
= control target key end

     0   :  { %s20_s0 = inlined_call_operand.<no memory space> [shape: f32[], index: 0, kind: input, shape index: {}]   ;;  %s21_s1 = inlined_call_operand.vmem [shape: f32[1,1,128], index: 1, kind: output, shape index: {}]  }
   0x1   :  { %v2_v0 = vstv %s20_s0 }
   0x2   :  { %3 = vst [vmem:[%s21_s1] sm:$0x1] %v2_v0 }

// kernel: content_encoder_forward.36
= control target key start
LH: loop header
LB: loop body
LE: loop exit
PB: predicated region body
PF: predicated region fallthrough
CT: control target
= control target key end

     0   :  { %s691_s21 = smov 0   ;;  %s693_s22 = smov 0   ;;  %s744_s0 = inlined_call_operand.vmem [shape: bf16[2,32,128], index: 0, kind: input, shape index: {}]   ;;  %s745_s1 = inlined_call_operand.vmem [shape: f32[2,1,128], index: 1, kind: input, shape index: {}]   ;;  %s746_s2 = inlined_call_operand.vmem [shape: f32[2,1,128], index: 2, kind: input, shape index: {}]   ;;  %s747_s3 = inlined_call_operand.vmem [shape: f32[1,1,128], index: 3, kind: input, shape index: {}]   ;;  %s748_s4 = inlined_call_operand.vmem [shape: f32[1,1,128], index: 4, kind: input, shape index: {}]   ;;  %s749_s5 = inlined_call_operand.vmem [shape: bf16[2,32,128], index: 5, kind: input, shape index: {}]   ;;  %s750_s6 = inlined_call_operand.vmem [shape: bf16[2,32,128], index: 6, kind: output, shape index: {}]  }
   0x1   :  { %s695_s23 = smov 0  }
   0x2 LB: > { %s28_s24 = sadd.s32 1, %s650_s22  ;;  %p557_p0 = scmp.ge.s32.totalorder %s654_s23, 1  ;;  %s654_s23 = sphi %s695_s23, %s16_s23   ;;  %s650_s22 = sphi %s693_s22, %s752_s22   ;;  %s646_s21 = sphi %s691_s21, %s751_s21  }
   0x3   : > { %p30_p1 = scmp.ge.s32.totalorder %s28_s24, 2  ;;  %p266_p2 = scmp.lt.s32.totalorder %s654_s23, 3 }
   0x5   : > { %s754_s24 = smov (%p30_p1, %s28_s24), 0  ;;  %p267_p3 = pnand %p557_p0, %p266_p2 }
   0x6   : > { %p320_p4 = scmp.lt.s32.totalorder (!%p267_p3), %s646_s21, 1  ;;  %v378_v0 = vlaneseq (!%p267_p3)  ;;  %v375_v3 = vld [vmem:[%s747_s3] sm:$0x1] (!%p267_p3) }
   0x7   : > { %270 = sbr.rel (%p267_p3) target bundleno = 32 (0x20), region = 44  ;;  %v565_v20 = vld [vmem:[%s748_s4] ss:$0 sm:$0xff] (!%p267_p3) }
   0x8   : > { %v379_v1 = vshrl.u32 (!%p267_p3), %v378_v0, 7 }
   0xa   : > { %v380_v7 = vsub.s32 (!%p267_p3), 0, %v379_v1 }
   0xe   : > { %s756_s21 = smov (!%p320_p4, %s646_s21), 1 }
   0xf   : > { %s709_s25 = sshll.u32 %s756_s21, 4  ;;  %s331_s28 = scalar_lea.vmem %s745_s1, %s756_s21 }
  0x10   : > { %s327_s7 = scalar_lea.vmem %s744_s0, %s709_s25  ;;  %s334_s10 = scalar_lea.vmem %s746_s2, %s756_s21  ;;  %v564_v2 = vld [vmem:[%s331_s28] ss:$0 sm:$0xff] }
  0x11   : > { %s343_s15 = scalar_lea.vmem %s749_s5, %s709_s25  ;;  %v580_v4 = vld [vmem:[%s327_s7] sm:$0xff]   ;;  %v605_v5 = vld [vmem:[%s327_s7 + $0x8] sm:$0xff]   ;;  %s353_s20 = scalar_lea.vmem %s750_s6, %s709_s25 }
  0x12   : > { %v374_v6 = vld [vmem:[%s334_s10] sm:$0x1]  ;;  %v581_v8 = vunpack.c.l.bf16 %v580_v4  ;;  %v582_v9 = vunpack.c.h.bf16 %v580_v4  ;;  %v585_v10 = vunpack.c.l.bf16 %v605_v5  ;;  %v586_v11 = vunpack.c.h.bf16 %v605_v5  ;;  %v606_v14 = vld [vmem:[%s343_s15 + $0x8] sm:$0xff]  }
  0x13   : > { %v376_v12 = vmul.f32 %v375_v3, %v374_v6  ;;  %v588_v13 = vld [vmem:[%s343_s15] sm:$0xff]   ;;  %v593_v23 = vunpack.c.l.bf16 %v606_v14  ;;  %v594_v24 = vunpack.c.h.bf16 %v606_v14 }
  0x14   : > { %v370_v15 = vsub.f32 %v581_v8, %v564_v2  ;;  %v371_v16 = vsub.f32 %v582_v9, %v564_v2  ;;  %v372_v17 = vsub.f32 %v585_v10, %v564_v2  ;;  %v373_v18 = vsub.f32 %v586_v11, %v564_v2 }
  0x15   : > { %v381_v19 = vrot.slane %v376_v12, %v380_v7  ;;  %v589_v21 = vunpack.c.l.bf16 %v588_v13  ;;  %v590_v22 = vunpack.c.h.bf16 %v588_v13 }
  0x17   : > { %v383_v25 = vmul.f32 %v381_v19, %v370_v15  ;;  %v384_v26 = vmul.f32 %v381_v19, %v371_v16  ;;  %v385_v27 = vmul.f32 %v381_v19, %v372_v17  ;;  %v386_v28 = vmul.f32 %v381_v19, %v373_v18 }
  0x19   : > { %v394_v29 = vadd.f32 %v565_v20, %v383_v25  ;;  %v395_v30 = vadd.f32 %v565_v20, %v384_v26  ;;  %v396_v31 = vadd.f32 %v565_v20, %v385_v27  ;;  %v397_v32 = vadd.f32 %v565_v20, %v386_v28 }
  0x1b   : > { %v406_v33 = vadd.f32 %v589_v21, %v394_v29  ;;  %v407_v34 = vadd.f32 %v590_v22, %v395_v30  ;;  %v408_v35 = vadd.f32 %v593_v23, %v396_v31  ;;  %v409_v36 = vadd.f32 %v594_v24, %v397_v32 }
  0x1d   : > { %v598_v37 = vpack.c.bf16 %v407_v34, %v406_v33  ;;  %v603_v38 = vpack.c.bf16 %v409_v36, %v408_v35 }
  0x1f   : > { %599 = vst [vmem:[%s353_s20] sm:$0xff] %v598_v37   ;;  %607 = vst [vmem:[%s353_s20 + $0x8] sm:$0xff] %v603_v38  }
  0x20 PF: > { %s16_s23 = sadd.s32 1, %s654_s23   ;;  %s751_s21 = smov %s650_s22 }
  0x21   : > { %p13_p5 = scmp.ge.s32.totalorder %s16_s23, 4   ;;  %s752_s22 = smov %s754_s24 }
  0x23   :  { %15 = sbr.rel (!%p13_p5) target bundleno = 2 (0x2), region = 83 }

// kernel: content_encoder_forward.40
= control target key start
LH: loop header
LB: loop body
LE: loop exit
PB: predicated region body
PF: predicated region fallthrough
CT: control target
= control target key end

     0   :  { %s865_s27 = smov 0   ;;  %s867_s28 = smov 0   ;;  %s931_s0 = inlined_call_operand.vmem [shape: bf16[2,32,128], index: 0, kind: input, shape index: {}]   ;;  %s932_s1 = inlined_call_operand.vmem [shape: f32[2,1,128], index: 1, kind: input, shape index: {}]   ;;  %s933_s2 = inlined_call_operand.vmem [shape: f32[2,1,128], index: 2, kind: input, shape index: {}]   ;;  %s934_s3 = inlined_call_operand.vmem [shape: f32[1,1,128], index: 3, kind: input, shape index: {}]   ;;  %s935_s4 = inlined_call_operand.vmem [shape: f32[1,1,128], index: 4, kind: input, shape index: {}]   ;;  %s936_s5 = inlined_call_operand.vmem [shape: bf16[2,32,128], index: 5, kind: input, shape index: {}]   ;;  %s937_s6 = inlined_call_operand.vmem [shape: bf16[2,32,128], index: 6, kind: output, shape index: {0}]   ;;  %s938_s7 = inlined_call_operand.vmem [shape: f32[2,1,128], index: 7, kind: output, shape index: {1}]   ;;  %s939_s8 = inlined_call_operand.vmem [shape: f32[2,1,128], index: 8, kind: output, shape index: {2}]  }
   0x1   :  { %s869_s29 = smov 0  }
   0x2 LB: > { %s31_s30 = sadd.s32 1, %s813_s28  ;;  %p719_p0 = scmp.ge.s32.totalorder %s817_s29, 1  ;;  %s817_s29 = sphi %s869_s29, %s19_s29   ;;  %s813_s28 = sphi %s867_s28, %s941_s28   ;;  %s809_s27 = sphi %s865_s27, %s940_s27  }
   0x3   : > { %p33_p1 = scmp.ge.s32.totalorder %s31_s30, 2  ;;  %p321_p2 = scmp.lt.s32.totalorder %s817_s29, 3 }
   0x5   : > { %s943_s30 = smov (%p33_p1, %s31_s30), 0  ;;  %p322_p3 = pnand %p719_p0, %p321_p2 }
   0x6   : > { %p385_p4 = scmp.lt.s32.totalorder (!%p322_p3), %s809_s27, 1  ;;  %v449_v0 = vlaneseq (!%p322_p3)  ;;  %v819_v1 = vmov (!%p322_p3), 0.0   ;;  %v446_v4 = vld [vmem:[%s934_s3] sm:$0x1] (!%p322_p3) }
   0x7   : > { %325 = sbr.rel (%p322_p3) target bundleno = 60 (0x3c), region = 44  ;;  %505 = vst [vmem:[#allocation2] sm:$0x1] (!%p322_p3), %v819_v1  ;;  %506 = vst [vmem:[#allocation3] sm:$0x1] (!%p322_p3), %v819_v1 }
   0x8   : > { %v450_v2 = vshrl.u32 (!%p322_p3), %v449_v0, 7  ;;  %v727_v21 = vld [vmem:[%s935_s4] ss:$0 sm:$0xff] (!%p322_p3) }
   0xa   : > { %v451_v8 = vsub.s32 (!%p322_p3), 0, %v450_v2 }
   0xe   : > { %s945_s27 = smov (!%p385_p4, %s809_s27), 1  ;;  %v507_v59 = vld [vmem:[#allocation2] sm:$0x1]  ;;  %v519_v62 = vld [vmem:[#allocation3] sm:$0x1] }
   0xf   : > { %s886_s9 = sshll.u32 %s945_s27, 4  ;;  %s396_s12 = scalar_lea.vmem %s932_s1, %s945_s27 }
  0x10   : > { %s392_s15 = scalar_lea.vmem %s931_s0, %s886_s9  ;;  %s399_s18 = scalar_lea.vmem %s933_s2, %s945_s27  ;;  %v726_v3 = vld [vmem:[%s396_s12] ss:$0 sm:$0xff] }
  0x11   : > { %s408_s23 = scalar_lea.vmem %s936_s5, %s886_s9  ;;  %v742_v5 = vld [vmem:[%s392_s15] sm:$0xff]   ;;  %v767_v6 = vld [vmem:[%s392_s15 + $0x8] sm:$0xff]   ;;  %s418_s11 = scalar_lea.vmem %s937_s6, %s886_s9 }
  0x12   : > { %v445_v7 = vld [vmem:[%s399_s18] sm:$0x1]  ;;  %v743_v9 = vunpack.c.l.bf16 %v742_v5  ;;  %v744_v10 = vunpack.c.h.bf16 %v742_v5  ;;  %v747_v11 = vunpack.c.l.bf16 %v767_v6  ;;  %v748_v12 = vunpack.c.h.bf16 %v767_v6  ;;  %v768_v15 = vld [vmem:[%s408_s23 + $0x8] sm:$0xff]   ;;  %s422_s13 = scalar_lea.vmem %s938_s7, %s945_s27  ;;  %s425_s16 = scalar_lea.vmem %s939_s8, %s945_s27 }
  0x13   : > { %v447_v13 = vmul.f32 %v446_v4, %v445_v7  ;;  %v750_v14 = vld [vmem:[%s408_s23] sm:$0xff]   ;;  %v755_v24 = vunpack.c.l.bf16 %v768_v15  ;;  %v756_v25 = vunpack.c.h.bf16 %v768_v15 }
  0x14   : > { %v441_v16 = vsub.f32 %v743_v9, %v726_v3  ;;  %v442_v17 = vsub.f32 %v744_v10, %v726_v3  ;;  %v443_v18 = vsub.f32 %v747_v11, %v726_v3  ;;  %v444_v19 = vsub.f32 %v748_v12, %v726_v3 }
  0x15   : > { %v452_v20 = vrot.slane %v447_v13, %v451_v8  ;;  %v751_v22 = vunpack.c.l.bf16 %v750_v14  ;;  %v752_v23 = vunpack.c.h.bf16 %v750_v14 }
  0x17   : > { %v454_v26 = vmul.f32 %v452_v20, %v441_v16  ;;  %v455_v27 = vmul.f32 %v452_v20, %v442_v17  ;;  %v456_v28 = vmul.f32 %v452_v20, %v443_v18  ;;  %v457_v29 = vmul.f32 %v452_v20, %v444_v19 }
  0x19   : > { %v465_v30 = vadd.f32 %v727_v21, %v454_v26  ;;  %v466_v31 = vadd.f32 %v727_v21, %v455_v27  ;;  %v467_v32 = vadd.f32 %v727_v21, %v456_v28  ;;  %v468_v33 = vadd.f32 %v727_v21, %v457_v29 }
  0x1b   : > { %v477_v34 = vadd.f32 %v751_v22, %v465_v30  ;;  %v478_v35 = vadd.f32 %v752_v23, %v466_v31  ;;  %v479_v36 = vadd.f32 %v755_v24, %v467_v32  ;;  %v480_v37 = vadd.f32 %v756_v25, %v468_v33 }
  0x1d   : > { %v508_v38 = vadd.f32 %v478_v35, %v477_v34  ;;  %v520_v39 = vmul.f32 %v477_v34, %v477_v34  ;;  %v521_v40 = vmul.f32 %v478_v35, %v478_v35  ;;  %v522_v41 = vmul.f32 %v479_v36, %v479_v36 }
  0x1e   : > { %v760_v42 = vpack.c.bf16 %v478_v35, %v477_v34  ;;  %v765_v43 = vpack.c.bf16 %v480_v37, %v479_v36  ;;  %v523_v45 = vmul.f32 %v480_v37, %v480_v37 }
  0x1f   : > { %v509_v44 = vadd.f32 %v508_v38, %v479_v36  ;;  %v524_v46 = vadd.f32 %v521_v40, %v520_v39 }
  0x20   : > { %761 = vst [vmem:[%s418_s11] sm:$0xff] %v760_v42   ;;  %769 = vst [vmem:[%s418_s11 + $0x8] sm:$0xff] %v765_v43  }
  0x21   : > { %v510_v47 = vadd.f32 %v509_v44, %v480_v37  ;;  %v525_v48 = vadd.f32 %v524_v46, %v522_v41 }
  0x23   : > { %v511_v49 = vrot.slane %v510_v47, 4  ;;  %v526_v50 = vadd.f32 %v525_v48, %v523_v45 }
  0x25   : > { %v512_v51 = vadd.f32 %v511_v49, %v510_v47  ;;  %v527_v52 = vrot.slane %v526_v50, 4 }
  0x27   : > { %v513_v53 = vrot.slane %v512_v51, 2  ;;  %v528_v54 = vadd.f32 %v527_v52, %v526_v50 }
  0x29   : > { %v514_v55 = vadd.f32 %v513_v53, %v512_v51  ;;  %v529_v56 = vrot.slane %v528_v54, 2 }
  0x2b   : > { %v515_v57 = vrot.slane %v514_v55, 1  ;;  %v530_v58 = vadd.f32 %v529_v56, %v528_v54 }
  0x2d   : > { %v516_v60 = vadd.f32 %v515_v57, %v514_v55  ;;  %v531_v61 = vrot.slane %v530_v58, 1 }
  0x2f   : > { %v517_v63 = vadd.f32 %v516_v60, %v507_v59  ;;  %v532_v0 = vadd.f32 %v531_v61, %v530_v58 }
  0x31   : > { %518 = vst [vmem:[#allocation2] sm:$0x1] %v517_v63  ;;  %v533_v1 = vadd.f32 %v532_v0, %v519_v62 }
  0x33   : > { %534 = vst [vmem:[#allocation3] sm:$0x1] %v533_v1 }
  0x38   : > { %v538_v2 = vld [vmem:[#allocation2] sm:$0x1] }
  0x39   : > { %539 = vst [vmem:[%s422_s13] sm:$0x1] %v538_v2 }
  0x3a   : > { %v540_v3 = vld [vmem:[#allocation3] sm:$0x1] }
  0x3b   : > { %541 = vst [vmem:[%s425_s16] sm:$0x1] %v540_v3 }
  0x3c PF: > { %s19_s29 = sadd.s32 1, %s817_s29   ;;  %s940_s27 = smov %s813_s28 }
  0x3d   : > { %p16_p5 = scmp.ge.s32.totalorder %s19_s29, 4   ;;  %s941_s28 = smov %s943_s30 }
  0x3f   :  { %18 = sbr.rel (!%p16_p5) target bundleno = 2 (0x2), region = 115 }

// kernel: content_encoder_forward.41
= control target key start
LH: loop header
LB: loop body
LE: loop exit
PB: predicated region body
PF: predicated region fallthrough
CT: control target
= control target key end

     0   :  { %s546_s18 = smov 0   ;;  %s548_s19 = smov 0   ;;  %s591_s0 = inlined_call_operand.vmem [shape: bf16[2,32,128], index: 0, kind: input, shape index: {}]   ;;  %s592_s1 = inlined_call_operand.vmem [shape: f32[2,1,128], index: 1, kind: input, shape index: {}]   ;;  %s593_s2 = inlined_call_operand.vmem [shape: f32[2,1,128], index: 2, kind: input, shape index: {}]   ;;  %s594_s3 = inlined_call_operand.vmem [shape: f32[1,1,128], index: 3, kind: input, shape index: {}]   ;;  %s595_s4 = inlined_call_operand.vmem [shape: f32[1,1,128], index: 4, kind: input, shape index: {}]   ;;  %s596_s5 = inlined_call_operand.vmem [shape: f32[2,32,128], index: 5, kind: output, shape index: {}]  }
   0x1   :  { %s550_s20 = smov 0  }
   0x2 LB: > { %s27_s21 = sadd.s32 1, %s510_s19  ;;  %p448_p0 = scmp.ge.s32.totalorder %s514_s20, 1  ;;  %s514_s20 = sphi %s550_s20, %s15_s20   ;;  %s510_s19 = sphi %s548_s19, %s598_s19   ;;  %s506_s18 = sphi %s546_s18, %s597_s18  }
   0x3   : > { %p29_p1 = scmp.ge.s32.totalorder %s27_s21, 2  ;;  %p224_p2 = scmp.lt.s32.totalorder %s514_s20, 3 }
   0x5   : > { %s600_s21 = smov (%p29_p1, %s27_s21), 0  ;;  %p225_p3 = pnand %p448_p0, %p224_p2 }
   0x6   : > { %p267_p4 = scmp.lt.s32.totalorder (!%p225_p3), %s506_s18, 1  ;;  %v315_v0 = vlaneseq (!%p225_p3)  ;;  %v312_v2 = vld [vmem:[%s594_s3] sm:$0x1] (!%p225_p3) }
   0x7   : > { %228 = sbr.rel (%p225_p3) target bundleno = 29 (0x1d), region = 40  ;;  %v454_v17 = vld [vmem:[%s595_s4] ss:$0 sm:$0xff] (!%p225_p3) }
   0x8   : > { %v316_v1 = vshrl.u32 (!%p225_p3), %v315_v0, 7 }
   0xa   : > { %v317_v4 = vsub.s32 (!%p225_p3), 0, %v316_v1 }
   0xe   : > { %s602_s18 = smov (!%p267_p4, %s506_s18), 1 }
   0xf   : > { %s457_s22 = sshll.u32 %s602_s18, 4  ;;  %s278_s25 = scalar_lea.vmem %s592_s1, %s602_s18 }
  0x10   : > { %s274_s30 = scalar_lea.vmem %s591_s0, %s457_s22  ;;  %s281_s8 = scalar_lea.vmem %s593_s2, %s602_s18  ;;  %v453_v3 = vld [vmem:[%s278_s25] ss:$0 sm:$0xff] }
  0x11   : > { %v460_v5 = vld [vmem:[%s274_s30] sm:$0xff]   ;;  %v467_v7 = vld [vmem:[%s274_s30 + $0x8] sm:$0xff]   ;;  %s458_s9 = sshll.u32 %s602_s18, 5 }
  0x12   : > { %v311_v6 = vld [vmem:[%s281_s8] sm:$0x1]  ;;  %v461_v8 = vunpack.c.l.bf16 %v460_v5  ;;  %v462_v10 = vunpack.c.h.bf16 %v460_v5  ;;  %v465_v11 = vunpack.c.l.bf16 %v467_v7  ;;  %v466_v12 = vunpack.c.h.bf16 %v467_v7  ;;  %s290_s14 = scalar_lea.vmem %s596_s5, %s458_s9 }
  0x13   : > { %v313_v9 = vmul.f32 %v312_v2, %v311_v6 }
  0x14   : > { %v307_v13 = vsub.f32 %v461_v8, %v453_v3  ;;  %v308_v15 = vsub.f32 %v462_v10, %v453_v3  ;;  %v309_v16 = vsub.f32 %v465_v11, %v453_v3  ;;  %v310_v18 = vsub.f32 %v466_v12, %v453_v3 }
  0x15   : > { %v318_v14 = vrot.slane %v313_v9, %v317_v4 }
  0x17   : > { %v320_v19 = vmul.f32 %v318_v14, %v307_v13  ;;  %v321_v20 = vmul.f32 %v318_v14, %v308_v15  ;;  %v322_v21 = vmul.f32 %v318_v14, %v309_v16  ;;  %v323_v22 = vmul.f32 %v318_v14, %v310_v18 }
  0x19   : > { %v331_v23 = vadd.f32 %v454_v17, %v320_v19  ;;  %v332_v24 = vadd.f32 %v454_v17, %v321_v20  ;;  %v333_v25 = vadd.f32 %v454_v17, %v322_v21  ;;  %v334_v26 = vadd.f32 %v454_v17, %v323_v22 }
  0x1b   : > { %335 = vst [vmem:[%s290_s14] sm:$0xff] %v331_v23  ;;  %336 = vst [vmem:[%s290_s14 + $0x8] sm:$0xff] %v332_v24 }
  0x1c   : > { %337 = vst [vmem:[%s290_s14 + $0x10] sm:$0xff] %v333_v25  ;;  %338 = vst [vmem:[%s290_s14 + $0x18] sm:$0xff] %v334_v26 }
  0x1d PF: > { %s15_s20 = sadd.s32 1, %s514_s20   ;;  %s597_s18 = smov %s510_s19 }
  0x1e   : > { %p12_p5 = scmp.ge.s32.totalorder %s15_s20, 4   ;;  %s598_s19 = smov %s600_s21 }
  0x20   :  { %14 = sbr.rel (!%p12_p5) target bundleno = 2 (0x2), region = 76 }

</bundles_post_ra>
